<compile_context>
chip_gen: v7x
topology: tpu7x:2x2x1
jax: 0.10.0
libtpu: 0.0.40
codegen_flags: <defaults>
</compile_context>

<pallas_src>
import jax
import jax.numpy as jnp
from jax.experimental import pallas as pl
from jax.experimental.pallas import tpu as pltpu


# ----------------------------------------------------------------------------
# Small helpers
# ----------------------------------------------------------------------------
def _pick_tile(m, target, mult=1):
    """Largest divisor of m that is <= target and a multiple of `mult`;
    falls back to the full extent (always legal for a BlockSpec)."""
    cap = min(target, m)
    for t in range(cap, 0, -1):
        if m % t == 0 and t % mult == 0:
            return t
    return m


def _cparams(semantics):
    return pltpu.CompilerParams(dimension_semantics=semantics,
                                vmem_limit_bytes=40 * 1024 * 1024)


def im2col_nhwc(x, k, cin):
    """NHWC im2col (valid conv, stride 1) over the first `cin` channels.
    Patch features ordered (kh, kw, cin), cin fastest.  Pure layout plumbing."""
    n, h, w, _ = x.shape
    ho, wo = h - k + 1, w - k + 1
    taps = [x[:, i:i + ho, j:j + wo, :cin] for i in range(k) for j in range(k)]
    p = jnp.concatenate(taps, axis=-1)                  # (N, Ho, Wo, k*k*cin)
    return p.reshape(n * ho * wo, k * k * cin), (n, ho, wo)


# ----------------------------------------------------------------------------
# Pallas kernels
# ----------------------------------------------------------------------------
def _gemm_stats_kernel(a_ref, w_ref, y_ref, s_ref):
    # (TM, K) bf16 @ (K, C) bf16 -> f32 accumulator; emit bf16 output plus
    # per-block (1, 2, C) partial [sum; sum-of-squares] for the fused BN stats.
    acc = jnp.dot(a_ref[...], w_ref[...], preferred_element_type=jnp.float32)
    y_ref[...] = acc.astype(y_ref.dtype)
    s1 = jnp.sum(acc, axis=0, keepdims=True)
    s2 = jnp.sum(acc * acc, axis=0, keepdims=True)
    s_ref[...] = jnp.concatenate([s1, s2], axis=0)[None]


def conv1_gemm_stats(a, w, target_tm=2048):
    """Row-tiled im2col GEMM with fused BN-stat partials.
    a: (M, K) bf16 patches, w: (K, C) bf16.  Returns (y bf16 (M, C), partials)."""
    m, k = a.shape
    c = w.shape[1]
    tm = _pick_tile(m, target_tm, 8)
    g = m // tm
    return pl.pallas_call(
        _gemm_stats_kernel,
        out_shape=(jax.ShapeDtypeStruct((m, c), jnp.bfloat16),
                   jax.ShapeDtypeStruct((g, 2, c), jnp.float32)),
        grid=(g,),
        in_specs=[pl.BlockSpec((tm, k), lambda i: (i, 0)),
                  pl.BlockSpec((k, c), lambda i: (0, 0))],
        out_specs=(pl.BlockSpec((tm, c), lambda i: (i, 0)),
                   pl.BlockSpec((1, 2, c), lambda i: (i, 0, 0))),
        compiler_params=_cparams(("parallel",)),
    )(a, w)


def conv2_stats(x, w, target_tb=8):
    """conv2 as an in-kernel 5x5 tap loop over the pooled NHWC block (no HBM
    im2col).  x: (N, 12, 12, 128) bf16, w: (5, 5, 128, 128) bf16.
    Returns (y bf16 (N*64, 128) with rows ordered (n, ho, wo), stat partials)."""
    n, h, _, c = x.shape
    cout = w.shape[-1]
    ho = h - 4                                          # 8
    tb = _pick_tile(n, target_tb, 1)
    g = n // tb
    rows = tb * ho * ho

    def kernel(x_ref, w_ref, y_ref, s_ref):
        # Single bf16->f32 cast of the block; f32 trailing (8,128) tiles make
        # the per-tap (TB,8,8,C)->(TB*64,C) collapse layout-trivial.
        xv = x_ref[...].astype(jnp.float32)             # (TB, 12, 12, C)
        acc = jnp.zeros((rows, cout), jnp.float32)
        for ki in range(5):
            for kj in range(5):
                xs = xv[:, ki:ki + ho, kj:kj + ho, :]   # (TB, 8, 8, C)
                xs = xs.reshape(rows, c).astype(jnp.bfloat16)
                acc = acc + jnp.dot(xs, w_ref[ki, kj],
                                    preferred_element_type=jnp.float32)
        y_ref[...] = acc.astype(y_ref.dtype)
        s1 = jnp.sum(acc, axis=0, keepdims=True)
        s2 = jnp.sum(acc * acc, axis=0, keepdims=True)
        s_ref[...] = jnp.concatenate([s1, s2], axis=0)[None]

    return pl.pallas_call(
        kernel,
        out_shape=(jax.ShapeDtypeStruct((n * ho * ho, cout), jnp.bfloat16),
                   jax.ShapeDtypeStruct((g, 2, cout), jnp.float32)),
        grid=(g,),
        in_specs=[pl.BlockSpec((tb, h, h, c), lambda i: (i, 0, 0, 0)),
                  pl.BlockSpec(w.shape, lambda i: (0, 0, 0, 0))],
        out_specs=(pl.BlockSpec((rows, cout), lambda i: (i, 0)),
                   pl.BlockSpec((1, 2, cout), lambda i: (i, 0, 0))),
        compiler_params=_cparams(("parallel",)),
    )(x, w)


def bn_scale_shift(partials, gamma, beta, count):
    """Finalize fused BN batch stats (tiny plain-JAX reduce over per-block
    partials) and fold gamma/beta into a (2, C) [scale; shift]."""
    s = jnp.sum(partials, axis=0)                       # (2, C)
    mean = s[0] / count
    var = s[1] / count - mean * mean                    # biased var (PyTorch)
    inv = jax.lax.rsqrt(var + 1e-5)
    scale = gamma * inv
    shift = beta - mean * scale
    return jnp.stack([scale, shift]).astype(jnp.float32)


def _bn_relu_pool_kernel(x_ref, ss_ref, o_ref):
    # x_ref: (2R, Wq, 2C) bf16 - lanes [0:C]/[C:2C] are the horizontal 2x2
    # partners; consecutive row pairs are the vertical partners.
    c = o_ref.shape[-1]
    scale = ss_ref[0:1, :]                              # (1, C) f32
    shift = ss_ref[1:2, :]
    x = x_ref[...]
    xa = x[:, :, :c].astype(jnp.float32)
    xb = x[:, :, c:].astype(jnp.float32)
    ya = jnp.maximum(xa * scale + shift, 0.0)
    yb = jnp.maximum(xb * scale + shift, 0.0)
    yh = jnp.maximum(ya, yb)                            # horizontal pool (2R, Wq, C)
    r2, wq, _ = yh.shape
    yv = jnp.max(yh.reshape(r2 // 2, 2, wq, c), axis=1)  # vertical pool (R, Wq, C)
    o_ref[...] = yv.astype(o_ref.dtype)


def bn_relu_pool(y, ss, n, ho, wo, target_tr=256):
    """Fused BatchNorm(batch stats) + ReLU + 2x2/stride-2 max pool.
    y: (N*Ho*Wo, C) bf16 conv output (rows ordered n, ho, wo).
    Returns (N, Ho//2, Wo//2, C) bf16 NHWC."""
    c = ss.shape[-1]
    hq, wq = ho // 2, wo // 2
    # Pure reshape: lanes [C:2C] hold the wo-odd horizontal partner.
    x3 = y.reshape(n * ho, wq, 2 * c)
    tr = _pick_tile(n * hq, target_tr, 1)
    out = pl.pallas_call(
        _bn_relu_pool_kernel,
        out_shape=jax.ShapeDtypeStruct((n * hq, wq, c), jnp.bfloat16),
        grid=((n * hq) // tr,),
        in_specs=[pl.BlockSpec((2 * tr, wq, 2 * c), lambda i: (i, 0, 0)),
                  pl.BlockSpec((2, c), lambda i: (0, 0))],
        out_specs=pl.BlockSpec((tr, wq, c), lambda i: (i, 0, 0)),
        compiler_params=_cparams(("parallel",)),
    )(x3, ss)
    return out.reshape(n, hq, wq, c)


def _tail_kernel(p_ref, w3_ref, b3_ref, w1_ref, b1_ref, w2_ref, b2_ref, o_ref):
    # Fused: conv3(im2col)+ReLU -> fc1+ReLU -> fc2 -> log_softmax.
    # p_ref: (TB, 4, K3) bf16 - conv3 patches per image (4 spatial positions).
    # w1_ref: (4, 128, 256) bf16 - fc1 weight with the NCHW flatten folded in.
    pm = p_ref[...]
    tb = pm.shape[0]
    n_pos = pm.shape[1]
    n1 = w1_ref.shape[2]
    acc = jnp.zeros((tb, n1), jnp.float32)
    for s in range(n_pos):
        ps = pm[:, s, :]                                          # (TB, K3)
        c3 = jnp.dot(ps, w3_ref[...], preferred_element_type=jnp.float32)
        c3 = jnp.maximum(c3 + b3_ref[...], 0.0).astype(jnp.bfloat16)   # (TB, 128)
        acc = acc + jnp.dot(c3, w1_ref[s], preferred_element_type=jnp.float32)
    h = jnp.maximum(acc + b1_ref[...], 0.0).astype(jnp.bfloat16)       # (TB, 256)
    logits = jnp.dot(h, w2_ref[...], preferred_element_type=jnp.float32)
    logits = logits + b2_ref[...]                 # (TB, 128); padded lanes ~ -1e30
    m = jnp.max(logits, axis=-1, keepdims=True)
    z = logits - m
    lse = jnp.log(jnp.sum(jnp.exp(z), axis=-1, keepdims=True))
    o_ref[...] = (z - lse).astype(o_ref.dtype)


def tail_fused(patches, w3, b3, w1, b1, w2, b2, target_tb=128):
    n, s, k3 = patches.shape
    n_out = w2.shape[1]
    tb = _pick_tile(n, target_tb, 1)
    return pl.pallas_call(
        _tail_kernel,
        out_shape=jax.ShapeDtypeStruct((n, n_out), jnp.float32),
        grid=(n // tb,),
        in_specs=[pl.BlockSpec((tb, s, k3), lambda i: (i, 0, 0)),
                  pl.BlockSpec(w3.shape, lambda i: (0, 0)),
                  pl.BlockSpec(b3.shape, lambda i: (0, 0)),
                  pl.BlockSpec(w1.shape, lambda i: (0, 0, 0)),
                  pl.BlockSpec(b1.shape, lambda i: (0, 0)),
                  pl.BlockSpec(w2.shape, lambda i: (0, 0)),
                  pl.BlockSpec(b2.shape, lambda i: (0, 0))],
        out_specs=pl.BlockSpec((tb, n_out), lambda i: (i, 0)),
        compiler_params=_cparams(("parallel",)),
    )(patches, w3, b3, w1, b1, w2, b2)


# ----------------------------------------------------------------------------
# Parameters: synthetic PyTorch-layout params + one-time kernel-layout prep
# ----------------------------------------------------------------------------
def init_params(key):
    ks = jax.random.split(key, 10)

    def w(k, shape, scale=0.05):
        return (scale * jax.random.normal(k, shape)).astype(jnp.float32)

    return {
        "conv1_w": w(ks[0], (50, 1, 5, 5)), "conv1_b": w(ks[1], (50,)),
        "conv2_w": w(ks[2], (60, 50, 5, 5)), "conv2_b": w(ks[3], (60,)),
        "conv3_w": w(ks[4], (80, 60, 3, 3)), "conv3_b": w(ks[5], (80,)),
        "bn1_gamma": jnp.ones((50,), jnp.float32), "bn1_beta": jnp.zeros((50,), jnp.float32),
        "bn2_gamma": jnp.ones((60,), jnp.float32), "bn2_beta": jnp.zeros((60,), jnp.float32),
        "fc1_w": w(ks[6], (250, 320)), "fc1_b": w(ks[7], (250,)),
        "fc2_w": w(ks[8], (25, 250)), "fc2_b": w(ks[9], (25,)),
    }


def prepare_params(p):
    """One-time re-layout: NHWC-ordered conv weights, 128/256 lane padding,
    bf16 GEMM operands, conv1/conv2 biases dropped (cancelled by training-mode
    BN), and the NCHW flatten folded into fc1's weight."""
    C = 128       # lane padding for conv/bn channels
    F1 = 256      # fc1 width padding
    NC = 128      # fc2 logit lane padding

    def conv_w(w, cout_pad):
        cout, cin, kh, kw = w.shape
        w = jnp.transpose(w, (2, 3, 1, 0)).reshape(kh * kw * cin, cout)
        if cout_pad > cout:
            w = jnp.pad(w, ((0, 0), (0, cout_pad - cout)))
        return w.astype(jnp.bfloat16)

    def padvec(v, n_pad):
        return jnp.pad(v, (0, n_pad - v.shape[0])).astype(jnp.float32)

    kp = {}
    # conv1: (50,1,5,5) -> (25, 128) bf16 (bias dropped; BN absorbs it)
    kp["w1"] = conv_w(p["conv1_w"], C)
    kp["g1"] = padvec(p["bn1_gamma"], C)
    kp["be1"] = padvec(p["bn1_beta"], C)
    # conv2: (60,50,5,5) -> (5,5,128,128) bf16 tap weights (bias dropped)
    w2 = jnp.transpose(p["conv2_w"], (2, 3, 1, 0))        # (5,5,50,60)
    kp["w2"] = jnp.pad(w2, ((0, 0), (0, 0), (0, C - 50), (0, C - 60))).astype(jnp.bfloat16)
    kp["g2"] = padvec(p["bn2_gamma"], C)
    kp["be2"] = padvec(p["bn2_beta"], C)
    # conv3: (80,60,3,3) -> (540, 128) bf16 + zero-padded bias
    kp["w3"] = conv_w(p["conv3_w"], C)
    kp["b3"] = padvec(p["conv3_b"], C).reshape(1, -1)
    # fc1: fold the PyTorch NCHW flatten (feature index = c*4 + s): weight laid
    # out as (spatial s, padded channel c, out j); padded channel rows are zero.
    w1t = p["fc1_w"].T.reshape(80, 4, 250).transpose(1, 0, 2)   # (4, 80, 250)
    w1t = jnp.pad(w1t, ((0, 0), (0, C - 80), (0, F1 - 250)))
    kp["fc1_w"] = w1t.astype(jnp.bfloat16)
    kp["fc1_b"] = padvec(p["fc1_b"], F1).reshape(1, -1)
    # fc2: pad to 128 output lanes; padded logits masked with -1e30 bias.
    kp["fc2_w"] = jnp.pad(p["fc2_w"].T, ((0, F1 - 250), (0, NC - 25))).astype(jnp.bfloat16)
    b2 = jnp.full((NC,), -1e30, jnp.float32).at[:25].set(p["fc2_b"].astype(jnp.float32))
    kp["fc2_b"] = b2.reshape(1, -1)
    return kp


# ----------------------------------------------------------------------------
# Forward pass (mirrors Convnet.forward)
# ----------------------------------------------------------------------------
@jax.jit
def convnet_forward(kp, x):
    # x: (N, 1, 28, 28) NCHW f32.  With Cin=1 the NHWC view is a pure reshape.
    n = x.shape[0]
    xh = x.reshape(n, 28, 28, 1).astype(jnp.bfloat16)

    # conv1 (+ fused BN1 batch-stat partials) -> BN1 + ReLU + pool1
    # TODO(synk): stretch - fold the 5x5 im2col into the GEMM kernel and skip
    # materializing the pre-pool conv1 activation (recompute it in the pool pass).
    pch, (n, ho, wo) = im2col_nhwc(xh, 5, 1)                    # (N*576, 25) bf16
    y, parts = conv1_gemm_stats(pch, kp["w1"])                  # (N*576, 128) bf16
    ss1 = bn_scale_shift(parts, kp["g1"], kp["be1"], y.shape[0])
    p1 = bn_relu_pool(y, ss1, n, ho, wo)                        # (N, 12, 12, 128) bf16

    # conv2 via in-kernel 5x5 tap loop (+ fused BN2 stats) -> BN2 + ReLU + pool2
    y2, parts2 = conv2_stats(p1, kp["w2"])                      # (N*64, 128) bf16
    ss2 = bn_scale_shift(parts2, kp["g2"], kp["be2"], y2.shape[0])
    p2 = bn_relu_pool(y2, ss2, n, 8, 8)                         # (N, 4, 4, 128) bf16

    # fused tail: conv3+ReLU -> fc1+ReLU -> fc2 -> log_softmax (padded lanes sliced off)
    pch3, _ = im2col_nhwc(p2, 3, 60)                            # (N*4, 540) bf16
    pch3 = pch3.reshape(n, 4, 540)
    logits = tail_fused(pch3, kp["w3"], kp["b3"], kp["fc1_w"], kp["fc1_b"],
                        kp["fc2_w"], kp["fc2_b"])               # (N, 128) f32
    return logits[:, :25]


# ----------------------------------------------------------------------------
# Pure-JAX reference (exactly mirrors the PyTorch module, f32)
# ----------------------------------------------------------------------------
def reference_forward(p, x):
    hp = jax.lax.Precision.HIGHEST

    def conv(x, w, b):
        y = jax.lax.conv_general_dilated(
            x, w, (1, 1), "VALID",
            dimension_numbers=("NCHW", "OIHW", "NCHW"), precision=hp)
        return y + b.reshape(1, -1, 1, 1)

    def bn(x, g, be):
        mean = jnp.mean(x, axis=(0, 2, 3), keepdims=True)
        var = jnp.mean((x - mean) ** 2, axis=(0, 2, 3), keepdims=True)
        return (x - mean) * jax.lax.rsqrt(var + 1e-5) * g.reshape(1, -1, 1, 1) \
            + be.reshape(1, -1, 1, 1)

    def pool(x):
        return jax.lax.reduce_window(x, -jnp.inf, jax.lax.max,
                                     (1, 1, 2, 2), (1, 1, 2, 2), "VALID")

    y = pool(jax.nn.relu(bn(conv(x, p["conv1_w"], p["conv1_b"]),
                            p["bn1_gamma"], p["bn1_beta"])))
    y = pool(jax.nn.relu(bn(conv(y, p["conv2_w"], p["conv2_b"]),
                            p["bn2_gamma"], p["bn2_beta"])))
    y = jax.nn.relu(conv(y, p["conv3_w"], p["conv3_b"]))
    y = y.reshape(y.shape[0], -1)                               # NCHW flatten
    y = jax.nn.relu(jnp.dot(y, p["fc1_w"].T, precision=hp) + p["fc1_b"])
    y = jnp.dot(y, p["fc2_w"].T, precision=hp) + p["fc2_b"]
    return jax.nn.log_softmax(y, axis=1)


if __name__ == "__main__":
    key = jax.random.PRNGKey(0)
    k_params, k_x = jax.random.split(key)
    params = init_params(k_params)
    kparams = prepare_params(params)

    # Architecture implies 28x28 single-channel input:
    # 28 -conv5-> 24 -pool-> 12 -conv5-> 8 -pool-> 4 -conv3-> 2  => 80*2*2 = 320
    x = jax.random.normal(k_x, (2, 1, 28, 28), dtype=jnp.float32)

    out = jax.block_until_ready(convnet_forward(kparams, x))
    assert out.shape == (2, 25)
    assert bool(jnp.all(jnp.isfinite(out)))
    assert bool(jnp.allclose(jnp.sum(jnp.exp(out), axis=1), 1.0, atol=1e-3))

    ref = reference_forward(params, x)
    assert bool(jnp.allclose(out, ref, atol=1e-1)), float(jnp.max(jnp.abs(out - ref)))

    print("KERNEL_OK")
</pallas_src>

<mosaic_0001>
module attributes {stable_mosaic.version = 11 : i64} {
  func.func @_gemm_stats_kernel(%arg0: i32, %arg1: memref<1152x25xbf16, #tpu.memory_space<vmem>>, %arg2: memref<25x128xbf16, #tpu.memory_space<vmem>>, %arg3: memref<1152x128xbf16, #tpu.memory_space<vmem>>, %arg4: memref<1x2x128xf32, #tpu.memory_space<vmem>>) attributes {dimension_semantics = [#tpu.dimension_semantics<parallel>], iteration_bounds = array<i64: 1>, scalar_prefetch = 0 : i64, scratch_operands = 0 : i64, tpu.core_type = #tpu.core_type<tc>, window_params = [{transform_indices = @transform_0, window_bounds = array<i64: 1152, 25>}, {pipeline_mode = #tpu.pipeline_mode<synchronous>, transform_indices = @transform_1, window_bounds = array<i64: 25, 128>}, {transform_indices = @transform_2, window_bounds = array<i64: 1152, 128>}, {transform_indices = @transform_3, window_bounds = array<i64: 1, 2, 128>}]} {
    %c0 = arith.constant 0 : index
    %c0_0 = arith.constant 0 : index
    %0 = vector.load %arg1[%c0, %c0_0] : memref<1152x25xbf16, #tpu.memory_space<vmem>>, vector<1152x25xbf16>
    %c0_1 = arith.constant 0 : index
    %c0_2 = arith.constant 0 : index
    %1 = vector.load %arg2[%c0_1, %c0_2] : memref<25x128xbf16, #tpu.memory_space<vmem>>, vector<25x128xbf16>
    %cst = arith.constant dense<0.000000e+00> : vector<1152x128xf32>
    %2 = tpu.matmul %0, %1, %cst {dimension_numbers = #tpu.dot_dimension_numbers<[1], [0], [0], [1], [0, 0, 1, 1], [], []>} : vector<1152x25xbf16>, vector<25x128xbf16>, vector<1152x128xf32> -> vector<1152x128xf32>
    %3 = arith.truncf %2 : vector<1152x128xf32> to vector<1152x128xbf16>
    %c0_3 = arith.constant 0 : index
    %c0_4 = arith.constant 0 : index
    %4 = vector.load %arg3[%c0_3, %c0_4] : memref<1152x128xbf16, #tpu.memory_space<vmem>>, vector<1152x128xbf16>
    tpu.vector_store %arg3[%c0_3, %c0_4], %3 {strides = array<i32>} : memref<1152x128xbf16, #tpu.memory_space<vmem>>, vector<1152x128xbf16>,
    %cst_5 = arith.constant dense<0.000000e+00> : vector<128xf32>
    %5 = vector.multi_reduction <add>, %2, %cst_5 [0] : vector<1152x128xf32> to vector<128xf32>
    %6 = vector.shape_cast %5 : vector<128xf32> to vector<1x128xf32>
    %7 = arith.mulf %2, %2 : vector<1152x128xf32>
    %cst_6 = arith.constant dense<0.000000e+00> : vector<128xf32>
    %8 = vector.multi_reduction <add>, %7, %cst_6 [0] : vector<1152x128xf32> to vector<128xf32>
    %9 = vector.shape_cast %8 : vector<128xf32> to vector<1x128xf32>
    %10 = tpu.concatenate %6, %9 in 0 : vector<1x128xf32>, vector<1x128xf32> -> vector<2x128xf32>
    %11 = vector.shape_cast %10 : vector<2x128xf32> to vector<1x2x128xf32>
    %c0_7 = arith.constant 0 : index
    %c0_8 = arith.constant 0 : index
    %c0_9 = arith.constant 0 : index
    %12 = vector.load %arg4[%c0_7, %c0_8, %c0_9] : memref<1x2x128xf32, #tpu.memory_space<vmem>>, vector<1x2x128xf32>
    tpu.vector_store %arg4[%c0_7, %c0_8, %c0_9], %11 {strides = array<i32>} : memref<1x2x128xf32, #tpu.memory_space<vmem>>, vector<1x2x128xf32>,
    return
  }
  func.func @transform_0(%arg0: i32) -> (i32, i32) {
    %c0_i32 = arith.constant 0 : i32
    %c0_i32_0 = arith.constant 0 : i32
    return %arg0, %c0_i32 : i32, i32
  }
  func.func @transform_1(%arg0: i32) -> (i32, i32) {
    %c0_i32 = arith.constant 0 : i32
    %c0_i32_0 = arith.constant 0 : i32
    %c0_i32_1 = arith.constant 0 : i32
    return %c0_i32, %c0_i32_0 : i32, i32
  }
  func.func @transform_2(%arg0: i32) -> (i32, i32) {
    %c0_i32 = arith.constant 0 : i32
    %c0_i32_0 = arith.constant 0 : i32
    return %arg0, %c0_i32 : i32, i32
  }
  func.func @transform_3(%arg0: i32) -> (i32, i32, i32) {
    %c0_i32 = arith.constant 0 : i32
    %c0_i32_0 = arith.constant 0 : i32
    %c0_i32_1 = arith.constant 0 : i32
    return %arg0, %c0_i32, %c0_i32_0 : i32, i32, i32
  }
}

module attributes {stable_mosaic.version = 11 : i64} {
  func.func @_bn_relu_pool_kernel(%arg0: i32, %arg1: memref<48x12x256xbf16, #tpu.memory_space<vmem>>, %arg2: memref<2x128xf32, #tpu.memory_space<vmem>>, %arg3: memref<24x12x128xbf16, #tpu.memory_space<vmem>>) attributes {dimension_semantics = [#tpu.dimension_semantics<parallel>], iteration_bounds = array<i64: 1>, scalar_prefetch = 0 : i64, scratch_operands = 0 : i64, tpu.core_type = #tpu.core_type<tc>, window_params = [{transform_indices = @transform_0, window_bounds = array<i64: 48, 12, 256>}, {pipeline_mode = #tpu.pipeline_mode<synchronous>, transform_indices = @transform_1, window_bounds = array<i64: 2, 128>}, {transform_indices = @transform_2, window_bounds = array<i64: 24, 12, 128>}]} {
    %c0 = arith.constant 0 : index
    %c0_0 = arith.constant 0 : index
    %0 = vector.load %arg2[%c0, %c0_0] : memref<2x128xf32, #tpu.memory_space<vmem>>, vector<1x128xf32>
    %c1 = arith.constant 1 : index
    %c0_1 = arith.constant 0 : index
    %1 = vector.load %arg2[%c1, %c0_1] : memref<2x128xf32, #tpu.memory_space<vmem>>, vector<1x128xf32>
    %c0_2 = arith.constant 0 : index
    %c0_3 = arith.constant 0 : index
    %c0_4 = arith.constant 0 : index
    %2 = vector.load %arg1[%c0_2, %c0_3, %c0_4] : memref<48x12x256xbf16, #tpu.memory_space<vmem>>, vector<48x12x256xbf16>
    %3 = vector.extract_strided_slice %2 {offsets = [0, 0, 0], sizes = [48, 12, 128], strides = [1, 1, 1]} : vector<48x12x256xbf16> to vector<48x12x128xbf16>
    %4 = arith.extf %3 : vector<48x12x128xbf16> to vector<48x12x128xf32>
    %5 = vector.extract_strided_slice %2 {offsets = [0, 0, 128], sizes = [48, 12, 128], strides = [1, 1, 1]} : vector<48x12x256xbf16> to vector<48x12x128xbf16>
    %6 = arith.extf %5 : vector<48x12x128xbf16> to vector<48x12x128xf32>
    %7 = vector.shape_cast %0 : vector<1x128xf32> to vector<1x1x128xf32>
    %8 = vector.broadcast %7 : vector<1x1x128xf32> to vector<48x12x128xf32>
    %9 = arith.mulf %4, %8 : vector<48x12x128xf32>
    %10 = vector.shape_cast %1 : vector<1x128xf32> to vector<1x1x128xf32>
    %11 = vector.broadcast %10 : vector<1x1x128xf32> to vector<48x12x128xf32>
    %12 = arith.addf %9, %11 : vector<48x12x128xf32>
    %cst = arith.constant 0.000000e+00 : f32
    %13 = vector.broadcast %cst : f32 to vector<48x12x128xf32>
    %14 = arith.maximumf %12, %13 : vector<48x12x128xf32>
    %15 = vector.shape_cast %0 : vector<1x128xf32> to vector<1x1x128xf32>
    %16 = vector.broadcast %15 : vector<1x1x128xf32> to vector<48x12x128xf32>
    %17 = arith.mulf %6, %16 : vector<48x12x128xf32>
    %18 = vector.shape_cast %1 : vector<1x128xf32> to vector<1x1x128xf32>
    %19 = vector.broadcast %18 : vector<1x1x128xf32> to vector<48x12x128xf32>
    %20 = arith.addf %17, %19 : vector<48x12x128xf32>
    %cst_5 = arith.constant 0.000000e+00 : f32
    %21 = vector.broadcast %cst_5 : f32 to vector<48x12x128xf32>
    %22 = arith.maximumf %20, %21 : vector<48x12x128xf32>
    %23 = arith.maximumf %14, %22 : vector<48x12x128xf32>
    %24 = vector.shape_cast %23 : vector<48x12x128xf32> to vector<24x2x12x128xf32>
    %cst_6 = arith.constant dense<0xFF800000> : vector<24x12x128xf32>
    %25 = vector.multi_reduction <maximumf>, %24, %cst_6 [1] : vector<24x2x12x128xf32> to vector<24x12x128xf32>
    %26 = arith.truncf %25 : vector<24x12x128xf32> to vector<24x12x128xbf16>
    %c0_7 = arith.constant 0 : index
    %c0_8 = arith.constant 0 : index
    %c0_9 = arith.constant 0 : index
    %27 = vector.load %arg3[%c0_7, %c0_8, %c0_9] : memref<24x12x128xbf16, #tpu.memory_space<vmem>>, vector<24x12x128xbf16>
    tpu.vector_store %arg3[%c0_7, %c0_8, %c0_9], %26 {strides = array<i32>} : memref<24x12x128xbf16, #tpu.memory_space<vmem>>, vector<24x12x128xbf16>,
    return
  }
  func.func @transform_0(%arg0: i32) -> (i32, i32, i32) {
    %c0_i32 = arith.constant 0 : i32
    %c0_i32_0 = arith.constant 0 : i32
    %c0_i32_1 = arith.constant 0 : i32
    return %arg0, %c0_i32, %c0_i32_0 : i32, i32, i32
  }
  func.func @transform_1(%arg0: i32) -> (i32, i32) {
    %c0_i32 = arith.constant 0 : i32
    %c0_i32_0 = arith.constant 0 : i32
    %c0_i32_1 = arith.constant 0 : i32
    return %c0_i32, %c0_i32_0 : i32, i32
  }
  func.func @transform_2(%arg0: i32) -> (i32, i32, i32) {
    %c0_i32 = arith.constant 0 : i32
    %c0_i32_0 = arith.constant 0 : i32
    %c0_i32_1 = arith.constant 0 : i32
    return %arg0, %c0_i32, %c0_i32_0 : i32, i32, i32
  }
}

module attributes {stable_mosaic.version = 11 : i64} {
  func.func @kernel(%arg0: i32, %arg1: memref<2x12x12x128xbf16, #tpu.memory_space<vmem>>, %arg2: memref<5x5x128x128xbf16, #tpu.memory_space<vmem>>, %arg3: memref<128x128xbf16, #tpu.memory_space<vmem>>, %arg4: memref<1x2x128xf32, #tpu.memory_space<vmem>>) attributes {dimension_semantics = [#tpu.dimension_semantics<parallel>], iteration_bounds = array<i64: 1>, scalar_prefetch = 0 : i64, scratch_operands = 0 : i64, tpu.core_type = #tpu.core_type<tc>, window_params = [{transform_indices = @transform_0, window_bounds = array<i64: 2, 12, 12, 128>}, {pipeline_mode = #tpu.pipeline_mode<synchronous>, transform_indices = @transform_1, window_bounds = array<i64: 5, 5, 128, 128>}, {transform_indices = @transform_2, window_bounds = array<i64: 128, 128>}, {transform_indices = @transform_3, window_bounds = array<i64: 1, 2, 128>}]} {
    %c0 = arith.constant 0 : index
    %c0_0 = arith.constant 0 : index
    %c0_1 = arith.constant 0 : index
    %c0_2 = arith.constant 0 : index
    %0 = vector.load %arg1[%c0, %c0_0, %c0_1, %c0_2] : memref<2x12x12x128xbf16, #tpu.memory_space<vmem>>, vector<2x12x12x128xbf16>
    %1 = arith.extf %0 : vector<2x12x12x128xbf16> to vector<2x12x12x128xf32>
    %cst = arith.constant 0.000000e+00 : f32
    %2 = vector.broadcast %cst : f32 to vector<128x128xf32>
    %3 = vector.extract_strided_slice %1 {offsets = [0, 0, 0, 0], sizes = [2, 8, 8, 128], strides = [1, 1, 1, 1]} : vector<2x12x12x128xf32> to vector<2x8x8x128xf32>
    %4 = vector.shape_cast %3 : vector<2x8x8x128xf32> to vector<128x128xf32>
    %5 = arith.truncf %4 : vector<128x128xf32> to vector<128x128xbf16>
    %c0_3 = arith.constant 0 : index
    %c0_4 = arith.constant 0 : index
    %c0_5 = arith.constant 0 : index
    %c0_6 = arith.constant 0 : index
    %6 = vector.load %arg2[%c0_3, %c0_4, %c0_5, %c0_6] : memref<5x5x128x128xbf16, #tpu.memory_space<vmem>>, vector<1x1x128x128xbf16>
    %7 = vector.shape_cast %6 : vector<1x1x128x128xbf16> to vector<128x128xbf16>
    %cst_7 = arith.constant dense<0.000000e+00> : vector<128x128xf32>
    %8 = tpu.matmul %5, %7, %cst_7 {dimension_numbers = #tpu.dot_dimension_numbers<[1], [0], [0], [1], [0, 0, 1, 1], [], []>} : vector<128x128xbf16>, vector<128x128xbf16>, vector<128x128xf32> -> vector<128x128xf32>
    %9 = arith.addf %2, %8 : vector<128x128xf32>
    %10 = vector.extract_strided_slice %1 {offsets = [0, 0, 1, 0], sizes = [2, 8, 8, 128], strides = [1, 1, 1, 1]} : vector<2x12x12x128xf32> to vector<2x8x8x128xf32>
    %11 = vector.shape_cast %10 : vector<2x8x8x128xf32> to vector<128x128xf32>
    %12 = arith.truncf %11 : vector<128x128xf32> to vector<128x128xbf16>
    %c0_8 = arith.constant 0 : index
    %c1 = arith.constant 1 : index
    %c0_9 = arith.constant 0 : index
    %c0_10 = arith.constant 0 : index
    %13 = vector.load %arg2[%c0_8, %c1, %c0_9, %c0_10] : memref<5x5x128x128xbf16, #tpu.memory_space<vmem>>, vector<1x1x128x128xbf16>
    %14 = vector.shape_cast %13 : vector<1x1x128x128xbf16> to vector<128x128xbf16>
    %cst_11 = arith.constant dense<0.000000e+00> : vector<128x128xf32>
    %15 = tpu.matmul %12, %14, %cst_11 {dimension_numbers = #tpu.dot_dimension_numbers<[1], [0], [0], [1], [0, 0, 1, 1], [], []>} : vector<128x128xbf16>, vector<128x128xbf16>, vector<128x128xf32> -> vector<128x128xf32>
    %16 = arith.addf %9, %15 : vector<128x128xf32>
    %17 = vector.extract_strided_slice %1 {offsets = [0, 0, 2, 0], sizes = [2, 8, 8, 128], strides = [1, 1, 1, 1]} : vector<2x12x12x128xf32> to vector<2x8x8x128xf32>
    %18 = vector.shape_cast %17 : vector<2x8x8x128xf32> to vector<128x128xf32>
    %19 = arith.truncf %18 : vector<128x128xf32> to vector<128x128xbf16>
    %c0_12 = arith.constant 0 : index
    %c2 = arith.constant 2 : index
    %c0_13 = arith.constant 0 : index
    %c0_14 = arith.constant 0 : index
    %20 = vector.load %arg2[%c0_12, %c2, %c0_13, %c0_14] : memref<5x5x128x128xbf16, #tpu.memory_space<vmem>>, vector<1x1x128x128xbf16>
    %21 = vector.shape_cast %20 : vector<1x1x128x128xbf16> to vector<128x128xbf16>
    %cst_15 = arith.constant dense<0.000000e+00> : vector<128x128xf32>
    %22 = tpu.matmul %19, %21, %cst_15 {dimension_numbers = #tpu.dot_dimension_numbers<[1], [0], [0], [1], [0, 0, 1, 1], [], []>} : vector<128x128xbf16>, vector<128x128xbf16>, vector<128x128xf32> -> vector<128x128xf32>
    %23 = arith.addf %16, %22 : vector<128x128xf32>
    %24 = vector.extract_strided_slice %1 {offsets = [0, 0, 3, 0], sizes = [2, 8, 8, 128], strides = [1, 1, 1, 1]} : vector<2x12x12x128xf32> to vector<2x8x8x128xf32>
    %25 = vector.shape_cast %24 : vector<2x8x8x128xf32> to vector<128x128xf32>
    %26 = arith.truncf %25 : vector<128x128xf32> to vector<128x128xbf16>
    %c0_16 = arith.constant 0 : index
    %c3 = arith.constant 3 : index
    %c0_17 = arith.constant 0 : index
    %c0_18 = arith.constant 0 : index
    %27 = vector.load %arg2[%c0_16, %c3, %c0_17, %c0_18] : memref<5x5x128x128xbf16, #tpu.memory_space<vmem>>, vector<1x1x128x128xbf16>
    %28 = vector.shape_cast %27 : vector<1x1x128x128xbf16> to vector<128x128xbf16>
    %cst_19 = arith.constant dense<0.000000e+00> : vector<128x128xf32>
    %29 = tpu.matmul %26, %28, %cst_19 {dimension_numbers = #tpu.dot_dimension_numbers<[1], [0], [0], [1], [0, 0, 1, 1], [], []>} : vector<128x128xbf16>, vector<128x128xbf16>, vector<128x128xf32> -> vector<128x128xf32>
    %30 = arith.addf %23, %29 : vector<128x128xf32>
    %31 = vector.extract_strided_slice %1 {offsets = [0, 0, 4, 0], sizes = [2, 8, 8, 128], strides = [1, 1, 1, 1]} : vector<2x12x12x128xf32> to vector<2x8x8x128xf32>
    %32 = vector.shape_cast %31 : vector<2x8x8x128xf32> to vector<128x128xf32>
    %33 = arith.truncf %32 : vector<128x128xf32> to vector<128x128xbf16>
    %c0_20 = arith.constant 0 : index
    %c4 = arith.constant 4 : index
    %c0_21 = arith.constant 0 : index
    %c0_22 = arith.constant 0 : index
    %34 = vector.load %arg2[%c0_20, %c4, %c0_21, %c0_22] : memref<5x5x128x128xbf16, #tpu.memory_space<vmem>>, vector<1x1x128x128xbf16>
    %35 = vector.shape_cast %34 : vector<1x1x128x128xbf16> to vector<128x128xbf16>
    %cst_23 = arith.constant dense<0.000000e+00> : vector<128x128xf32>
    %36 = tpu.matmul %33, %35, %cst_23 {dimension_numbers = #tpu.dot_dimension_numbers<[1], [0], [0], [1], [0, 0, 1, 1], [], []>} : vector<128x128xbf16>, vector<128x128xbf16>, vector<128x128xf32> -> vector<128x128xf32>
    %37 = arith.addf %30, %36 : vector<128x128xf32>
    %38 = vector.extract_strided_slice %1 {offsets = [0, 1, 0, 0], sizes = [2, 8, 8, 128], strides = [1, 1, 1, 1]} : vector<2x12x12x128xf32> to vector<2x8x8x128xf32>
    %39 = vector.shape_cast %38 : vector<2x8x8x128xf32> to vector<128x128xf32>
    %40 = arith.truncf %39 : vector<128x128xf32> to vector<128x128xbf16>
    %c1_24 = arith.constant 1 : index
    %c0_25 = arith.constant 0 : index
    %c0_26 = arith.constant 0 : index
    %c0_27 = arith.constant 0 : index
    %41 = vector.load %arg2[%c1_24, %c0_25, %c0_26, %c0_27] : memref<5x5x128x128xbf16, #tpu.memory_space<vmem>>, vector<1x1x128x128xbf16>
    %42 = vector.shape_cast %41 : vector<1x1x128x128xbf16> to vector<128x128xbf16>
    %cst_28 = arith.constant dense<0.000000e+00> : vector<128x128xf32>
    %43 = tpu.matmul %40, %42, %cst_28 {dimension_numbers = #tpu.dot_dimension_numbers<[1], [0], [0], [1], [0, 0, 1, 1], [], []>} : vector<128x128xbf16>, vector<128x128xbf16>, vector<128x128xf32> -> vector<128x128xf32>
    %44 = arith.addf %37, %43 : vector<128x128xf32>
    %45 = vector.extract_strided_slice %1 {offsets = [0, 1, 1, 0], sizes = [2, 8, 8, 128], strides = [1, 1, 1, 1]} : vector<2x12x12x128xf32> to vector<2x8x8x128xf32>
    %46 = vector.shape_cast %45 : vector<2x8x8x128xf32> to vector<128x128xf32>
    %47 = arith.truncf %46 : vector<128x128xf32> to vector<128x128xbf16>
    %c1_29 = arith.constant 1 : index
    %c1_30 = arith.constant 1 : index
    %c0_31 = arith.constant 0 : index
    %c0_32 = arith.constant 0 : index
    %48 = vector.load %arg2[%c1_29, %c1_30, %c0_31, %c0_32] : memref<5x5x128x128xbf16, #tpu.memory_space<vmem>>, vector<1x1x128x128xbf16>
    %49 = vector.shape_cast %48 : vector<1x1x128x128xbf16> to vector<128x128xbf16>
    %cst_33 = arith.constant dense<0.000000e+00> : vector<128x128xf32>
    %50 = tpu.matmul %47, %49, %cst_33 {dimension_numbers = #tpu.dot_dimension_numbers<[1], [0], [0], [1], [0, 0, 1, 1], [], []>} : vector<128x128xbf16>, vector<128x128xbf16>, vector<128x128xf32> -> vector<128x128xf32>
    %51 = arith.addf %44, %50 : vector<128x128xf32>
    %52 = vector.extract_strided_slice %1 {offsets = [0, 1, 2, 0], sizes = [2, 8, 8, 128], strides = [1, 1, 1, 1]} : vector<2x12x12x128xf32> to vector<2x8x8x128xf32>
    %53 = vector.shape_cast %52 : vector<2x8x8x128xf32> to vector<128x128xf32>
    %54 = arith.truncf %53 : vector<128x128xf32> to vector<128x128xbf16>
    %c1_34 = arith.constant 1 : index
    %c2_35 = arith.constant 2 : index
    %c0_36 = arith.constant 0 : index
    %c0_37 = arith.constant 0 : index
    %55 = vector.load %arg2[%c1_34, %c2_35, %c0_36, %c0_37] : memref<5x5x128x128xbf16, #tpu.memory_space<vmem>>, vector<1x1x128x128xbf16>
    %56 = vector.shape_cast %55 : vector<1x1x128x128xbf16> to vector<128x128xbf16>
    %cst_38 = arith.constant dense<0.000000e+00> : vector<128x128xf32>
    %57 = tpu.matmul %54, %56, %cst_38 {dimension_numbers = #tpu.dot_dimension_numbers<[1], [0], [0], [1], [0, 0, 1, 1], [], []>} : vector<128x128xbf16>, vector<128x128xbf16>, vector<128x128xf32> -> vector<128x128xf32>
    %58 = arith.addf %51, %57 : vector<128x128xf32>
    %59 = vector.extract_strided_slice %1 {offsets = [0, 1, 3, 0], sizes = [2, 8, 8, 128], strides = [1, 1, 1, 1]} : vector<2x12x12x128xf32> to vector<2x8x8x128xf32>
    %60 = vector.shape_cast %59 : vector<2x8x8x128xf32> to vector<128x128xf32>
    %61 = arith.truncf %60 : vector<128x128xf32> to vector<128x128xbf16>
    %c1_39 = arith.constant 1 : index
    %c3_40 = arith.constant 3 : index
    %c0_41 = arith.constant 0 : index
    %c0_42 = arith.constant 0 : index
    %62 = vector.load %arg2[%c1_39, %c3_40, %c0_41, %c0_42] : memref<5x5x128x128xbf16, #tpu.memory_space<vmem>>, vector<1x1x128x128xbf16>
    %63 = vector.shape_cast %62 : vector<1x1x128x128xbf16> to vector<128x128xbf16>
    %cst_43 = arith.constant dense<0.000000e+00> : vector<128x128xf32>
    %64 = tpu.matmul %61, %63, %cst_43 {dimension_numbers = #tpu.dot_dimension_numbers<[1], [0], [0], [1], [0, 0, 1, 1], [], []>} : vector<128x128xbf16>, vector<128x128xbf16>, vector<128x128xf32> -> vector<128x128xf32>
    %65 = arith.addf %58, %64 : vector<128x128xf32>
    %66 = vector.extract_strided_slice %1 {offsets = [0, 1, 4, 0], sizes = [2, 8, 8, 128], strides = [1, 1, 1, 1]} : vector<2x12x12x128xf32> to vector<2x8x8x128xf32>
    %67 = vector.shape_cast %66 : vector<2x8x8x128xf32> to vector<128x128xf32>
    %68 = arith.truncf %67 : vector<128x128xf32> to vector<128x128xbf16>
    %c1_44 = arith.constant 1 : index
    %c4_45 = arith.constant 4 : index
    %c0_46 = arith.constant 0 : index
    %c0_47 = arith.constant 0 : index
    %69 = vector.load %arg2[%c1_44, %c4_45, %c0_46, %c0_47] : memref<5x5x128x128xbf16, #tpu.memory_space<vmem>>, vector<1x1x128x128xbf16>
    %70 = vector.shape_cast %69 : vector<1x1x128x128xbf16> to vector<128x128xbf16>
    %cst_48 = arith.constant dense<0.000000e+00> : vector<128x128xf32>
    %71 = tpu.matmul %68, %70, %cst_48 {dimension_numbers = #tpu.dot_dimension_numbers<[1], [0], [0], [1], [0, 0, 1, 1], [], []>} : vector<128x128xbf16>, vector<128x128xbf16>, vector<128x128xf32> -> vector<128x128xf32>
    %72 = arith.addf %65, %71 : vector<128x128xf32>
    %73 = vector.extract_strided_slice %1 {offsets = [0, 2, 0, 0], sizes = [2, 8, 8, 128], strides = [1, 1, 1, 1]} : vector<2x12x12x128xf32> to vector<2x8x8x128xf32>
    %74 = vector.shape_cast %73 : vector<2x8x8x128xf32> to vector<128x128xf32>
    %75 = arith.truncf %74 : vector<128x128xf32> to vector<128x128xbf16>
    %c2_49 = arith.constant 2 : index
    %c0_50 = arith.constant 0 : index
    %c0_51 = arith.constant 0 : index
    %c0_52 = arith.constant 0 : index
    %76 = vector.load %arg2[%c2_49, %c0_50, %c0_51, %c0_52] : memref<5x5x128x128xbf16, #tpu.memory_space<vmem>>, vector<1x1x128x128xbf16>
    %77 = vector.shape_cast %76 : vector<1x1x128x128xbf16> to vector<128x128xbf16>
    %cst_53 = arith.constant dense<0.000000e+00> : vector<128x128xf32>
    %78 = tpu.matmul %75, %77, %cst_53 {dimension_numbers = #tpu.dot_dimension_numbers<[1], [0], [0], [1], [0, 0, 1, 1], [], []>} : vector<128x128xbf16>, vector<128x128xbf16>, vector<128x128xf32> -> vector<128x128xf32>
    %79 = arith.addf %72, %78 : vector<128x128xf32>
    %80 = vector.extract_strided_slice %1 {offsets = [0, 2, 1, 0], sizes = [2, 8, 8, 128], strides = [1, 1, 1, 1]} : vector<2x12x12x128xf32> to vector<2x8x8x128xf32>
    %81 = vector.shape_cast %80 : vector<2x8x8x128xf32> to vector<128x128xf32>
    %82 = arith.truncf %81 : vector<128x128xf32> to vector<128x128xbf16>
    %c2_54 = arith.constant 2 : index
    %c1_55 = arith.constant 1 : index
    %c0_56 = arith.constant 0 : index
    %c0_57 = arith.constant 0 : index
    %83 = vector.load %arg2[%c2_54, %c1_55, %c0_56, %c0_57] : memref<5x5x128x128xbf16, #tpu.memory_space<vmem>>, vector<1x1x128x128xbf16>
    %84 = vector.shape_cast %83 : vector<1x1x128x128xbf16> to vector<128x128xbf16>
    %cst_58 = arith.constant dense<0.000000e+00> : vector<128x128xf32>
    %85 = tpu.matmul %82, %84, %cst_58 {dimension_numbers = #tpu.dot_dimension_numbers<[1], [0], [0], [1], [0, 0, 1, 1], [], []>} : vector<128x128xbf16>, vector<128x128xbf16>, vector<128x128xf32> -> vector<128x128xf32>
    %86 = arith.addf %79, %85 : vector<128x128xf32>
    %87 = vector.extract_strided_slice %1 {offsets = [0, 2, 2, 0], sizes = [2, 8, 8, 128], strides = [1, 1, 1, 1]} : vector<2x12x12x128xf32> to vector<2x8x8x128xf32>
    %88 = vector.shape_cast %87 : vector<2x8x8x128xf32> to vector<128x128xf32>
    %89 = arith.truncf %88 : vector<128x128xf32> to vector<128x128xbf16>
    %c2_59 = arith.constant 2 : index
    %c2_60 = arith.constant 2 : index
    %c0_61 = arith.constant 0 : index
    %c0_62 = arith.constant 0 : index
    %90 = vector.load %arg2[%c2_59, %c2_60, %c0_61, %c0_62] : memref<5x5x128x128xbf16, #tpu.memory_space<vmem>>, vector<1x1x128x128xbf16>
    %91 = vector.shape_cast %90 : vector<1x1x128x128xbf16> to vector<128x128xbf16>
    %cst_63 = arith.constant dense<0.000000e+00> : vector<128x128xf32>
    %92 = tpu.matmul %89, %91, %cst_63 {dimension_numbers = #tpu.dot_dimension_numbers<[1], [0], [0], [1], [0, 0, 1, 1], [], []>} : vector<128x128xbf16>, vector<128x128xbf16>, vector<128x128xf32> -> vector<128x128xf32>
    %93 = arith.addf %86, %92 : vector<128x128xf32>
    %94 = vector.extract_strided_slice %1 {offsets = [0, 2, 3, 0], sizes = [2, 8, 8, 128], strides = [1, 1, 1, 1]} : vector<2x12x12x128xf32> to vector<2x8x8x128xf32>
    %95 = vector.shape_cast %94 : vector<2x8x8x128xf32> to vector<128x128xf32>
    %96 = arith.truncf %95 : vector<128x128xf32> to vector<128x128xbf16>
    %c2_64 = arith.constant 2 : index
    %c3_65 = arith.constant 3 : index
    %c0_66 = arith.constant 0 : index
    %c0_67 = arith.constant 0 : index
    %97 = vector.load %arg2[%c2_64, %c3_65, %c0_66, %c0_67] : memref<5x5x128x128xbf16, #tpu.memory_space<vmem>>, vector<1x1x128x128xbf16>
    %98 = vector.shape_cast %97 : vector<1x1x128x128xbf16> to vector<128x128xbf16>
    %cst_68 = arith.constant dense<0.000000e+00> : vector<128x128xf32>
    %99 = tpu.matmul %96, %98, %cst_68 {dimension_numbers = #tpu.dot_dimension_numbers<[1], [0], [0], [1], [0, 0, 1, 1], [], []>} : vector<128x128xbf16>, vector<128x128xbf16>, vector<128x128xf32> -> vector<128x128xf32>
    %100 = arith.addf %93, %99 : vector<128x128xf32>
    %101 = vector.extract_strided_slice %1 {offsets = [0, 2, 4, 0], sizes = [2, 8, 8, 128], strides = [1, 1, 1, 1]} : vector<2x12x12x128xf32> to vector<2x8x8x128xf32>
    %102 = vector.shape_cast %101 : vector<2x8x8x128xf32> to vector<128x128xf32>
    %103 = arith.truncf %102 : vector<128x128xf32> to vector<128x128xbf16>
    %c2_69 = arith.constant 2 : index
    %c4_70 = arith.constant 4 : index
    %c0_71 = arith.constant 0 : index
    %c0_72 = arith.constant 0 : index
    %104 = vector.load %arg2[%c2_69, %c4_70, %c0_71, %c0_72] : memref<5x5x128x128xbf16, #tpu.memory_space<vmem>>, vector<1x1x128x128xbf16>
    %105 = vector.shape_cast %104 : vector<1x1x128x128xbf16> to vector<128x128xbf16>
    %cst_73 = arith.constant dense<0.000000e+00> : vector<128x128xf32>
    %106 = tpu.matmul %103, %105, %cst_73 {dimension_numbers = #tpu.dot_dimension_numbers<[1], [0], [0], [1], [0, 0, 1, 1], [], []>} : vector<128x128xbf16>, vector<128x128xbf16>, vector<128x128xf32> -> vector<128x128xf32>
    %107 = arith.addf %100, %106 : vector<128x128xf32>
    %108 = vector.extract_strided_slice %1 {offsets = [0, 3, 0, 0], sizes = [2, 8, 8, 128], strides = [1, 1, 1, 1]} : vector<2x12x12x128xf32> to vector<2x8x8x128xf32>
    %109 = vector.shape_cast %108 : vector<2x8x8x128xf32> to vector<128x128xf32>
    %110 = arith.truncf %109 : vector<128x128xf32> to vector<128x128xbf16>
    %c3_74 = arith.constant 3 : index
    %c0_75 = arith.constant 0 : index
    %c0_76 = arith.constant 0 : index
    %c0_77 = arith.constant 0 : index
    %111 = vector.load %arg2[%c3_74, %c0_75, %c0_76, %c0_77] : memref<5x5x128x128xbf16, #tpu.memory_space<vmem>>, vector<1x1x128x128xbf16>
    %112 = vector.shape_cast %111 : vector<1x1x128x128xbf16> to vector<128x128xbf16>
    %cst_78 = arith.constant dense<0.000000e+00> : vector<128x128xf32>
    %113 = tpu.matmul %110, %112, %cst_78 {dimension_numbers = #tpu.dot_dimension_numbers<[1], [0], [0], [1], [0, 0, 1, 1], [], []>} : vector<128x128xbf16>, vector<128x128xbf16>, vector<128x128xf32> -> vector<128x128xf32>
    %114 = arith.addf %107, %113 : vector<128x128xf32>
    %115 = vector.extract_strided_slice %1 {offsets = [0, 3, 1, 0], sizes = [2, 8, 8, 128], strides = [1, 1, 1, 1]} : vector<2x12x12x128xf32> to vector<2x8x8x128xf32>
    %116 = vector.shape_cast %115 : vector<2x8x8x128xf32> to vector<128x128xf32>
    %117 = arith.truncf %116 : vector<128x128xf32> to vector<128x128xbf16>
    %c3_79 = arith.constant 3 : index
    %c1_80 = arith.constant 1 : index
    %c0_81 = arith.constant 0 : index
    %c0_82 = arith.constant 0 : index
    %118 = vector.load %arg2[%c3_79, %c1_80, %c0_81, %c0_82] : memref<5x5x128x128xbf16, #tpu.memory_space<vmem>>, vector<1x1x128x128xbf16>
    %119 = vector.shape_cast %118 : vector<1x1x128x128xbf16> to vector<128x128xbf16>
    %cst_83 = arith.constant dense<0.000000e+00> : vector<128x128xf32>
    %120 = tpu.matmul %117, %119, %cst_83 {dimension_numbers = #tpu.dot_dimension_numbers<[1], [0], [0], [1], [0, 0, 1, 1], [], []>} : vector<128x128xbf16>, vector<128x128xbf16>, vector<128x128xf32> -> vector<128x128xf32>
    %121 = arith.addf %114, %120 : vector<128x128xf32>
    %122 = vector.extract_strided_slice %1 {offsets = [0, 3, 2, 0], sizes = [2, 8, 8, 128], strides = [1, 1, 1, 1]} : vector<2x12x12x128xf32> to vector<2x8x8x128xf32>
    %123 = vector.shape_cast %122 : vector<2x8x8x128xf32> to vector<128x128xf32>
    %124 = arith.truncf %123 : vector<128x128xf32> to vector<128x128xbf16>
    %c3_84 = arith.constant 3 : index
    %c2_85 = arith.constant 2 : index
    %c0_86 = arith.constant 0 : index
    %c0_87 = arith.constant 0 : index
    %125 = vector.load %arg2[%c3_84, %c2_85, %c0_86, %c0_87] : memref<5x5x128x128xbf16, #tpu.memory_space<vmem>>, vector<1x1x128x128xbf16>
    %126 = vector.shape_cast %125 : vector<1x1x128x128xbf16> to vector<128x128xbf16>
    %cst_88 = arith.constant dense<0.000000e+00> : vector<128x128xf32>
    %127 = tpu.matmul %124, %126, %cst_88 {dimension_numbers = #tpu.dot_dimension_numbers<[1], [0], [0], [1], [0, 0, 1, 1], [], []>} : vector<128x128xbf16>, vector<128x128xbf16>, vector<128x128xf32> -> vector<128x128xf32>
    %128 = arith.addf %121, %127 : vector<128x128xf32>
    %129 = vector.extract_strided_slice %1 {offsets = [0, 3, 3, 0], sizes = [2, 8, 8, 128], strides = [1, 1, 1, 1]} : vector<2x12x12x128xf32> to vector<2x8x8x128xf32>
    %130 = vector.shape_cast %129 : vector<2x8x8x128xf32> to vector<128x128xf32>
    %131 = arith.truncf %130 : vector<128x128xf32> to vector<128x128xbf16>
    %c3_89 = arith.constant 3 : index
    %c3_90 = arith.constant 3 : index
    %c0_91 = arith.constant 0 : index
    %c0_92 = arith.constant 0 : index
    %132 = vector.load %arg2[%c3_89, %c3_90, %c0_91, %c0_92] : memref<5x5x128x128xbf16, #tpu.memory_space<vmem>>, vector<1x1x128x128xbf16>
    %133 = vector.shape_cast %132 : vector<1x1x128x128xbf16> to vector<128x128xbf16>
    %cst_93 = arith.constant dense<0.000000e+00> : vector<128x128xf32>
    %134 = tpu.matmul %131, %133, %cst_93 {dimension_numbers = #tpu.dot_dimension_numbers<[1], [0], [0], [1], [0, 0, 1, 1], [], []>} : vector<128x128xbf16>, vector<128x128xbf16>, vector<128x128xf32> -> vector<128x128xf32>
    %135 = arith.addf %128, %134 : vector<128x128xf32>
    %136 = vector.extract_strided_slice %1 {offsets = [0, 3, 4, 0], sizes = [2, 8, 8, 128], strides = [1, 1, 1, 1]} : vector<2x12x12x128xf32> to vector<2x8x8x128xf32>
    %137 = vector.shape_cast %136 : vector<2x8x8x128xf32> to vector<128x128xf32>
    %138 = arith.truncf %137 : vector<128x128xf32> to vector<128x128xbf16>
    %c3_94 = arith.constant 3 : index
    %c4_95 = arith.constant 4 : index
    %c0_96 = arith.constant 0 : index
    %c0_97 = arith.constant 0 : index
    %139 = vector.load %arg2[%c3_94, %c4_95, %c0_96, %c0_97] : memref<5x5x128x128xbf16, #tpu.memory_space<vmem>>, vector<1x1x128x128xbf16>
    %140 = vector.shape_cast %139 : vector<1x1x128x128xbf16> to vector<128x128xbf16>
    %cst_98 = arith.constant dense<0.000000e+00> : vector<128x128xf32>
    %141 = tpu.matmul %138, %140, %cst_98 {dimension_numbers = #tpu.dot_dimension_numbers<[1], [0], [0], [1], [0, 0, 1, 1], [], []>} : vector<128x128xbf16>, vector<128x128xbf16>, vector<128x128xf32> -> vector<128x128xf32>
    %142 = arith.addf %135, %141 : vector<128x128xf32>
    %143 = vector.extract_strided_slice %1 {offsets = [0, 4, 0, 0], sizes = [2, 8, 8, 128], strides = [1, 1, 1, 1]} : vector<2x12x12x128xf32> to vector<2x8x8x128xf32>
    %144 = vector.shape_cast %143 : vector<2x8x8x128xf32> to vector<128x128xf32>
    %145 = arith.truncf %144 : vector<128x128xf32> to vector<128x128xbf16>
    %c4_99 = arith.constant 4 : index
    %c0_100 = arith.constant 0 : index
    %c0_101 = arith.constant 0 : index
    %c0_102 = arith.constant 0 : index
    %146 = vector.load %arg2[%c4_99, %c0_100, %c0_101, %c0_102] : memref<5x5x128x128xbf16, #tpu.memory_space<vmem>>, vector<1x1x128x128xbf16>
    %147 = vector.shape_cast %146 : vector<1x1x128x128xbf16> to vector<128x128xbf16>
    %cst_103 = arith.constant dense<0.000000e+00> : vector<128x128xf32>
    %148 = tpu.matmul %145, %147, %cst_103 {dimension_numbers = #tpu.dot_dimension_numbers<[1], [0], [0], [1], [0, 0, 1, 1], [], []>} : vector<128x128xbf16>, vector<128x128xbf16>, vector<128x128xf32> -> vector<128x128xf32>
    %149 = arith.addf %142, %148 : vector<128x128xf32>
    %150 = vector.extract_strided_slice %1 {offsets = [0, 4, 1, 0], sizes = [2, 8, 8, 128], strides = [1, 1, 1, 1]} : vector<2x12x12x128xf32> to vector<2x8x8x128xf32>
    %151 = vector.shape_cast %150 : vector<2x8x8x128xf32> to vector<128x128xf32>
    %152 = arith.truncf %151 : vector<128x128xf32> to vector<128x128xbf16>
    %c4_104 = arith.constant 4 : index
    %c1_105 = arith.constant 1 : index
    %c0_106 = arith.constant 0 : index
    %c0_107 = arith.constant 0 : index
    %153 = vector.load %arg2[%c4_104, %c1_105, %c0_106, %c0_107] : memref<5x5x128x128xbf16, #tpu.memory_space<vmem>>, vector<1x1x128x128xbf16>
    %154 = vector.shape_cast %153 : vector<1x1x128x128xbf16> to vector<128x128xbf16>
    %cst_108 = arith.constant dense<0.000000e+00> : vector<128x128xf32>
    %155 = tpu.matmul %152, %154, %cst_108 {dimension_numbers = #tpu.dot_dimension_numbers<[1], [0], [0], [1], [0, 0, 1, 1], [], []>} : vector<128x128xbf16>, vector<128x128xbf16>, vector<128x128xf32> -> vector<128x128xf32>
    %156 = arith.addf %149, %155 : vector<128x128xf32>
    %157 = vector.extract_strided_slice %1 {offsets = [0, 4, 2, 0], sizes = [2, 8, 8, 128], strides = [1, 1, 1, 1]} : vector<2x12x12x128xf32> to vector<2x8x8x128xf32>
    %158 = vector.shape_cast %157 : vector<2x8x8x128xf32> to vector<128x128xf32>
    %159 = arith.truncf %158 : vector<128x128xf32> to vector<128x128xbf16>
    %c4_109 = arith.constant 4 : index
    %c2_110 = arith.constant 2 : index
    %c0_111 = arith.constant 0 : index
    %c0_112 = arith.constant 0 : index
    %160 = vector.load %arg2[%c4_109, %c2_110, %c0_111, %c0_112] : memref<5x5x128x128xbf16, #tpu.memory_space<vmem>>, vector<1x1x128x128xbf16>
    %161 = vector.shape_cast %160 : vector<1x1x128x128xbf16> to vector<128x128xbf16>
    %cst_113 = arith.constant dense<0.000000e+00> : vector<128x128xf32>
    %162 = tpu.matmul %159, %161, %cst_113 {dimension_numbers = #tpu.dot_dimension_numbers<[1], [0], [0], [1], [0, 0, 1, 1], [], []>} : vector<128x128xbf16>, vector<128x128xbf16>, vector<128x128xf32> -> vector<128x128xf32>
    %163 = arith.addf %156, %162 : vector<128x128xf32>
    %164 = vector.extract_strided_slice %1 {offsets = [0, 4, 3, 0], sizes = [2, 8, 8, 128], strides = [1, 1, 1, 1]} : vector<2x12x12x128xf32> to vector<2x8x8x128xf32>
    %165 = vector.shape_cast %164 : vector<2x8x8x128xf32> to vector<128x128xf32>
    %166 = arith.truncf %165 : vector<128x128xf32> to vector<128x128xbf16>
    %c4_114 = arith.constant 4 : index
    %c3_115 = arith.constant 3 : index
    %c0_116 = arith.constant 0 : index
    %c0_117 = arith.constant 0 : index
    %167 = vector.load %arg2[%c4_114, %c3_115, %c0_116, %c0_117] : memref<5x5x128x128xbf16, #tpu.memory_space<vmem>>, vector<1x1x128x128xbf16>
    %168 = vector.shape_cast %167 : vector<1x1x128x128xbf16> to vector<128x128xbf16>
    %cst_118 = arith.constant dense<0.000000e+00> : vector<128x128xf32>
    %169 = tpu.matmul %166, %168, %cst_118 {dimension_numbers = #tpu.dot_dimension_numbers<[1], [0], [0], [1], [0, 0, 1, 1], [], []>} : vector<128x128xbf16>, vector<128x128xbf16>, vector<128x128xf32> -> vector<128x128xf32>
    %170 = arith.addf %163, %169 : vector<128x128xf32>
    %171 = vector.extract_strided_slice %1 {offsets = [0, 4, 4, 0], sizes = [2, 8, 8, 128], strides = [1, 1, 1, 1]} : vector<2x12x12x128xf32> to vector<2x8x8x128xf32>
    %172 = vector.shape_cast %171 : vector<2x8x8x128xf32> to vector<128x128xf32>
    %173 = arith.truncf %172 : vector<128x128xf32> to vector<128x128xbf16>
    %c4_119 = arith.constant 4 : index
    %c4_120 = arith.constant 4 : index
    %c0_121 = arith.constant 0 : index
    %c0_122 = arith.constant 0 : index
    %174 = vector.load %arg2[%c4_119, %c4_120, %c0_121, %c0_122] : memref<5x5x128x128xbf16, #tpu.memory_space<vmem>>, vector<1x1x128x128xbf16>
    %175 = vector.shape_cast %174 : vector<1x1x128x128xbf16> to vector<128x128xbf16>
    %cst_123 = arith.constant dense<0.000000e+00> : vector<128x128xf32>
    %176 = tpu.matmul %173, %175, %cst_123 {dimension_numbers = #tpu.dot_dimension_numbers<[1], [0], [0], [1], [0, 0, 1, 1], [], []>} : vector<128x128xbf16>, vector<128x128xbf16>, vector<128x128xf32> -> vector<128x128xf32>
    %177 = arith.addf %170, %176 : vector<128x128xf32>
    %178 = arith.truncf %177 : vector<128x128xf32> to vector<128x128xbf16>
    %c0_124 = arith.constant 0 : index
    %c0_125 = arith.constant 0 : index
    %179 = vector.load %arg3[%c0_124, %c0_125] : memref<128x128xbf16, #tpu.memory_space<vmem>>, vector<128x128xbf16>
    tpu.vector_store %arg3[%c0_124, %c0_125], %178 {strides = array<i32>} : memref<128x128xbf16, #tpu.memory_space<vmem>>, vector<128x128xbf16>,
    %cst_126 = arith.constant dense<0.000000e+00> : vector<128xf32>
    %180 = vector.multi_reduction <add>, %177, %cst_126 [0] : vector<128x128xf32> to vector<128xf32>
    %181 = vector.shape_cast %180 : vector<128xf32> to vector<1x128xf32>
    %182 = arith.mulf %177, %177 : vector<128x128xf32>
    %cst_127 = arith.constant dense<0.000000e+00> : vector<128xf32>
    %183 = vector.multi_reduction <add>, %182, %cst_127 [0] : vector<128x128xf32> to vector<128xf32>
    %184 = vector.shape_cast %183 : vector<128xf32> to vector<1x128xf32>
    %185 = tpu.concatenate %181, %184 in 0 : vector<1x128xf32>, vector<1x128xf32> -> vector<2x128xf32>
    %186 = vector.shape_cast %185 : vector<2x128xf32> to vector<1x2x128xf32>
    %c0_128 = arith.constant 0 : index
    %c0_129 = arith.constant 0 : index
    %c0_130 = arith.constant 0 : index
    %187 = vector.load %arg4[%c0_128, %c0_129, %c0_130] : memref<1x2x128xf32, #tpu.memory_space<vmem>>, vector<1x2x128xf32>
    tpu.vector_store %arg4[%c0_128, %c0_129, %c0_130], %186 {strides = array<i32>} : memref<1x2x128xf32, #tpu.memory_space<vmem>>, vector<1x2x128xf32>,
    return
  }
  func.func @transform_0(%arg0: i32) -> (i32, i32, i32, i32) {
    %c0_i32 = arith.constant 0 : i32
    %c0_i32_0 = arith.constant 0 : i32
    %c0_i32_1 = arith.constant 0 : i32
    %c0_i32_2 = arith.constant 0 : i32
    return %arg0, %c0_i32, %c0_i32_0, %c0_i32_1 : i32, i32, i32, i32
  }
  func.func @transform_1(%arg0: i32) -> (i32, i32, i32, i32) {
    %c0_i32 = arith.constant 0 : i32
    %c0_i32_0 = arith.constant 0 : i32
    %c0_i32_1 = arith.constant 0 : i32
    %c0_i32_2 = arith.constant 0 : i32
    %c0_i32_3 = arith.constant 0 : i32
    return %c0_i32, %c0_i32_0, %c0_i32_1, %c0_i32_2 : i32, i32, i32, i32
  }
  func.func @transform_2(%arg0: i32) -> (i32, i32) {
    %c0_i32 = arith.constant 0 : i32
    %c0_i32_0 = arith.constant 0 : i32
    return %arg0, %c0_i32 : i32, i32
  }
  func.func @transform_3(%arg0: i32) -> (i32, i32, i32) {
    %c0_i32 = arith.constant 0 : i32
    %c0_i32_0 = arith.constant 0 : i32
    %c0_i32_1 = arith.constant 0 : i32
    return %arg0, %c0_i32, %c0_i32_0 : i32, i32, i32
  }
}

module attributes {stable_mosaic.version = 11 : i64} {
  func.func @_bn_relu_pool_kernel(%arg0: i32, %arg1: memref<16x4x256xbf16, #tpu.memory_space<vmem>>, %arg2: memref<2x128xf32, #tpu.memory_space<vmem>>, %arg3: memref<8x4x128xbf16, #tpu.memory_space<vmem>>) attributes {dimension_semantics = [#tpu.dimension_semantics<parallel>], iteration_bounds = array<i64: 1>, scalar_prefetch = 0 : i64, scratch_operands = 0 : i64, tpu.core_type = #tpu.core_type<tc>, window_params = [{transform_indices = @transform_0, window_bounds = array<i64: 16, 4, 256>}, {pipeline_mode = #tpu.pipeline_mode<synchronous>, transform_indices = @transform_1, window_bounds = array<i64: 2, 128>}, {transform_indices = @transform_2, window_bounds = array<i64: 8, 4, 128>}]} {
    %c0 = arith.constant 0 : index
    %c0_0 = arith.constant 0 : index
    %0 = vector.load %arg2[%c0, %c0_0] : memref<2x128xf32, #tpu.memory_space<vmem>>, vector<1x128xf32>
    %c1 = arith.constant 1 : index
    %c0_1 = arith.constant 0 : index
    %1 = vector.load %arg2[%c1, %c0_1] : memref<2x128xf32, #tpu.memory_space<vmem>>, vector<1x128xf32>
    %c0_2 = arith.constant 0 : index
    %c0_3 = arith.constant 0 : index
    %c0_4 = arith.constant 0 : index
    %2 = vector.load %arg1[%c0_2, %c0_3, %c0_4] : memref<16x4x256xbf16, #tpu.memory_space<vmem>>, vector<16x4x256xbf16>
    %3 = vector.extract_strided_slice %2 {offsets = [0, 0, 0], sizes = [16, 4, 128], strides = [1, 1, 1]} : vector<16x4x256xbf16> to vector<16x4x128xbf16>
    %4 = arith.extf %3 : vector<16x4x128xbf16> to vector<16x4x128xf32>
    %5 = vector.extract_strided_slice %2 {offsets = [0, 0, 128], sizes = [16, 4, 128], strides = [1, 1, 1]} : vector<16x4x256xbf16> to vector<16x4x128xbf16>
    %6 = arith.extf %5 : vector<16x4x128xbf16> to vector<16x4x128xf32>
    %7 = vector.shape_cast %0 : vector<1x128xf32> to vector<1x1x128xf32>
    %8 = vector.broadcast %7 : vector<1x1x128xf32> to vector<16x4x128xf32>
    %9 = arith.mulf %4, %8 : vector<16x4x128xf32>
    %10 = vector.shape_cast %1 : vector<1x128xf32> to vector<1x1x128xf32>
    %11 = vector.broadcast %10 : vector<1x1x128xf32> to vector<16x4x128xf32>
    %12 = arith.addf %9, %11 : vector<16x4x128xf32>
    %cst = arith.constant 0.000000e+00 : f32
    %13 = vector.broadcast %cst : f32 to vector<16x4x128xf32>
    %14 = arith.maximumf %12, %13 : vector<16x4x128xf32>
    %15 = vector.shape_cast %0 : vector<1x128xf32> to vector<1x1x128xf32>
    %16 = vector.broadcast %15 : vector<1x1x128xf32> to vector<16x4x128xf32>
    %17 = arith.mulf %6, %16 : vector<16x4x128xf32>
    %18 = vector.shape_cast %1 : vector<1x128xf32> to vector<1x1x128xf32>
    %19 = vector.broadcast %18 : vector<1x1x128xf32> to vector<16x4x128xf32>
    %20 = arith.addf %17, %19 : vector<16x4x128xf32>
    %cst_5 = arith.constant 0.000000e+00 : f32
    %21 = vector.broadcast %cst_5 : f32 to vector<16x4x128xf32>
    %22 = arith.maximumf %20, %21 : vector<16x4x128xf32>
    %23 = arith.maximumf %14, %22 : vector<16x4x128xf32>
    %24 = vector.shape_cast %23 : vector<16x4x128xf32> to vector<8x2x4x128xf32>
    %cst_6 = arith.constant dense<0xFF800000> : vector<8x4x128xf32>
    %25 = vector.multi_reduction <maximumf>, %24, %cst_6 [1] : vector<8x2x4x128xf32> to vector<8x4x128xf32>
    %26 = arith.truncf %25 : vector<8x4x128xf32> to vector<8x4x128xbf16>
    %c0_7 = arith.constant 0 : index
    %c0_8 = arith.constant 0 : index
    %c0_9 = arith.constant 0 : index
    %27 = vector.load %arg3[%c0_7, %c0_8, %c0_9] : memref<8x4x128xbf16, #tpu.memory_space<vmem>>, vector<8x4x128xbf16>
    tpu.vector_store %arg3[%c0_7, %c0_8, %c0_9], %26 {strides = array<i32>} : memref<8x4x128xbf16, #tpu.memory_space<vmem>>, vector<8x4x128xbf16>,
    return
  }
  func.func @transform_0(%arg0: i32) -> (i32, i32, i32) {
    %c0_i32 = arith.constant 0 : i32
    %c0_i32_0 = arith.constant 0 : i32
    %c0_i32_1 = arith.constant 0 : i32
    return %arg0, %c0_i32, %c0_i32_0 : i32, i32, i32
  }
  func.func @transform_1(%arg0: i32) -> (i32, i32) {
    %c0_i32 = arith.constant 0 : i32
    %c0_i32_0 = arith.constant 0 : i32
    %c0_i32_1 = arith.constant 0 : i32
    return %c0_i32, %c0_i32_0 : i32, i32
  }
  func.func @transform_2(%arg0: i32) -> (i32, i32, i32) {
    %c0_i32 = arith.constant 0 : i32
    %c0_i32_0 = arith.constant 0 : i32
    %c0_i32_1 = arith.constant 0 : i32
    return %arg0, %c0_i32, %c0_i32_0 : i32, i32, i32
  }
}

module attributes {stable_mosaic.version = 11 : i64} {
  func.func @_tail_kernel(%arg0: i32, %arg1: memref<2x4x540xbf16, #tpu.memory_space<vmem>>, %arg2: memref<540x128xbf16, #tpu.memory_space<vmem>>, %arg3: memref<1x128xf32, #tpu.memory_space<vmem>>, %arg4: memref<4x128x256xbf16, #tpu.memory_space<vmem>>, %arg5: memref<1x256xf32, #tpu.memory_space<vmem>>, %arg6: memref<256x128xbf16, #tpu.memory_space<vmem>>, %arg7: memref<1x128xf32, #tpu.memory_space<vmem>>, %arg8: memref<2x128xf32, #tpu.memory_space<vmem>>) attributes {dimension_semantics = [#tpu.dimension_semantics<parallel>], iteration_bounds = array<i64: 1>, scalar_prefetch = 0 : i64, scratch_operands = 0 : i64, tpu.core_type = #tpu.core_type<tc>, window_params = [{transform_indices = @transform_0, window_bounds = array<i64: 2, 4, 540>}, {pipeline_mode = #tpu.pipeline_mode<synchronous>, transform_indices = @transform_1, window_bounds = array<i64: 540, 128>}, {pipeline_mode = #tpu.pipeline_mode<synchronous>, transform_indices = @transform_2, window_bounds = array<i64: 1, 128>}, {pipeline_mode = #tpu.pipeline_mode<synchronous>, transform_indices = @transform_3, window_bounds = array<i64: 4, 128, 256>}, {pipeline_mode = #tpu.pipeline_mode<synchronous>, transform_indices = @transform_4, window_bounds = array<i64: 1, 256>}, {pipeline_mode = #tpu.pipeline_mode<synchronous>, transform_indices = @transform_5, window_bounds = array<i64: 256, 128>}, {pipeline_mode = #tpu.pipeline_mode<synchronous>, transform_indices = @transform_6, window_bounds = array<i64: 1, 128>}, {transform_indices = @transform_7, window_bounds = array<i64: 2, 128>}]} {
    %c0 = arith.constant 0 : index
    %c0_0 = arith.constant 0 : index
    %c0_1 = arith.constant 0 : index
    %0 = vector.load %arg1[%c0, %c0_0, %c0_1] : memref<2x4x540xbf16, #tpu.memory_space<vmem>>, vector<2x4x540xbf16>
    %cst = arith.constant 0.000000e+00 : f32
    %1 = vector.broadcast %cst : f32 to vector<2x256xf32>
    %2 = vector.extract_strided_slice %0 {offsets = [0, 0, 0], sizes = [2, 1, 540], strides = [1, 1, 1]} : vector<2x4x540xbf16> to vector<2x1x540xbf16>
    %3 = vector.shape_cast %2 : vector<2x1x540xbf16> to vector<2x540xbf16>
    %c0_2 = arith.constant 0 : index
    %c0_3 = arith.constant 0 : index
    %4 = vector.load %arg2[%c0_2, %c0_3] : memref<540x128xbf16, #tpu.memory_space<vmem>>, vector<540x128xbf16>
    %cst_4 = arith.constant dense<0.000000e+00> : vector<2x128xf32>
    %5 = tpu.matmul %3, %4, %cst_4 {dimension_numbers = #tpu.dot_dimension_numbers<[1], [0], [0], [1], [0, 0, 1, 1], [], []>} : vector<2x540xbf16>, vector<540x128xbf16>, vector<2x128xf32> -> vector<2x128xf32>
    %c0_5 = arith.constant 0 : index
    %c0_6 = arith.constant 0 : index
    %6 = vector.load %arg3[%c0_5, %c0_6] : memref<1x128xf32, #tpu.memory_space<vmem>>, vector<1x128xf32>
    %7 = vector.broadcast %6 : vector<1x128xf32> to vector<2x128xf32>
    %8 = arith.addf %5, %7 : vector<2x128xf32>
    %cst_7 = arith.constant 0.000000e+00 : f32
    %9 = vector.broadcast %cst_7 : f32 to vector<2x128xf32>
    %10 = arith.maximumf %8, %9 : vector<2x128xf32>
    %11 = arith.truncf %10 : vector<2x128xf32> to vector<2x128xbf16>
    %c0_8 = arith.constant 0 : index
    %c0_9 = arith.constant 0 : index
    %c0_10 = arith.constant 0 : index
    %12 = vector.load %arg4[%c0_8, %c0_9, %c0_10] : memref<4x128x256xbf16, #tpu.memory_space<vmem>>, vector<1x128x256xbf16>
    %13 = vector.shape_cast %12 : vector<1x128x256xbf16> to vector<128x256xbf16>
    %cst_11 = arith.constant dense<0.000000e+00> : vector<2x256xf32>
    %14 = tpu.matmul %11, %13, %cst_11 {dimension_numbers = #tpu.dot_dimension_numbers<[1], [0], [0], [1], [0, 0, 1, 1], [], []>} : vector<2x128xbf16>, vector<128x256xbf16>, vector<2x256xf32> -> vector<2x256xf32>
    %15 = arith.addf %1, %14 : vector<2x256xf32>
    %16 = vector.extract_strided_slice %0 {offsets = [0, 1, 0], sizes = [2, 1, 540], strides = [1, 1, 1]} : vector<2x4x540xbf16> to vector<2x1x540xbf16>
    %17 = vector.shape_cast %16 : vector<2x1x540xbf16> to vector<2x540xbf16>
    %c0_12 = arith.constant 0 : index
    %c0_13 = arith.constant 0 : index
    %18 = vector.load %arg2[%c0_12, %c0_13] : memref<540x128xbf16, #tpu.memory_space<vmem>>, vector<540x128xbf16>
    %cst_14 = arith.constant dense<0.000000e+00> : vector<2x128xf32>
    %19 = tpu.matmul %17, %18, %cst_14 {dimension_numbers = #tpu.dot_dimension_numbers<[1], [0], [0], [1], [0, 0, 1, 1], [], []>} : vector<2x540xbf16>, vector<540x128xbf16>, vector<2x128xf32> -> vector<2x128xf32>
    %c0_15 = arith.constant 0 : index
    %c0_16 = arith.constant 0 : index
    %20 = vector.load %arg3[%c0_15, %c0_16] : memref<1x128xf32, #tpu.memory_space<vmem>>, vector<1x128xf32>
    %21 = vector.broadcast %20 : vector<1x128xf32> to vector<2x128xf32>
    %22 = arith.addf %19, %21 : vector<2x128xf32>
    %cst_17 = arith.constant 0.000000e+00 : f32
    %23 = vector.broadcast %cst_17 : f32 to vector<2x128xf32>
    %24 = arith.maximumf %22, %23 : vector<2x128xf32>
    %25 = arith.truncf %24 : vector<2x128xf32> to vector<2x128xbf16>
    %c1 = arith.constant 1 : index
    %c0_18 = arith.constant 0 : index
    %c0_19 = arith.constant 0 : index
    %26 = vector.load %arg4[%c1, %c0_18, %c0_19] : memref<4x128x256xbf16, #tpu.memory_space<vmem>>, vector<1x128x256xbf16>
    %27 = vector.shape_cast %26 : vector<1x128x256xbf16> to vector<128x256xbf16>
    %cst_20 = arith.constant dense<0.000000e+00> : vector<2x256xf32>
    %28 = tpu.matmul %25, %27, %cst_20 {dimension_numbers = #tpu.dot_dimension_numbers<[1], [0], [0], [1], [0, 0, 1, 1], [], []>} : vector<2x128xbf16>, vector<128x256xbf16>, vector<2x256xf32> -> vector<2x256xf32>
    %29 = arith.addf %15, %28 : vector<2x256xf32>
    %30 = vector.extract_strided_slice %0 {offsets = [0, 2, 0], sizes = [2, 1, 540], strides = [1, 1, 1]} : vector<2x4x540xbf16> to vector<2x1x540xbf16>
    %31 = vector.shape_cast %30 : vector<2x1x540xbf16> to vector<2x540xbf16>
    %c0_21 = arith.constant 0 : index
    %c0_22 = arith.constant 0 : index
    %32 = vector.load %arg2[%c0_21, %c0_22] : memref<540x128xbf16, #tpu.memory_space<vmem>>, vector<540x128xbf16>
    %cst_23 = arith.constant dense<0.000000e+00> : vector<2x128xf32>
    %33 = tpu.matmul %31, %32, %cst_23 {dimension_numbers = #tpu.dot_dimension_numbers<[1], [0], [0], [1], [0, 0, 1, 1], [], []>} : vector<2x540xbf16>, vector<540x128xbf16>, vector<2x128xf32> -> vector<2x128xf32>
    %c0_24 = arith.constant 0 : index
    %c0_25 = arith.constant 0 : index
    %34 = vector.load %arg3[%c0_24, %c0_25] : memref<1x128xf32, #tpu.memory_space<vmem>>, vector<1x128xf32>
    %35 = vector.broadcast %34 : vector<1x128xf32> to vector<2x128xf32>
    %36 = arith.addf %33, %35 : vector<2x128xf32>
    %cst_26 = arith.constant 0.000000e+00 : f32
    %37 = vector.broadcast %cst_26 : f32 to vector<2x128xf32>
    %38 = arith.maximumf %36, %37 : vector<2x128xf32>
    %39 = arith.truncf %38 : vector<2x128xf32> to vector<2x128xbf16>
    %c2 = arith.constant 2 : index
    %c0_27 = arith.constant 0 : index
    %c0_28 = arith.constant 0 : index
    %40 = vector.load %arg4[%c2, %c0_27, %c0_28] : memref<4x128x256xbf16, #tpu.memory_space<vmem>>, vector<1x128x256xbf16>
    %41 = vector.shape_cast %40 : vector<1x128x256xbf16> to vector<128x256xbf16>
    %cst_29 = arith.constant dense<0.000000e+00> : vector<2x256xf32>
    %42 = tpu.matmul %39, %41, %cst_29 {dimension_numbers = #tpu.dot_dimension_numbers<[1], [0], [0], [1], [0, 0, 1, 1], [], []>} : vector<2x128xbf16>, vector<128x256xbf16>, vector<2x256xf32> -> vector<2x256xf32>
    %43 = arith.addf %29, %42 : vector<2x256xf32>
    %44 = vector.extract_strided_slice %0 {offsets = [0, 3, 0], sizes = [2, 1, 540], strides = [1, 1, 1]} : vector<2x4x540xbf16> to vector<2x1x540xbf16>
    %45 = vector.shape_cast %44 : vector<2x1x540xbf16> to vector<2x540xbf16>
    %c0_30 = arith.constant 0 : index
    %c0_31 = arith.constant 0 : index
    %46 = vector.load %arg2[%c0_30, %c0_31] : memref<540x128xbf16, #tpu.memory_space<vmem>>, vector<540x128xbf16>
    %cst_32 = arith.constant dense<0.000000e+00> : vector<2x128xf32>
    %47 = tpu.matmul %45, %46, %cst_32 {dimension_numbers = #tpu.dot_dimension_numbers<[1], [0], [0], [1], [0, 0, 1, 1], [], []>} : vector<2x540xbf16>, vector<540x128xbf16>, vector<2x128xf32> -> vector<2x128xf32>
    %c0_33 = arith.constant 0 : index
    %c0_34 = arith.constant 0 : index
    %48 = vector.load %arg3[%c0_33, %c0_34] : memref<1x128xf32, #tpu.memory_space<vmem>>, vector<1x128xf32>
    %49 = vector.broadcast %48 : vector<1x128xf32> to vector<2x128xf32>
    %50 = arith.addf %47, %49 : vector<2x128xf32>
    %cst_35 = arith.constant 0.000000e+00 : f32
    %51 = vector.broadcast %cst_35 : f32 to vector<2x128xf32>
    %52 = arith.maximumf %50, %51 : vector<2x128xf32>
    %53 = arith.truncf %52 : vector<2x128xf32> to vector<2x128xbf16>
    %c3 = arith.constant 3 : index
    %c0_36 = arith.constant 0 : index
    %c0_37 = arith.constant 0 : index
    %54 = vector.load %arg4[%c3, %c0_36, %c0_37] : memref<4x128x256xbf16, #tpu.memory_space<vmem>>, vector<1x128x256xbf16>
    %55 = vector.shape_cast %54 : vector<1x128x256xbf16> to vector<128x256xbf16>
    %cst_38 = arith.constant dense<0.000000e+00> : vector<2x256xf32>
    %56 = tpu.matmul %53, %55, %cst_38 {dimension_numbers = #tpu.dot_dimension_numbers<[1], [0], [0], [1], [0, 0, 1, 1], [], []>} : vector<2x128xbf16>, vector<128x256xbf16>, vector<2x256xf32> -> vector<2x256xf32>
    %57 = arith.addf %43, %56 : vector<2x256xf32>
    %c0_39 = arith.constant 0 : index
    %c0_40 = arith.constant 0 : index
    %58 = vector.load %arg5[%c0_39, %c0_40] : memref<1x256xf32, #tpu.memory_space<vmem>>, vector<1x256xf32>
    %59 = vector.broadcast %58 : vector<1x256xf32> to vector<2x256xf32>
    %60 = arith.addf %57, %59 : vector<2x256xf32>
    %cst_41 = arith.constant 0.000000e+00 : f32
    %61 = vector.broadcast %cst_41 : f32 to vector<2x256xf32>
    %62 = arith.maximumf %60, %61 : vector<2x256xf32>
    %63 = arith.truncf %62 : vector<2x256xf32> to vector<2x256xbf16>
    %c0_42 = arith.constant 0 : index
    %c0_43 = arith.constant 0 : index
    %64 = vector.load %arg6[%c0_42, %c0_43] : memref<256x128xbf16, #tpu.memory_space<vmem>>, vector<256x128xbf16>
    %cst_44 = arith.constant dense<0.000000e+00> : vector<2x128xf32>
    %65 = tpu.matmul %63, %64, %cst_44 {dimension_numbers = #tpu.dot_dimension_numbers<[1], [0], [0], [1], [0, 0, 1, 1], [], []>} : vector<2x256xbf16>, vector<256x128xbf16>, vector<2x128xf32> -> vector<2x128xf32>
    %c0_45 = arith.constant 0 : index
    %c0_46 = arith.constant 0 : index
    %66 = vector.load %arg7[%c0_45, %c0_46] : memref<1x128xf32, #tpu.memory_space<vmem>>, vector<1x128xf32>
    %67 = vector.broadcast %66 : vector<1x128xf32> to vector<2x128xf32>
    %68 = arith.addf %65, %67 : vector<2x128xf32>
    %cst_47 = arith.constant dense<0xFF800000> : vector<2xf32>
    %69 = vector.multi_reduction <maximumf>, %68, %cst_47 [1] : vector<2x128xf32> to vector<2xf32>
    %70 = vector.shape_cast %69 : vector<2xf32> to vector<2x1xf32>
    %71 = vector.broadcast %70 : vector<2x1xf32> to vector<2x128xf32>
    %72 = arith.subf %68, %71 : vector<2x128xf32>
    %73 = math.exp %72 : vector<2x128xf32>
    %cst_48 = arith.constant dense<0.000000e+00> : vector<2xf32>
    %74 = vector.multi_reduction <add>, %73, %cst_48 [1] : vector<2x128xf32> to vector<2xf32>
    %75 = vector.shape_cast %74 : vector<2xf32> to vector<2x1xf32>
    %76 = math.log %75 : vector<2x1xf32>
    %77 = vector.broadcast %76 : vector<2x1xf32> to vector<2x128xf32>
    %78 = arith.subf %72, %77 : vector<2x128xf32>
    %c0_49 = arith.constant 0 : index
    %c0_50 = arith.constant 0 : index
    %79 = vector.load %arg8[%c0_49, %c0_50] : memref<2x128xf32, #tpu.memory_space<vmem>>, vector<2x128xf32>
    tpu.vector_store %arg8[%c0_49, %c0_50], %78 {strides = array<i32>} : memref<2x128xf32, #tpu.memory_space<vmem>>, vector<2x128xf32>,
    return
  }
  func.func @transform_0(%arg0: i32) -> (i32, i32, i32) {
    %c0_i32 = arith.constant 0 : i32
    %c0_i32_0 = arith.constant 0 : i32
    %c0_i32_1 = arith.constant 0 : i32
    return %arg0, %c0_i32, %c0_i32_0 : i32, i32, i32
  }
  func.func @transform_1(%arg0: i32) -> (i32, i32) {
    %c0_i32 = arith.constant 0 : i32
    %c0_i32_0 = arith.constant 0 : i32
    %c0_i32_1 = arith.constant 0 : i32
    return %c0_i32, %c0_i32_0 : i32, i32
  }
  func.func @transform_2(%arg0: i32) -> (i32, i32) {
    %c0_i32 = arith.constant 0 : i32
    %c0_i32_0 = arith.constant 0 : i32
    %c0_i32_1 = arith.constant 0 : i32
    return %c0_i32, %c0_i32_0 : i32, i32
  }
  func.func @transform_3(%arg0: i32) -> (i32, i32, i32) {
    %c0_i32 = arith.constant 0 : i32
    %c0_i32_0 = arith.constant 0 : i32
    %c0_i32_1 = arith.constant 0 : i32
    %c0_i32_2 = arith.constant 0 : i32
    return %c0_i32, %c0_i32_0, %c0_i32_1 : i32, i32, i32
  }
  func.func @transform_4(%arg0: i32) -> (i32, i32) {
    %c0_i32 = arith.constant 0 : i32
    %c0_i32_0 = arith.constant 0 : i32
    %c0_i32_1 = arith.constant 0 : i32
    return %c0_i32, %c0_i32_0 : i32, i32
  }
  func.func @transform_5(%arg0: i32) -> (i32, i32) {
    %c0_i32 = arith.constant 0 : i32
    %c0_i32_0 = arith.constant 0 : i32
    %c0_i32_1 = arith.constant 0 : i32
    return %c0_i32, %c0_i32_0 : i32, i32
  }
  func.func @transform_6(%arg0: i32) -> (i32, i32) {
    %c0_i32 = arith.constant 0 : i32
    %c0_i32_0 = arith.constant 0 : i32
    %c0_i32_1 = arith.constant 0 : i32
    return %c0_i32, %c0_i32_0 : i32, i32
  }
  func.func @transform_7(%arg0: i32) -> (i32, i32) {
    %c0_i32 = arith.constant 0 : i32
    %c0_i32_0 = arith.constant 0 : i32
    return %arg0, %c0_i32 : i32, i32
  }
}

</mosaic_0001>

<bundles_post_ra>
// kernel: convnet_forward.6
= control target key start
LH: loop header
LB: loop body
LE: loop exit
PB: predicated region body
PF: predicated region fallthrough
CT: control target
= control target key end

     0   :  { %vm1270_vm0 = vcmask 1043456   ;;  %s2621_s0 = inlined_call_operand.vmem [shape: bf16[48,12,256], index: 0, kind: input, shape index: {}]   ;;  %s2622_s1 = inlined_call_operand.vmem [shape: f32[2,128], index: 1, kind: input, shape index: {}]   ;;  %s2623_s2 = inlined_call_operand.vmem [shape: bf16[24,12,128], index: 2, kind: output, shape index: {}]  }
   0x1   :  { %v1730_v0 = vld [vmem:[%s2622_s1] ss:$0 sm:$0xff]  ;;  %v15_v2 = vld [vmem:[%s2621_s0 + $0x10] sm:$0xff]  ;;  %v14_v5 = vld [vmem:[%s2621_s0 + $0x8] sm:$0x33] }
   0x2   :  { %v13_v1 = vld [vmem:[%s2621_s0] sm:$0xff]  ;;  %v16_v6 = vld [vmem:[%s2621_s0 + $0x18] sm:$0x33]  ;;  %v111_v8 = vunpack.c.l.bf16 %v15_v2  ;;  %v303_v9 = vrot.slane %v15_v2, 4  ;;  %v110_v10 = vunpack.c.l.bf16 %v14_v5  ;;  %v302_v14 = vrot.slane %v14_v5, 4  ;;  %v19_v33 = vld [vmem:[%s2621_s0 + $0x30] sm:$0xff] }
   0x3   :  { %v109_v3 = vunpack.c.l.bf16 %v13_v1  ;;  %v301_v4 = vrot.slane %v13_v1, 4  ;;  %v1747_v7 = vld [vmem:[%s2622_s1 + $0x1] ss:$0 sm:$0xff]  ;;  %v112_v11 = vunpack.c.l.bf16 %v16_v6  ;;  %v304_v15 = vrot.slane %v16_v6, 4  ;;  %v18_v54 = vld [vmem:[%s2621_s0 + $0x28] sm:$0x33] }
   0x4   :  { %v495_v16 = vunpack.c.l.bf16 %v303_v9  ;;  %v595_v17 = vmul.f32 %v1730_v0, %v111_v8  ;;  %v594_v18 = vmul.f32 %v1730_v0, %v110_v10  ;;  %v494_v22 = vunpack.c.l.bf16 %v302_v14  ;;  %v17_v32 = vld [vmem:[%s2621_s0 + $0x20] sm:$0xff]  ;;  %v20_v63 = vld [vmem:[%s2621_s0 + $0x38] sm:$0x33] }
   0x5   :  { %v493_v12 = vunpack.c.l.bf16 %v301_v4  ;;  %v593_v13 = vmul.f32 %v1730_v0, %v109_v3  ;;  %v596_v19 = vmul.f32 %v1730_v0, %v112_v11  ;;  %v496_v23 = vunpack.c.l.bf16 %v304_v15  ;;  %v21_v14 = vld [vmem:[%s2621_s0 + $0x40] sm:$0xff] }
   0x6   :  { %v695_v24 = vadd.f32 %v1747_v7, %v595_v17  ;;  %v887_v25 = vmul.f32 %v1730_v0, %v495_v16  ;;  %v694_v26 = vadd.f32 %v1747_v7, %v594_v18  ;;  %v886_v30 = vmul.f32 %v1730_v0, %v494_v22 }
   0x7   :  { %v693_v20 = vadd.f32 %v1747_v7, %v593_v13  ;;  %v885_v21 = vmul.f32 %v1730_v0, %v493_v12  ;;  %v696_v27 = vadd.f32 %v1747_v7, %v596_v19  ;;  %v888_v31 = vmul.f32 %v1730_v0, %v496_v23  ;;  %v23_v23 = vld [vmem:[%s2621_s0 + $0x50] sm:$0xff] }
   0x8   :  { %v791_v34 = vmax.f32 %v695_v24, 0.0  ;;  %v983_v35 = vadd.f32 %v1747_v7, %v887_v25  ;;  %v790_v36 = vmax.f32 %v694_v26, 0.0  ;;  %v982_v39 = vadd.f32 %v1747_v7, %v886_v30 }
   0x9   :  { %v789_v28 = vmax.f32 %v693_v20, 0.0  ;;  %v981_v29 = vadd.f32 %v1747_v7, %v885_v21  ;;  %v792_v37 = vmax.f32 %v696_v27, 0.0  ;;  %v984_v40 = vadd.f32 %v1747_v7, %v888_v31 }
   0xa   :  { %v113_v41 = vunpack.c.l.bf16 %v17_v32  ;;  %v1079_v42 = vmax.f32 %v983_v35, 0.0  ;;  %v115_v43 = vunpack.c.l.bf16 %v19_v33  ;;  %v305_v44 = vrot.slane %v17_v32, 4 }
   0xb   :  { %v1077_v38 = vmax.f32 %v981_v29, 0.0  ;;  %v307_v45 = vrot.slane %v19_v33, 4  ;;  %v1078_v47 = vmax.f32 %v982_v39, 0.0  ;;  %v1080_v48 = vmax.f32 %v984_v40, 0.0  ;;  %v22_v40 = vld [vmem:[%s2621_s0 + $0x48] sm:$0x33] }
   0xc   :  { %v597_v49 = vmul.f32 %v1730_v0, %v113_v41  ;;  %v1175_v50 = vmax.f32 %v791_v34, %v1079_v42  ;;  %v497_v51 = vunpack.c.l.bf16 %v305_v44  ;;  %v599_v53 = vmul.f32 %v1730_v0, %v115_v43 }
   0xd   :  { %v1173_v46 = vmax.f32 %v789_v28, %v1077_v38  ;;  %v499_v52 = vunpack.c.l.bf16 %v307_v45  ;;  %v1174_v55 = vmax.f32 %v790_v36, %v1078_v47  ;;  %v1176_v56 = vmax.f32 %v792_v37, %v1080_v48 }
   0xe   :  { %v697_v57 = vadd.f32 %v1747_v7, %v597_v49  ;;  %v114_v58 = vunpack.c.l.bf16 %v18_v54  ;;  %v699_v60 = vadd.f32 %v1747_v7, %v599_v53  ;;  %v889_v61 = vmul.f32 %v1730_v0, %v497_v51  ;;  %v24_v49 = vld [vmem:[%s2621_s0 + $0x58] sm:$0x33] }
   0xf   :  { %v1269_v59 = vmax.f32 %v1173_v46, %v1175_v50  ;;  %v891_v62 = vmul.f32 %v1730_v0, %v499_v52  ;;  %v1271_v1 = vsel %vm1270_vm0, %v1174_v55, -inf  ;;  %v1272_v2 = vsel %vm1270_vm0, %v1176_v56, -inf }
  0x10   :  { %v793_v3 = vmax.f32 %v697_v57, 0.0  ;;  %v116_v4 = vunpack.c.l.bf16 %v20_v63  ;;  %v1273_v6 = vmax.f32 %v1271_v1, %v1272_v2  ;;  %v795_v8 = vmax.f32 %v699_v60, 0.0 }
  0x11   :  { %v1660_v5 = vpack.c.bf16 %v1269_v59, %v1269_v59  ;;  %v985_v9 = vadd.f32 %v1747_v7, %v889_v61  ;;  %v987_v10 = vadd.f32 %v1747_v7, %v891_v62  ;;  %v306_v11 = vrot.slane %v18_v54, 4 }
  0x12   :  { %v308_v12 = vrot.slane %v20_v63, 4  ;;  %v598_v13 = vmul.f32 %v1730_v0, %v114_v58  ;;  %v1661_v15 = vpack.c.bf16 %v1273_v6, %v1273_v6  ;;  %v600_v17 = vmul.f32 %v1730_v0, %v116_v4 }
  0x13   :  { %1558 = vst [vmem:[%s2623_s2] sm:$0xf] %v1660_v5  ;;  %v1081_v16 = vmax.f32 %v985_v9, 0.0  ;;  %v117_v18 = vunpack.c.l.bf16 %v21_v14  ;;  %v1083_v19 = vmax.f32 %v987_v10, 0.0  ;;  %v498_v20 = vunpack.c.l.bf16 %v306_v11 }
  0x14   :  { %v500_v21 = vunpack.c.l.bf16 %v308_v12  ;;  %v698_v22 = vadd.f32 %v1747_v7, %v598_v13  ;;  %1559 = vst [vmem:[%s2623_s2 + $0x4] sm:$0x3] %v1661_v15  ;;  %v700_v25 = vadd.f32 %v1747_v7, %v600_v17  ;;  %v119_v26 = vunpack.c.l.bf16 %v23_v23  ;;  %v27_v12 = vld [vmem:[%s2621_s0 + $0x70] sm:$0xff] }
  0x15   :  { %v1177_v24 = vmax.f32 %v793_v3, %v1081_v16  ;;  %v309_v27 = vrot.slane %v21_v14, 4  ;;  %v1179_v28 = vmax.f32 %v795_v8, %v1083_v19  ;;  %v890_v30 = vmul.f32 %v1730_v0, %v498_v20  ;;  %v25_v8 = vld [vmem:[%s2621_s0 + $0x60] sm:$0xff] }
  0x16   :  { %v794_v29 = vmax.f32 %v698_v22, 0.0  ;;  %v892_v31 = vmul.f32 %v1730_v0, %v500_v21  ;;  %v796_v32 = vmax.f32 %v700_v25, 0.0  ;;  %v311_v33 = vrot.slane %v23_v23, 4 }
  0x17   :  { %v501_v34 = vunpack.c.l.bf16 %v309_v27  ;;  %v601_v35 = vmul.f32 %v1730_v0, %v117_v18  ;;  %v1274_v36 = vmax.f32 %v1177_v24, %v1179_v28  ;;  %v986_v37 = vadd.f32 %v1747_v7, %v890_v30 }
  0x18   :  { %v988_v38 = vadd.f32 %v1747_v7, %v892_v31  ;;  %v603_v39 = vmul.f32 %v1730_v0, %v119_v26  ;;  %v503_v41 = vunpack.c.l.bf16 %v311_v33  ;;  %v118_v44 = vunpack.c.l.bf16 %v22_v40  ;;  %v26_v26 = vld [vmem:[%s2621_s0 + $0x68] sm:$0x33] }
  0x19   :  { %v701_v42 = vadd.f32 %v1747_v7, %v601_v35  ;;  %v893_v43 = vmul.f32 %v1730_v0, %v501_v34  ;;  %v1662_v45 = vpack.c.bf16 %v1274_v36, %v1274_v36  ;;  %v1082_v46 = vmax.f32 %v986_v37, 0.0  ;;  %v28_v35 = vld [vmem:[%s2621_s0 + $0x78] sm:$0x33] }
  0x1a   :  { %v1084_v47 = vmax.f32 %v988_v38, 0.0  ;;  %v703_v48 = vadd.f32 %v1747_v7, %v603_v39  ;;  %v895_v51 = vmul.f32 %v1730_v0, %v503_v41  ;;  %v120_v53 = vunpack.c.l.bf16 %v24_v49 }
  0x1b   :  { %v797_v50 = vmax.f32 %v701_v42, 0.0  ;;  %v989_v52 = vadd.f32 %v1747_v7, %v893_v43  ;;  %1560 = vst [vmem:[%s2623_s2 + $0x8] sm:$0xf] %v1662_v45  ;;  %v1178_v54 = vmax.f32 %v794_v29, %v1082_v46  ;;  %v310_v57 = vrot.slane %v22_v40, 4 }
  0x1c   :  { %v1180_v55 = vmax.f32 %v796_v32, %v1084_v47  ;;  %v799_v56 = vmax.f32 %v703_v48, 0.0  ;;  %v991_v58 = vadd.f32 %v1747_v7, %v895_v51  ;;  %v312_v60 = vrot.slane %v24_v49, 4 }
  0x1d   :  { %v1085_v59 = vmax.f32 %v989_v52, 0.0  ;;  %v602_v61 = vmul.f32 %v1730_v0, %v118_v44  ;;  %v1275_v62 = vsel %vm1270_vm0, %v1178_v54, -inf  ;;  %v502_v1 = vunpack.c.l.bf16 %v310_v57 }
  0x1e   :  { %v1276_v63 = vsel %vm1270_vm0, %v1180_v55, -inf  ;;  %v604_v2 = vmul.f32 %v1730_v0, %v120_v53  ;;  %v1087_v4 = vmax.f32 %v991_v58, 0.0  ;;  %v504_v6 = vunpack.c.l.bf16 %v312_v60  ;;  %v31_v60 = vld [vmem:[%s2621_s0 + $0x90] sm:$0xff] }
  0x1f   :  { %v1277_v3 = vmax.f32 %v1275_v62, %v1276_v63  ;;  %v1181_v5 = vmax.f32 %v797_v50, %v1085_v59  ;;  %v702_v9 = vadd.f32 %v1747_v7, %v602_v61  ;;  %v894_v11 = vmul.f32 %v1730_v0, %v502_v1 }
  0x20   :  { %v704_v10 = vadd.f32 %v1747_v7, %v604_v2  ;;  %v121_v13 = vunpack.c.l.bf16 %v25_v8  ;;  %v1183_v15 = vmax.f32 %v799_v56, %v1087_v4  ;;  %v896_v16 = vmul.f32 %v1730_v0, %v504_v6  ;;  %v29_v56 = vld [vmem:[%s2621_s0 + $0x80] sm:$0xff] }
  0x21   :  { %v1663_v14 = vpack.c.bf16 %v1277_v3, %v1277_v3  ;;  %v123_v17 = vunpack.c.l.bf16 %v27_v12  ;;  %v798_v18 = vmax.f32 %v702_v9, 0.0  ;;  %v990_v20 = vadd.f32 %v1747_v7, %v894_v11 }
  0x22   :  { %v800_v19 = vmax.f32 %v704_v10, 0.0  ;;  %v313_v21 = vrot.slane %v25_v8, 4  ;;  %v1278_v22 = vmax.f32 %v1181_v5, %v1183_v15  ;;  %v992_v23 = vadd.f32 %v1747_v7, %v896_v16  ;;  %v30_v16 = vld [vmem:[%s2621_s0 + $0x88] sm:$0x33] }
  0x23   :  { %1561 = vst [vmem:[%s2623_s2 + $0xc] sm:$0x3] %v1663_v14  ;;  %v315_v24 = vrot.slane %v27_v12, 4  ;;  %v605_v25 = vmul.f32 %v1730_v0, %v121_v13  ;;  %v1086_v27 = vmax.f32 %v990_v20, 0.0  ;;  %v607_v29 = vmul.f32 %v1730_v0, %v123_v17 }
  0x24   :  { %v505_v28 = vunpack.c.l.bf16 %v313_v21  ;;  %v122_v30 = vunpack.c.l.bf16 %v26_v26  ;;  %v1664_v31 = vpack.c.bf16 %v1278_v22, %v1278_v22  ;;  %v1088_v32 = vmax.f32 %v992_v23, 0.0 }
  0x25   :  { %v507_v33 = vunpack.c.l.bf16 %v315_v24  ;;  %v705_v34 = vadd.f32 %v1747_v7, %v605_v25  ;;  %v1182_v36 = vmax.f32 %v798_v18, %v1086_v27  ;;  %v707_v37 = vadd.f32 %v1747_v7, %v607_v29  ;;  %v32_v25 = vld [vmem:[%s2621_s0 + $0x98] sm:$0x33] }
  0x26   :  { %v897_v38 = vmul.f32 %v1730_v0, %v505_v28  ;;  %v124_v39 = vunpack.c.l.bf16 %v28_v35  ;;  %1562 = vst [vmem:[%s2623_s2 + $0x10] sm:$0xf] %v1664_v31  ;;  %v1184_v40 = vmax.f32 %v800_v19, %v1088_v32  ;;  %v314_v43 = vrot.slane %v26_v26, 4 }
  0x27   :  { %v801_v41 = vmax.f32 %v705_v34, 0.0  ;;  %v899_v42 = vmul.f32 %v1730_v0, %v507_v33  ;;  %v1279_v44 = vsel %vm1270_vm0, %v1182_v36, -inf  ;;  %v803_v45 = vmax.f32 %v707_v37, 0.0 }
  0x28   :  { %v993_v46 = vadd.f32 %v1747_v7, %v897_v38  ;;  %v316_v47 = vrot.slane %v28_v35, 4  ;;  %v1280_v48 = vsel %vm1270_vm0, %v1184_v40, -inf  ;;  %v506_v50 = vunpack.c.l.bf16 %v314_v43 }
  0x29   :  { %v995_v49 = vadd.f32 %v1747_v7, %v899_v42  ;;  %v606_v51 = vmul.f32 %v1730_v0, %v122_v30  ;;  %v1281_v52 = vmax.f32 %v1279_v44, %v1280_v48  ;;  %v608_v55 = vmul.f32 %v1730_v0, %v124_v39  ;;  %v33_v42 = vld [vmem:[%s2621_s0 + $0xa0] sm:$0xff] }
  0x2a   :  { %v1089_v53 = vmax.f32 %v993_v46, 0.0  ;;  %v508_v54 = vunpack.c.l.bf16 %v316_v47  ;;  %v898_v59 = vmul.f32 %v1730_v0, %v506_v50  ;;  %v125_v61 = vunpack.c.l.bf16 %v29_v56 }
  0x2b   :  { %v1091_v57 = vmax.f32 %v995_v49, 0.0  ;;  %v706_v58 = vadd.f32 %v1747_v7, %v606_v51  ;;  %v1665_v62 = vpack.c.bf16 %v1281_v52, %v1281_v52  ;;  %v708_v1 = vadd.f32 %v1747_v7, %v608_v55  ;;  %v35_v51 = vld [vmem:[%s2621_s0 + $0xb0] sm:$0xff] }
  0x2c   :  { %v1185_v63 = vmax.f32 %v801_v41, %v1089_v53  ;;  %v900_v2 = vmul.f32 %v1730_v0, %v508_v54  ;;  %v994_v5 = vadd.f32 %v1747_v7, %v898_v59  ;;  %v127_v6 = vunpack.c.l.bf16 %v31_v60 }
  0x2d   :  { %v1187_v3 = vmax.f32 %v803_v45, %v1091_v57  ;;  %v802_v4 = vmax.f32 %v706_v58, 0.0  ;;  %1563 = vst [vmem:[%s2623_s2 + $0x14] sm:$0x3] %v1665_v62  ;;  %v804_v8 = vmax.f32 %v708_v1, 0.0  ;;  %v317_v10 = vrot.slane %v29_v56, 4 }
  0x2e   :  { %v996_v9 = vadd.f32 %v1747_v7, %v900_v2  ;;  %v319_v11 = vrot.slane %v31_v60, 4  ;;  %v1090_v13 = vmax.f32 %v994_v5, 0.0  ;;  %v609_v14 = vmul.f32 %v1730_v0, %v125_v61  ;;  %v34_v1 = vld [vmem:[%s2621_s0 + $0xa8] sm:$0x33] }
  0x2f   :  { %v1282_v12 = vmax.f32 %v1185_v63, %v1187_v3  ;;  %v611_v15 = vmul.f32 %v1730_v0, %v127_v6  ;;  %v509_v18 = vunpack.c.l.bf16 %v317_v10  ;;  %v126_v20 = vunpack.c.l.bf16 %v30_v16 }
  0x30   :  { %v1092_v17 = vmax.f32 %v996_v9, 0.0  ;;  %v511_v19 = vunpack.c.l.bf16 %v319_v11  ;;  %v1186_v22 = vmax.f32 %v802_v4, %v1090_v13  ;;  %v709_v23 = vadd.f32 %v1747_v7, %v609_v14  ;;  %v36_v11 = vld [vmem:[%s2621_s0 + $0xb8] sm:$0x33] }
  0x31   :  { %v1666_v21 = vpack.c.bf16 %v1282_v12, %v1282_v12  ;;  %v711_v24 = vadd.f32 %v1747_v7, %v611_v15  ;;  %v901_v27 = vmul.f32 %v1730_v0, %v509_v18  ;;  %v128_v29 = vunpack.c.l.bf16 %v32_v25 }
  0x32   :  { %v1188_v26 = vmax.f32 %v804_v8, %v1092_v17  ;;  %v903_v28 = vmul.f32 %v1730_v0, %v511_v19  ;;  %v1283_v30 = vsel %vm1270_vm0, %v1186_v22, -inf  ;;  %v805_v31 = vmax.f32 %v709_v23, 0.0 }
  0x33   :  { %1564 = vst [vmem:[%s2623_s2 + $0x18] sm:$0xf] %v1666_v21  ;;  %v807_v32 = vmax.f32 %v711_v24, 0.0  ;;  %v318_v33 = vrot.slane %v30_v16, 4  ;;  %v997_v35 = vadd.f32 %v1747_v7, %v901_v27  ;;  %v320_v37 = vrot.slane %v32_v25, 4 }
  0x34   :  { %v1284_v34 = vsel %vm1270_vm0, %v1188_v26, -inf  ;;  %v999_v36 = vadd.f32 %v1747_v7, %v903_v28  ;;  %v610_v40 = vmul.f32 %v1730_v0, %v126_v20  ;;  %v612_v41 = vmul.f32 %v1730_v0, %v128_v29 }
  0x35   :  { %v1285_v38 = vmax.f32 %v1283_v30, %v1284_v34  ;;  %v510_v39 = vunpack.c.l.bf16 %v318_v33  ;;  %v1093_v43 = vmax.f32 %v997_v35, 0.0  ;;  %v512_v45 = vunpack.c.l.bf16 %v320_v37 }
  0x36   :  { %v1095_v44 = vmax.f32 %v999_v36, 0.0  ;;  %v129_v46 = vunpack.c.l.bf16 %v33_v42  ;;  %v710_v48 = vadd.f32 %v1747_v7, %v610_v40  ;;  %v712_v49 = vadd.f32 %v1747_v7, %v612_v41  ;;  %v39_v36 = vld [vmem:[%s2621_s0 + $0xd0] sm:$0xff] }
  0x37   :  { %v1667_v47 = vpack.c.bf16 %v1285_v38, %v1285_v38  ;;  %v902_v50 = vmul.f32 %v1730_v0, %v510_v39  ;;  %v1189_v52 = vmax.f32 %v805_v31, %v1093_v43  ;;  %v904_v54 = vmul.f32 %v1730_v0, %v512_v45 }
  0x38   :  { %v1191_v53 = vmax.f32 %v807_v32, %v1095_v44  ;;  %v131_v55 = vunpack.c.l.bf16 %v35_v51  ;;  %v806_v56 = vmax.f32 %v710_v48, 0.0  ;;  %v808_v57 = vmax.f32 %v712_v49, 0.0  ;;  %v37_v32 = vld [vmem:[%s2621_s0 + $0xc0] sm:$0xff] }
  0x39   :  { %1565 = vst [vmem:[%s2623_s2 + $0x1c] sm:$0x3] %v1667_v47  ;;  %v998_v58 = vadd.f32 %v1747_v7, %v902_v50  ;;  %v321_v59 = vrot.slane %v33_v42, 4  ;;  %v1000_v61 = vadd.f32 %v1747_v7, %v904_v54  ;;  %v323_v62 = vrot.slane %v35_v51, 4  ;;  %v38_v54 = vld [vmem:[%s2621_s0 + $0xc8] sm:$0x33] }
  0x3a   :  { %v1286_v60 = vmax.f32 %v1189_v52, %v1191_v53  ;;  %v613_v63 = vmul.f32 %v1730_v0, %v129_v46  ;;  %v615_v4 = vmul.f32 %v1730_v0, %v131_v55  ;;  %v130_v5 = vunpack.c.l.bf16 %v34_v1 }
  0x3b   :  { %v1094_v2 = vmax.f32 %v998_v58, 0.0  ;;  %v513_v3 = vunpack.c.l.bf16 %v321_v59  ;;  %v1096_v8 = vmax.f32 %v1000_v61, 0.0  ;;  %v515_v9 = vunpack.c.l.bf16 %v323_v62 }
  0x3c   :  { %v1668_v6 = vpack.c.bf16 %v1286_v60, %v1286_v60  ;;  %v713_v10 = vadd.f32 %v1747_v7, %v613_v63  ;;  %v715_v13 = vadd.f32 %v1747_v7, %v615_v4  ;;  %v132_v15 = vunpack.c.l.bf16 %v36_v11  ;;  %v40_v63 = vld [vmem:[%s2621_s0 + $0xd8] sm:$0x33] }
  0x3d   :  { %v1190_v12 = vmax.f32 %v806_v56, %v1094_v2  ;;  %v905_v14 = vmul.f32 %v1730_v0, %v513_v3  ;;  %v1192_v16 = vmax.f32 %v808_v57, %v1096_v8  ;;  %v907_v18 = vmul.f32 %v1730_v0, %v515_v9 }
  0x3e   :  { %1566 = vst [vmem:[%s2623_s2 + $0x20] sm:$0xf] %v1668_v6  ;;  %v809_v17 = vmax.f32 %v713_v10, 0.0  ;;  %v322_v19 = vrot.slane %v34_v1, 4  ;;  %v811_v21 = vmax.f32 %v715_v13, 0.0  ;;  %v324_v23 = vrot.slane %v36_v11, 4 }
  0x3f   :  { %v1287_v20 = vsel %vm1270_vm0, %v1190_v12, -inf  ;;  %v1001_v22 = vadd.f32 %v1747_v7, %v905_v14  ;;  %v1288_v24 = vsel %vm1270_vm0, %v1192_v16, -inf  ;;  %v1003_v25 = vadd.f32 %v1747_v7, %v907_v18  ;;  %v41_v18 = vld [vmem:[%s2621_s0 + $0xe0] sm:$0xff] }
  0x40   :  { %v514_v26 = vunpack.c.l.bf16 %v322_v19  ;;  %v614_v27 = vmul.f32 %v1730_v0, %v130_v5  ;;  %v1289_v28 = vmax.f32 %v1287_v20, %v1288_v24  ;;  %v516_v30 = vunpack.c.l.bf16 %v324_v23 }
  0x41   :  { %v1097_v29 = vmax.f32 %v1001_v22, 0.0  ;;  %v616_v31 = vmul.f32 %v1730_v0, %v132_v15  ;;  %v1099_v33 = vmax.f32 %v1003_v25, 0.0  ;;  %v133_v37 = vunpack.c.l.bf16 %v37_v32 }
  0x42   :  { %v714_v34 = vadd.f32 %v1747_v7, %v614_v27  ;;  %v906_v35 = vmul.f32 %v1730_v0, %v514_v26  ;;  %v1669_v38 = vpack.c.bf16 %v1289_v28, %v1289_v28  ;;  %v908_v41 = vmul.f32 %v1730_v0, %v516_v30  ;;  %v43_v27 = vld [vmem:[%s2621_s0 + $0xf0] sm:$0xff] }
  0x43   :  { %v1193_v39 = vmax.f32 %v809_v17, %v1097_v29  ;;  %v716_v40 = vadd.f32 %v1747_v7, %v616_v31  ;;  %v1195_v42 = vmax.f32 %v811_v21, %v1099_v33  ;;  %v135_v45 = vunpack.c.l.bf16 %v39_v36 }
  0x44   :  { %v810_v43 = vmax.f32 %v714_v34, 0.0  ;;  %v1002_v44 = vadd.f32 %v1747_v7, %v906_v35  ;;  %1567 = vst [vmem:[%s2623_s2 + $0x24] sm:$0x3] %v1669_v38  ;;  %v1004_v47 = vadd.f32 %v1747_v7, %v908_v41  ;;  %v325_v48 = vrot.slane %v37_v32, 4 }
  0x45   :  { %v812_v46 = vmax.f32 %v716_v40, 0.0  ;;  %v327_v49 = vrot.slane %v39_v36, 4  ;;  %v1290_v50 = vmax.f32 %v1193_v39, %v1195_v42  ;;  %v617_v52 = vmul.f32 %v1730_v0, %v133_v37  ;;  %v42_v40 = vld [vmem:[%s2621_s0 + $0xe8] sm:$0x33] }
  0x46   :  { %v1098_v51 = vmax.f32 %v1002_v44, 0.0  ;;  %v619_v53 = vmul.f32 %v1730_v0, %v135_v45  ;;  %v1100_v55 = vmax.f32 %v1004_v47, 0.0  ;;  %v517_v56 = vunpack.c.l.bf16 %v325_v48 }
  0x47   :  { %v519_v57 = vunpack.c.l.bf16 %v327_v49  ;;  %v134_v58 = vunpack.c.l.bf16 %v38_v54  ;;  %v1670_v59 = vpack.c.bf16 %v1290_v50, %v1290_v50  ;;  %v717_v61 = vadd.f32 %v1747_v7, %v617_v52  ;;  %v44_v49 = vld [vmem:[%s2621_s0 + $0xf8] sm:$0x33] }
  0x48   :  { %v1194_v60 = vmax.f32 %v810_v43, %v1098_v51  ;;  %v719_v62 = vadd.f32 %v1747_v7, %v619_v53  ;;  %v1196_v1 = vmax.f32 %v812_v46, %v1100_v55  ;;  %v909_v2 = vmul.f32 %v1730_v0, %v517_v56 }
  0x49   :  { %v911_v3 = vmul.f32 %v1730_v0, %v519_v57  ;;  %v136_v4 = vunpack.c.l.bf16 %v40_v63  ;;  %1568 = vst [vmem:[%s2623_s2 + $0x28] sm:$0xf] %v1670_v59  ;;  %v813_v6 = vmax.f32 %v717_v61, 0.0  ;;  %v326_v9 = vrot.slane %v38_v54, 4 }
  0x4a   :  { %v1291_v5 = vsel %vm1270_vm0, %v1194_v60, -inf  ;;  %v815_v8 = vmax.f32 %v719_v62, 0.0  ;;  %v1292_v10 = vsel %vm1270_vm0, %v1196_v1, -inf  ;;  %v1005_v11 = vadd.f32 %v1747_v7, %v909_v2 }
  0x4b   :  { %v1007_v12 = vadd.f32 %v1747_v7, %v911_v3  ;;  %v328_v13 = vrot.slane %v40_v63, 4  ;;  %v1293_v14 = vmax.f32 %v1291_v5, %v1292_v10  ;;  %v518_v15 = vunpack.c.l.bf16 %v326_v9 }
  0x4c   :  { %v618_v16 = vmul.f32 %v1730_v0, %v134_v58  ;;  %v620_v17 = vmul.f32 %v1730_v0, %v136_v4  ;;  %v1101_v19 = vmax.f32 %v1005_v11, 0.0  ;;  %v137_v22 = vunpack.c.l.bf16 %v41_v18 }
  0x4d   :  { %v1103_v20 = vmax.f32 %v1007_v12, 0.0  ;;  %v520_v21 = vunpack.c.l.bf16 %v328_v13  ;;  %v1671_v23 = vpack.c.bf16 %v1293_v14, %v1293_v14  ;;  %v910_v26 = vmul.f32 %v1730_v0, %v518_v15  ;;  %v47_v12 = vld [vmem:[%s2621_s0 + $0x110] sm:$0xff] }
  0x4e   :  { %v718_v24 = vadd.f32 %v1747_v7, %v618_v16  ;;  %v720_v25 = vadd.f32 %v1747_v7, %v620_v17  ;;  %v1197_v28 = vmax.f32 %v813_v6, %v1101_v19  ;;  %v139_v31 = vunpack.c.l.bf16 %v43_v27 }
  0x4f   :  { %v1199_v29 = vmax.f32 %v815_v8, %v1103_v20  ;;  %v912_v30 = vmul.f32 %v1730_v0, %v520_v21  ;;  %1569 = vst [vmem:[%s2623_s2 + $0x2c] sm:$0x3] %v1671_v23  ;;  %v1006_v34 = vadd.f32 %v1747_v7, %v910_v26  ;;  %v329_v35 = vrot.slane %v41_v18, 4  ;;  %v45_v8 = vld [vmem:[%s2621_s0 + $0x100] sm:$0xff] }
  0x50   :  { %v814_v32 = vmax.f32 %v718_v24, 0.0  ;;  %v816_v33 = vmax.f32 %v720_v25, 0.0  ;;  %v331_v38 = vrot.slane %v43_v27, 4  ;;  %v621_v39 = vmul.f32 %v1730_v0, %v137_v22 }
  0x51   :  { %v1294_v36 = vmax.f32 %v1197_v28, %v1199_v29  ;;  %v1008_v37 = vadd.f32 %v1747_v7, %v912_v30  ;;  %v1102_v41 = vmax.f32 %v1006_v34, 0.0  ;;  %v521_v42 = vunpack.c.l.bf16 %v329_v35  ;;  %v46_v30 = vld [vmem:[%s2621_s0 + $0x108] sm:$0x33] }
  0x52   :  { %v623_v43 = vmul.f32 %v1730_v0, %v139_v31  ;;  %v138_v44 = vunpack.c.l.bf16 %v42_v40  ;;  %v523_v47 = vunpack.c.l.bf16 %v331_v38  ;;  %v721_v48 = vadd.f32 %v1747_v7, %v621_v39  ;;  %v48_v39 = vld [vmem:[%s2621_s0 + $0x118] sm:$0x33] }
  0x53   :  { %v1672_v45 = vpack.c.bf16 %v1294_v36, %v1294_v36  ;;  %v1104_v46 = vmax.f32 %v1008_v37, 0.0  ;;  %v1198_v50 = vmax.f32 %v814_v32, %v1102_v41  ;;  %v913_v52 = vmul.f32 %v1730_v0, %v521_v42 }
  0x54   :  { %v723_v51 = vadd.f32 %v1747_v7, %v623_v43  ;;  %v140_v53 = vunpack.c.l.bf16 %v44_v49  ;;  %v817_v55 = vmax.f32 %v721_v48, 0.0  ;;  %v915_v56 = vmul.f32 %v1730_v0, %v523_v47 }
  0x55   :  { %1570 = vst [vmem:[%s2623_s2 + $0x30] sm:$0xf] %v1672_v45  ;;  %v1200_v54 = vmax.f32 %v816_v33, %v1104_v46  ;;  %v330_v57 = vrot.slane %v42_v40, 4  ;;  %v1295_v58 = vsel %vm1270_vm0, %v1198_v50, -inf  ;;  %v1009_v60 = vadd.f32 %v1747_v7, %v913_v52 }
  0x56   :  { %v819_v59 = vmax.f32 %v723_v51, 0.0  ;;  %v332_v61 = vrot.slane %v44_v49, 4  ;;  %v1011_v63 = vadd.f32 %v1747_v7, %v915_v56  ;;  %v622_v2 = vmul.f32 %v1730_v0, %v138_v44  ;;  %v49_v56 = vld [vmem:[%s2621_s0 + $0x120] sm:$0xff] }
  0x57   :  { %v1296_v62 = vsel %vm1270_vm0, %v1200_v54, -inf  ;;  %v522_v1 = vunpack.c.l.bf16 %v330_v57  ;;  %v1105_v4 = vmax.f32 %v1009_v60, 0.0  ;;  %v624_v6 = vmul.f32 %v1730_v0, %v140_v53 }
  0x58   :  { %v1297_v3 = vmax.f32 %v1295_v58, %v1296_v62  ;;  %v524_v5 = vunpack.c.l.bf16 %v332_v61  ;;  %v1107_v9 = vmax.f32 %v1011_v63, 0.0  ;;  %v722_v10 = vadd.f32 %v1747_v7, %v622_v2  ;;  %v51_v2 = vld [vmem:[%s2621_s0 + $0x130] sm:$0xff] }
  0x59   :  { %v914_v11 = vmul.f32 %v1730_v0, %v522_v1  ;;  %v141_v13 = vunpack.c.l.bf16 %v45_v8  ;;  %v1201_v15 = vmax.f32 %v817_v55, %v1105_v4  ;;  %v724_v16 = vadd.f32 %v1747_v7, %v624_v6 }
  0x5a   :  { %v1673_v14 = vpack.c.bf16 %v1297_v3, %v1297_v3  ;;  %v916_v17 = vmul.f32 %v1730_v0, %v524_v5  ;;  %v1203_v18 = vmax.f32 %v819_v59, %v1107_v9  ;;  %v818_v19 = vmax.f32 %v722_v10, 0.0 }
  0x5b   :  { %v1010_v20 = vadd.f32 %v1747_v7, %v914_v11  ;;  %v143_v21 = vunpack.c.l.bf16 %v47_v12  ;;  %v820_v22 = vmax.f32 %v724_v16, 0.0  ;;  %v333_v24 = vrot.slane %v45_v8, 4  ;;  %v50_v16 = vld [vmem:[%s2621_s0 + $0x128] sm:$0x33] }
  0x5c   :  { %1571 = vst [vmem:[%s2623_s2 + $0x34] sm:$0x3] %v1673_v14  ;;  %v1012_v23 = vadd.f32 %v1747_v7, %v916_v17  ;;  %v335_v25 = vrot.slane %v47_v12, 4  ;;  %v1298_v26 = vmax.f32 %v1201_v15, %v1203_v18  ;;  %v625_v28 = vmul.f32 %v1730_v0, %v141_v13 }
  0x5d   :  { %v1106_v27 = vmax.f32 %v1010_v20, 0.0  ;;  %v627_v29 = vmul.f32 %v1730_v0, %v143_v21  ;;  %v525_v32 = vunpack.c.l.bf16 %v333_v24  ;;  %v142_v34 = vunpack.c.l.bf16 %v46_v30 }
  0x5e   :  { %v1108_v31 = vmax.f32 %v1012_v23, 0.0  ;;  %v527_v33 = vunpack.c.l.bf16 %v335_v25  ;;  %v1674_v35 = vpack.c.bf16 %v1298_v26, %v1298_v26  ;;  %v725_v37 = vadd.f32 %v1747_v7, %v625_v28  ;;  %v52_v25 = vld [vmem:[%s2621_s0 + $0x138] sm:$0x33] }
  0x5f   :  { %v1202_v36 = vmax.f32 %v818_v19, %v1106_v27  ;;  %v727_v38 = vadd.f32 %v1747_v7, %v627_v29  ;;  %v917_v41 = vmul.f32 %v1730_v0, %v525_v32  ;;  %v144_v43 = vunpack.c.l.bf16 %v48_v39 }
  0x60   :  { %v1204_v40 = vmax.f32 %v820_v22, %v1108_v31  ;;  %v919_v42 = vmul.f32 %v1730_v0, %v527_v33  ;;  %1572 = vst [vmem:[%s2623_s2 + $0x38] sm:$0xf] %v1674_v35  ;;  %v821_v45 = vmax.f32 %v725_v37, 0.0  ;;  %v334_v47 = vrot.slane %v46_v30, 4 }
  0x61   :  { %v1299_v44 = vsel %vm1270_vm0, %v1202_v36, -inf  ;;  %v823_v46 = vmax.f32 %v727_v38, 0.0  ;;  %v1013_v49 = vadd.f32 %v1747_v7, %v917_v41  ;;  %v336_v51 = vrot.slane %v48_v39, 4 }
  0x62   :  { %v1300_v48 = vsel %vm1270_vm0, %v1204_v40, -inf  ;;  %v1015_v50 = vadd.f32 %v1747_v7, %v919_v42  ;;  %v526_v53 = vunpack.c.l.bf16 %v334_v47  ;;  %v626_v54 = vmul.f32 %v1730_v0, %v142_v34 }
  0x63   :  { %v1301_v52 = vmax.f32 %v1299_v44, %v1300_v48  ;;  %v628_v55 = vmul.f32 %v1730_v0, %v144_v43  ;;  %v1109_v57 = vmax.f32 %v1013_v49, 0.0  ;;  %v528_v59 = vunpack.c.l.bf16 %v336_v51 }
  0x64   :  { %v1111_v58 = vmax.f32 %v1015_v50, 0.0  ;;  %v145_v60 = vunpack.c.l.bf16 %v49_v56  ;;  %v726_v62 = vadd.f32 %v1747_v7, %v626_v54  ;;  %v918_v1 = vmul.f32 %v1730_v0, %v526_v53  ;;  %v55_v50 = vld [vmem:[%s2621_s0 + $0x150] sm:$0xff] }
  0x65   :  { %v1675_v61 = vpack.c.bf16 %v1301_v52, %v1301_v52  ;;  %v728_v63 = vadd.f32 %v1747_v7, %v628_v55  ;;  %v1205_v3 = vmax.f32 %v821_v45, %v1109_v57  ;;  %v920_v5 = vmul.f32 %v1730_v0, %v528_v59 }
  0x66   :  { %v1207_v4 = vmax.f32 %v823_v46, %v1111_v58  ;;  %v147_v6 = vunpack.c.l.bf16 %v51_v2  ;;  %v822_v8 = vmax.f32 %v726_v62, 0.0  ;;  %v1014_v10 = vadd.f32 %v1747_v7, %v918_v1  ;;  %v53_v46 = vld [vmem:[%s2621_s0 + $0x140] sm:$0xff] }
  0x67   :  { %1573 = vst [vmem:[%s2623_s2 + $0x3c] sm:$0x3] %v1675_v61  ;;  %v824_v9 = vmax.f32 %v728_v63, 0.0  ;;  %v337_v11 = vrot.slane %v49_v56, 4  ;;  %v1016_v13 = vadd.f32 %v1747_v7, %v920_v5  ;;  %v339_v14 = vrot.slane %v51_v2, 4 }
  0x68   :  { %v1302_v12 = vmax.f32 %v1205_v3, %v1207_v4  ;;  %v629_v15 = vmul.f32 %v1730_v0, %v145_v60  ;;  %v1110_v17 = vmax.f32 %v1014_v10, 0.0  ;;  %v631_v19 = vmul.f32 %v1730_v0, %v147_v6  ;;  %v54_v5 = vld [vmem:[%s2621_s0 + $0x148] sm:$0x33] }
  0x69   :  { %v529_v18 = vunpack.c.l.bf16 %v337_v11  ;;  %v146_v20 = vunpack.c.l.bf16 %v50_v16  ;;  %v1112_v22 = vmax.f32 %v1016_v13, 0.0  ;;  %v531_v23 = vunpack.c.l.bf16 %v339_v14 }
  0x6a   :  { %v1676_v21 = vpack.c.bf16 %v1302_v12, %v1302_v12  ;;  %v729_v24 = vadd.f32 %v1747_v7, %v629_v15  ;;  %v1206_v26 = vmax.f32 %v822_v8, %v1110_v17  ;;  %v731_v27 = vadd.f32 %v1747_v7, %v631_v19  ;;  %v2108_v12 = vld [vmem:[%s2622_s1 + $0x1] ss:$0 sm:$0xff]  ;;  %v56_v15 = vld [vmem:[%s2621_s0 + $0x158] sm:$0x33] }
  0x6b   :  { %v921_v28 = vmul.f32 %v1730_v0, %v529_v18  ;;  %v148_v29 = vunpack.c.l.bf16 %v52_v25  ;;  %v1208_v30 = vmax.f32 %v824_v9, %v1112_v22  ;;  %v923_v32 = vmul.f32 %v1730_v0, %v531_v23 }
  0x6c   :  { %1574 = vst [vmem:[%s2623_s2 + $0x40] sm:$0xf] %v1676_v21  ;;  %v825_v31 = vmax.f32 %v729_v24, 0.0  ;;  %v338_v33 = vrot.slane %v50_v16, 4  ;;  %v1303_v34 = vsel %vm1270_vm0, %v1206_v26, -inf  ;;  %v827_v35 = vmax.f32 %v731_v27, 0.0 }
  0x6d   :  { %v1017_v36 = vadd.f32 %v1747_v7, %v921_v28  ;;  %v340_v37 = vrot.slane %v52_v25, 4  ;;  %v1304_v38 = vsel %vm1270_vm0, %v1208_v30, -inf  ;;  %v1019_v39 = vadd.f32 %v1747_v7, %v923_v32  ;;  %v57_v32 = vld [vmem:[%s2621_s0 + $0x160] sm:$0xff] }
  0x6e   :  { %v530_v40 = vunpack.c.l.bf16 %v338_v33  ;;  %v630_v41 = vmul.f32 %v1730_v0, %v146_v20  ;;  %v1305_v42 = vmax.f32 %v1303_v34, %v1304_v38  ;;  %v632_v45 = vmul.f32 %v1730_v0, %v148_v29 }
  0x6f   :  { %v1113_v43 = vmax.f32 %v1017_v36, 0.0  ;;  %v532_v44 = vunpack.c.l.bf16 %v340_v37  ;;  %v1115_v47 = vmax.f32 %v1019_v39, 0.0  ;;  %v149_v51 = vunpack.c.l.bf16 %v53_v46 }
  0x70   :  { %v730_v48 = vadd.f32 %v1747_v7, %v630_v41  ;;  %v922_v49 = vmul.f32 %v1730_v0, %v530_v40  ;;  %v1677_v52 = vpack.c.bf16 %v1305_v42, %v1305_v42  ;;  %v732_v54 = vadd.f32 %v1747_v7, %v632_v45  ;;  %v59_v41 = vld [vmem:[%s2621_s0 + $0x170] sm:$0xff] }
  0x71   :  { %v1209_v53 = vmax.f32 %v825_v31, %v1113_v43  ;;  %v924_v55 = vmul.f32 %v1730_v0, %v532_v44  ;;  %v1211_v56 = vmax.f32 %v827_v35, %v1115_v47  ;;  %v151_v59 = vunpack.c.l.bf16 %v55_v50  ;;  %v2098_v0 = vld [vmem:[%s2622_s1] ss:$0 sm:$0xff] }
  0x72   :  { %v826_v57 = vmax.f32 %v730_v48, 0.0  ;;  %v1018_v58 = vadd.f32 %v1747_v7, %v922_v49  ;;  %1575 = vst [vmem:[%s2623_s2 + $0x44] sm:$0x3] %v1677_v52  ;;  %v828_v60 = vmax.f32 %v732_v54, 0.0  ;;  %v341_v62 = vrot.slane %v53_v46, 4 }
  0x73   :  { %v1020_v61 = vadd.f32 %v1747_v7, %v924_v55  ;;  %v343_v63 = vrot.slane %v55_v50, 4  ;;  %v1306_v1 = vmax.f32 %v1209_v53, %v1211_v56  ;;  %v633_v3 = vmul.f32 %v2098_v0, %v149_v51  ;;  %v58_v54 = vld [vmem:[%s2621_s0 + $0x168] sm:$0x33] }
  0x74   :  { %v1114_v2 = vmax.f32 %v1018_v58, 0.0  ;;  %v635_v4 = vmul.f32 %v2098_v0, %v151_v59  ;;  %v533_v8 = vunpack.c.l.bf16 %v341_v62  ;;  %v150_v9 = vunpack.c.l.bf16 %v54_v5 }
  0x75   :  { %v1116_v6 = vmax.f32 %v1020_v61, 0.0  ;;  %v535_v7 = vunpack.c.l.bf16 %v343_v63  ;;  %v1678_v10 = vpack.c.bf16 %v1306_v1, %v1306_v1  ;;  %v733_v13 = vadd.f32 %v2108_v12, %v633_v3  ;;  %v60_v63 = vld [vmem:[%s2621_s0 + $0x178] sm:$0x33] }
  0x76   :  { %v1210_v11 = vmax.f32 %v826_v57, %v1114_v2  ;;  %v735_v14 = vadd.f32 %v2108_v12, %v635_v4  ;;  %v925_v17 = vmul.f32 %v2098_v0, %v533_v8  ;;  %v152_v19 = vunpack.c.l.bf16 %v56_v15 }
  0x77   :  { %v1212_v16 = vmax.f32 %v828_v60, %v1116_v6  ;;  %v927_v18 = vmul.f32 %v2098_v0, %v535_v7  ;;  %1576 = vst [vmem:[%s2623_s2 + $0x48] sm:$0xf] %v1678_v10  ;;  %v829_v21 = vmax.f32 %v733_v13, 0.0  ;;  %v342_v23 = vrot.slane %v54_v5, 4 }
  0x78   :  { %v1307_v20 = vsel %vm1270_vm0, %v1210_v11, -inf  ;;  %v831_v22 = vmax.f32 %v735_v14, 0.0  ;;  %v1021_v25 = vadd.f32 %v2108_v12, %v925_v17  ;;  %v344_v27 = vrot.slane %v56_v15, 4 }
  0x79   :  { %v1308_v24 = vsel %vm1270_vm0, %v1212_v16, -inf  ;;  %v1023_v26 = vadd.f32 %v2108_v12, %v927_v18  ;;  %v534_v29 = vunpack.c.l.bf16 %v342_v23  ;;  %v634_v30 = vmul.f32 %v2098_v0, %v150_v9 }
  0x7a   :  { %v1309_v28 = vmax.f32 %v1307_v20, %v1308_v24  ;;  %v636_v31 = vmul.f32 %v2098_v0, %v152_v19  ;;  %v1117_v33 = vmax.f32 %v1021_v25, 0.0  ;;  %v536_v35 = vunpack.c.l.bf16 %v344_v27 }
  0x7b   :  { %v1119_v34 = vmax.f32 %v1023_v26, 0.0  ;;  %v153_v36 = vunpack.c.l.bf16 %v57_v32  ;;  %v734_v38 = vadd.f32 %v2108_v12, %v634_v30  ;;  %v926_v40 = vmul.f32 %v2098_v0, %v534_v29  ;;  %v63_v26 = vld [vmem:[%s2621_s0 + $0x190] sm:$0xff] }
  0x7c   :  { %v1679_v37 = vpack.c.bf16 %v1309_v28, %v1309_v28  ;;  %v736_v39 = vadd.f32 %v2108_v12, %v636_v31  ;;  %v1213_v42 = vmax.f32 %v829_v21, %v1117_v33  ;;  %v928_v44 = vmul.f32 %v2098_v0, %v536_v35 }
  0x7d   :  { %v1215_v43 = vmax.f32 %v831_v22, %v1119_v34  ;;  %v155_v45 = vunpack.c.l.bf16 %v59_v41  ;;  %v830_v46 = vmax.f32 %v734_v38, 0.0  ;;  %v1022_v48 = vadd.f32 %v2108_v12, %v926_v40  ;;  %v61_v22 = vld [vmem:[%s2621_s0 + $0x180] sm:$0xff] }
  0x7e   :  { %1577 = vst [vmem:[%s2623_s2 + $0x4c] sm:$0x3] %v1679_v37  ;;  %v832_v47 = vmax.f32 %v736_v39, 0.0  ;;  %v345_v49 = vrot.slane %v57_v32, 4  ;;  %v1024_v51 = vadd.f32 %v2108_v12, %v928_v44  ;;  %v347_v52 = vrot.slane %v59_v41, 4 }
  0x7f   :  { %v1310_v50 = vmax.f32 %v1213_v42, %v1215_v43  ;;  %v637_v53 = vmul.f32 %v2098_v0, %v153_v36  ;;  %v1118_v55 = vmax.f32 %v1022_v48, 0.0  ;;  %v639_v57 = vmul.f32 %v2098_v0, %v155_v45  ;;  %v62_v44 = vld [vmem:[%s2621_s0 + $0x188] sm:$0x33] }
  0x80   :  { %v537_v56 = vunpack.c.l.bf16 %v345_v49  ;;  %v154_v58 = vunpack.c.l.bf16 %v58_v54  ;;  %v1120_v60 = vmax.f32 %v1024_v51, 0.0  ;;  %v539_v61 = vunpack.c.l.bf16 %v347_v52 }
  0x81   :  { %v1680_v59 = vpack.c.bf16 %v1310_v50, %v1310_v50  ;;  %v737_v62 = vadd.f32 %v2108_v12, %v637_v53  ;;  %v1214_v1 = vmax.f32 %v830_v46, %v1118_v55  ;;  %v739_v2 = vadd.f32 %v2108_v12, %v639_v57  ;;  %v64_v53 = vld [vmem:[%s2621_s0 + $0x198] sm:$0x33] }
  0x82   :  { %v929_v3 = vmul.f32 %v2098_v0, %v537_v56  ;;  %v156_v4 = vunpack.c.l.bf16 %v60_v63  ;;  %v1216_v5 = vmax.f32 %v832_v47, %v1120_v60  ;;  %v931_v8 = vmul.f32 %v2098_v0, %v539_v61 }
  0x83   :  { %1578 = vst [vmem:[%s2623_s2 + $0x50] sm:$0xf] %v1680_v59  ;;  %v833_v6 = vmax.f32 %v737_v62, 0.0  ;;  %v346_v7 = vrot.slane %v58_v54, 4  ;;  %v1311_v9 = vsel %vm1270_vm0, %v1214_v1, -inf  ;;  %v835_v10 = vmax.f32 %v739_v2, 0.0 }
  0x84   :  { %v1025_v11 = vadd.f32 %v2108_v12, %v929_v3  ;;  %v348_v13 = vrot.slane %v60_v63, 4  ;;  %v1312_v14 = vsel %vm1270_vm0, %v1216_v5, -inf  ;;  %v1027_v15 = vadd.f32 %v2108_v12, %v931_v8  ;;  %v65_v8 = vld [vmem:[%s2621_s0 + $0x1a0] sm:$0xff] }
  0x85   :  { %v538_v16 = vunpack.c.l.bf16 %v346_v7  ;;  %v638_v17 = vmul.f32 %v2098_v0, %v154_v58  ;;  %v1313_v18 = vmax.f32 %v1311_v9, %v1312_v14  ;;  %v640_v21 = vmul.f32 %v2098_v0, %v156_v4 }
  0x86   :  { %v1121_v19 = vmax.f32 %v1025_v11, 0.0  ;;  %v540_v20 = vunpack.c.l.bf16 %v348_v13  ;;  %v1123_v23 = vmax.f32 %v1027_v15, 0.0  ;;  %v157_v27 = vunpack.c.l.bf16 %v61_v22 }
  0x87   :  { %v738_v24 = vadd.f32 %v2108_v12, %v638_v17  ;;  %v930_v25 = vmul.f32 %v2098_v0, %v538_v16  ;;  %v1681_v28 = vpack.c.bf16 %v1313_v18, %v1313_v18  ;;  %v740_v30 = vadd.f32 %v2108_v12, %v640_v21  ;;  %v67_v17 = vld [vmem:[%s2621_s0 + $0x1b0] sm:$0xff] }
  0x88   :  { %v1217_v29 = vmax.f32 %v833_v6, %v1121_v19  ;;  %v932_v31 = vmul.f32 %v2098_v0, %v540_v20  ;;  %v1219_v32 = vmax.f32 %v835_v10, %v1123_v23  ;;  %v159_v35 = vunpack.c.l.bf16 %v63_v26 }
  0x89   :  { %v834_v33 = vmax.f32 %v738_v24, 0.0  ;;  %v1026_v34 = vadd.f32 %v2108_v12, %v930_v25  ;;  %1579 = vst [vmem:[%s2623_s2 + $0x54] sm:$0x3] %v1681_v28  ;;  %v836_v36 = vmax.f32 %v740_v30, 0.0  ;;  %v349_v38 = vrot.slane %v61_v22, 4 }
  0x8a   :  { %v1028_v37 = vadd.f32 %v2108_v12, %v932_v31  ;;  %v351_v39 = vrot.slane %v63_v26, 4  ;;  %v1314_v40 = vmax.f32 %v1217_v29, %v1219_v32  ;;  %v641_v42 = vmul.f32 %v2098_v0, %v157_v27  ;;  %v66_v30 = vld [vmem:[%s2621_s0 + $0x1a8] sm:$0x33] }
  0x8b   :  { %v1122_v41 = vmax.f32 %v1026_v34, 0.0  ;;  %v643_v43 = vmul.f32 %v2098_v0, %v159_v35  ;;  %v541_v46 = vunpack.c.l.bf16 %v349_v38  ;;  %v158_v48 = vunpack.c.l.bf16 %v62_v44 }
  0x8c   :  { %v1124_v45 = vmax.f32 %v1028_v37, 0.0  ;;  %v543_v47 = vunpack.c.l.bf16 %v351_v39  ;;  %v1682_v49 = vpack.c.bf16 %v1314_v40, %v1314_v40  ;;  %v741_v51 = vadd.f32 %v2108_v12, %v641_v42  ;;  %v68_v39 = vld [vmem:[%s2621_s0 + $0x1b8] sm:$0x33] }
  0x8d   :  { %v1218_v50 = vmax.f32 %v834_v33, %v1122_v41  ;;  %v743_v52 = vadd.f32 %v2108_v12, %v643_v43  ;;  %v933_v55 = vmul.f32 %v2098_v0, %v541_v46  ;;  %v160_v57 = vunpack.c.l.bf16 %v64_v53 }
  0x8e   :  { %v1220_v54 = vmax.f32 %v836_v36, %v1124_v45  ;;  %v935_v56 = vmul.f32 %v2098_v0, %v543_v47  ;;  %1580 = vst [vmem:[%s2623_s2 + $0x58] sm:$0xf] %v1682_v49  ;;  %v837_v59 = vmax.f32 %v741_v51, 0.0  ;;  %v350_v61 = vrot.slane %v62_v44, 4 }
  0x8f   :  { %v1315_v58 = vsel %vm1270_vm0, %v1218_v50, -inf  ;;  %v839_v60 = vmax.f32 %v743_v52, 0.0  ;;  %v1029_v63 = vadd.f32 %v2108_v12, %v933_v55  ;;  %v352_v2 = vrot.slane %v64_v53, 4 }
  0x90   :  { %v1316_v62 = vsel %vm1270_vm0, %v1220_v54, -inf  ;;  %v1031_v1 = vadd.f32 %v2108_v12, %v935_v56  ;;  %v542_v4 = vunpack.c.l.bf16 %v350_v61  ;;  %v642_v5 = vmul.f32 %v2098_v0, %v158_v48 }
  0x91   :  { %v1317_v3 = vmax.f32 %v1315_v58, %v1316_v62  ;;  %v644_v6 = vmul.f32 %v2098_v0, %v160_v57  ;;  %v1125_v7 = vmax.f32 %v1029_v63, 0.0  ;;  %v544_v10 = vunpack.c.l.bf16 %v352_v2 }
  0x92   :  { %v1127_v9 = vmax.f32 %v1031_v1, 0.0  ;;  %v161_v11 = vunpack.c.l.bf16 %v65_v8  ;;  %v742_v14 = vadd.f32 %v2108_v12, %v642_v5  ;;  %v934_v16 = vmul.f32 %v2098_v0, %v542_v4  ;;  %v71_v1 = vld [vmem:[%s2621_s0 + $0x1d0] sm:$0xff] }
  0x93   :  { %v1683_v13 = vpack.c.bf16 %v1317_v3, %v1317_v3  ;;  %v744_v15 = vadd.f32 %v2108_v12, %v644_v6  ;;  %v1221_v18 = vmax.f32 %v837_v59, %v1125_v7  ;;  %v936_v20 = vmul.f32 %v2098_v0, %v544_v10 }
  0x94   :  { %v1223_v19 = vmax.f32 %v839_v60, %v1127_v9  ;;  %v163_v21 = vunpack.c.l.bf16 %v67_v17  ;;  %v838_v22 = vmax.f32 %v742_v14, 0.0  ;;  %v1030_v24 = vadd.f32 %v2108_v12, %v934_v16  ;;  %v69_v60 = vld [vmem:[%s2621_s0 + $0x1c0] sm:$0xff] }
  0x95   :  { %1581 = vst [vmem:[%s2623_s2 + $0x5c] sm:$0x3] %v1683_v13  ;;  %v840_v23 = vmax.f32 %v744_v15, 0.0  ;;  %v353_v25 = vrot.slane %v65_v8, 4  ;;  %v1032_v27 = vadd.f32 %v2108_v12, %v936_v20  ;;  %v355_v28 = vrot.slane %v67_v17, 4 }
  0x96   :  { %v1318_v26 = vmax.f32 %v1221_v18, %v1223_v19  ;;  %v645_v29 = vmul.f32 %v2098_v0, %v161_v11  ;;  %v1126_v31 = vmax.f32 %v1030_v24, 0.0  ;;  %v647_v33 = vmul.f32 %v2098_v0, %v163_v21  ;;  %v70_v20 = vld [vmem:[%s2621_s0 + $0x1c8] sm:$0x33] }
  0x97   :  { %v545_v32 = vunpack.c.l.bf16 %v353_v25  ;;  %v162_v34 = vunpack.c.l.bf16 %v66_v30  ;;  %v1128_v36 = vmax.f32 %v1032_v27, 0.0  ;;  %v547_v37 = vunpack.c.l.bf16 %v355_v28 }
  0x98   :  { %v1684_v35 = vpack.c.bf16 %v1318_v26, %v1318_v26  ;;  %v745_v38 = vadd.f32 %v2108_v12, %v645_v29  ;;  %v1222_v40 = vmax.f32 %v838_v22, %v1126_v31  ;;  %v747_v41 = vadd.f32 %v2108_v12, %v647_v33  ;;  %v72_v29 = vld [vmem:[%s2621_s0 + $0x1d8] sm:$0x33] }
  0x99   :  { %v937_v42 = vmul.f32 %v2098_v0, %v545_v32  ;;  %v164_v43 = vunpack.c.l.bf16 %v68_v39  ;;  %v1224_v44 = vmax.f32 %v840_v23, %v1128_v36  ;;  %v939_v46 = vmul.f32 %v2098_v0, %v547_v37 }
  0x9a   :  { %1582 = vst [vmem:[%s2623_s2 + $0x60] sm:$0xf] %v1684_v35  ;;  %v841_v45 = vmax.f32 %v745_v38, 0.0  ;;  %v354_v47 = vrot.slane %v66_v30, 4  ;;  %v1319_v48 = vsel %vm1270_vm0, %v1222_v40, -inf  ;;  %v843_v49 = vmax.f32 %v747_v41, 0.0 }
  0x9b   :  { %v1033_v50 = vadd.f32 %v2108_v12, %v937_v42  ;;  %v356_v51 = vrot.slane %v68_v39, 4  ;;  %v1320_v52 = vsel %vm1270_vm0, %v1224_v44, -inf  ;;  %v1035_v53 = vadd.f32 %v2108_v12, %v939_v46  ;;  %v73_v46 = vld [vmem:[%s2621_s0 + $0x1e0] sm:$0xff] }
  0x9c   :  { %v546_v54 = vunpack.c.l.bf16 %v354_v47  ;;  %v646_v55 = vmul.f32 %v2098_v0, %v162_v34  ;;  %v1321_v56 = vmax.f32 %v1319_v48, %v1320_v52  ;;  %v648_v59 = vmul.f32 %v2098_v0, %v164_v43 }
  0x9d   :  { %v1129_v57 = vmax.f32 %v1033_v50, 0.0  ;;  %v548_v58 = vunpack.c.l.bf16 %v356_v51  ;;  %v1131_v61 = vmax.f32 %v1035_v53, 0.0  ;;  %v165_v2 = vunpack.c.l.bf16 %v69_v60 }
  0x9e   :  { %v746_v62 = vadd.f32 %v2108_v12, %v646_v55  ;;  %v938_v63 = vmul.f32 %v2098_v0, %v546_v54  ;;  %v1685_v3 = vpack.c.bf16 %v1321_v56, %v1321_v56  ;;  %v748_v5 = vadd.f32 %v2108_v12, %v648_v59  ;;  %v75_v55 = vld [vmem:[%s2621_s0 + $0x1f0] sm:$0xff] }
  0x9f   :  { %v1225_v4 = vmax.f32 %v841_v45, %v1129_v57  ;;  %v940_v6 = vmul.f32 %v2098_v0, %v548_v58  ;;  %v1227_v8 = vmax.f32 %v843_v49, %v1131_v61  ;;  %v167_v10 = vunpack.c.l.bf16 %v71_v1 }
  0xa0   :  { %v842_v7 = vmax.f32 %v746_v62, 0.0  ;;  %v1034_v9 = vadd.f32 %v2108_v12, %v938_v63  ;;  %1583 = vst [vmem:[%s2623_s2 + $0x64] sm:$0x3] %v1685_v3  ;;  %v844_v11 = vmax.f32 %v748_v5, 0.0  ;;  %v357_v14 = vrot.slane %v69_v60, 4 }
  0xa1   :  { %v1036_v13 = vadd.f32 %v2108_v12, %v940_v6  ;;  %v359_v15 = vrot.slane %v71_v1, 4  ;;  %v1322_v16 = vmax.f32 %v1225_v4, %v1227_v8  ;;  %v649_v18 = vmul.f32 %v2098_v0, %v165_v2  ;;  %v74_v5 = vld [vmem:[%s2621_s0 + $0x1e8] sm:$0x33] }
  0xa2   :  { %v1130_v17 = vmax.f32 %v1034_v9, 0.0  ;;  %v651_v19 = vmul.f32 %v2098_v0, %v167_v10  ;;  %v549_v22 = vunpack.c.l.bf16 %v357_v14  ;;  %v166_v24 = vunpack.c.l.bf16 %v70_v20 }
  0xa3   :  { %v1132_v21 = vmax.f32 %v1036_v13, 0.0  ;;  %v551_v23 = vunpack.c.l.bf16 %v359_v15  ;;  %v1686_v25 = vpack.c.bf16 %v1322_v16, %v1322_v16  ;;  %v749_v27 = vadd.f32 %v2108_v12, %v649_v18  ;;  %v76_v15 = vld [vmem:[%s2621_s0 + $0x1f8] sm:$0x33] }
  0xa4   :  { %v1226_v26 = vmax.f32 %v842_v7, %v1130_v17  ;;  %v751_v28 = vadd.f32 %v2108_v12, %v651_v19  ;;  %v941_v31 = vmul.f32 %v2098_v0, %v549_v22  ;;  %v168_v33 = vunpack.c.l.bf16 %v72_v29 }
  0xa5   :  { %v1228_v30 = vmax.f32 %v844_v11, %v1132_v21  ;;  %v943_v32 = vmul.f32 %v2098_v0, %v551_v23  ;;  %1584 = vst [vmem:[%s2623_s2 + $0x68] sm:$0xf] %v1686_v25  ;;  %v845_v35 = vmax.f32 %v749_v27, 0.0  ;;  %v358_v37 = vrot.slane %v70_v20, 4 }
  0xa6   :  { %v1323_v34 = vsel %vm1270_vm0, %v1226_v26, -inf  ;;  %v847_v36 = vmax.f32 %v751_v28, 0.0  ;;  %v1037_v39 = vadd.f32 %v2108_v12, %v941_v31  ;;  %v360_v41 = vrot.slane %v72_v29, 4 }
  0xa7   :  { %v1324_v38 = vsel %vm1270_vm0, %v1228_v30, -inf  ;;  %v1039_v40 = vadd.f32 %v2108_v12, %v943_v32  ;;  %v550_v43 = vunpack.c.l.bf16 %v358_v37  ;;  %v650_v44 = vmul.f32 %v2098_v0, %v166_v24 }
  0xa8   :  { %v1325_v42 = vmax.f32 %v1323_v34, %v1324_v38  ;;  %v652_v45 = vmul.f32 %v2098_v0, %v168_v33  ;;  %v1133_v47 = vmax.f32 %v1037_v39, 0.0  ;;  %v552_v49 = vunpack.c.l.bf16 %v360_v41 }
  0xa9   :  { %v1135_v48 = vmax.f32 %v1039_v40, 0.0  ;;  %v169_v50 = vunpack.c.l.bf16 %v73_v46  ;;  %v750_v52 = vadd.f32 %v2108_v12, %v650_v44  ;;  %v942_v54 = vmul.f32 %v2098_v0, %v550_v43  ;;  %v79_v40 = vld [vmem:[%s2621_s0 + $0x210] sm:$0xff] }
  0xaa   :  { %v1687_v51 = vpack.c.bf16 %v1325_v42, %v1325_v42  ;;  %v752_v53 = vadd.f32 %v2108_v12, %v652_v45  ;;  %v1229_v56 = vmax.f32 %v845_v35, %v1133_v47  ;;  %v944_v58 = vmul.f32 %v2098_v0, %v552_v49 }
  0xab   :  { %v1231_v57 = vmax.f32 %v847_v36, %v1135_v48  ;;  %v171_v59 = vunpack.c.l.bf16 %v75_v55  ;;  %v846_v60 = vmax.f32 %v750_v52, 0.0  ;;  %v1038_v62 = vadd.f32 %v2108_v12, %v942_v54  ;;  %v77_v36 = vld [vmem:[%s2621_s0 + $0x200] sm:$0xff] }
  0xac   :  { %1585 = vst [vmem:[%s2623_s2 + $0x6c] sm:$0x3] %v1687_v51  ;;  %v848_v61 = vmax.f32 %v752_v53, 0.0  ;;  %v361_v63 = vrot.slane %v73_v46, 4  ;;  %v1040_v2 = vadd.f32 %v2108_v12, %v944_v58  ;;  %v363_v3 = vrot.slane %v75_v55, 4 }
  0xad   :  { %v1326_v1 = vmax.f32 %v1229_v56, %v1231_v57  ;;  %v653_v4 = vmul.f32 %v2098_v0, %v169_v50  ;;  %v1134_v6 = vmax.f32 %v1038_v62, 0.0  ;;  %v655_v7 = vmul.f32 %v2098_v0, %v171_v59  ;;  %v78_v58 = vld [vmem:[%s2621_s0 + $0x208] sm:$0x33] }
  0xae   :  { %v553_v8 = vunpack.c.l.bf16 %v361_v63  ;;  %v170_v9 = vunpack.c.l.bf16 %v74_v5  ;;  %v1136_v11 = vmax.f32 %v1040_v2, 0.0  ;;  %v555_v13 = vunpack.c.l.bf16 %v363_v3 }
  0xaf   :  { %v1688_v10 = vpack.c.bf16 %v1326_v1, %v1326_v1  ;;  %v753_v14 = vadd.f32 %v2108_v12, %v653_v4  ;;  %v1230_v16 = vmax.f32 %v846_v60, %v1134_v6  ;;  %v755_v17 = vadd.f32 %v2108_v12, %v655_v7  ;;  %v80_v4 = vld [vmem:[%s2621_s0 + $0x218] sm:$0x33] }
  0xb0   :  { %v945_v18 = vmul.f32 %v2098_v0, %v553_v8  ;;  %v172_v19 = vunpack.c.l.bf16 %v76_v15  ;;  %v1232_v20 = vmax.f32 %v848_v61, %v1136_v11  ;;  %v947_v22 = vmul.f32 %v2098_v0, %v555_v13 }
  0xb1   :  { %1586 = vst [vmem:[%s2623_s2 + $0x70] sm:$0xf] %v1688_v10  ;;  %v849_v21 = vmax.f32 %v753_v14, 0.0  ;;  %v362_v23 = vrot.slane %v74_v5, 4  ;;  %v1327_v24 = vsel %vm1270_vm0, %v1230_v16, -inf  ;;  %v851_v25 = vmax.f32 %v755_v17, 0.0 }
  0xb2   :  { %v1041_v26 = vadd.f32 %v2108_v12, %v945_v18  ;;  %v364_v27 = vrot.slane %v76_v15, 4  ;;  %v1328_v28 = vsel %vm1270_vm0, %v1232_v20, -inf  ;;  %v1043_v29 = vadd.f32 %v2108_v12, %v947_v22  ;;  %v81_v22 = vld [vmem:[%s2621_s0 + $0x220] sm:$0xff] }
  0xb3   :  { %v554_v30 = vunpack.c.l.bf16 %v362_v23  ;;  %v654_v31 = vmul.f32 %v2098_v0, %v170_v9  ;;  %v1329_v32 = vmax.f32 %v1327_v24, %v1328_v28  ;;  %v656_v35 = vmul.f32 %v2098_v0, %v172_v19 }
  0xb4   :  { %v1137_v33 = vmax.f32 %v1041_v26, 0.0  ;;  %v556_v34 = vunpack.c.l.bf16 %v364_v27  ;;  %v1139_v37 = vmax.f32 %v1043_v29, 0.0  ;;  %v173_v41 = vunpack.c.l.bf16 %v77_v36 }
  0xb5   :  { %v754_v38 = vadd.f32 %v2108_v12, %v654_v31  ;;  %v946_v39 = vmul.f32 %v2098_v0, %v554_v30  ;;  %v1689_v42 = vpack.c.bf16 %v1329_v32, %v1329_v32  ;;  %v756_v44 = vadd.f32 %v2108_v12, %v656_v35  ;;  %v83_v31 = vld [vmem:[%s2621_s0 + $0x230] sm:$0xff] }
  0xb6   :  { %v1233_v43 = vmax.f32 %v849_v21, %v1137_v33  ;;  %v948_v45 = vmul.f32 %v2098_v0, %v556_v34  ;;  %v1235_v46 = vmax.f32 %v851_v25, %v1139_v37  ;;  %v175_v49 = vunpack.c.l.bf16 %v79_v40 }
  0xb7   :  { %v850_v47 = vmax.f32 %v754_v38, 0.0  ;;  %v1042_v48 = vadd.f32 %v2108_v12, %v946_v39  ;;  %1587 = vst [vmem:[%s2623_s2 + $0x74] sm:$0x3] %v1689_v42  ;;  %v852_v50 = vmax.f32 %v756_v44, 0.0  ;;  %v365_v52 = vrot.slane %v77_v36, 4 }
  0xb8   :  { %v1044_v51 = vadd.f32 %v2108_v12, %v948_v45  ;;  %v367_v53 = vrot.slane %v79_v40, 4  ;;  %v1330_v54 = vmax.f32 %v1233_v43, %v1235_v46  ;;  %v657_v56 = vmul.f32 %v2098_v0, %v173_v41  ;;  %v82_v44 = vld [vmem:[%s2621_s0 + $0x228] sm:$0x33] }
  0xb9   :  { %v1138_v55 = vmax.f32 %v1042_v48, 0.0  ;;  %v659_v57 = vmul.f32 %v2098_v0, %v175_v49  ;;  %v557_v60 = vunpack.c.l.bf16 %v365_v52  ;;  %v174_v62 = vunpack.c.l.bf16 %v78_v58 }
  0xba   :  { %v1140_v59 = vmax.f32 %v1044_v51, 0.0  ;;  %v559_v61 = vunpack.c.l.bf16 %v367_v53  ;;  %v1690_v63 = vpack.c.bf16 %v1330_v54, %v1330_v54  ;;  %v757_v2 = vadd.f32 %v2108_v12, %v657_v56  ;;  %v84_v53 = vld [vmem:[%s2621_s0 + $0x238] sm:$0x33] }
  0xbb   :  { %v1234_v1 = vmax.f32 %v850_v47, %v1138_v55  ;;  %v759_v3 = vadd.f32 %v2108_v12, %v659_v57  ;;  %v949_v6 = vmul.f32 %v2098_v0, %v557_v60  ;;  %v176_v7 = vunpack.c.l.bf16 %v80_v4 }
  0xbc   :  { %v1236_v5 = vmax.f32 %v852_v50, %v1140_v59  ;;  %v951_v8 = vmul.f32 %v2098_v0, %v559_v61  ;;  %1588 = vst [vmem:[%s2623_s2 + $0x78] sm:$0xf] %v1690_v63  ;;  %v853_v10 = vmax.f32 %v757_v2, 0.0  ;;  %v366_v13 = vrot.slane %v78_v58, 4 }
  0xbd   :  { %v1331_v9 = vsel %vm1270_vm0, %v1234_v1, -inf  ;;  %v855_v11 = vmax.f32 %v759_v3, 0.0  ;;  %v1045_v15 = vadd.f32 %v2108_v12, %v949_v6  ;;  %v368_v17 = vrot.slane %v80_v4, 4 }
  0xbe   :  { %v1332_v14 = vsel %vm1270_vm0, %v1236_v5, -inf  ;;  %v1047_v16 = vadd.f32 %v2108_v12, %v951_v8  ;;  %v558_v19 = vunpack.c.l.bf16 %v366_v13  ;;  %v658_v20 = vmul.f32 %v2098_v0, %v174_v62 }
  0xbf   :  { %v1333_v18 = vmax.f32 %v1331_v9, %v1332_v14  ;;  %v660_v21 = vmul.f32 %v2098_v0, %v176_v7  ;;  %v1141_v23 = vmax.f32 %v1045_v15, 0.0  ;;  %v560_v25 = vunpack.c.l.bf16 %v368_v17 }
  0xc0   :  { %v1143_v24 = vmax.f32 %v1047_v16, 0.0  ;;  %v177_v26 = vunpack.c.l.bf16 %v81_v22  ;;  %v758_v28 = vadd.f32 %v2108_v12, %v658_v20  ;;  %v950_v30 = vmul.f32 %v2098_v0, %v558_v19  ;;  %v87_v16 = vld [vmem:[%s2621_s0 + $0x250] sm:$0xff] }
  0xc1   :  { %v1691_v27 = vpack.c.bf16 %v1333_v18, %v1333_v18  ;;  %v760_v29 = vadd.f32 %v2108_v12, %v660_v21  ;;  %v1237_v32 = vmax.f32 %v853_v10, %v1141_v23  ;;  %v952_v34 = vmul.f32 %v2098_v0, %v560_v25 }
  0xc2   :  { %v1239_v33 = vmax.f32 %v855_v11, %v1143_v24  ;;  %v179_v35 = vunpack.c.l.bf16 %v83_v31  ;;  %v854_v36 = vmax.f32 %v758_v28, 0.0  ;;  %v1046_v38 = vadd.f32 %v2108_v12, %v950_v30  ;;  %v85_v11 = vld [vmem:[%s2621_s0 + $0x240] sm:$0xff] }
  0xc3   :  { %1589 = vst [vmem:[%s2623_s2 + $0x7c] sm:$0x3] %v1691_v27  ;;  %v856_v37 = vmax.f32 %v760_v29, 0.0  ;;  %v369_v39 = vrot.slane %v81_v22, 4  ;;  %v1048_v41 = vadd.f32 %v2108_v12, %v952_v34  ;;  %v371_v42 = vrot.slane %v83_v31, 4 }
  0xc4   :  { %v1334_v40 = vmax.f32 %v1237_v32, %v1239_v33  ;;  %v661_v43 = vmul.f32 %v2098_v0, %v177_v26  ;;  %v1142_v45 = vmax.f32 %v1046_v38, 0.0  ;;  %v663_v47 = vmul.f32 %v2098_v0, %v179_v35  ;;  %v86_v34 = vld [vmem:[%s2621_s0 + $0x248] sm:$0x33] }
  0xc5   :  { %v561_v46 = vunpack.c.l.bf16 %v369_v39  ;;  %v178_v48 = vunpack.c.l.bf16 %v82_v44  ;;  %v1144_v50 = vmax.f32 %v1048_v41, 0.0  ;;  %v563_v51 = vunpack.c.l.bf16 %v371_v42 }
  0xc6   :  { %v1692_v49 = vpack.c.bf16 %v1334_v40, %v1334_v40  ;;  %v761_v52 = vadd.f32 %v2108_v12, %v661_v43  ;;  %v1238_v54 = vmax.f32 %v854_v36, %v1142_v45  ;;  %v763_v55 = vadd.f32 %v2108_v12, %v663_v47  ;;  %v88_v43 = vld [vmem:[%s2621_s0 + $0x258] sm:$0x33] }
  0xc7   :  { %v953_v56 = vmul.f32 %v2098_v0, %v561_v46  ;;  %v180_v57 = vunpack.c.l.bf16 %v84_v53  ;;  %v1240_v58 = vmax.f32 %v856_v37, %v1144_v50  ;;  %v955_v60 = vmul.f32 %v2098_v0, %v563_v51 }
  0xc8   :  { %1590 = vst [vmem:[%s2623_s2 + $0x80] sm:$0xf] %v1692_v49  ;;  %v857_v59 = vmax.f32 %v761_v52, 0.0  ;;  %v370_v61 = vrot.slane %v82_v44, 4  ;;  %v1335_v62 = vsel %vm1270_vm0, %v1238_v54, -inf  ;;  %v859_v63 = vmax.f32 %v763_v55, 0.0 }
  0xc9   :  { %v1049_v1 = vadd.f32 %v2108_v12, %v953_v56  ;;  %v372_v2 = vrot.slane %v84_v53, 4  ;;  %v1336_v3 = vsel %vm1270_vm0, %v1240_v58, -inf  ;;  %v1051_v4 = vadd.f32 %v2108_v12, %v955_v60  ;;  %v89_v60 = vld [vmem:[%s2621_s0 + $0x260] sm:$0xff] }
  0xca   :  { %v562_v5 = vunpack.c.l.bf16 %v370_v61  ;;  %v662_v6 = vmul.f32 %v2098_v0, %v178_v48  ;;  %v1337_v8 = vmax.f32 %v1335_v62, %v1336_v3  ;;  %v664_v10 = vmul.f32 %v2098_v0, %v180_v57 }
  0xcb   :  { %v1145_v7 = vmax.f32 %v1049_v1, 0.0  ;;  %v564_v9 = vunpack.c.l.bf16 %v372_v2  ;;  %v1147_v13 = vmax.f32 %v1051_v4, 0.0  ;;  %v181_v17 = vunpack.c.l.bf16 %v85_v11 }
  0xcc   :  { %v762_v14 = vadd.f32 %v2108_v12, %v662_v6  ;;  %v954_v15 = vmul.f32 %v2098_v0, %v562_v5  ;;  %v1693_v18 = vpack.c.bf16 %v1337_v8, %v1337_v8  ;;  %v764_v20 = vadd.f32 %v2108_v12, %v664_v10  ;;  %v91_v6 = vld [vmem:[%s2621_s0 + $0x270] sm:$0xff] }
  0xcd   :  { %v1241_v19 = vmax.f32 %v857_v59, %v1145_v7  ;;  %v956_v21 = vmul.f32 %v2098_v0, %v564_v9  ;;  %v1243_v22 = vmax.f32 %v859_v63, %v1147_v13  ;;  %v183_v25 = vunpack.c.l.bf16 %v87_v16 }
  0xce   :  { %v858_v23 = vmax.f32 %v762_v14, 0.0  ;;  %v1050_v24 = vadd.f32 %v2108_v12, %v954_v15  ;;  %1591 = vst [vmem:[%s2623_s2 + $0x84] sm:$0x3] %v1693_v18  ;;  %v860_v26 = vmax.f32 %v764_v20, 0.0  ;;  %v373_v28 = vrot.slane %v85_v11, 4 }
  0xcf   :  { %v1052_v27 = vadd.f32 %v2108_v12, %v956_v21  ;;  %v375_v29 = vrot.slane %v87_v16, 4  ;;  %v1338_v30 = vmax.f32 %v1241_v19, %v1243_v22  ;;  %v665_v32 = vmul.f32 %v2098_v0, %v181_v17  ;;  %v90_v20 = vld [vmem:[%s2621_s0 + $0x268] sm:$0x33] }
  0xd0   :  { %v1146_v31 = vmax.f32 %v1050_v24, 0.0  ;;  %v667_v33 = vmul.f32 %v2098_v0, %v183_v25  ;;  %v565_v36 = vunpack.c.l.bf16 %v373_v28  ;;  %v182_v38 = vunpack.c.l.bf16 %v86_v34 }
  0xd1   :  { %v1148_v35 = vmax.f32 %v1052_v27, 0.0  ;;  %v567_v37 = vunpack.c.l.bf16 %v375_v29  ;;  %v1694_v39 = vpack.c.bf16 %v1338_v30, %v1338_v30  ;;  %v765_v41 = vadd.f32 %v2108_v12, %v665_v32  ;;  %v92_v29 = vld [vmem:[%s2621_s0 + $0x278] sm:$0x33] }
  0xd2   :  { %v1242_v40 = vmax.f32 %v858_v23, %v1146_v31  ;;  %v767_v42 = vadd.f32 %v2108_v12, %v667_v33  ;;  %v957_v45 = vmul.f32 %v2098_v0, %v565_v36  ;;  %v184_v47 = vunpack.c.l.bf16 %v88_v43 }
  0xd3   :  { %v1244_v44 = vmax.f32 %v860_v26, %v1148_v35  ;;  %v959_v46 = vmul.f32 %v2098_v0, %v567_v37  ;;  %1592 = vst [vmem:[%s2623_s2 + $0x88] sm:$0xf] %v1694_v39  ;;  %v861_v49 = vmax.f32 %v765_v41, 0.0  ;;  %v374_v51 = vrot.slane %v86_v34, 4 }
  0xd4   :  { %v1339_v48 = vsel %vm1270_vm0, %v1242_v40, -inf  ;;  %v863_v50 = vmax.f32 %v767_v42, 0.0  ;;  %v1053_v53 = vadd.f32 %v2108_v12, %v957_v45  ;;  %v376_v55 = vrot.slane %v88_v43, 4 }
  0xd5   :  { %v1340_v52 = vsel %vm1270_vm0, %v1244_v44, -inf  ;;  %v1055_v54 = vadd.f32 %v2108_v12, %v959_v46  ;;  %v566_v57 = vunpack.c.l.bf16 %v374_v51  ;;  %v666_v58 = vmul.f32 %v2098_v0, %v182_v38 }
  0xd6   :  { %v1341_v56 = vmax.f32 %v1339_v48, %v1340_v52  ;;  %v668_v59 = vmul.f32 %v2098_v0, %v184_v47  ;;  %v1149_v61 = vmax.f32 %v1053_v53, 0.0  ;;  %v568_v63 = vunpack.c.l.bf16 %v376_v55 }
  0xd7   :  { %v1151_v62 = vmax.f32 %v1055_v54, 0.0  ;;  %v185_v1 = vunpack.c.l.bf16 %v89_v60  ;;  %v766_v3 = vadd.f32 %v2108_v12, %v666_v58  ;;  %v958_v5 = vmul.f32 %v2098_v0, %v566_v57  ;;  %v95_v54 = vld [vmem:[%s2621_s0 + $0x290] sm:$0xff] }
  0xd8   :  { %v1695_v2 = vpack.c.bf16 %v1341_v56, %v1341_v56  ;;  %v768_v4 = vadd.f32 %v2108_v12, %v668_v59  ;;  %v1245_v8 = vmax.f32 %v861_v49, %v1149_v61  ;;  %v960_v9 = vmul.f32 %v2098_v0, %v568_v63 }
  0xd9   :  { %v1247_v7 = vmax.f32 %v863_v50, %v1151_v62  ;;  %v187_v10 = vunpack.c.l.bf16 %v91_v6  ;;  %v862_v11 = vmax.f32 %v766_v3, 0.0  ;;  %v1054_v14 = vadd.f32 %v2108_v12, %v958_v5  ;;  %v93_v50 = vld [vmem:[%s2621_s0 + $0x280] sm:$0xff] }
  0xda   :  { %1593 = vst [vmem:[%s2623_s2 + $0x8c] sm:$0x3] %v1695_v2  ;;  %v864_v13 = vmax.f32 %v768_v4, 0.0  ;;  %v377_v15 = vrot.slane %v89_v60, 4  ;;  %v1056_v17 = vadd.f32 %v2108_v12, %v960_v9  ;;  %v379_v18 = vrot.slane %v91_v6, 4 }
  0xdb   :  { %v1342_v16 = vmax.f32 %v1245_v8, %v1247_v7  ;;  %v669_v19 = vmul.f32 %v2098_v0, %v185_v1  ;;  %v1150_v21 = vmax.f32 %v1054_v14, 0.0  ;;  %v671_v23 = vmul.f32 %v2098_v0, %v187_v10  ;;  %v94_v9 = vld [vmem:[%s2621_s0 + $0x288] sm:$0x33] }
  0xdc   :  { %v569_v22 = vunpack.c.l.bf16 %v377_v15  ;;  %v186_v24 = vunpack.c.l.bf16 %v90_v20  ;;  %v1152_v26 = vmax.f32 %v1056_v17, 0.0  ;;  %v571_v27 = vunpack.c.l.bf16 %v379_v18 }
  0xdd   :  { %v1696_v25 = vpack.c.bf16 %v1342_v16, %v1342_v16  ;;  %v769_v28 = vadd.f32 %v2108_v12, %v669_v19  ;;  %v1246_v30 = vmax.f32 %v862_v11, %v1150_v21  ;;  %v771_v31 = vadd.f32 %v2108_v12, %v671_v23  ;;  %v2478_v16 = vld [vmem:[%s2622_s1 + $0x1] ss:$0 sm:$0xff]  ;;  %v96_v19 = vld [vmem:[%s2621_s0 + $0x298] sm:$0x33] }
  0xde   :  { %v961_v32 = vmul.f32 %v2098_v0, %v569_v22  ;;  %v188_v33 = vunpack.c.l.bf16 %v92_v29  ;;  %v1248_v34 = vmax.f32 %v864_v13, %v1152_v26  ;;  %v963_v36 = vmul.f32 %v2098_v0, %v571_v27 }
  0xdf   :  { %1594 = vst [vmem:[%s2623_s2 + $0x90] sm:$0xf] %v1696_v25  ;;  %v865_v35 = vmax.f32 %v769_v28, 0.0  ;;  %v378_v37 = vrot.slane %v90_v20, 4  ;;  %v1343_v38 = vsel %vm1270_vm0, %v1246_v30, -inf  ;;  %v867_v39 = vmax.f32 %v771_v31, 0.0 }
  0xe0   :  { %v1057_v40 = vadd.f32 %v2108_v12, %v961_v32  ;;  %v380_v41 = vrot.slane %v92_v29, 4  ;;  %v1344_v42 = vsel %vm1270_vm0, %v1248_v34, -inf  ;;  %v1059_v43 = vadd.f32 %v2108_v12, %v963_v36  ;;  %v97_v36 = vld [vmem:[%s2621_s0 + $0x2a0] sm:$0xff] }
  0xe1   :  { %v570_v44 = vunpack.c.l.bf16 %v378_v37  ;;  %v670_v45 = vmul.f32 %v2098_v0, %v186_v24  ;;  %v1345_v46 = vmax.f32 %v1343_v38, %v1344_v42  ;;  %v672_v49 = vmul.f32 %v2098_v0, %v188_v33 }
  0xe2   :  { %v1153_v47 = vmax.f32 %v1057_v40, 0.0  ;;  %v572_v48 = vunpack.c.l.bf16 %v380_v41  ;;  %v1155_v51 = vmax.f32 %v1059_v43, 0.0  ;;  %v189_v55 = vunpack.c.l.bf16 %v93_v50 }
  0xe3   :  { %v770_v52 = vadd.f32 %v2108_v12, %v670_v45  ;;  %v962_v53 = vmul.f32 %v2098_v0, %v570_v44  ;;  %v1697_v56 = vpack.c.bf16 %v1345_v46, %v1345_v46  ;;  %v772_v58 = vadd.f32 %v2108_v12, %v672_v49  ;;  %v99_v45 = vld [vmem:[%s2621_s0 + $0x2b0] sm:$0xff] }
  0xe4   :  { %v1249_v57 = vmax.f32 %v865_v35, %v1153_v47  ;;  %v964_v59 = vmul.f32 %v2098_v0, %v572_v48  ;;  %v1251_v60 = vmax.f32 %v867_v39, %v1155_v51  ;;  %v191_v63 = vunpack.c.l.bf16 %v95_v54  ;;  %v2468_v0 = vld [vmem:[%s2622_s1] ss:$0 sm:$0xff] }
  0xe5   :  { %v866_v61 = vmax.f32 %v770_v52, 0.0  ;;  %v1058_v62 = vadd.f32 %v2108_v12, %v962_v53  ;;  %1595 = vst [vmem:[%s2623_s2 + $0x94] sm:$0x3] %v1697_v56  ;;  %v868_v1 = vmax.f32 %v772_v58, 0.0  ;;  %v381_v3 = vrot.slane %v93_v50, 4 }
  0xe6   :  { %v1060_v2 = vadd.f32 %v2108_v12, %v964_v59  ;;  %v383_v4 = vrot.slane %v95_v54, 4  ;;  %v1346_v5 = vmax.f32 %v1249_v57, %v1251_v60  ;;  %v673_v8 = vmul.f32 %v2468_v0, %v189_v55  ;;  %v98_v58 = vld [vmem:[%s2621_s0 + $0x2a8] sm:$0x33] }
  0xe7   :  { %v1154_v6 = vmax.f32 %v1058_v62, 0.0  ;;  %v675_v7 = vmul.f32 %v2468_v0, %v191_v63  ;;  %v573_v11 = vunpack.c.l.bf16 %v381_v3  ;;  %v190_v13 = vunpack.c.l.bf16 %v94_v9 }
  0xe8   :  { %v1156_v10 = vmax.f32 %v1060_v2, 0.0  ;;  %v575_v12 = vunpack.c.l.bf16 %v383_v4  ;;  %v1698_v14 = vpack.c.bf16 %v1346_v5, %v1346_v5  ;;  %v773_v17 = vadd.f32 %v2478_v16, %v673_v8  ;;  %v100_v4 = vld [vmem:[%s2621_s0 + $0x2b8] sm:$0x33] }
  0xe9   :  { %v1250_v15 = vmax.f32 %v866_v61, %v1154_v6  ;;  %v775_v18 = vadd.f32 %v2478_v16, %v675_v7  ;;  %v965_v21 = vmul.f32 %v2468_v0, %v573_v11  ;;  %v192_v23 = vunpack.c.l.bf16 %v96_v19 }
  0xea   :  { %v1252_v20 = vmax.f32 %v868_v1, %v1156_v10  ;;  %v967_v22 = vmul.f32 %v2468_v0, %v575_v12  ;;  %1596 = vst [vmem:[%s2623_s2 + $0x98] sm:$0xf] %v1698_v14  ;;  %v869_v25 = vmax.f32 %v773_v17, 0.0  ;;  %v382_v27 = vrot.slane %v94_v9, 4 }
  0xeb   :  { %v1347_v24 = vsel %vm1270_vm0, %v1250_v15, -inf  ;;  %v871_v26 = vmax.f32 %v775_v18, 0.0  ;;  %v1061_v29 = vadd.f32 %v2478_v16, %v965_v21  ;;  %v384_v31 = vrot.slane %v96_v19, 4 }
  0xec   :  { %v1348_v28 = vsel %vm1270_vm0, %v1252_v20, -inf  ;;  %v1063_v30 = vadd.f32 %v2478_v16, %v967_v22  ;;  %v574_v33 = vunpack.c.l.bf16 %v382_v27  ;;  %v674_v34 = vmul.f32 %v2468_v0, %v190_v13 }
  0xed   :  { %v1349_v32 = vmax.f32 %v1347_v24, %v1348_v28  ;;  %v676_v35 = vmul.f32 %v2468_v0, %v192_v23  ;;  %v1157_v37 = vmax.f32 %v1061_v29, 0.0  ;;  %v576_v39 = vunpack.c.l.bf16 %v384_v31 }
  0xee   :  { %v1159_v38 = vmax.f32 %v1063_v30, 0.0  ;;  %v193_v40 = vunpack.c.l.bf16 %v97_v36  ;;  %v774_v42 = vadd.f32 %v2478_v16, %v674_v34  ;;  %v966_v44 = vmul.f32 %v2468_v0, %v574_v33  ;;  %v103_v30 = vld [vmem:[%s2621_s0 + $0x2d0] sm:$0xff] }
  0xef   :  { %v1699_v41 = vpack.c.bf16 %v1349_v32, %v1349_v32  ;;  %v776_v43 = vadd.f32 %v2478_v16, %v676_v35  ;;  %v1253_v46 = vmax.f32 %v869_v25, %v1157_v37  ;;  %v968_v48 = vmul.f32 %v2468_v0, %v576_v39 }
  0xf0   :  { %v1255_v47 = vmax.f32 %v871_v26, %v1159_v38  ;;  %v195_v49 = vunpack.c.l.bf16 %v99_v45  ;;  %v870_v50 = vmax.f32 %v774_v42, 0.0  ;;  %v1062_v52 = vadd.f32 %v2478_v16, %v966_v44  ;;  %v101_v26 = vld [vmem:[%s2621_s0 + $0x2c0] sm:$0xff] }
  0xf1   :  { %1597 = vst [vmem:[%s2623_s2 + $0x9c] sm:$0x3] %v1699_v41  ;;  %v872_v51 = vmax.f32 %v776_v43, 0.0  ;;  %v385_v53 = vrot.slane %v97_v36, 4  ;;  %v1064_v55 = vadd.f32 %v2478_v16, %v968_v48  ;;  %v387_v56 = vrot.slane %v99_v45, 4 }
  0xf2   :  { %v1350_v54 = vmax.f32 %v1253_v46, %v1255_v47  ;;  %v677_v57 = vmul.f32 %v2468_v0, %v193_v40  ;;  %v1158_v59 = vmax.f32 %v1062_v52, 0.0  ;;  %v679_v61 = vmul.f32 %v2468_v0, %v195_v49  ;;  %v102_v48 = vld [vmem:[%s2621_s0 + $0x2c8] sm:$0x33] }
  0xf3   :  { %v577_v60 = vunpack.c.l.bf16 %v385_v53  ;;  %v194_v62 = vunpack.c.l.bf16 %v98_v58  ;;  %v1160_v1 = vmax.f32 %v1064_v55, 0.0  ;;  %v579_v2 = vunpack.c.l.bf16 %v387_v56 }
  0xf4   :  { %v1700_v63 = vpack.c.bf16 %v1350_v54, %v1350_v54  ;;  %v777_v3 = vadd.f32 %v2478_v16, %v677_v57  ;;  %v1254_v5 = vmax.f32 %v870_v50, %v1158_v59  ;;  %v779_v6 = vadd.f32 %v2478_v16, %v679_v61  ;;  %v104_v57 = vld [vmem:[%s2621_s0 + $0x2d8] sm:$0x33] }
  0xf5   :  { %v969_v8 = vmul.f32 %v2468_v0, %v577_v60  ;;  %v196_v7 = vunpack.c.l.bf16 %v100_v4  ;;  %v1256_v9 = vmax.f32 %v872_v51, %v1160_v1  ;;  %v971_v11 = vmul.f32 %v2468_v0, %v579_v2 }
  0xf6   :  { %1598 = vst [vmem:[%s2623_s2 + $0xa0] sm:$0xf] %v1700_v63  ;;  %v873_v10 = vmax.f32 %v777_v3, 0.0  ;;  %v386_v12 = vrot.slane %v98_v58, 4  ;;  %v1351_v13 = vsel %vm1270_vm0, %v1254_v5, -inf  ;;  %v875_v14 = vmax.f32 %v779_v6, 0.0 }
  0xf7   :  { %v1065_v15 = vadd.f32 %v2478_v16, %v969_v8  ;;  %v388_v17 = vrot.slane %v100_v4, 4  ;;  %v1352_v18 = vsel %vm1270_vm0, %v1256_v9, -inf  ;;  %v1067_v19 = vadd.f32 %v2478_v16, %v971_v11  ;;  %v105_v11 = vld [vmem:[%s2621_s0 + $0x2e0] sm:$0xff] }
  0xf8   :  { %v578_v20 = vunpack.c.l.bf16 %v386_v12  ;;  %v678_v21 = vmul.f32 %v2468_v0, %v194_v62  ;;  %v1353_v22 = vmax.f32 %v1351_v13, %v1352_v18  ;;  %v680_v25 = vmul.f32 %v2468_v0, %v196_v7 }
  0xf9   :  { %v1161_v23 = vmax.f32 %v1065_v15, 0.0  ;;  %v580_v24 = vunpack.c.l.bf16 %v388_v17  ;;  %v1163_v27 = vmax.f32 %v1067_v19, 0.0  ;;  %v197_v31 = vunpack.c.l.bf16 %v101_v26 }
  0xfa   :  { %v778_v28 = vadd.f32 %v2478_v16, %v678_v21  ;;  %v970_v29 = vmul.f32 %v2468_v0, %v578_v20  ;;  %v1701_v32 = vpack.c.bf16 %v1353_v22, %v1353_v22  ;;  %v780_v34 = vadd.f32 %v2478_v16, %v680_v25  ;;  %v107_v21 = vld [vmem:[%s2621_s0 + $0x2f0] sm:$0xff] }
  0xfb   :  { %v1257_v33 = vmax.f32 %v873_v10, %v1161_v23  ;;  %v972_v35 = vmul.f32 %v2468_v0, %v580_v24  ;;  %v1259_v36 = vmax.f32 %v875_v14, %v1163_v27  ;;  %v199_v39 = vunpack.c.l.bf16 %v103_v30 }
  0xfc   :  { %v874_v37 = vmax.f32 %v778_v28, 0.0  ;;  %v1066_v38 = vadd.f32 %v2478_v16, %v970_v29  ;;  %1599 = vst [vmem:[%s2623_s2 + $0xa4] sm:$0x3] %v1701_v32  ;;  %v876_v40 = vmax.f32 %v780_v34, 0.0  ;;  %v389_v42 = vrot.slane %v101_v26, 4 }
  0xfd   :  { %v1068_v41 = vadd.f32 %v2478_v16, %v972_v35  ;;  %v391_v43 = vrot.slane %v103_v30, 4  ;;  %v1354_v44 = vmax.f32 %v1257_v33, %v1259_v36  ;;  %v681_v46 = vmul.f32 %v2468_v0, %v197_v31  ;;  %v106_v34 = vld [vmem:[%s2621_s0 + $0x2e8] sm:$0x33] }
  0xfe   :  { %v1162_v45 = vmax.f32 %v1066_v38, 0.0  ;;  %v683_v47 = vmul.f32 %v2468_v0, %v199_v39  ;;  %v581_v50 = vunpack.c.l.bf16 %v389_v42  ;;  %v198_v52 = vunpack.c.l.bf16 %v102_v48 }
  0xff   :  { %v1164_v49 = vmax.f32 %v1068_v41, 0.0  ;;  %v583_v51 = vunpack.c.l.bf16 %v391_v43  ;;  %v1702_v53 = vpack.c.bf16 %v1354_v44, %v1354_v44  ;;  %v781_v55 = vadd.f32 %v2478_v16, %v681_v46  ;;  %v108_v43 = vld [vmem:[%s2621_s0 + $0x2f8] sm:$0x33] }
 0x100   :  { %v1258_v54 = vmax.f32 %v874_v37, %v1162_v45  ;;  %v783_v56 = vadd.f32 %v2478_v16, %v683_v47  ;;  %v973_v59 = vmul.f32 %v2468_v0, %v581_v50  ;;  %v200_v61 = vunpack.c.l.bf16 %v104_v57 }
 0x101   :  { %v1260_v58 = vmax.f32 %v876_v40, %v1164_v49  ;;  %v975_v60 = vmul.f32 %v2468_v0, %v583_v51  ;;  %1600 = vst [vmem:[%s2623_s2 + $0xa8] sm:$0xf] %v1702_v53  ;;  %v877_v63 = vmax.f32 %v781_v55, 0.0  ;;  %v390_v2 = vrot.slane %v102_v48, 4 }
 0x102   :  { %v1355_v62 = vsel %vm1270_vm0, %v1258_v54, -inf  ;;  %v879_v1 = vmax.f32 %v783_v56, 0.0  ;;  %v1069_v4 = vadd.f32 %v2478_v16, %v973_v59  ;;  %v392_v6 = vrot.slane %v104_v57, 4 }
 0x103   :  { %v1356_v3 = vsel %vm1270_vm0, %v1260_v58, -inf  ;;  %v1071_v5 = vadd.f32 %v2478_v16, %v975_v60  ;;  %v582_v7 = vunpack.c.l.bf16 %v390_v2  ;;  %v682_v9 = vmul.f32 %v2468_v0, %v198_v52 }
 0x104   :  { %v1357_v8 = vmax.f32 %v1355_v62, %v1356_v3  ;;  %v684_v10 = vmul.f32 %v2468_v0, %v200_v61  ;;  %v1165_v12 = vmax.f32 %v1069_v4, 0.0  ;;  %v584_v14 = vunpack.c.l.bf16 %v392_v6 }
 0x105   :  { %v1167_v13 = vmax.f32 %v1071_v5, 0.0  ;;  %v201_v15 = vunpack.c.l.bf16 %v105_v11  ;;  %v782_v18 = vadd.f32 %v2478_v16, %v682_v9  ;;  %v974_v20 = vmul.f32 %v2468_v0, %v582_v7 }
 0x106   :  { %v1703_v17 = vpack.c.bf16 %v1357_v8, %v1357_v8  ;;  %v784_v19 = vadd.f32 %v2478_v16, %v684_v10  ;;  %v1261_v22 = vmax.f32 %v877_v63, %v1165_v12  ;;  %v976_v24 = vmul.f32 %v2468_v0, %v584_v14 }
 0x107   :  { %v1263_v23 = vmax.f32 %v879_v1, %v1167_v13  ;;  %v203_v25 = vunpack.c.l.bf16 %v107_v21  ;;  %v878_v26 = vmax.f32 %v782_v18, 0.0  ;;  %v1070_v28 = vadd.f32 %v2478_v16, %v974_v20 }
 0x108   :  { %1601 = vst [vmem:[%s2623_s2 + $0xac] sm:$0x3] %v1703_v17  ;;  %v880_v27 = vmax.f32 %v784_v19, 0.0  ;;  %v393_v29 = vrot.slane %v105_v11, 4  ;;  %v1072_v31 = vadd.f32 %v2478_v16, %v976_v24  ;;  %v395_v32 = vrot.slane %v107_v21, 4 }
 0x109   :  { %v1358_v30 = vmax.f32 %v1261_v22, %v1263_v23  ;;  %v685_v33 = vmul.f32 %v2468_v0, %v201_v15  ;;  %v1166_v35 = vmax.f32 %v1070_v28, 0.0  ;;  %v687_v37 = vmul.f32 %v2468_v0, %v203_v25 }
 0x10a   :  { %v585_v36 = vunpack.c.l.bf16 %v393_v29  ;;  %v202_v38 = vunpack.c.l.bf16 %v106_v34  ;;  %v1168_v40 = vmax.f32 %v1072_v31, 0.0  ;;  %v587_v41 = vunpack.c.l.bf16 %v395_v32 }
 0x10b   :  { %v1704_v39 = vpack.c.bf16 %v1358_v30, %v1358_v30  ;;  %v785_v42 = vadd.f32 %v2478_v16, %v685_v33  ;;  %v1262_v44 = vmax.f32 %v878_v26, %v1166_v35  ;;  %v787_v45 = vadd.f32 %v2478_v16, %v687_v37 }
 0x10c   :  { %v977_v46 = vmul.f32 %v2468_v0, %v585_v36  ;;  %v204_v47 = vunpack.c.l.bf16 %v108_v43  ;;  %v1264_v48 = vmax.f32 %v880_v27, %v1168_v40  ;;  %v979_v50 = vmul.f32 %v2468_v0, %v587_v41 }
 0x10d   :  { %1602 = vst [vmem:[%s2623_s2 + $0xb0] sm:$0xf] %v1704_v39  ;;  %v881_v49 = vmax.f32 %v785_v42, 0.0  ;;  %v394_v51 = vrot.slane %v106_v34, 4  ;;  %v1359_v52 = vsel %vm1270_vm0, %v1262_v44, -inf  ;;  %v883_v53 = vmax.f32 %v787_v45, 0.0 }
 0x10e   :  { %v1073_v54 = vadd.f32 %v2478_v16, %v977_v46  ;;  %v396_v55 = vrot.slane %v108_v43, 4  ;;  %v1360_v56 = vsel %vm1270_vm0, %v1264_v48, -inf  ;;  %v1075_v57 = vadd.f32 %v2478_v16, %v979_v50 }
 0x10f   :  { %v586_v58 = vunpack.c.l.bf16 %v394_v51  ;;  %v686_v59 = vmul.f32 %v2468_v0, %v202_v38  ;;  %v1361_v60 = vmax.f32 %v1359_v52, %v1360_v56  ;;  %v688_v63 = vmul.f32 %v2468_v0, %v204_v47 }
 0x110   :  { %v1169_v61 = vmax.f32 %v1073_v54, 0.0  ;;  %v588_v62 = vunpack.c.l.bf16 %v396_v55  ;;  %v1171_v1 = vmax.f32 %v1075_v57, 0.0 }
 0x111   :  { %v786_v2 = vadd.f32 %v2478_v16, %v686_v59  ;;  %v978_v3 = vmul.f32 %v2468_v0, %v586_v58  ;;  %v1705_v4 = vpack.c.bf16 %v1361_v60, %v1361_v60  ;;  %v788_v6 = vadd.f32 %v2478_v16, %v688_v63 }
 0x112   :  { %v1265_v5 = vmax.f32 %v881_v49, %v1169_v61  ;;  %v980_v8 = vmul.f32 %v2468_v0, %v588_v62  ;;  %v1267_v7 = vmax.f32 %v883_v53, %v1171_v1 }
 0x113   :  { %v882_v9 = vmax.f32 %v786_v2, 0.0  ;;  %v1074_v10 = vadd.f32 %v2478_v16, %v978_v3  ;;  %1603 = vst [vmem:[%s2623_s2 + $0xb4] sm:$0x3] %v1705_v4  ;;  %v884_v11 = vmax.f32 %v788_v6, 0.0 }
 0x114   :  { %v1076_v12 = vadd.f32 %v2478_v16, %v980_v8  ;;  %v1362_v13 = vmax.f32 %v1265_v5, %v1267_v7 }
 0x115   :  { %v1170_v14 = vmax.f32 %v1074_v10, 0.0 }
 0x116   :  { %v1172_v15 = vmax.f32 %v1076_v12, 0.0  ;;  %v1706_v17 = vpack.c.bf16 %v1362_v13, %v1362_v13 }
 0x117   :  { %v1266_v18 = vmax.f32 %v882_v9, %v1170_v14 }
 0x118   :  { %v1268_v19 = vmax.f32 %v884_v11, %v1172_v15  ;;  %1604 = vst [vmem:[%s2623_s2 + $0xb8] sm:$0xf] %v1706_v17 }
 0x119   :  { %v1363_v0 = vsel %vm1270_vm0, %v1266_v18, -inf }
 0x11a   :  { %v1364_v20 = vsel %vm1270_vm0, %v1268_v19, -inf }
 0x11b   :  { %v1365_v21 = vmax.f32 %v1363_v0, %v1364_v20 }
 0x11d   :  { %v1707_v22 = vpack.c.bf16 %v1365_v21, %v1365_v21 }
 0x11f   :  { %1605 = vst [vmem:[%s2623_s2 + $0xbc] sm:$0x3] %v1707_v22 }

// kernel: convnet_forward.5
= control target key start
LH: loop header
LB: loop body
LE: loop exit
PB: predicated region body
PF: predicated region fallthrough
CT: control target
= control target key end

     0   :  { %vm750_vm0 = vcmask 1043456   ;;  %vm751_vm1 = vcmask 1044480   ;;  %vm533_vm2 = vcmask 203776   ;;  %v3705_v1 = vmov 65535   ;;  %s4671_s1 = inlined_call_operand.vmem [shape: bf16[25,128], index: 1, kind: input, shape index: {}]   ;;  %s4672_s0 = inlined_call_operand.vmem [shape: bf16[1152,25], index: 0, kind: input, shape index: {}]   ;;  %s4673_s2 = inlined_call_operand.vmem [shape: bf16[1152,128], index: 2, kind: output, shape index: {0}]   ;;  %s4674_s3 = inlined_call_operand.vmem [shape: f32[1,2,128], index: 3, kind: output, shape index: {1}]  }
   0x1   :  { %v3631_v0 = vld [vmem:[%s4671_s1] sm:$0xff]   ;;  %v752_v2 = vsel %vm750_vm0, 4294967295, %v3705_v1  ;;  %v3632_v3 = vld [vmem:[%s4671_s1 + $0x8] sm:$0x1f]   ;;  %v3635_v8 = vld [vmem:[%s4672_s0 + $0x10] sm:$0xff]   ;;  %vm2528_vm3 = vcmask 1040384  }
   0x2   :  { %3478 = vmatprep.subr.bf16.mxu0 %v3631_v0  ;;  %v753_v4 = vsel %vm751_vm1, %v752_v2, 0  ;;  %v3633_v5 = vld [vmem:[%s4672_s0] sm:$0xff]   ;;  %3626 = vmatprep.subr.bf16.mxu1 %v3631_v0  ;;  %v3634_v7 = vld [vmem:[%s4672_s0 + $0x8] sm:$0xff]   ;;  %v3636_v9 = vld [vmem:[%s4672_s0 + $0x18] sm:$0xff]  }
   0x3   :  { %3479 = vmatpush3.bf16.msra.mxu0 %v3631_v0  ;;  %v755_v6 = vand.u32 %v3632_v3, %v753_v4  ;;  %3628 = vmatpush3.bf16.msra.mxu1 %v3631_v0  ;;  %v3637_v10 = vld [vmem:[%s4672_s0 + $0x20] sm:$0xff]   ;;  %v3638_v11 = vld [vmem:[%s4672_s0 + $0x28] sm:$0xff]   ;;  %v3639_v12 = vld [vmem:[%s4672_s0 + $0x30] sm:$0xff]  }
   0x4   :  { %3482 = vmatprep.mubr.msk.bf16.mxu0 %vm533_vm2, %v3633_v5  ;;  %v3640_v13 = vld [vmem:[%s4672_s0 + $0x38] sm:$0xff]   ;;  %v3641_v14 = vld [vmem:[%s4672_s0 + $0x40] sm:$0xff]   ;;  %v3642_v15 = vld [vmem:[%s4672_s0 + $0x48] sm:$0xff]  }
   0x5   :  { %3480 = vmatprep.subr.bf16.mxu0 %v755_v6  ;;  %3627 = vmatprep.subr.bf16.mxu1 %v755_v6  ;;  %v3643_v16 = vld [vmem:[%s4672_s0 + $0x50] sm:$0xff]   ;;  %v3669_v17 = vld [vmem:[%s4672_s0 + $0x120] sm:$0xff]   ;;  %v3670_v18 = vld [vmem:[%s4672_s0 + $0x128] sm:$0xff]  }
   0x6   :  { %3554 = vmatprep.mubr.msk.bf16.mxu1 %vm533_vm2, %v3669_v17  ;;  %v3671_v19 = vld [vmem:[%s4672_s0 + $0x130] sm:$0xff]   ;;  %v3644_v20 = vld [vmem:[%s4672_s0 + $0x58] sm:$0xff]   ;;  %v3673_v22 = vld [vmem:[%s4672_s0 + $0x140] sm:$0xff]  }
   0x7   :  { %3481 = vmatpush3.bf16.msra.mxu0 %v755_v6  ;;  %3629 = vmatpush3.bf16.msra.mxu1 %v755_v6  ;;  %v3672_v21 = vld [vmem:[%s4672_s0 + $0x138] sm:$0xff]   ;;  %v3645_v23 = vld [vmem:[%s4672_s0 + $0x60] sm:$0xff]   ;;  %v3646_v24 = vld [vmem:[%s4672_s0 + $0x68] sm:$0xff]  }
   0x8   :  { %v3674_v25 = vld [vmem:[%s4672_s0 + $0x148] sm:$0xff]   ;;  %v3675_v26 = vld [vmem:[%s4672_s0 + $0x150] sm:$0xff]   ;;  %v3676_v28 = vld [vmem:[%s4672_s0 + $0x158] sm:$0xff]  }
   0x9   :  { %v3647_v27 = vld [vmem:[%s4672_s0 + $0x70] sm:$0xff]   ;;  %v3648_v29 = vld [vmem:[%s4672_s0 + $0x78] sm:$0xff]   ;;  %v3677_v30 = vld [vmem:[%s4672_s0 + $0x160] sm:$0xff]  }
   0xa   :  { %3483 = vmatmul.mubr.msk.bf16.vlgmr.msra.gmra.mrb[0].mxu0 %vm533_vm2, %v3634_v7  ;;  %3555 = vmatmul.mubr.msk.bf16.vlgmr.msra.gmra.mrb[0].mxu1 %vm533_vm2, %v3670_v18  ;;  %v3649_v31 = vld [vmem:[%s4672_s0 + $0x80] sm:$0xff]   ;;  %v3678_v32 = vld [vmem:[%s4672_s0 + $0x168] sm:$0xff]   ;;  %v3679_v34 = vld [vmem:[%s4672_s0 + $0x170] sm:$0xff]  }
   0xb   :  { %3486 = vmatprep.mubr.msk.bf16.mxu0 %vm533_vm2, %v3635_v8  ;;  %3558 = vmatprep.mubr.msk.bf16.mxu1 %vm533_vm2, %v3671_v19  ;;  %v3650_v33 = vld [vmem:[%s4672_s0 + $0x88] sm:$0xff]   ;;  %v3651_v35 = vld [vmem:[%s4672_s0 + $0x90] sm:$0xff]   ;;  %v3680_v36 = vld [vmem:[%s4672_s0 + $0x178] sm:$0xff]  }
   0xc   :  { %v3652_v37 = vld [vmem:[%s4672_s0 + $0x98] sm:$0xff]   ;;  %v3681_v38 = vld [vmem:[%s4672_s0 + $0x180] sm:$0xff]   ;;  %v3682_v40 = vld [vmem:[%s4672_s0 + $0x188] sm:$0xff]  }
   0xd   :  { %v3653_v39 = vld [vmem:[%s4672_s0 + $0xa0] sm:$0xff]   ;;  %v3654_v41 = vld [vmem:[%s4672_s0 + $0xa8] sm:$0xff]   ;;  %v3683_v42 = vld [vmem:[%s4672_s0 + $0x190] sm:$0xff]  }
   0xe   :  { %v3655_v43 = vld [vmem:[%s4672_s0 + $0xb0] sm:$0xff]   ;;  %v3684_v44 = vld [vmem:[%s4672_s0 + $0x198] sm:$0xff]   ;;  %v3685_v46 = vld [vmem:[%s4672_s0 + $0x1a0] sm:$0xff]  }
   0xf   :  { %v3656_v45 = vld [vmem:[%s4672_s0 + $0xb8] sm:$0xff]   ;;  %v3657_v47 = vld [vmem:[%s4672_s0 + $0xc0] sm:$0xff]   ;;  %v3686_v48 = vld [vmem:[%s4672_s0 + $0x1a8] sm:$0xff]  }
  0x10   :  { %v3658_v49 = vld [vmem:[%s4672_s0 + $0xc8] sm:$0xff]   ;;  %v3687_v50 = vld [vmem:[%s4672_s0 + $0x1b0] sm:$0xff]   ;;  %v3688_v52 = vld [vmem:[%s4672_s0 + $0x1b8] sm:$0xff]  }
  0x11   :  { %v3659_v51 = vld [vmem:[%s4672_s0 + $0xd0] sm:$0xff]   ;;  %v3660_v53 = vld [vmem:[%s4672_s0 + $0xd8] sm:$0xff]   ;;  %v3689_v54 = vld [vmem:[%s4672_s0 + $0x1c0] sm:$0xff]  }
  0x12   :  { %3487 = vmatmul.mubr.msk.bf16.gmra.mrb[4].mxu0 %vm533_vm2, %v3636_v9  ;;  %3559 = vmatmul.mubr.msk.bf16.gmra.mrb[4].mxu1 %vm533_vm2, %v3672_v21  ;;  %v3661_v55 = vld [vmem:[%s4672_s0 + $0xe0] sm:$0xff]   ;;  %v3690_v56 = vld [vmem:[%s4672_s0 + $0x1c8] sm:$0xff]   ;;  %v3691_v58 = vld [vmem:[%s4672_s0 + $0x1d0] sm:$0xff]  }
  0x13   :  { %3490 = vmatprep.mubr.msk.bf16.mxu0 %vm533_vm2, %v3637_v10  ;;  %3562 = vmatprep.mubr.msk.bf16.mxu1 %vm533_vm2, %v3673_v22  ;;  %v3662_v57 = vld [vmem:[%s4672_s0 + $0xe8] sm:$0xff]   ;;  %v3663_v59 = vld [vmem:[%s4672_s0 + $0xf0] sm:$0xff]   ;;  %v3692_v60 = vld [vmem:[%s4672_s0 + $0x1d8] sm:$0xff]  }
  0x14   :  { %v3664_v61 = vld [vmem:[%s4672_s0 + $0xf8] sm:$0xff]   ;;  %v3693_v62 = vld [vmem:[%s4672_s0 + $0x1e0] sm:$0xff]   ;;  %v3694_v0 = vld [vmem:[%s4672_s0 + $0x1e8] sm:$0xff]  }
  0x15   :  { %v3665_v63 = vld [vmem:[%s4672_s0 + $0x100] sm:$0xff]   ;;  %v3666_v1 = vld [vmem:[%s4672_s0 + $0x108] sm:$0xff]   ;;  %v3695_v2 = vld [vmem:[%s4672_s0 + $0x1f0] sm:$0xff]  }
  0x16   :  { %v3667_v3 = vld [vmem:[%s4672_s0 + $0x110] sm:$0xff]   ;;  %v3696_v4 = vld [vmem:[%s4672_s0 + $0x1f8] sm:$0xff]   ;;  %v3697_v6 = vld [vmem:[%s4672_s0 + $0x200] sm:$0xff]  }
  0x17   :  { %v3668_v5 = vld [vmem:[%s4672_s0 + $0x118] sm:$0xff]   ;;  %v3698_v7 = vld [vmem:[%s4672_s0 + $0x208] sm:$0xff]   ;;  %v3699_v8 = vld [vmem:[%s4672_s0 + $0x210] sm:$0xff]  }
  0x18   :  { %v3700_v9 = vld [vmem:[%s4672_s0 + $0x218] sm:$0xff]   ;;  %v3701_v10 = vld [vmem:[%s4672_s0 + $0x220] sm:$0xff]  }
  0x1a   :  { %3491 = vmatmul.mubr.msk.bf16.gmra.mrb[8].mxu0 %vm533_vm2, %v3638_v11  ;;  %3563 = vmatmul.mubr.msk.bf16.gmra.mrb[8].mxu1 %vm533_vm2, %v3674_v25  ;;  %v3702_v11 = vld [vmem:[%s4672_s0 + $0x228] sm:$0xff]  }
  0x1b   :  { %3494 = vmatprep.mubr.msk.bf16.mxu0 %vm533_vm2, %v3639_v12  ;;  %3566 = vmatprep.mubr.msk.bf16.mxu1 %vm533_vm2, %v3675_v26  ;;  %v3703_v12 = vld [vmem:[%s4672_s0 + $0x230] sm:$0xff]  }
  0x22   :  { %3495 = vmatmul.mubr.msk.bf16.gmra.mrb[12].mxu0 %vm533_vm2, %v3640_v13  ;;  %3567 = vmatmul.mubr.msk.bf16.gmra.mrb[12].mxu1 %vm533_vm2, %v3676_v28  ;;  %v3704_v13 = vld [vmem:[%s4672_s0 + $0x238] sm:$0xff]  }
  0x23   :  { %3498 = vmatprep.mubr.msk.bf16.mxu0 %vm533_vm2, %v3641_v14  ;;  %3570 = vmatprep.mubr.msk.bf16.mxu1 %vm533_vm2, %v3677_v30 }
  0x2a   :  { %3499 = vmatmul.mubr.msk.bf16.gmra.mrb[16].mxu0 %vm533_vm2, %v3642_v15  ;;  %3571 = vmatmul.mubr.msk.bf16.gmra.mrb[16].mxu1 %vm533_vm2, %v3678_v32 }
  0x2b   :  { %3502 = vmatprep.mubr.msk.bf16.mxu0 %vm533_vm2, %v3643_v16  ;;  %3574 = vmatprep.mubr.msk.bf16.mxu1 %vm533_vm2, %v3679_v34 }
  0x32   :  { %3503 = vmatmul.mubr.msk.bf16.gmra.mrb[20].mxu0 %vm533_vm2, %v3644_v20  ;;  %3575 = vmatmul.mubr.msk.bf16.gmra.mrb[20].mxu1 %vm533_vm2, %v3680_v36 }
  0x33   :  { %3506 = vmatprep.mubr.msk.bf16.mxu0 %vm533_vm2, %v3645_v23  ;;  %3578 = vmatprep.mubr.msk.bf16.mxu1 %vm533_vm2, %v3681_v38 }
  0x3a   :  { %3507 = vmatmul.mubr.msk.bf16.gmra.mrb[24].mxu0 %vm533_vm2, %v3646_v24  ;;  %3579 = vmatmul.mubr.msk.bf16.gmra.mrb[24].mxu1 %vm533_vm2, %v3682_v40 }
  0x3b   :  { %3510 = vmatprep.mubr.msk.bf16.mxu0 %vm533_vm2, %v3647_v27  ;;  %3582 = vmatprep.mubr.msk.bf16.mxu1 %vm533_vm2, %v3683_v42 }
  0x42   :  { %3511 = vmatmul.mubr.msk.bf16.gmra.mrb[28].mxu0 %vm533_vm2, %v3648_v29  ;;  %3583 = vmatmul.mubr.msk.bf16.gmra.mrb[28].mxu1 %vm533_vm2, %v3684_v44 }
  0x43   :  { %3514 = vmatprep.mubr.msk.bf16.mxu0 %vm533_vm2, %v3649_v31  ;;  %3586 = vmatprep.mubr.msk.bf16.mxu1 %vm533_vm2, %v3685_v46 }
  0x4a   :  { %3515 = vmatmul.mubr.msk.bf16.gmra.mrb[32].mxu0 %vm533_vm2, %v3650_v33  ;;  %3587 = vmatmul.mubr.msk.bf16.gmra.mrb[32].mxu1 %vm533_vm2, %v3686_v48 }
  0x4b   :  { %3518 = vmatprep.mubr.msk.bf16.mxu0 %vm533_vm2, %v3651_v35  ;;  %3590 = vmatprep.mubr.msk.bf16.mxu1 %vm533_vm2, %v3687_v50 }
  0x52   :  { %3519 = vmatmul.mubr.msk.bf16.gmra.mrb[36].mxu0 %vm533_vm2, %v3652_v37  ;;  %3591 = vmatmul.mubr.msk.bf16.gmra.mrb[36].mxu1 %vm533_vm2, %v3688_v52 }
  0x53   :  { %3522 = vmatprep.mubr.msk.bf16.mxu0 %vm533_vm2, %v3653_v39  ;;  %3594 = vmatprep.mubr.msk.bf16.mxu1 %vm533_vm2, %v3689_v54 }
  0x5a   :  { %3523 = vmatmul.mubr.msk.bf16.gmra.mrb[40].mxu0 %vm533_vm2, %v3654_v41  ;;  %3595 = vmatmul.mubr.msk.bf16.gmra.mrb[40].mxu1 %vm533_vm2, %v3690_v56 }
  0x5b   :  { %3526 = vmatprep.mubr.msk.bf16.mxu0 %vm533_vm2, %v3655_v43  ;;  %3598 = vmatprep.mubr.msk.bf16.mxu1 %vm533_vm2, %v3691_v58 }
  0x62   :  { %3527 = vmatmul.mubr.msk.bf16.gmra.mrb[44].mxu0 %vm533_vm2, %v3656_v45  ;;  %3599 = vmatmul.mubr.msk.bf16.gmra.mrb[44].mxu1 %vm533_vm2, %v3692_v60 }
  0x63   :  { %3530 = vmatprep.mubr.msk.bf16.mxu0 %vm533_vm2, %v3657_v47  ;;  %3602 = vmatprep.mubr.msk.bf16.mxu1 %vm533_vm2, %v3693_v62 }
  0x6a   :  { %3531 = vmatmul.mubr.msk.bf16.gmra.mrb[48].mxu0 %vm533_vm2, %v3658_v49  ;;  %3603 = vmatmul.mubr.msk.bf16.gmra.mrb[48].mxu1 %vm533_vm2, %v3694_v0 }
  0x6b   :  { %3534 = vmatprep.mubr.msk.bf16.mxu0 %vm533_vm2, %v3659_v51  ;;  %3606 = vmatprep.mubr.msk.bf16.mxu1 %vm533_vm2, %v3695_v2 }
  0x72   :  { %3535 = vmatmul.mubr.msk.bf16.gmra.mrb[52].mxu0 %vm533_vm2, %v3660_v53  ;;  %3607 = vmatmul.mubr.msk.bf16.gmra.mrb[52].mxu1 %vm533_vm2, %v3696_v4 }
  0x73   :  { %3538 = vmatprep.mubr.msk.bf16.mxu0 %vm533_vm2, %v3661_v55  ;;  %3610 = vmatprep.mubr.msk.bf16.mxu1 %vm533_vm2, %v3697_v6 }
  0x7a   :  { %3539 = vmatmul.mubr.msk.bf16.gmra.mrb[56].mxu0 %vm533_vm2, %v3662_v57  ;;  %3611 = vmatmul.mubr.msk.bf16.gmra.mrb[56].mxu1 %vm533_vm2, %v3698_v7 }
  0x7b   :  { %3542 = vmatprep.mubr.msk.bf16.mxu0 %vm533_vm2, %v3663_v59  ;;  %3614 = vmatprep.mubr.msk.bf16.mxu1 %vm533_vm2, %v3699_v8 }
  0x82   :  { %3543 = vmatmul.mubr.msk.bf16.gmra.mrb[60].mxu0 %vm533_vm2, %v3664_v61  ;;  %3615 = vmatmul.mubr.msk.bf16.gmra.mrb[60].mxu1 %vm533_vm2, %v3700_v9 }
  0x83   :  { %3546 = vmatprep.mubr.msk.bf16.mxu0 %vm533_vm2, %v3665_v63  ;;  %3618 = vmatprep.mubr.msk.bf16.mxu1 %vm533_vm2, %v3701_v10 }
  0x8a   :  { %3547 = vmatmul.mubr.msk.bf16.gmra.mrb[64].mxu0 %vm533_vm2, %v3666_v1  ;;  %3619 = vmatmul.mubr.msk.bf16.gmra.mrb[64].mxu1 %vm533_vm2, %v3702_v11 }
  0x8b   :  { %3550 = vmatprep.mubr.msk.bf16.mxu0 %vm533_vm2, %v3667_v3  ;;  %3622 = vmatprep.mubr.msk.bf16.mxu1 %vm533_vm2, %v3703_v12 }
  0x92   :  { %3551 = vmatmul.mubr.msk.bf16.gmra.mrb[68].mxu0 %vm533_vm2, %v3668_v5  ;;  %3623 = vmatmul.mubr.msk.bf16.gmra.mrb[68].mxu1 %vm533_vm2, %v3704_v13 }
  0xdd   :  { %v3484_v14 = vpop.f32.mrb[0].mxu0 }
  0xde   :  { %v791_v15 = vpop.f32.mrb[1].mxu0  ;;  %v2237_v23 = vmul.f32 %v3484_v14, %v3484_v14 }
  0xdf   :  { %v3485_v16 = vpop.f32.mrb[2].mxu0  ;;  %v2235_v19 = vmul.f32 %v791_v15, %v791_v15 }
  0xe0   :  { %v2981_v17 = vpack.c.bf16 %v3485_v16, %v3484_v14  ;;  %v794_v18 = vpop.f32.mrb[3].mxu0  ;;  %v2238_v26 = vmul.f32 %v3485_v16, %v3485_v16 }
  0xe1   :  { %v2976_v20 = vpack.c.bf16 %v794_v18, %v791_v15  ;;  %v2086_v21 = vadd.f32 %v794_v18, %v791_v15  ;;  %v2236_v22 = vmul.f32 %v794_v18, %v794_v18 }
  0xe2   :  { %3333 = vst [vmem:[%s4673_s2 + $0x8] sm:$0xff] %v2981_v17  }
  0xe3   :  { %2977 = vst [vmem:[%s4673_s2] sm:$0xff] %v2976_v20   ;;  %v2087_v24 = vadd.f32 %v3484_v14, %v2086_v21  ;;  %v2379_v25 = vadd.f32 %v2236_v22, %v2235_v19 }
  0xe5   :  { %v2088_v27 = vadd.f32 %v3485_v16, %v2087_v24  ;;  %v2380_v28 = vadd.f32 %v2379_v25, %v2237_v23  ;;  %v3488_v29 = vpop.f32.mrb[4].mxu0  ;;  %v4044_v16 = vpop.f32.mrb[0].mxu1 }
  0xe6   :  { %v807_v30 = vpop.f32.mrb[5].mxu0  ;;  %v2241_v41 = vmul.f32 %v3488_v29, %v3488_v29  ;;  %v4046_v21 = vpop.f32.mrb[1].mxu1 }
  0xe7   :  { %v2381_v31 = vadd.f32 %v2380_v28, %v2238_v26  ;;  %v2089_v32 = vadd.f32 %v2088_v27, %v807_v30  ;;  %v2239_v33 = vmul.f32 %v807_v30, %v807_v30  ;;  %v3489_v34 = vpop.f32.mrb[6].mxu0  ;;  %v4048_v23 = vpop.f32.mrb[2].mxu1 }
  0xe8   :  { %v2991_v35 = vpack.c.bf16 %v3489_v34, %v3488_v29  ;;  %v810_v36 = vpop.f32.mrb[7].mxu0  ;;  %v2242_v44 = vmul.f32 %v3489_v34, %v3489_v34  ;;  %v3161_v28 = vpack.c.bf16 %v4048_v23, %v4044_v16 }
  0xe9   :  { %v2382_v37 = vadd.f32 %v2381_v31, %v2239_v33  ;;  %v2986_v38 = vpack.c.bf16 %v810_v36, %v807_v30  ;;  %v2090_v39 = vadd.f32 %v2089_v32, %v810_v36  ;;  %v2240_v40 = vmul.f32 %v810_v36, %v810_v36 }
  0xea   :  { %3335 = vst [vmem:[%s4673_s2 + $0x18] sm:$0xff] %v2991_v35   ;;  %3369 = vst [vmem:[%s4673_s2 + $0x128] sm:$0xff] %v3161_v28  }
  0xeb   :  { %3334 = vst [vmem:[%s4673_s2 + $0x10] sm:$0xff] %v2986_v38   ;;  %v2091_v42 = vadd.f32 %v3488_v29, %v2090_v39  ;;  %v2383_v43 = vadd.f32 %v2382_v37, %v2240_v40  ;;  %v4052_v29 = vpop.f32.mrb[3].mxu1 }
  0xec   :  { %v3156_v32 = vpack.c.bf16 %v4052_v29, %v4046_v21  ;;  %v4068_v40 = vpop.f32.mrb[4].mxu1 }
  0xed   :  { %v2092_v45 = vadd.f32 %v3489_v34, %v2091_v42  ;;  %v2384_v46 = vadd.f32 %v2383_v43, %v2241_v41  ;;  %v3492_v47 = vpop.f32.mrb[8].mxu0 }
  0xee   :  { %v823_v48 = vpop.f32.mrb[9].mxu0  ;;  %v2245_v59 = vmul.f32 %v3492_v47, %v3492_v47  ;;  %3368 = vst [vmem:[%s4673_s2 + $0x120] sm:$0xff] %v3156_v32  }
  0xef   :  { %v2385_v49 = vadd.f32 %v2384_v46, %v2242_v44  ;;  %v2093_v50 = vadd.f32 %v2092_v45, %v823_v48  ;;  %v2243_v51 = vmul.f32 %v823_v48, %v823_v48  ;;  %v3493_v52 = vpop.f32.mrb[10].mxu0  ;;  %v4070_v45 = vpop.f32.mrb[5].mxu1 }
  0xf0   :  { %v3001_v53 = vpack.c.bf16 %v3493_v52, %v3492_v47  ;;  %v826_v54 = vpop.f32.mrb[11].mxu0  ;;  %v2246_v62 = vmul.f32 %v3493_v52, %v3493_v52 }
  0xf1   :  { %v2386_v55 = vadd.f32 %v2385_v49, %v2243_v51  ;;  %v2996_v56 = vpack.c.bf16 %v826_v54, %v823_v48  ;;  %v2094_v57 = vadd.f32 %v2093_v50, %v826_v54  ;;  %v2244_v58 = vmul.f32 %v826_v54, %v826_v54 }
  0xf2   :  { %3337 = vst [vmem:[%s4673_s2 + $0x28] sm:$0xff] %v3001_v53  }
  0xf3   :  { %3336 = vst [vmem:[%s4673_s2 + $0x20] sm:$0xff] %v2996_v56   ;;  %v2095_v60 = vadd.f32 %v3492_v47, %v2094_v57  ;;  %v2387_v61 = vadd.f32 %v2386_v55, %v2244_v58  ;;  %v4072_v47 = vpop.f32.mrb[6].mxu1 }
  0xf4   :  { %v4076_v53 = vpop.f32.mrb[7].mxu1 }
  0xf5   :  { %v2388_v63 = vadd.f32 %v2387_v61, %v2245_v59  ;;  %v3496_v0 = vpop.f32.mrb[12].mxu0  ;;  %v2096_v1 = vadd.f32 %v3493_v52, %v2095_v60  ;;  %v3171_v52 = vpack.c.bf16 %v4072_v47, %v4068_v40  ;;  %v3166_v56 = vpack.c.bf16 %v4076_v53, %v4070_v45 }
  0xf6   :  { %v839_v2 = vpop.f32.mrb[13].mxu0  ;;  %v2249_v13 = vmul.f32 %v3496_v0, %v3496_v0 }
  0xf7   :  { %v2097_v3 = vadd.f32 %v2096_v1, %v839_v2  ;;  %v2247_v4 = vmul.f32 %v839_v2, %v839_v2  ;;  %v2389_v5 = vadd.f32 %v2388_v63, %v2246_v62  ;;  %v3497_v6 = vpop.f32.mrb[14].mxu0  ;;  %3371 = vst [vmem:[%s4673_s2 + $0x138] sm:$0xff] %v3171_v52   ;;  %3370 = vst [vmem:[%s4673_s2 + $0x130] sm:$0xff] %v3166_v56  }
  0xf8   :  { %v3011_v7 = vpack.c.bf16 %v3497_v6, %v3496_v0  ;;  %v842_v8 = vpop.f32.mrb[15].mxu0  ;;  %v2250_v17 = vmul.f32 %v3497_v6, %v3497_v6 }
  0xf9   :  { %v2390_v9 = vadd.f32 %v2389_v5, %v2247_v4  ;;  %v3006_v10 = vpack.c.bf16 %v842_v8, %v839_v2  ;;  %v2098_v11 = vadd.f32 %v2097_v3, %v842_v8  ;;  %v2248_v12 = vmul.f32 %v842_v8, %v842_v8 }
  0xfa   :  { %3339 = vst [vmem:[%s4673_s2 + $0x38] sm:$0xff] %v3011_v7  }
  0xfb   :  { %3338 = vst [vmem:[%s4673_s2 + $0x30] sm:$0xff] %v3006_v10   ;;  %v2099_v14 = vadd.f32 %v3496_v0, %v2098_v11  ;;  %v2391_v15 = vadd.f32 %v2390_v9, %v2248_v12  ;;  %v4092_v0 = vpop.f32.mrb[8].mxu1 }
  0xfc   :  { %v4094_v5 = vpop.f32.mrb[9].mxu1 }
  0xfd   :  { %v2392_v18 = vadd.f32 %v2391_v15, %v2249_v13  ;;  %v3500_v19 = vpop.f32.mrb[16].mxu0  ;;  %v2100_v20 = vadd.f32 %v3497_v6, %v2099_v14  ;;  %v4096_v7 = vpop.f32.mrb[10].mxu1 }
  0xfe   :  { %v855_v22 = vpop.f32.mrb[17].mxu0  ;;  %v2253_v37 = vmul.f32 %v3500_v19, %v3500_v19  ;;  %v3181_v12 = vpack.c.bf16 %v4096_v7, %v4092_v0  ;;  %v4100_v13 = vpop.f32.mrb[11].mxu1 }
  0xff   :  { %v2101_v24 = vadd.f32 %v2100_v20, %v855_v22  ;;  %v2251_v25 = vmul.f32 %v855_v22, %v855_v22  ;;  %v2393_v26 = vadd.f32 %v2392_v18, %v2250_v17  ;;  %v3501_v27 = vpop.f32.mrb[18].mxu0  ;;  %v3176_v17 = vpack.c.bf16 %v4100_v13, %v4094_v5 }
 0x100   :  { %v3021_v30 = vpack.c.bf16 %v3501_v27, %v3500_v19  ;;  %v858_v31 = vpop.f32.mrb[19].mxu0  ;;  %v2254_v41 = vmul.f32 %v3501_v27, %v3501_v27  ;;  %3373 = vst [vmem:[%s4673_s2 + $0x148] sm:$0xff] %v3181_v12  }
 0x101   :  { %v2394_v33 = vadd.f32 %v2393_v26, %v2251_v25  ;;  %v3016_v34 = vpack.c.bf16 %v858_v31, %v855_v22  ;;  %v2102_v35 = vadd.f32 %v2101_v24, %v858_v31  ;;  %v2252_v36 = vmul.f32 %v858_v31, %v858_v31  ;;  %3372 = vst [vmem:[%s4673_s2 + $0x140] sm:$0xff] %v3176_v17  }
 0x102   :  { %3341 = vst [vmem:[%s4673_s2 + $0x48] sm:$0xff] %v3021_v30  }
 0x103   :  { %3340 = vst [vmem:[%s4673_s2 + $0x40] sm:$0xff] %v3016_v34   ;;  %v2103_v38 = vadd.f32 %v3500_v19, %v2102_v35  ;;  %v2395_v39 = vadd.f32 %v2394_v33, %v2252_v36 }
 0x105   :  { %v2396_v42 = vadd.f32 %v2395_v39, %v2253_v37  ;;  %v3504_v43 = vpop.f32.mrb[20].mxu0  ;;  %v2104_v44 = vadd.f32 %v3501_v27, %v2103_v38  ;;  %v4116_v27 = vpop.f32.mrb[12].mxu1 }
 0x106   :  { %v871_v46 = vpop.f32.mrb[21].mxu0  ;;  %v2257_v61 = vmul.f32 %v3504_v43, %v3504_v43  ;;  %v4118_v33 = vpop.f32.mrb[13].mxu1 }
 0x107   :  { %v2105_v48 = vadd.f32 %v2104_v44, %v871_v46  ;;  %v2255_v49 = vmul.f32 %v871_v46, %v871_v46  ;;  %v2397_v50 = vadd.f32 %v2396_v42, %v2254_v41  ;;  %v3505_v51 = vpop.f32.mrb[22].mxu0  ;;  %v4120_v35 = vpop.f32.mrb[14].mxu1 }
 0x108   :  { %v3031_v54 = vpack.c.bf16 %v3505_v51, %v3504_v43  ;;  %v874_v55 = vpop.f32.mrb[23].mxu0  ;;  %v2258_v1 = vmul.f32 %v3505_v51, %v3505_v51  ;;  %v3191_v41 = vpack.c.bf16 %v4120_v35, %v4116_v27  ;;  %v4124_v42 = vpop.f32.mrb[15].mxu1 }
 0x109   :  { %v2398_v57 = vadd.f32 %v2397_v50, %v2255_v49  ;;  %v3026_v58 = vpack.c.bf16 %v874_v55, %v871_v46  ;;  %v2106_v59 = vadd.f32 %v2105_v48, %v874_v55  ;;  %v2256_v60 = vmul.f32 %v874_v55, %v874_v55  ;;  %v4140_v56 = vpop.f32.mrb[16].mxu1 }
 0x10a   :  { %3343 = vst [vmem:[%s4673_s2 + $0x58] sm:$0xff] %v3031_v54   ;;  %v3186_v46 = vpack.c.bf16 %v4124_v42, %v4118_v33  ;;  %3375 = vst [vmem:[%s4673_s2 + $0x158] sm:$0xff] %v3191_v41  }
 0x10b   :  { %3342 = vst [vmem:[%s4673_s2 + $0x50] sm:$0xff] %v3026_v58   ;;  %v2107_v62 = vadd.f32 %v3504_v43, %v2106_v59  ;;  %v2399_v63 = vadd.f32 %v2398_v57, %v2256_v60 }
 0x10c   :  { %3374 = vst [vmem:[%s4673_s2 + $0x150] sm:$0xff] %v3186_v46  }
 0x10d   :  { %v2400_v2 = vadd.f32 %v2399_v63, %v2257_v61  ;;  %v3508_v3 = vpop.f32.mrb[24].mxu0  ;;  %v2108_v4 = vadd.f32 %v3505_v51, %v2107_v62  ;;  %v4142_v61 = vpop.f32.mrb[17].mxu1 }
 0x10e   :  { %v887_v6 = vpop.f32.mrb[25].mxu0  ;;  %v2261_v24 = vmul.f32 %v3508_v3, %v3508_v3  ;;  %v4144_v63 = vpop.f32.mrb[18].mxu1 }
 0x10f   :  { %v2109_v8 = vadd.f32 %v2108_v4, %v887_v6  ;;  %v2259_v9 = vmul.f32 %v887_v6, %v887_v6  ;;  %v2401_v10 = vadd.f32 %v2400_v2, %v2258_v1  ;;  %v3509_v11 = vpop.f32.mrb[26].mxu0 }
 0x110   :  { %v3041_v14 = vpack.c.bf16 %v3509_v11, %v3508_v3  ;;  %v890_v15 = vpop.f32.mrb[27].mxu0  ;;  %v2262_v28 = vmul.f32 %v3509_v11, %v3509_v11 }
 0x111   :  { %v2402_v18 = vadd.f32 %v2401_v10, %v2259_v9  ;;  %v3036_v19 = vpack.c.bf16 %v890_v15, %v887_v6  ;;  %v2110_v20 = vadd.f32 %v2109_v8, %v890_v15  ;;  %v2260_v22 = vmul.f32 %v890_v15, %v890_v15  ;;  %v4148_v8 = vpop.f32.mrb[19].mxu1 }
 0x112   :  { %3345 = vst [vmem:[%s4673_s2 + $0x68] sm:$0xff] %v3041_v14   ;;  %v3201_v6 = vpack.c.bf16 %v4144_v63, %v4140_v56 }
 0x113   :  { %3344 = vst [vmem:[%s4673_s2 + $0x60] sm:$0xff] %v3036_v19   ;;  %v2111_v25 = vadd.f32 %v3508_v3, %v2110_v20  ;;  %v2403_v26 = vadd.f32 %v2402_v18, %v2260_v22  ;;  %v4164_v22 = vpop.f32.mrb[20].mxu1 }
 0x114   :  { %3377 = vst [vmem:[%s4673_s2 + $0x168] sm:$0xff] %v3201_v6  }
 0x115   :  { %v2404_v30 = vadd.f32 %v2403_v26, %v2261_v24  ;;  %v3512_v31 = vpop.f32.mrb[28].mxu0  ;;  %v2112_v32 = vadd.f32 %v3509_v11, %v2111_v25  ;;  %v3196_v11 = vpack.c.bf16 %v4148_v8, %v4142_v61 }
 0x116   :  { %v903_v34 = vpop.f32.mrb[29].mxu0  ;;  %v2265_v52 = vmul.f32 %v3512_v31, %v3512_v31 }
 0x117   :  { %v2113_v36 = vadd.f32 %v2112_v32, %v903_v34  ;;  %v2263_v37 = vmul.f32 %v903_v34, %v903_v34  ;;  %v2405_v38 = vadd.f32 %v2404_v30, %v2262_v28  ;;  %v3513_v39 = vpop.f32.mrb[30].mxu0  ;;  %3376 = vst [vmem:[%s4673_s2 + $0x160] sm:$0xff] %v3196_v11   ;;  %v4166_v30 = vpop.f32.mrb[21].mxu1 }
 0x118   :  { %v3051_v43 = vpack.c.bf16 %v3513_v39, %v3512_v31  ;;  %v906_v44 = vpop.f32.mrb[31].mxu0  ;;  %v2266_v57 = vmul.f32 %v3513_v39, %v3513_v39  ;;  %v4168_v32 = vpop.f32.mrb[22].mxu1 }
 0x119   :  { %v2406_v48 = vadd.f32 %v2405_v38, %v2263_v37  ;;  %v3046_v49 = vpack.c.bf16 %v906_v44, %v903_v34  ;;  %v2114_v50 = vadd.f32 %v2113_v36, %v906_v44  ;;  %v2264_v51 = vmul.f32 %v906_v44, %v906_v44  ;;  %v4172_v41 = vpop.f32.mrb[23].mxu1 }
 0x11a   :  { %3347 = vst [vmem:[%s4673_s2 + $0x78] sm:$0xff] %v3051_v43   ;;  %v3206_v46 = vpack.c.bf16 %v4172_v41, %v4166_v30 }
 0x11b   :  { %3346 = vst [vmem:[%s4673_s2 + $0x70] sm:$0xff] %v3046_v49   ;;  %v2115_v54 = vadd.f32 %v3512_v31, %v2114_v50  ;;  %v2407_v55 = vadd.f32 %v2406_v48, %v2264_v51 }
 0x11c   :  { %3378 = vst [vmem:[%s4673_s2 + $0x170] sm:$0xff] %v3206_v46  }
 0x11d   :  { %v2408_v58 = vadd.f32 %v2407_v55, %v2265_v52  ;;  %v3516_v59 = vpop.f32.mrb[32].mxu0  ;;  %v2116_v60 = vadd.f32 %v3513_v39, %v2115_v54  ;;  %v3211_v39 = vpack.c.bf16 %v4168_v32, %v4164_v22 }
 0x11e   :  { %v919_v62 = vpop.f32.mrb[33].mxu0  ;;  %v2269_v18 = vmul.f32 %v3516_v59, %v3516_v59 }
 0x11f   :  { %v2117_v1 = vadd.f32 %v2116_v60, %v919_v62  ;;  %v2267_v2 = vmul.f32 %v919_v62, %v919_v62  ;;  %v2409_v3 = vadd.f32 %v2408_v58, %v2266_v57  ;;  %v3517_v4 = vpop.f32.mrb[34].mxu0  ;;  %3379 = vst [vmem:[%s4673_s2 + $0x178] sm:$0xff] %v3211_v39   ;;  %v4188_v57 = vpop.f32.mrb[24].mxu1 }
 0x120   :  { %v3061_v9 = vpack.c.bf16 %v3517_v4, %v3516_v59  ;;  %v922_v10 = vpop.f32.mrb[35].mxu0  ;;  %v2270_v24 = vmul.f32 %v3517_v4, %v3517_v4 }
 0x121   :  { %v2410_v12 = vadd.f32 %v2409_v3, %v2267_v2  ;;  %v3056_v14 = vpack.c.bf16 %v922_v10, %v919_v62  ;;  %v2118_v15 = vadd.f32 %v2117_v1, %v922_v10  ;;  %v2268_v17 = vmul.f32 %v922_v10, %v922_v10  ;;  %v4190_v1 = vpop.f32.mrb[25].mxu1 }
 0x122   :  { %3349 = vst [vmem:[%s4673_s2 + $0x88] sm:$0xff] %v3061_v9   ;;  %v4192_v3 = vpop.f32.mrb[26].mxu1 }
 0x123   :  { %3348 = vst [vmem:[%s4673_s2 + $0x80] sm:$0xff] %v3056_v14   ;;  %v2119_v19 = vadd.f32 %v3516_v59, %v2118_v15  ;;  %v2411_v20 = vadd.f32 %v2410_v12, %v2268_v17  ;;  %v3221_v11 = vpack.c.bf16 %v4192_v3, %v4188_v57  ;;  %v4196_v12 = vpop.f32.mrb[27].mxu1 }
 0x124   :  { %v3216_v17 = vpack.c.bf16 %v4196_v12, %v4190_v1 }
 0x125   :  { %v2412_v25 = vadd.f32 %v2411_v20, %v2269_v18  ;;  %v3520_v26 = vpop.f32.mrb[36].mxu0  ;;  %v2120_v28 = vadd.f32 %v3517_v4, %v2119_v19  ;;  %3381 = vst [vmem:[%s4673_s2 + $0x188] sm:$0xff] %v3221_v11  }
 0x126   :  { %v935_v31 = vpop.f32.mrb[37].mxu0  ;;  %v2273_v52 = vmul.f32 %v3520_v26, %v3520_v26  ;;  %3380 = vst [vmem:[%s4673_s2 + $0x180] sm:$0xff] %v3216_v17  }
 0x127   :  { %v2121_v34 = vadd.f32 %v2120_v28, %v935_v31  ;;  %v2271_v36 = vmul.f32 %v935_v31, %v935_v31  ;;  %v2413_v37 = vadd.f32 %v2412_v25, %v2270_v24  ;;  %v3521_v38 = vpop.f32.mrb[38].mxu0 }
 0x128   :  { %v3071_v43 = vpack.c.bf16 %v3521_v38, %v3520_v26  ;;  %v938_v44 = vpop.f32.mrb[39].mxu0  ;;  %v2274_v58 = vmul.f32 %v3521_v38, %v3521_v38 }
 0x129   :  { %v2414_v48 = vadd.f32 %v2413_v37, %v2271_v36  ;;  %v3066_v49 = vpack.c.bf16 %v938_v44, %v935_v31  ;;  %v2122_v50 = vadd.f32 %v2121_v34, %v938_v44  ;;  %v2272_v51 = vmul.f32 %v938_v44, %v938_v44  ;;  %v4212_v31 = vpop.f32.mrb[28].mxu1 }
 0x12a   :  { %3351 = vst [vmem:[%s4673_s2 + $0x98] sm:$0xff] %v3071_v43   ;;  %v4214_v39 = vpop.f32.mrb[29].mxu1 }
 0x12b   :  { %3350 = vst [vmem:[%s4673_s2 + $0x90] sm:$0xff] %v3066_v49   ;;  %v2123_v54 = vadd.f32 %v3520_v26, %v2122_v50  ;;  %v2415_v55 = vadd.f32 %v2414_v48, %v2272_v51  ;;  %v4216_v44 = vpop.f32.mrb[30].mxu1 }
 0x12c   :  { %v3231_v51 = vpack.c.bf16 %v4216_v44, %v4212_v31 }
 0x12d   :  { %v2416_v59 = vadd.f32 %v2415_v55, %v2273_v52  ;;  %v3524_v60 = vpop.f32.mrb[40].mxu0  ;;  %v2124_v62 = vadd.f32 %v3521_v38, %v2123_v54  ;;  %v4220_v52 = vpop.f32.mrb[31].mxu1 }
 0x12e   :  { %v951_v2 = vpop.f32.mrb[41].mxu0  ;;  %v2277_v25 = vmul.f32 %v3524_v60, %v3524_v60  ;;  %3383 = vst [vmem:[%s4673_s2 + $0x198] sm:$0xff] %v3231_v51  }
 0x12f   :  { %v2125_v4 = vadd.f32 %v2124_v62, %v951_v2  ;;  %v2275_v6 = vmul.f32 %v951_v2, %v951_v2  ;;  %v2417_v9 = vadd.f32 %v2416_v59, %v2274_v58  ;;  %v3525_v10 = vpop.f32.mrb[42].mxu0  ;;  %v3226_v58 = vpack.c.bf16 %v4220_v52, %v4214_v39 }
 0x130   :  { %v3081_v14 = vpack.c.bf16 %v3525_v10, %v3524_v60  ;;  %v954_v15 = vpop.f32.mrb[43].mxu0  ;;  %v2278_v34 = vmul.f32 %v3525_v10, %v3525_v10 }
 0x131   :  { %v2418_v18 = vadd.f32 %v2417_v9, %v2275_v6  ;;  %v3076_v19 = vpack.c.bf16 %v954_v15, %v951_v2  ;;  %v2126_v20 = vadd.f32 %v2125_v4, %v954_v15  ;;  %v2276_v24 = vmul.f32 %v954_v15, %v954_v15  ;;  %3382 = vst [vmem:[%s4673_s2 + $0x190] sm:$0xff] %v3226_v58  }
 0x132   :  { %3353 = vst [vmem:[%s4673_s2 + $0xa8] sm:$0xff] %v3081_v14  }
 0x133   :  { %3352 = vst [vmem:[%s4673_s2 + $0xa0] sm:$0xff] %v3076_v19   ;;  %v2127_v26 = vadd.f32 %v3524_v60, %v2126_v20  ;;  %v2419_v28 = vadd.f32 %v2418_v18, %v2276_v24 }
 0x135   :  { %v2420_v36 = vadd.f32 %v2419_v28, %v2277_v25  ;;  %v3528_v37 = vpop.f32.mrb[44].mxu0  ;;  %v2128_v38 = vadd.f32 %v3525_v10, %v2127_v26  ;;  %v4236_v10 = vpop.f32.mrb[32].mxu1 }
 0x136   :  { %v967_v43 = vpop.f32.mrb[45].mxu0  ;;  %v2281_v4 = vmul.f32 %v3528_v37, %v3528_v37  ;;  %v4238_v18 = vpop.f32.mrb[33].mxu1 }
 0x137   :  { %v2129_v46 = vadd.f32 %v2128_v38, %v967_v43  ;;  %v2279_v48 = vmul.f32 %v967_v43, %v967_v43  ;;  %v2421_v49 = vadd.f32 %v2420_v36, %v2278_v34  ;;  %v3529_v50 = vpop.f32.mrb[46].mxu0  ;;  %v4240_v20 = vpop.f32.mrb[34].mxu1 }
 0x138   :  { %v3091_v54 = vpack.c.bf16 %v3529_v50, %v3528_v37  ;;  %v970_v55 = vpop.f32.mrb[47].mxu0  ;;  %v2282_v11 = vmul.f32 %v3529_v50, %v3529_v50  ;;  %v3241_v34 = vpack.c.bf16 %v4240_v20, %v4236_v10  ;;  %v4244_v36 = vpop.f32.mrb[35].mxu1 }
 0x139   :  { %v2422_v59 = vadd.f32 %v2421_v49, %v2279_v48  ;;  %v3086_v60 = vpack.c.bf16 %v970_v55, %v967_v43  ;;  %v2130_v62 = vadd.f32 %v2129_v46, %v970_v55  ;;  %v2280_v2 = vmul.f32 %v970_v55, %v970_v55  ;;  %v4260_v58 = vpop.f32.mrb[36].mxu1 }
 0x13a   :  { %3355 = vst [vmem:[%s4673_s2 + $0xb8] sm:$0xff] %v3091_v54   ;;  %v3236_v43 = vpack.c.bf16 %v4244_v36, %v4238_v18  ;;  %3385 = vst [vmem:[%s4673_s2 + $0x1a8] sm:$0xff] %v3241_v34  }
 0x13b   :  { %3354 = vst [vmem:[%s4673_s2 + $0xb0] sm:$0xff] %v3086_v60   ;;  %v2131_v6 = vadd.f32 %v3528_v37, %v2130_v62  ;;  %v2423_v9 = vadd.f32 %v2422_v59, %v2280_v2 }
 0x13c   :  { %3384 = vst [vmem:[%s4673_s2 + $0x1a0] sm:$0xff] %v3236_v43  }
 0x13d   :  { %v2424_v14 = vadd.f32 %v2423_v9, %v2281_v4  ;;  %v3532_v15 = vpop.f32.mrb[48].mxu0  ;;  %v2132_v17 = vadd.f32 %v3529_v50, %v2131_v6  ;;  %v4262_v4 = vpop.f32.mrb[37].mxu1 }
 0x13e   :  { %v983_v19 = vpop.f32.mrb[49].mxu0  ;;  %v2285_v51 = vmul.f32 %v3532_v15, %v3532_v15  ;;  %v4264_v9 = vpop.f32.mrb[38].mxu1 }
 0x13f   :  { %v2133_v24 = vadd.f32 %v2132_v17, %v983_v19  ;;  %v2283_v25 = vmul.f32 %v983_v19, %v983_v19  ;;  %v2425_v26 = vadd.f32 %v2424_v14, %v2282_v11  ;;  %v3533_v28 = vpop.f32.mrb[50].mxu0 }
 0x140   :  { %v3101_v37 = vpack.c.bf16 %v3533_v28, %v3532_v15  ;;  %v986_v38 = vpop.f32.mrb[51].mxu0  ;;  %v2286_v59 = vmul.f32 %v3533_v28, %v3533_v28 }
 0x141   :  { %v2426_v46 = vadd.f32 %v2425_v26, %v2283_v25  ;;  %v3096_v48 = vpack.c.bf16 %v986_v38, %v983_v19  ;;  %v2134_v49 = vadd.f32 %v2133_v24, %v986_v38  ;;  %v2284_v50 = vmul.f32 %v986_v38, %v986_v38 }
 0x142   :  { %3357 = vst [vmem:[%s4673_s2 + $0xc8] sm:$0xff] %v3101_v37   ;;  %v3251_v24 = vpack.c.bf16 %v4264_v9, %v4260_v58 }
 0x143   :  { %3356 = vst [vmem:[%s4673_s2 + $0xc0] sm:$0xff] %v3096_v48   ;;  %v2135_v54 = vadd.f32 %v3532_v15, %v2134_v49  ;;  %v2427_v55 = vadd.f32 %v2426_v46, %v2284_v50  ;;  %v4268_v15 = vpop.f32.mrb[39].mxu1 }
 0x144   :  { %v3246_v34 = vpack.c.bf16 %v4268_v15, %v4262_v4  ;;  %3387 = vst [vmem:[%s4673_s2 + $0x1b8] sm:$0xff] %v3251_v24   ;;  %v4284_v50 = vpop.f32.mrb[40].mxu1 }
 0x145   :  { %v2428_v60 = vadd.f32 %v2427_v55, %v2285_v51  ;;  %v3536_v62 = vpop.f32.mrb[52].mxu0  ;;  %v2136_v2 = vadd.f32 %v3533_v28, %v2135_v54 }
 0x146   :  { %v999_v6 = vpop.f32.mrb[53].mxu0  ;;  %3386 = vst [vmem:[%s4673_s2 + $0x1b0] sm:$0xff] %v3246_v34   ;;  %v2289_v46 = vmul.f32 %v3536_v62, %v3536_v62 }
 0x147   :  { %v2137_v11 = vadd.f32 %v2136_v2, %v999_v6  ;;  %v2287_v14 = vmul.f32 %v999_v6, %v999_v6  ;;  %v2429_v17 = vadd.f32 %v2428_v60, %v2286_v59  ;;  %v3537_v19 = vpop.f32.mrb[54].mxu0  ;;  %v4286_v60 = vpop.f32.mrb[41].mxu1 }
 0x148   :  { %v3111_v25 = vpack.c.bf16 %v3537_v19, %v3536_v62  ;;  %v1002_v26 = vpop.f32.mrb[55].mxu0  ;;  %v2290_v51 = vmul.f32 %v3537_v19, %v3537_v19 }
 0x149   :  { %v2430_v28 = vadd.f32 %v2429_v17, %v2287_v14  ;;  %v3106_v37 = vpack.c.bf16 %v1002_v26, %v999_v6  ;;  %v2138_v38 = vadd.f32 %v2137_v11, %v1002_v26  ;;  %v2288_v43 = vmul.f32 %v1002_v26, %v1002_v26  ;;  %v4288_v6 = vpop.f32.mrb[42].mxu1 }
 0x14a   :  { %3359 = vst [vmem:[%s4673_s2 + $0xd8] sm:$0xff] %v3111_v25   ;;  %4695 = vst [vmem:[#allocation2_spill] sm:$0xff] %v4288_v6  ;;  %v3261_v25 = vpack.c.bf16 %v4288_v6, %v4284_v50 }
 0x14b   :  { %3358 = vst [vmem:[%s4673_s2 + $0xd0] sm:$0xff] %v3106_v37   ;;  %v2139_v48 = vadd.f32 %v3536_v62, %v2138_v38  ;;  %v2431_v49 = vadd.f32 %v2430_v28, %v2288_v43  ;;  %v4292_v62 = vpop.f32.mrb[43].mxu1 }
 0x14c   :  { %v3256_v28 = vpack.c.bf16 %v4292_v62, %v4286_v60  ;;  %3389 = vst [vmem:[%s4673_s2 + $0x1c8] sm:$0xff] %v3261_v25  }
 0x14d   :  { %v2432_v54 = vadd.f32 %v2431_v49, %v2289_v46  ;;  %v3540_v55 = vpop.f32.mrb[56].mxu0  ;;  %v2140_v59 = vadd.f32 %v3537_v19, %v2139_v48 }
 0x14e   :  { %v1015_v2 = vpop.f32.mrb[57].mxu0  ;;  %3388 = vst [vmem:[%s4673_s2 + $0x1c0] sm:$0xff] %v3256_v28   ;;  %v2293_v46 = vmul.f32 %v3540_v55, %v3540_v55 }
 0x14f   :  { %v2141_v11 = vadd.f32 %v2140_v59, %v1015_v2  ;;  %v2291_v14 = vmul.f32 %v1015_v2, %v1015_v2  ;;  %v2433_v17 = vadd.f32 %v2432_v54, %v2290_v51  ;;  %v3541_v24 = vpop.f32.mrb[58].mxu0  ;;  %v4308_v51 = vpop.f32.mrb[44].mxu1 }
 0x150   :  { %v3121_v26 = vpack.c.bf16 %v3541_v24, %v3540_v55  ;;  %v1018_v34 = vpop.f32.mrb[59].mxu0  ;;  %4696 = vst [vmem:[#allocation3_spill] sm:$0xff] %v4308_v51  ;;  %v2294_v54 = vmul.f32 %v3541_v24, %v3541_v24 }
 0x151   :  { %v2434_v19 = vadd.f32 %v2433_v17, %v2291_v14  ;;  %v3116_v37 = vpack.c.bf16 %v1018_v34, %v1015_v2  ;;  %v2142_v38 = vadd.f32 %v2141_v11, %v1018_v34  ;;  %v2292_v43 = vmul.f32 %v1018_v34, %v1018_v34  ;;  %v4310_v14 = vpop.f32.mrb[45].mxu1 }
 0x152   :  { %3361 = vst [vmem:[%s4673_s2 + $0xe8] sm:$0xff] %v3121_v26   ;;  %4697 = vst [vmem:[#allocation4_spill] sm:$0xff] %v4310_v14  ;;  %v4312_v25 = vpop.f32.mrb[46].mxu1 }
 0x153   :  { %3360 = vst [vmem:[%s4673_s2 + $0xe0] sm:$0xff] %v3116_v37   ;;  %v2143_v48 = vadd.f32 %v3540_v55, %v2142_v38  ;;  %v2435_v49 = vadd.f32 %v2434_v19, %v2292_v43  ;;  %4698 = vst [vmem:[#allocation5_spill] sm:$0xff] %v4312_v25  ;;  %v3271_v37 = vpack.c.bf16 %v4312_v25, %v4308_v51  ;;  %v4316_v55 = vpop.f32.mrb[47].mxu1 }
 0x154   :  { %4699 = vst [vmem:[#allocation6_spill] sm:$0xff] %v4316_v55  ;;  %v3266_v43 = vpack.c.bf16 %v4316_v55, %v4310_v14 }
 0x155   :  { %v2436_v59 = vadd.f32 %v2435_v49, %v2293_v46  ;;  %v3544_v2 = vpop.f32.mrb[60].mxu0  ;;  %v2144_v11 = vadd.f32 %v3541_v24, %v2143_v48  ;;  %3391 = vst [vmem:[%s4673_s2 + $0x1d8] sm:$0xff] %v3271_v37  }
 0x156   :  { %v1031_v17 = vpop.f32.mrb[61].mxu0  ;;  %3390 = vst [vmem:[%s4673_s2 + $0x1d0] sm:$0xff] %v3266_v43  }
 0x157   :  { %v2145_v26 = vadd.f32 %v2144_v11, %v1031_v17  ;;  %v2295_v34 = vmul.f32 %v1031_v17, %v1031_v17  ;;  %v2437_v28 = vadd.f32 %v2436_v59, %v2294_v54  ;;  %v3545_v6 = vpop.f32.mrb[62].mxu0  ;;  %v2297_v54 = vmul.f32 %v3544_v2, %v3544_v2 }
 0x158   :  { %v3131_v19 = vpack.c.bf16 %v3545_v6, %v3544_v2  ;;  %v1034_v38 = vpop.f32.mrb[63].mxu0 }
 0x159   :  { %v2438_v24 = vadd.f32 %v2437_v28, %v2295_v34  ;;  %v3126_v46 = vpack.c.bf16 %v1034_v38, %v1031_v17  ;;  %v2146_v48 = vadd.f32 %v2145_v26, %v1034_v38  ;;  %v2296_v49 = vmul.f32 %v1034_v38, %v1034_v38  ;;  %v4332_v17 = vpop.f32.mrb[48].mxu1 }
 0x15a   :  { %3363 = vst [vmem:[%s4673_s2 + $0xf8] sm:$0xff] %v3131_v19   ;;  %4700 = vst [vmem:[#allocation7_spill] sm:$0xff] %v4332_v17  ;;  %v2298_v26 = vmul.f32 %v3545_v6, %v3545_v6  ;;  %v4334_v38 = vpop.f32.mrb[49].mxu1 }
 0x15b   :  { %3362 = vst [vmem:[%s4673_s2 + $0xf0] sm:$0xff] %v3126_v46   ;;  %v2147_v59 = vadd.f32 %v3544_v2, %v2146_v48  ;;  %v2439_v11 = vadd.f32 %v2438_v24, %v2296_v49  ;;  %4701 = vst [vmem:[#allocation8_spill] sm:$0xff] %v4334_v38  ;;  %v4336_v25 = vpop.f32.mrb[50].mxu1 }
 0x15c   :  { %4702 = vst [vmem:[#allocation9_spill] sm:$0xff] %v4336_v25  ;;  %v3281_v46 = vpack.c.bf16 %v4336_v25, %v4332_v17  ;;  %v4340_v2 = vpop.f32.mrb[51].mxu1 }
 0x15d   :  { %v2440_v34 = vadd.f32 %v2439_v11, %v2297_v54  ;;  %v3548_v28 = vpop.f32.mrb[64].mxu0  ;;  %v2148_v37 = vadd.f32 %v3545_v6, %v2147_v59  ;;  %4703 = vst [vmem:[#allocation10_spill] sm:$0xff] %v4340_v2  ;;  %v3276_v49 = vpack.c.bf16 %v4340_v2, %v4334_v38 }
 0x15e   :  { %v1047_v19 = vpop.f32.mrb[65].mxu0  ;;  %3393 = vst [vmem:[%s4673_s2 + $0x1e8] sm:$0xff] %v3281_v46  }
 0x15f   :  { %v2149_v51 = vadd.f32 %v2148_v37, %v1047_v19  ;;  %v2299_v43 = vmul.f32 %v1047_v19, %v1047_v19  ;;  %v2441_v55 = vadd.f32 %v2440_v34, %v2298_v26  ;;  %v3549_v14 = vpop.f32.mrb[66].mxu0  ;;  %3392 = vst [vmem:[%s4673_s2 + $0x1e0] sm:$0xff] %v3276_v49   ;;  %v2301_v26 = vmul.f32 %v3548_v28, %v3548_v28  ;;  %v4356_v34 = vpop.f32.mrb[52].mxu1 }
 0x160   :  { %v3141_v24 = vpack.c.bf16 %v3549_v14, %v3548_v28  ;;  %v1050_v48 = vpop.f32.mrb[67].mxu0  ;;  %v2302_v37 = vmul.f32 %v3549_v14, %v3549_v14 }
 0x161   :  { %v2442_v6 = vadd.f32 %v2441_v55, %v2299_v43  ;;  %v3136_v54 = vpack.c.bf16 %v1050_v48, %v1047_v19  ;;  %v2150_v59 = vadd.f32 %v2149_v51, %v1050_v48  ;;  %v2300_v11 = vmul.f32 %v1050_v48, %v1050_v48  ;;  %v4358_v48 = vpop.f32.mrb[53].mxu1 }
 0x162   :  { %3365 = vst [vmem:[%s4673_s2 + $0x108] sm:$0xff] %v3141_v24   ;;  %v4360_v25 = vpop.f32.mrb[54].mxu1 }
 0x163   :  { %3364 = vst [vmem:[%s4673_s2 + $0x100] sm:$0xff] %v3136_v54   ;;  %v2151_v55 = vadd.f32 %v3548_v28, %v2150_v59  ;;  %v2443_v51 = vadd.f32 %v2442_v6, %v2300_v11  ;;  %4704 = vst [vmem:[#allocation11_spill] sm:$0xff] %v4360_v25  ;;  %v3291_v54 = vpack.c.bf16 %v4360_v25, %v4356_v34  ;;  %v4364_v28 = vpop.f32.mrb[55].mxu1 }
 0x164   :  { %v3286_v11 = vpack.c.bf16 %v4364_v28, %v4358_v48 }
 0x165   :  { %v2444_v19 = vadd.f32 %v2443_v51, %v2301_v26  ;;  %v3552_v43 = vpop.f32.mrb[68].mxu0  ;;  %v2152_v46 = vadd.f32 %v3549_v14, %v2151_v55  ;;  %3395 = vst [vmem:[%s4673_s2 + $0x1f8] sm:$0xff] %v3291_v54   ;;  %v2307_v54 = vmul.f32 %v4046_v21, %v4046_v21 }
 0x166   :  { %v1063_v24 = vpop.f32.mrb[69].mxu0  ;;  %3394 = vst [vmem:[%s4673_s2 + $0x1f0] sm:$0xff] %v3286_v11  }
 0x167   :  { %v2153_v17 = vadd.f32 %v2152_v46, %v1063_v24  ;;  %v2303_v49 = vmul.f32 %v1063_v24, %v1063_v24  ;;  %v2445_v2 = vadd.f32 %v2444_v19, %v2302_v37  ;;  %v3553_v38 = vpop.f32.mrb[70].mxu0  ;;  %v2305_v37 = vmul.f32 %v3552_v43, %v3552_v43  ;;  %v4380_v19 = vpop.f32.mrb[56].mxu1 }
 0x168   :  { %v3151_v6 = vpack.c.bf16 %v3553_v38, %v3552_v43  ;;  %v1066_v59 = vpop.f32.mrb[71].mxu0  ;;  %v2306_v46 = vmul.f32 %v3553_v38, %v3553_v38 }
 0x169   :  { %v2446_v14 = vadd.f32 %v2445_v2, %v2303_v49  ;;  %v3146_v26 = vpack.c.bf16 %v1066_v59, %v1063_v24  ;;  %v2154_v55 = vadd.f32 %v2153_v17, %v1066_v59  ;;  %v2304_v51 = vmul.f32 %v1066_v59, %v1066_v59 }
 0x16a   :  { %3367 = vst [vmem:[%s4673_s2 + $0x118] sm:$0xff] %v3151_v6   ;;  %v4384_v6 = vpop.f32.mrb[57].mxu1 }
 0x16b   :  { %3366 = vst [vmem:[%s4673_s2 + $0x110] sm:$0xff] %v3146_v26   ;;  %v2155_v2 = vadd.f32 %v3552_v43, %v2154_v55  ;;  %v2447_v17 = vadd.f32 %v2446_v14, %v2304_v51  ;;  %v4386_v59 = vpop.f32.mrb[58].mxu1  ;;  %v2308_v51 = vmul.f32 %v4052_v29, %v4052_v29 }
 0x16c   :  { %v3301_v26 = vpack.c.bf16 %v4386_v59, %v4380_v19  ;;  %v4391_v43 = vpop.f32.mrb[59].mxu1 }
 0x16d   :  { %v2156_v24 = vadd.f32 %v3553_v38, %v2155_v2  ;;  %v2448_v49 = vadd.f32 %v2447_v17, %v2305_v37  ;;  %v3296_v14 = vpack.c.bf16 %v4391_v43, %v4384_v6  ;;  %v4407_v17 = vpop.f32.mrb[60].mxu1 }
 0x16e   :  { %3397 = vst [vmem:[%s4673_s2 + $0x208] sm:$0xff] %v3301_v26  }
 0x16f   :  { %v2449_v11 = vadd.f32 %v2448_v49, %v2306_v46  ;;  %v2157_v25 = vadd.f32 %v2156_v24, %v4046_v21  ;;  %3396 = vst [vmem:[%s4673_s2 + $0x200] sm:$0xff] %v3296_v14   ;;  %v2309_v21 = vmul.f32 %v4044_v16, %v4044_v16  ;;  %v2311_v24 = vmul.f32 %v4070_v45, %v4070_v45  ;;  %v4414_v49 = vpop.f32.mrb[61].mxu1 }
 0x171   :  { %v2450_v38 = vadd.f32 %v2449_v11, %v2307_v54  ;;  %v2158_v55 = vadd.f32 %v2157_v25, %v4052_v29  ;;  %v2310_v25 = vmul.f32 %v4048_v23, %v4048_v23  ;;  %v4416_v54 = vpop.f32.mrb[62].mxu1 }
 0x172   :  { %v4421_v14 = vpop.f32.mrb[63].mxu1 }
 0x173   :  { %v2159_v37 = vadd.f32 %v4044_v16, %v2158_v55  ;;  %v2451_v2 = vadd.f32 %v2450_v38, %v2308_v51  ;;  %v3311_v16 = vpack.c.bf16 %v4416_v54, %v4407_v17  ;;  %v3306_v38 = vpack.c.bf16 %v4421_v14, %v4414_v49 }
 0x174   :  { %v2312_v51 = vmul.f32 %v4076_v53, %v4076_v53 }
 0x175   :  { %v2160_v29 = vadd.f32 %v4048_v23, %v2159_v37  ;;  %v2452_v46 = vadd.f32 %v2451_v2, %v2309_v21  ;;  %3399 = vst [vmem:[%s4673_s2 + $0x218] sm:$0xff] %v3311_v16   ;;  %3398 = vst [vmem:[%s4673_s2 + $0x210] sm:$0xff] %v3306_v38   ;;  %v4437_v2 = vpop.f32.mrb[64].mxu1 }
 0x177   :  { %v2453_v11 = vadd.f32 %v2452_v46, %v2310_v25  ;;  %v2161_v26 = vadd.f32 %v2160_v29, %v4070_v45  ;;  %v2313_v45 = vmul.f32 %v4068_v40, %v4068_v40  ;;  %v2314_v25 = vmul.f32 %v4072_v47, %v4072_v47 }
 0x178   :  { %v2315_v46 = vmul.f32 %v4094_v5, %v4094_v5 }
 0x179   :  { %v2454_v23 = vadd.f32 %v2453_v11, %v2311_v24  ;;  %v2162_v55 = vadd.f32 %v2161_v26, %v4076_v53  ;;  %v4444_v24 = vpop.f32.mrb[65].mxu1 }
 0x17a   :  { %v4446_v11 = vpop.f32.mrb[66].mxu1 }
 0x17b   :  { %v2163_v21 = vadd.f32 %v4068_v40, %v2162_v55  ;;  %v2455_v37 = vadd.f32 %v2454_v23, %v2312_v51  ;;  %v3321_v40 = vpack.c.bf16 %v4446_v11, %v4437_v2  ;;  %v4451_v38 = vpop.f32.mrb[67].mxu1  ;;  %v2316_v51 = vmul.f32 %v4100_v13, %v4100_v13 }
 0x17c   :  { %v3316_v23 = vpack.c.bf16 %v4451_v38, %v4444_v24 }
 0x17d   :  { %v2164_v53 = vadd.f32 %v4072_v47, %v2163_v21  ;;  %v2456_v29 = vadd.f32 %v2455_v37, %v2313_v45  ;;  %3401 = vst [vmem:[%s4673_s2 + $0x228] sm:$0xff] %v3321_v40   ;;  %v4467_v37 = vpop.f32.mrb[68].mxu1 }
 0x17e   :  { %3400 = vst [vmem:[%s4673_s2 + $0x220] sm:$0xff] %v3316_v23  }
 0x17f   :  { %v2457_v26 = vadd.f32 %v2456_v29, %v2314_v25  ;;  %v2165_v16 = vadd.f32 %v2164_v53, %v4094_v5  ;;  %v2317_v5 = vmul.f32 %v4092_v0, %v4092_v0  ;;  %v2318_v25 = vmul.f32 %v4096_v7, %v4096_v7 }
 0x180   :  { %v2319_v29 = vmul.f32 %v4118_v33, %v4118_v33 }
 0x181   :  { %v2458_v47 = vadd.f32 %v2457_v26, %v2315_v46  ;;  %v2166_v55 = vadd.f32 %v2165_v16, %v4100_v13  ;;  %v4474_v46 = vpop.f32.mrb[69].mxu1 }
 0x182   :  { %v4476_v26 = vpop.f32.mrb[70].mxu1 }
 0x183   :  { %v2167_v45 = vadd.f32 %v4092_v0, %v2166_v55  ;;  %v2459_v21 = vadd.f32 %v2458_v47, %v2316_v51  ;;  %v3331_v0 = vpack.c.bf16 %v4476_v26, %v4467_v37  ;;  %v4481_v23 = vpop.f32.mrb[71].mxu1  ;;  %v2320_v51 = vmul.f32 %v4124_v42, %v4124_v42 }
 0x184   :  { %v3326_v47 = vpack.c.bf16 %v4481_v23, %v4474_v46 }
 0x185   :  { %v2460_v13 = vadd.f32 %v2459_v21, %v2317_v5  ;;  %v2168_v53 = vadd.f32 %v4096_v7, %v2167_v45  ;;  %3403 = vst [vmem:[%s4673_s2 + $0x238] sm:$0xff] %v3331_v0   ;;  %v2322_v21 = vmul.f32 %v4120_v35, %v4120_v35  ;;  %v2324_v0 = vmul.f32 %v4148_v8, %v4148_v8 }
 0x186   :  { %3402 = vst [vmem:[%s4673_s2 + $0x230] sm:$0xff] %v3326_v47  }
 0x187   :  { %v2169_v16 = vadd.f32 %v2168_v53, %v4118_v33  ;;  %v2461_v40 = vadd.f32 %v2460_v13, %v2318_v25  ;;  %v2321_v33 = vmul.f32 %v4116_v27, %v4116_v27  ;;  %v2323_v13 = vmul.f32 %v4142_v61, %v4142_v61 }
 0x189   :  { %v2462_v55 = vadd.f32 %v2461_v40, %v2319_v29  ;;  %v2170_v7 = vadd.f32 %v2169_v16, %v4124_v42 }
 0x18b   :  { %v2171_v5 = vadd.f32 %v4116_v27, %v2170_v7  ;;  %v2463_v45 = vadd.f32 %v2462_v55, %v2320_v51  ;;  %v2325_v27 = vmul.f32 %v4140_v56, %v4140_v56 }
 0x18d   :  { %v2464_v25 = vadd.f32 %v2463_v45, %v2321_v33  ;;  %v2172_v42 = vadd.f32 %v4120_v35, %v2171_v5  ;;  %v2326_v35 = vmul.f32 %v4144_v63, %v4144_v63 }
 0x18f   :  { %v2173_v53 = vadd.f32 %v2172_v42, %v4142_v61  ;;  %v2465_v29 = vadd.f32 %v2464_v25, %v2322_v21  ;;  %v2327_v61 = vmul.f32 %v4166_v30, %v4166_v30  ;;  %v2328_v21 = vmul.f32 %v4172_v41, %v4172_v41 }
 0x191   :  { %v2466_v16 = vadd.f32 %v2465_v29, %v2323_v13  ;;  %v2174_v40 = vadd.f32 %v2173_v53, %v4148_v8 }
 0x193   :  { %v2175_v47 = vadd.f32 %v4140_v56, %v2174_v40  ;;  %v2467_v55 = vadd.f32 %v2466_v16, %v2324_v0  ;;  %v2329_v56 = vmul.f32 %v4164_v22, %v4164_v22  ;;  %v2332_v0 = vmul.f32 %v4196_v12, %v4196_v12 }
 0x195   :  { %v2468_v7 = vadd.f32 %v2467_v55, %v2325_v27  ;;  %v2176_v51 = vadd.f32 %v4144_v63, %v2175_v47  ;;  %v2330_v63 = vmul.f32 %v4168_v32, %v4168_v32 }
 0x197   :  { %v2177_v33 = vadd.f32 %v2176_v51, %v4166_v30  ;;  %v2469_v5 = vadd.f32 %v2468_v7, %v2326_v35  ;;  %v2331_v30 = vmul.f32 %v4190_v1, %v4190_v1 }
 0x199   :  { %v2470_v45 = vadd.f32 %v2469_v5, %v2327_v61  ;;  %v2178_v8 = vadd.f32 %v2177_v33, %v4172_v41  ;;  %v2336_v33 = vmul.f32 %v4220_v52, %v4220_v52 }
 0x19b   :  { %v2179_v25 = vadd.f32 %v4164_v22, %v2178_v8  ;;  %v2471_v42 = vadd.f32 %v2470_v45, %v2328_v21  ;;  %v2333_v22 = vmul.f32 %v4188_v57, %v4188_v57 }
 0x19d   :  { %v2472_v13 = vadd.f32 %v2471_v42, %v2329_v56  ;;  %v2180_v53 = vadd.f32 %v4168_v32, %v2179_v25  ;;  %v2334_v32 = vmul.f32 %v4192_v3, %v4192_v3 }
 0x19f   :  { %v2181_v29 = vadd.f32 %v2180_v53, %v4190_v1  ;;  %v2473_v16 = vadd.f32 %v2472_v13, %v2330_v63  ;;  %v2335_v1 = vmul.f32 %v4214_v39, %v4214_v39  ;;  %v2340_v63 = vmul.f32 %v4244_v36, %v4244_v36 }
 0x1a1   :  { %v2474_v40 = vadd.f32 %v2473_v16, %v2331_v30  ;;  %v2182_v41 = vadd.f32 %v2181_v29, %v4196_v12 }
 0x1a3   :  { %v2183_v27 = vadd.f32 %v4188_v57, %v2182_v41  ;;  %v2475_v47 = vadd.f32 %v2474_v40, %v2332_v0  ;;  %v2337_v57 = vmul.f32 %v4212_v31, %v4212_v31  ;;  %v2344_v0 = vmul.f32 %v4268_v15, %v4268_v15 }
 0x1a5   :  { %v2476_v55 = vadd.f32 %v2475_v47, %v2333_v22  ;;  %v2184_v35 = vadd.f32 %v4192_v3, %v2183_v27  ;;  %v2338_v3 = vmul.f32 %v4216_v44, %v4216_v44 }
 0x1a7   :  { %v2185_v7 = vadd.f32 %v2184_v35, %v4214_v39  ;;  %v2477_v51 = vadd.f32 %v2476_v55, %v2334_v32  ;;  %v2339_v39 = vmul.f32 %v4238_v18, %v4238_v18 }
 0x1a9   :  { %v2478_v61 = vadd.f32 %v2477_v51, %v2335_v1  ;;  %v2186_v12 = vadd.f32 %v2185_v7, %v4220_v52  ;;  %v2348_v7 = vmul.f32 %v4292_v62, %v4292_v62 }
 0x1ab   :  { %v2187_v5 = vadd.f32 %v4212_v31, %v2186_v12  ;;  %v2479_v45 = vadd.f32 %v2478_v61, %v2336_v33  ;;  %v2341_v31 = vmul.f32 %v4236_v10, %v4236_v10  ;;  %v4705_v12 = vld [vmem:[#allocation2_spill] sm:$0xff] }
 0x1ad   :  { %v2480_v8 = vadd.f32 %v2479_v45, %v2337_v57  ;;  %v2188_v21 = vadd.f32 %v4216_v44, %v2187_v5  ;;  %v2342_v44 = vmul.f32 %v4240_v20, %v4240_v20 }
 0x1af   :  { %v2189_v56 = vadd.f32 %v2188_v21, %v4238_v18  ;;  %v2481_v25 = vadd.f32 %v2480_v8, %v2338_v3  ;;  %v2343_v18 = vmul.f32 %v4262_v4, %v4262_v4 }
 0x1b1   :  { %v2482_v42 = vadd.f32 %v2481_v25, %v2339_v39  ;;  %v2190_v52 = vadd.f32 %v2189_v56, %v4244_v36 }
 0x1b3   :  { %v2191_v13 = vadd.f32 %v4236_v10, %v2190_v52  ;;  %v2483_v53 = vadd.f32 %v2482_v42, %v2340_v63  ;;  %v2345_v10 = vmul.f32 %v4260_v58, %v4260_v58  ;;  %v4709_v52 = vld [vmem:[#allocation5_spill] sm:$0xff] }
 0x1b4   :  { %v2354_v63 = vmul.f32 %v4709_v52, %v4709_v52 }
 0x1b5   :  { %v2484_v30 = vadd.f32 %v2483_v53, %v2341_v31  ;;  %v2192_v29 = vadd.f32 %v4240_v20, %v2191_v13  ;;  %v2346_v20 = vmul.f32 %v4264_v9, %v4264_v9  ;;  %v4710_v53 = vld [vmem:[#allocation8_spill] sm:$0xff] }
 0x1b7   :  { %v2193_v16 = vadd.f32 %v2192_v29, %v4262_v4  ;;  %v2485_v40 = vadd.f32 %v2484_v30, %v2342_v44  ;;  %v2347_v4 = vmul.f32 %v4286_v60, %v4286_v60  ;;  %v2355_v44 = vmul.f32 %v4710_v53, %v4710_v53 }
 0x1b9   :  { %v2486_v41 = vadd.f32 %v2485_v40, %v2343_v18  ;;  %v2194_v36 = vadd.f32 %v2193_v16, %v4268_v15  ;;  %v4711_v16 = vld [vmem:[#allocation10_spill] sm:$0xff] }
 0x1bb   :  { %v2195_v22 = vadd.f32 %v4260_v58, %v2194_v36  ;;  %v2487_v27 = vadd.f32 %v2486_v41, %v2344_v0  ;;  %v2349_v58 = vmul.f32 %v4284_v50, %v4284_v50  ;;  %v2356_v41 = vmul.f32 %v4711_v16, %v4711_v16  ;;  %v4712_v36 = vld [vmem:[#allocation7_spill] sm:$0xff] }
 0x1bc   :  { %v2357_v0 = vmul.f32 %v4712_v36, %v4712_v36 }
 0x1bd   :  { %v2488_v47 = vadd.f32 %v2487_v27, %v2345_v10  ;;  %v2196_v32 = vadd.f32 %v4264_v9, %v2195_v22  ;;  %v2350_v9 = vmul.f32 %v4705_v12, %v4705_v12  ;;  %v4713_v27 = vld [vmem:[#allocation9_spill] sm:$0xff] }
 0x1bf   :  { %v2197_v55 = vadd.f32 %v2196_v32, %v4286_v60  ;;  %v2489_v35 = vadd.f32 %v2488_v47, %v2346_v20  ;;  %v4706_v60 = vld [vmem:[#allocation4_spill] sm:$0xff]  ;;  %v2358_v20 = vmul.f32 %v4713_v27, %v4713_v27 }
 0x1c0   :  { %v2351_v5 = vmul.f32 %v4706_v60, %v4706_v60 }
 0x1c1   :  { %v2490_v1 = vadd.f32 %v2489_v35, %v2347_v4  ;;  %v2198_v15 = vadd.f32 %v2197_v55, %v4292_v62  ;;  %v4707_v62 = vld [vmem:[#allocation6_spill] sm:$0xff]  ;;  %v2359_v4 = vmul.f32 %v4358_v48, %v4358_v48 }
 0x1c2   :  { %v2352_v39 = vmul.f32 %v4707_v62, %v4707_v62 }
 0x1c3   :  { %v2199_v51 = vadd.f32 %v4284_v50, %v2198_v15  ;;  %v2491_v61 = vadd.f32 %v2490_v1, %v2348_v7  ;;  %v4708_v50 = vld [vmem:[#allocation3_spill] sm:$0xff]  ;;  %v2360_v7 = vmul.f32 %v4364_v28, %v4364_v28 }
 0x1c4   :  { %v2353_v56 = vmul.f32 %v4708_v50, %v4708_v50 }
 0x1c5   :  { %v2492_v33 = vadd.f32 %v2491_v61, %v2349_v58  ;;  %v2200_v57 = vadd.f32 %v4705_v12, %v2199_v51  ;;  %v2361_v58 = vmul.f32 %v4356_v34, %v4356_v34  ;;  %v4714_v12 = vld [vmem:[#allocation11_spill] sm:$0xff] }
 0x1c7   :  { %v2201_v45 = vadd.f32 %v2200_v57, %v4706_v60  ;;  %v2493_v3 = vadd.f32 %v2492_v33, %v2350_v9  ;;  %v2362_v9 = vmul.f32 %v4714_v12, %v4714_v12 }
 0x1c9   :  { %v2494_v8 = vadd.f32 %v2493_v3, %v2351_v5  ;;  %v2202_v21 = vadd.f32 %v2201_v45, %v4707_v62  ;;  %v2364_v3 = vmul.f32 %v4391_v43, %v4391_v43 }
 0x1cb   :  { %v2203_v25 = vadd.f32 %v4708_v50, %v2202_v21  ;;  %v2495_v42 = vadd.f32 %v2494_v8, %v2352_v39  ;;  %v2366_v21 = vmul.f32 %v4386_v59, %v4386_v59 }
 0x1cd   :  { %v2496_v31 = vadd.f32 %v2495_v42, %v2353_v56  ;;  %v2204_v13 = vadd.f32 %v4709_v52, %v2203_v25  ;;  %v2368_v52 = vmul.f32 %v4421_v14, %v4421_v14 }
 0x1cf   :  { %v2205_v30 = vadd.f32 %v2204_v13, %v4710_v53  ;;  %v2497_v29 = vadd.f32 %v2496_v31, %v2354_v63 }
 0x1d1   :  { %v2498_v18 = vadd.f32 %v2497_v29, %v2355_v44  ;;  %v2206_v40 = vadd.f32 %v2205_v30, %v4711_v16 }
 0x1d3   :  { %v2207_v10 = vadd.f32 %v4712_v36, %v2206_v40  ;;  %v2499_v22 = vadd.f32 %v2498_v18, %v2356_v41  ;;  %v2372_v18 = vmul.f32 %v4451_v38, %v4451_v38 }
 0x1d5   :  { %v2500_v47 = vadd.f32 %v2499_v22, %v2357_v0  ;;  %v2208_v32 = vadd.f32 %v4713_v27, %v2207_v10  ;;  %v2376_v27 = vmul.f32 %v4481_v23, %v4481_v23 }
 0x1d7   :  { %v2209_v55 = vadd.f32 %v2208_v32, %v4358_v48  ;;  %v2501_v35 = vadd.f32 %v2500_v47, %v2358_v20  ;;  %v2363_v48 = vmul.f32 %v4384_v6, %v4384_v6 }
 0x1d9   :  { %v2502_v1 = vadd.f32 %v2501_v35, %v2359_v4  ;;  %v2210_v15 = vadd.f32 %v2209_v55, %v4364_v28 }
 0x1db   :  { %v2211_v51 = vadd.f32 %v4356_v34, %v2210_v15  ;;  %v2503_v61 = vadd.f32 %v2502_v1, %v2360_v7  ;;  %v2365_v34 = vmul.f32 %v4380_v19, %v4380_v19 }
 0x1dd   :  { %v2504_v33 = vadd.f32 %v2503_v61, %v2361_v58  ;;  %v2212_v57 = vadd.f32 %v4714_v12, %v2211_v51 }
 0x1df   :  { %v2213_v60 = vadd.f32 %v2212_v57, %v4384_v6  ;;  %v2505_v5 = vadd.f32 %v2504_v33, %v2362_v9  ;;  %v2367_v6 = vmul.f32 %v4414_v49, %v4414_v49 }
 0x1e1   :  { %v2506_v45 = vadd.f32 %v2505_v5, %v2363_v48  ;;  %v2214_v28 = vadd.f32 %v2213_v60, %v4391_v43 }
 0x1e3   :  { %v2215_v8 = vadd.f32 %v4380_v19, %v2214_v28  ;;  %v2507_v62 = vadd.f32 %v2506_v45, %v2364_v3  ;;  %v2369_v19 = vmul.f32 %v4407_v17, %v4407_v17 }
 0x1e5   :  { %v2508_v39 = vadd.f32 %v2507_v62, %v2365_v34  ;;  %v2216_v50 = vadd.f32 %v4386_v59, %v2215_v8  ;;  %v2370_v59 = vmul.f32 %v4416_v54, %v4416_v54 }
 0x1e7   :  { %v2217_v56 = vadd.f32 %v2216_v50, %v4414_v49  ;;  %v2509_v25 = vadd.f32 %v2508_v39, %v2366_v21  ;;  %v2371_v49 = vmul.f32 %v4444_v24, %v4444_v24 }
 0x1e9   :  { %v2510_v42 = vadd.f32 %v2509_v25, %v2367_v6  ;;  %v2218_v43 = vadd.f32 %v2217_v56, %v4421_v14 }
 0x1eb   :  { %v2219_v63 = vadd.f32 %v4407_v17, %v2218_v43  ;;  %v2511_v31 = vadd.f32 %v2510_v42, %v2368_v52  ;;  %v2373_v17 = vmul.f32 %v4437_v2, %v4437_v2 }
 0x1ed   :  { %v2512_v13 = vadd.f32 %v2511_v31, %v2369_v19  ;;  %v2220_v53 = vadd.f32 %v4416_v54, %v2219_v63  ;;  %v2374_v54 = vmul.f32 %v4446_v11, %v4446_v11 }
 0x1ef   :  { %v2221_v44 = vadd.f32 %v2220_v53, %v4444_v24  ;;  %v2513_v30 = vadd.f32 %v2512_v13, %v2370_v59  ;;  %v2375_v24 = vmul.f32 %v4474_v46, %v4474_v46 }
 0x1f1   :  { %v2514_v29 = vadd.f32 %v2513_v30, %v2371_v49  ;;  %v2222_v14 = vadd.f32 %v2221_v44, %v4451_v38 }
 0x1f3   :  { %v2223_v16 = vadd.f32 %v4437_v2, %v2222_v14  ;;  %v2515_v40 = vadd.f32 %v2514_v29, %v2372_v18  ;;  %v2377_v2 = vmul.f32 %v4467_v37, %v4467_v37 }
 0x1f5   :  { %v2516_v41 = vadd.f32 %v2515_v40, %v2373_v17  ;;  %v2224_v36 = vadd.f32 %v4446_v11, %v2223_v16  ;;  %v2378_v11 = vmul.f32 %v4476_v26, %v4476_v26 }
 0x1f7   :  { %v2225_v0 = vadd.f32 %v2224_v36, %v4474_v46  ;;  %v2517_v10 = vadd.f32 %v2516_v41, %v2374_v54 }
 0x1f9   :  { %v2518_v22 = vadd.f32 %v2517_v10, %v2375_v24  ;;  %v2226_v38 = vadd.f32 %v2225_v0, %v4481_v23 }
 0x1fb   :  { %v2227_v20 = vadd.f32 %v4467_v37, %v2226_v38  ;;  %v2519_v47 = vadd.f32 %v2518_v22, %v2376_v27 }
 0x1fd   :  { %v2228_v32 = vadd.f32 %v4476_v26, %v2227_v20  ;;  %v2520_v4 = vadd.f32 %v2519_v47, %v2377_v2 }
 0x1ff   :  { %v2229_v46 = vrot.slane %v2228_v32, 4  ;;  %v2521_v55 = vadd.f32 %v2520_v4, %v2378_v11 }
 0x201   :  { %v2230_v35 = vadd.f32 %v2229_v46, %v2228_v32  ;;  %v2522_v1 = vrot.slane %v2521_v55, 4 }
 0x203   :  { %v2231_v15 = vrot.slane %v2230_v35, 2  ;;  %v2523_v7 = vadd.f32 %v2522_v1, %v2521_v55 }
 0x205   :  { %v2232_v58 = vadd.f32 %v2231_v15, %v2230_v35  ;;  %v2524_v23 = vrot.slane %v2523_v7, 2 }
 0x207   :  { %v2233_v51 = vrot.slane %v2232_v58, 1  ;;  %v2525_v61 = vadd.f32 %v2524_v23, %v2523_v7 }
 0x209   :  { %v2526_v12 = vrot.slane %v2525_v61, 1  ;;  %v2234_v37 = vadd.f32 %v2233_v51, %v2232_v58 }
 0x20b   :  { %v2527_v9 = vadd.f32 %v2526_v12, %v2525_v61 }
 0x20d   :  { %v2529_v33 = vsel %vm2528_vm3, %v2234_v37, %v2527_v9 }
 0x20e   :  { %2530 = vst [vmem:[%s4674_s3] sm:$0x3] %v2529_v33 }

// kernel: convnet_forward.8
= control target key start
LH: loop header
LB: loop body
LE: loop exit
PB: predicated region body
PF: predicated region fallthrough
CT: control target
= control target key end

     0   :  { %vm229_vm0 = vcmask 1043456   ;;  %s453_s0 = inlined_call_operand.vmem [shape: bf16[16,4,256], index: 0, kind: input, shape index: {}]   ;;  %s454_s1 = inlined_call_operand.vmem [shape: f32[2,128], index: 1, kind: input, shape index: {}]   ;;  %s455_s2 = inlined_call_operand.vmem [shape: bf16[8,4,128], index: 2, kind: output, shape index: {}]  }
   0x1   :  { %v294_v0 = vld [vmem:[%s454_s1] ss:$0 sm:$0xff]  ;;  %v14_v2 = vld [vmem:[%s453_s0 + $0x4] sm:$0xf]  ;;  %v15_v5 = vld [vmem:[%s453_s0 + $0x8] sm:$0xf] }
   0x2   :  { %v13_v1 = vld [vmem:[%s453_s0] sm:$0xf]  ;;  %v30_v7 = vunpack.c.l.bf16 %v14_v2  ;;  %v62_v8 = vrot.slane %v14_v2, 2  ;;  %v16_v9 = vld [vmem:[%s453_s0 + $0xc] sm:$0xf]  ;;  %v31_v10 = vunpack.c.l.bf16 %v15_v5  ;;  %v63_v11 = vrot.slane %v15_v5, 2 }
   0x3   :  { %v29_v3 = vunpack.c.l.bf16 %v13_v1  ;;  %v61_v4 = vrot.slane %v13_v1, 2  ;;  %v308_v6 = vld [vmem:[%s454_s1 + $0x1] ss:$0 sm:$0xff]  ;;  %v32_v14 = vunpack.c.l.bf16 %v16_v9  ;;  %v64_v15 = vrot.slane %v16_v9, 2  ;;  %v17_v32 = vld [vmem:[%s453_s0 + $0x10] sm:$0xf] }
   0x4   :  { %v94_v16 = vunpack.c.l.bf16 %v62_v8  ;;  %v114_v17 = vmul.f32 %v294_v0, %v30_v7  ;;  %v95_v18 = vunpack.c.l.bf16 %v63_v11  ;;  %v115_v19 = vmul.f32 %v294_v0, %v31_v10  ;;  %v18_v37 = vld [vmem:[%s453_s0 + $0x14] sm:$0xf]  ;;  %v19_v62 = vld [vmem:[%s453_s0 + $0x18] sm:$0xf] }
   0x5   :  { %v93_v12 = vunpack.c.l.bf16 %v61_v4  ;;  %v113_v13 = vmul.f32 %v294_v0, %v29_v3  ;;  %v96_v22 = vunpack.c.l.bf16 %v64_v15  ;;  %v116_v23 = vmul.f32 %v294_v0, %v32_v14  ;;  %v20_v4 = vld [vmem:[%s453_s0 + $0x1c] sm:$0xf] }
   0x6   :  { %v134_v24 = vadd.f32 %v308_v6, %v114_v17  ;;  %v166_v25 = vmul.f32 %v294_v0, %v94_v16  ;;  %v135_v26 = vadd.f32 %v308_v6, %v115_v19  ;;  %v167_v27 = vmul.f32 %v294_v0, %v95_v18  ;;  %v21_v18 = vld [vmem:[%s453_s0 + $0x20] sm:$0xf] }
   0x7   :  { %v133_v20 = vadd.f32 %v308_v6, %v113_v13  ;;  %v165_v21 = vmul.f32 %v294_v0, %v93_v12  ;;  %v136_v30 = vadd.f32 %v308_v6, %v116_v23  ;;  %v168_v31 = vmul.f32 %v294_v0, %v96_v22  ;;  %v22_v22 = vld [vmem:[%s453_s0 + $0x24] sm:$0xf] }
   0x8   :  { %v150_v33 = vmax.f32 %v134_v24, 0.0  ;;  %v182_v34 = vadd.f32 %v308_v6, %v166_v25  ;;  %v151_v35 = vmax.f32 %v135_v26, 0.0  ;;  %v183_v36 = vadd.f32 %v308_v6, %v167_v27 }
   0x9   :  { %v149_v28 = vmax.f32 %v133_v20, 0.0  ;;  %v181_v29 = vadd.f32 %v308_v6, %v165_v21  ;;  %v152_v39 = vmax.f32 %v136_v30, 0.0  ;;  %v184_v40 = vadd.f32 %v308_v6, %v168_v31 }
   0xa   :  { %v33_v41 = vunpack.c.l.bf16 %v17_v32  ;;  %v198_v42 = vmax.f32 %v182_v34, 0.0  ;;  %v199_v43 = vmax.f32 %v183_v36, 0.0  ;;  %v34_v44 = vunpack.c.l.bf16 %v18_v37 }
   0xb   :  { %v197_v38 = vmax.f32 %v181_v29, 0.0  ;;  %v65_v45 = vrot.slane %v17_v32, 2  ;;  %v200_v47 = vmax.f32 %v184_v40, 0.0  ;;  %v66_v48 = vrot.slane %v18_v37, 2 }
   0xc   :  { %v117_v49 = vmul.f32 %v294_v0, %v33_v41  ;;  %v214_v50 = vmax.f32 %v150_v33, %v198_v42  ;;  %v215_v51 = vmax.f32 %v151_v35, %v199_v43  ;;  %v118_v53 = vmul.f32 %v294_v0, %v34_v44  ;;  %v23_v44 = vld [vmem:[%s453_s0 + $0x28] sm:$0xf] }
   0xd   :  { %v213_v46 = vmax.f32 %v149_v28, %v197_v38  ;;  %v97_v52 = vunpack.c.l.bf16 %v65_v45  ;;  %v216_v55 = vmax.f32 %v152_v39, %v200_v47  ;;  %v98_v56 = vunpack.c.l.bf16 %v66_v48 }
   0xe   :  { %v137_v57 = vadd.f32 %v308_v6, %v117_v49  ;;  %v231_v58 = vsel %vm229_vm0, %v214_v50, -inf  ;;  %v233_v59 = vsel %vm229_vm0, %v215_v51, -inf  ;;  %v138_v60 = vadd.f32 %v308_v6, %v118_v53  ;;  %v24_v53 = vld [vmem:[%s453_s0 + $0x2c] sm:$0xf] }
   0xf   :  { %v230_v54 = vsel %vm229_vm0, %v213_v46, -inf  ;;  %v169_v61 = vmul.f32 %v294_v0, %v97_v52  ;;  %v234_v1 = vsel %vm229_vm0, %v216_v55, -inf  ;;  %v170_v3 = vmul.f32 %v294_v0, %v98_v56 }
  0x10   :  { %v232_v63 = vmax.f32 %v230_v54, %v231_v58  ;;  %v153_v2 = vmax.f32 %v137_v57, 0.0  ;;  %v235_v5 = vmax.f32 %v233_v59, %v234_v1  ;;  %v154_v7 = vmax.f32 %v138_v60, 0.0 }
  0x11   :  { %v185_v8 = vadd.f32 %v308_v6, %v169_v61  ;;  %v35_v9 = vunpack.c.l.bf16 %v19_v62  ;;  %v186_v11 = vadd.f32 %v308_v6, %v170_v3  ;;  %v36_v12 = vunpack.c.l.bf16 %v20_v4 }
  0x12   :  { %v254_v10 = vpack.c.bf16 %v232_v63, %v232_v63  ;;  %v67_v13 = vrot.slane %v19_v62, 2  ;;  %v255_v14 = vpack.c.bf16 %v235_v5, %v235_v5  ;;  %v68_v16 = vrot.slane %v20_v4, 2 }
  0x13   :  { %v201_v15 = vmax.f32 %v185_v8, 0.0  ;;  %v119_v17 = vmul.f32 %v294_v0, %v35_v9  ;;  %v202_v19 = vmax.f32 %v186_v11, 0.0  ;;  %v120_v21 = vmul.f32 %v294_v0, %v36_v12  ;;  %v25_v12 = vld [vmem:[%s453_s0 + $0x30] sm:$0xf] }
  0x14   :  { %262 = vst [vmem:[%s455_s2] sm:$0x3] %v254_v10  ;;  %v99_v20 = vunpack.c.l.bf16 %v67_v13  ;;  %v37_v23 = vunpack.c.l.bf16 %v21_v18  ;;  %263 = vst [vmem:[%s455_s2 + $0x2] sm:$0x3] %v255_v14  ;;  %v100_v25 = vunpack.c.l.bf16 %v68_v16  ;;  %v38_v27 = vunpack.c.l.bf16 %v22_v22 }
  0x15   :  { %v217_v24 = vmax.f32 %v153_v2, %v201_v15  ;;  %v139_v26 = vadd.f32 %v308_v6, %v119_v17  ;;  %v218_v28 = vmax.f32 %v154_v7, %v202_v19  ;;  %v140_v29 = vadd.f32 %v308_v6, %v120_v21  ;;  %v26_v21 = vld [vmem:[%s453_s0 + $0x34] sm:$0xf] }
  0x16   :  { %v171_v30 = vmul.f32 %v294_v0, %v99_v20  ;;  %v69_v31 = vrot.slane %v21_v18, 2  ;;  %v172_v34 = vmul.f32 %v294_v0, %v100_v25  ;;  %v70_v35 = vrot.slane %v22_v22, 2 }
  0x17   :  { %v236_v32 = vsel %vm229_vm0, %v217_v24, -inf  ;;  %v155_v33 = vmax.f32 %v139_v26, 0.0  ;;  %v237_v36 = vsel %vm229_vm0, %v218_v28, -inf  ;;  %v156_v37 = vmax.f32 %v140_v29, 0.0 }
  0x18   :  { %v187_v38 = vadd.f32 %v308_v6, %v171_v30  ;;  %v101_v39 = vunpack.c.l.bf16 %v69_v31  ;;  %v238_v40 = vmax.f32 %v236_v32, %v237_v36  ;;  %v188_v41 = vadd.f32 %v308_v6, %v172_v34  ;;  %v27_v34 = vld [vmem:[%s453_s0 + $0x38] sm:$0xf] }
  0x19   :  { %v102_v42 = vunpack.c.l.bf16 %v70_v35  ;;  %v121_v43 = vmul.f32 %v294_v0, %v37_v23  ;;  %v122_v46 = vmul.f32 %v294_v0, %v38_v27  ;;  %v39_v48 = vunpack.c.l.bf16 %v23_v44 }
  0x1a   :  { %v203_v45 = vmax.f32 %v187_v38, 0.0  ;;  %v173_v47 = vmul.f32 %v294_v0, %v101_v39  ;;  %v256_v49 = vpack.c.bf16 %v238_v40, %v238_v40  ;;  %v204_v50 = vmax.f32 %v188_v41, 0.0 }
  0x1b   :  { %v141_v51 = vadd.f32 %v308_v6, %v121_v43  ;;  %v174_v52 = vmul.f32 %v294_v0, %v102_v42  ;;  %v142_v55 = vadd.f32 %v308_v6, %v122_v46  ;;  %v40_v57 = vunpack.c.l.bf16 %v24_v53  ;;  %v28_v43 = vld [vmem:[%s453_s0 + $0x3c] sm:$0xf] }
  0x1c   :  { %v219_v54 = vmax.f32 %v155_v33, %v203_v45  ;;  %v189_v56 = vadd.f32 %v308_v6, %v173_v47  ;;  %264 = vst [vmem:[%s455_s2 + $0x4] sm:$0x3] %v256_v49  ;;  %v220_v58 = vmax.f32 %v156_v37, %v204_v50  ;;  %v71_v61 = vrot.slane %v23_v44, 2 }
  0x1d   :  { %v157_v59 = vmax.f32 %v141_v51, 0.0  ;;  %v190_v60 = vadd.f32 %v308_v6, %v174_v52  ;;  %v158_v63 = vmax.f32 %v142_v55, 0.0  ;;  %v72_v2 = vrot.slane %v24_v53, 2 }
  0x1e   :  { %v239_v62 = vsel %vm229_vm0, %v219_v54, -inf  ;;  %v205_v1 = vmax.f32 %v189_v56, 0.0  ;;  %v240_v3 = vsel %vm229_vm0, %v220_v58, -inf  ;;  %v103_v5 = vunpack.c.l.bf16 %v71_v61 }
  0x1f   :  { %v206_v4 = vmax.f32 %v190_v60, 0.0  ;;  %v123_v7 = vmul.f32 %v294_v0, %v39_v48  ;;  %v241_v8 = vmax.f32 %v239_v62, %v240_v3  ;;  %v104_v10 = vunpack.c.l.bf16 %v72_v2 }
  0x20   :  { %v221_v9 = vmax.f32 %v157_v59, %v205_v1  ;;  %v124_v11 = vmul.f32 %v294_v0, %v40_v57  ;;  %v175_v15 = vmul.f32 %v294_v0, %v103_v5  ;;  %v41_v16 = vunpack.c.l.bf16 %v25_v12 }
  0x21   :  { %v222_v13 = vmax.f32 %v158_v63, %v206_v4  ;;  %v143_v14 = vadd.f32 %v308_v6, %v123_v7  ;;  %v257_v17 = vpack.c.bf16 %v241_v8, %v241_v8  ;;  %v176_v20 = vmul.f32 %v294_v0, %v104_v10 }
  0x22   :  { %v242_v18 = vsel %vm229_vm0, %v221_v9, -inf  ;;  %v144_v19 = vadd.f32 %v308_v6, %v124_v11  ;;  %v191_v24 = vadd.f32 %v308_v6, %v175_v15  ;;  %v42_v25 = vunpack.c.l.bf16 %v26_v21 }
  0x23   :  { %v243_v22 = vsel %vm229_vm0, %v222_v13, -inf  ;;  %v159_v23 = vmax.f32 %v143_v14, 0.0  ;;  %265 = vst [vmem:[%s455_s2 + $0x6] sm:$0x3] %v257_v17  ;;  %v192_v28 = vadd.f32 %v308_v6, %v176_v20  ;;  %v73_v29 = vrot.slane %v25_v12, 2 }
  0x24   :  { %v244_v26 = vmax.f32 %v242_v18, %v243_v22  ;;  %v160_v27 = vmax.f32 %v144_v19, 0.0  ;;  %v207_v30 = vmax.f32 %v191_v24, 0.0  ;;  %v74_v31 = vrot.slane %v26_v21, 2 }
  0x25   :  { %v125_v32 = vmul.f32 %v294_v0, %v41_v16  ;;  %v126_v33 = vmul.f32 %v294_v0, %v42_v25  ;;  %v208_v36 = vmax.f32 %v192_v28, 0.0  ;;  %v105_v37 = vunpack.c.l.bf16 %v73_v29 }
  0x26   :  { %v258_v35 = vpack.c.bf16 %v244_v26, %v244_v26  ;;  %v43_v38 = vunpack.c.l.bf16 %v27_v34  ;;  %v223_v39 = vmax.f32 %v159_v23, %v207_v30  ;;  %v106_v40 = vunpack.c.l.bf16 %v74_v31 }
  0x27   :  { %v145_v41 = vadd.f32 %v308_v6, %v125_v32  ;;  %v146_v42 = vadd.f32 %v308_v6, %v126_v33  ;;  %v224_v44 = vmax.f32 %v160_v27, %v208_v36  ;;  %v177_v45 = vmul.f32 %v294_v0, %v105_v37 }
  0x28   :  { %266 = vst [vmem:[%s455_s2 + $0x8] sm:$0x3] %v258_v35  ;;  %v44_v46 = vunpack.c.l.bf16 %v28_v43  ;;  %v75_v47 = vrot.slane %v27_v34, 2  ;;  %v245_v48 = vsel %vm229_vm0, %v223_v39, -inf  ;;  %v178_v51 = vmul.f32 %v294_v0, %v106_v40 }
  0x29   :  { %v161_v49 = vmax.f32 %v145_v41, 0.0  ;;  %v162_v50 = vmax.f32 %v146_v42, 0.0  ;;  %v246_v52 = vsel %vm229_vm0, %v224_v44, -inf  ;;  %v193_v53 = vadd.f32 %v308_v6, %v177_v45 }
  0x2a   :  { %v76_v54 = vrot.slane %v28_v43, 2  ;;  %v107_v55 = vunpack.c.l.bf16 %v75_v47  ;;  %v247_v56 = vmax.f32 %v245_v48, %v246_v52  ;;  %v194_v57 = vadd.f32 %v308_v6, %v178_v51 }
  0x2b   :  { %v127_v58 = vmul.f32 %v294_v0, %v43_v38  ;;  %v128_v59 = vmul.f32 %v294_v0, %v44_v46  ;;  %v209_v60 = vmax.f32 %v193_v53, 0.0 }
  0x2c   :  { %v108_v61 = vunpack.c.l.bf16 %v76_v54  ;;  %v179_v62 = vmul.f32 %v294_v0, %v107_v55  ;;  %v259_v63 = vpack.c.bf16 %v247_v56, %v247_v56  ;;  %v210_v1 = vmax.f32 %v194_v57, 0.0 }
  0x2d   :  { %v147_v2 = vadd.f32 %v308_v6, %v127_v58  ;;  %v148_v3 = vadd.f32 %v308_v6, %v128_v59  ;;  %v225_v4 = vmax.f32 %v161_v49, %v209_v60 }
  0x2e   :  { %v180_v5 = vmul.f32 %v294_v0, %v108_v61  ;;  %v195_v7 = vadd.f32 %v308_v6, %v179_v62  ;;  %267 = vst [vmem:[%s455_s2 + $0xa] sm:$0x3] %v259_v63  ;;  %v226_v8 = vmax.f32 %v162_v50, %v210_v1 }
  0x2f   :  { %v163_v9 = vmax.f32 %v147_v2, 0.0  ;;  %v248_v10 = vsel %vm229_vm0, %v225_v4, -inf  ;;  %v164_v11 = vmax.f32 %v148_v3, 0.0 }
  0x30   :  { %v196_v12 = vadd.f32 %v308_v6, %v180_v5  ;;  %v211_v13 = vmax.f32 %v195_v7, 0.0  ;;  %v249_v14 = vsel %vm229_vm0, %v226_v8, -inf }
  0x31   :  { %v250_v15 = vmax.f32 %v248_v10, %v249_v14 }
  0x32   :  { %v212_v16 = vmax.f32 %v196_v12, 0.0  ;;  %v227_v17 = vmax.f32 %v163_v9, %v211_v13 }
  0x33   :  { %v260_v0 = vpack.c.bf16 %v250_v15, %v250_v15 }
  0x34   :  { %v228_v18 = vmax.f32 %v164_v11, %v212_v16  ;;  %v251_v19 = vsel %vm229_vm0, %v227_v17, -inf }
  0x35   :  { %268 = vst [vmem:[%s455_s2 + $0xc] sm:$0x3] %v260_v0 }
  0x36   :  { %v252_v20 = vsel %vm229_vm0, %v228_v18, -inf }
  0x37   :  { %v253_v21 = vmax.f32 %v251_v19, %v252_v20 }
  0x39   :  { %v261_v22 = vpack.c.bf16 %v253_v21, %v253_v21 }
  0x3b   :  { %269 = vst [vmem:[%s455_s2 + $0xe] sm:$0x3] %v261_v22 }

// kernel: convnet_forward.9
= control target key start
LH: loop header
LB: loop body
LE: loop exit
PB: predicated region body
PF: predicated region fallthrough
CT: control target
= control target key end

     0   :  { %v115_v29 = vlaneseq  ;;  %v2350_v34 = vmov 1983009808   ;;  %v3137_v38 = vmov 0.0   ;;  %vm170_vm0 = vcmask 1041409   ;;  %s3129_s0 = inlined_call_operand.vmem [shape: bf16[2,4,540], index: 0, kind: input, shape index: {}]   ;;  %s3130_s1 = inlined_call_operand.vmem [shape: bf16[540,128], index: 1, kind: input, shape index: {}]   ;;  %s3131_s2 = inlined_call_operand.vmem [shape: f32[1,128], index: 2, kind: input, shape index: {}]   ;;  %s3132_s3 = inlined_call_operand.vmem [shape: bf16[4,128,256], index: 3, kind: input, shape index: {}]   ;;  %s3133_s4 = inlined_call_operand.vmem [shape: f32[1,256], index: 4, kind: input, shape index: {}]   ;;  %s3134_s5 = inlined_call_operand.vmem [shape: bf16[256,128], index: 5, kind: input, shape index: {}]   ;;  %s3135_s6 = inlined_call_operand.vmem [shape: f32[1,128], index: 6, kind: input, shape index: {}]   ;;  %s3136_s7 = inlined_call_operand.hbm [shape: f32[2,128], index: 7, kind: output, shape index: {}]  }
   0x1   :  { %v2398_v0 = vld [vmem:[%s3130_s1 + $0x40] sm:$0xff]   ;;  %v2421_v4 = vld [vmem:[%s3130_s1 + $0x48] sm:$0xff]   ;;  %v2445_v8 = vld [vmem:[%s3130_s1 + $0x50] sm:$0xff]   ;;  %v113_v35 = vunpack.c.l.s4 %v2350_v34  ;;  %vm396_vm1 = vcmask 1045504   ;;  %vm2352_vm2 = vmmov 0   ;;  %vm392_vm3 = vcmask 228352  }
   0x2   :  { %v2403_v1 = vld [vmem:[%s3130_s1] sm:$0xff]   ;;  %1910 = vmatprep.subr.bf16.mxu0 %v2398_v0  ;;  %v2427_v5 = vld [vmem:[%s3130_s1 + $0x8] sm:$0xff]   ;;  %v2451_v9 = vld [vmem:[%s3130_s1 + $0x10] sm:$0xff]   ;;  %v2587_v36 = vshrl.u32 %v115_v29, 7 }
   0x3   :  { %v2409_v2 = vld [vmem:[%s3130_s1 + $0xc0] sm:$0xff]   ;;  %1911 = vmatpush3.bf16.msra.mxu0 %v2403_v1  ;;  %v2433_v6 = vld [vmem:[%s3130_s1 + $0xc8] sm:$0xff]   ;;  %v2457_v10 = vld [vmem:[%s3130_s1 + $0xd0] sm:$0xff]   ;;  %v114_v39 = vunpack.c.0.s8 %v113_v35 }
   0x4   :  { %v2415_v3 = vld [vmem:[%s3130_s1 + $0x80] sm:$0xff]   ;;  %1932 = vmatprep.subr.bf16.mxu1 %v2409_v2  ;;  %1912 = vmatprep.subr.bf16.mxu0 %v2421_v4  ;;  %v2439_v7 = vld [vmem:[%s3130_s1 + $0x88] sm:$0xff]   ;;  %v2463_v11 = vld [vmem:[%s3130_s1 + $0x90] sm:$0xff]  }
   0x5   :  { %1933 = vmatpush3.bf16.msra.mxu1 %v2415_v3  ;;  %v2469_v12 = vld [vmem:[%s3130_s1 + $0x58] sm:$0xff]   ;;  %v2493_v16 = vld [vmem:[%s3130_s1 + $0x60] sm:$0xff]   ;;  %v2517_v20 = vld [vmem:[%s3130_s1 + $0x68] sm:$0xff]   ;;  %v117_v42 = vsub.s32 %v114_v39, %v2587_v36 }
   0x6   :  { %1934 = vmatprep.subr.bf16.mxu1 %v2433_v6  ;;  %v2475_v13 = vld [vmem:[%s3130_s1 + $0x18] sm:$0xff]   ;;  %v2499_v17 = vld [vmem:[%s3130_s1 + $0x20] sm:$0xff]   ;;  %v2523_v21 = vld [vmem:[%s3130_s1 + $0x28] sm:$0xff]  }
   0x7   :  { %1913 = vmatpush3.bf16.msra.mxu0 %v2427_v5  ;;  %v2481_v14 = vld [vmem:[%s3130_s1 + $0xd8] sm:$0xff]   ;;  %v2505_v18 = vld [vmem:[%s3130_s1 + $0xe0] sm:$0xff]   ;;  %v2529_v22 = vld [vmem:[%s3130_s1 + $0xe8] sm:$0xff]  }
   0x8   :  { %1914 = vmatprep.subr.bf16.mxu0 %v2445_v8  ;;  %v2487_v15 = vld [vmem:[%s3130_s1 + $0x98] sm:$0xff]   ;;  %v2511_v19 = vld [vmem:[%s3130_s1 + $0xa0] sm:$0xff]   ;;  %v2535_v23 = vld [vmem:[%s3130_s1 + $0xa8] sm:$0xff]  }
   0x9   :  { %1935 = vmatpush3.bf16.msra.mxu1 %v2439_v7  ;;  %v2541_v24 = vld [vmem:[%s3130_s1 + $0x70] sm:$0xff]   ;;  %v2565_v28 = vld [vmem:[%s3130_s1 + $0x78] sm:$0xff]   ;;  %v28_v32 = vld [vmem:[%s3129_s0] sm:$0xff] }
   0xa   :  { %1936 = vmatprep.subr.bf16.mxu1 %v2457_v10  ;;  %v2547_v25 = vld [vmem:[%s3130_s1 + $0x30] sm:$0xff]   ;;  %v2571_v30 = vld [vmem:[%s3130_s1 + $0x38] sm:$0xff]   ;;  %v111_v40 = vcombine.high %v28_v32, %v28_v32  ;;  %v118_v43 = vrot.slane %v28_v32, %v117_v42  ;;  %v1741_v59 = vld.sshfl [vmem:[%s3129_s0 + $0x8] sm:$0x3 pattern:$0x76325410] }
   0xb   :  { %1915 = vmatpush3.bf16.msra.mxu0 %v2451_v9  ;;  %v2553_v26 = vld [vmem:[%s3130_s1 + $0xf0] sm:$0xff]   ;;  %v2577_v31 = vld [vmem:[%s3130_s1 + $0xf8] sm:$0xff]   ;;  %v2632_v35 = vld [vmem:[%s3130_s1 + $0x100] sm:$0xff]  }
   0xc   :  { %1916 = vmatprep.subr.bf16.mxu0 %v2469_v12  ;;  %v2559_v27 = vld [vmem:[%s3130_s1 + $0xb0] sm:$0xff]   ;;  %v2592_v37 = vld [vmem:[%s3130_s1 + $0xb8] sm:$0xff]   ;;  %v125_v45 = vrot.slane %v111_v40, %v117_v42  ;;  %v126_v47 = vcombine.high %v118_v43, %v118_v43  ;;  %v2598_v49 = vunpack.c.l.b16 %v118_v43  ;;  %v2641_v43 = vunpack.c.l.b16 %v1741_v59 }
   0xd   :  { %1937 = vmatpush3.bf16.msra.mxu1 %v2463_v11  ;;  %v30_v33 = vld [vmem:[%s3129_s0 + $0xa] sm:$0xff]  ;;  %v1742_v51 = vld.sshfl [vmem:[%s3129_s0 + $0x12] sm:$0x3 pattern:$0x76325410] }
   0xe   :  { %1938 = vmatprep.subr.bf16.mxu1 %v2481_v14  ;;  %v135_v41 = vcombine.high %v30_v33, %v30_v33  ;;  %v142_v44 = vrot.slane %v30_v33, %v117_v42  ;;  %v127_v52 = vcombine.high %v125_v45, %v125_v45  ;;  %v2605_v54 = vunpack.c.l.b16 %v125_v45 }
   0xf   :  { %1917 = vmatpush3.bf16.msra.mxu0 %v2475_v13  ;;  %v2609_v56 = vunpack.c.l.b16 %v126_v47  ;;  %v2622_v63 = vunpack.c.l.b16 %v1742_v51 }
  0x10   :  { %1918 = vmatprep.subr.bf16.mxu0 %v2493_v16  ;;  %v149_v46 = vrot.slane %v135_v41, %v117_v42  ;;  %v150_v48 = vcombine.high %v142_v44, %v142_v44  ;;  %v2600_v50 = vunpack.c.l.b16 %v142_v44  ;;  %v2617_v60 = vunpack.c.l.b16 %v127_v52  ;;  %v2192_v42 = vld [vmem:[%s3130_s1 + $0x108] sm:$0x3f]  }
  0x11   :  { %1939 = vmatpush3.bf16.msra.mxu1 %v2487_v15  ;;  %v540_v33 = vrot.slane %v2609_v56, 1  ;;  %v2653_v59 = vsel %vm396_vm1, %v2192_v42, 0 }
  0x12   :  { %1940 = vmatprep.subr.bf16.mxu1 %v2505_v18  ;;  %v151_v53 = vcombine.high %v149_v46, %v149_v46  ;;  %v2607_v55 = vunpack.c.l.b16 %v149_v46  ;;  %v2611_v57 = vunpack.c.l.b16 %v150_v48  ;;  %v169_v58 = vrot.slane %v2600_v50, 7 }
  0x13   :  { %1919 = vmatpush3.bf16.msra.mxu0 %v2499_v17  ;;  %v178_v48 = vrot.slane %v2622_v63, 7  ;;  %v544_v52 = vrot.slane %v2617_v60, 1 }
  0x14   :  { %1920 = vmatprep.subr.bf16.mxu0 %v2517_v20  ;;  %v2619_v61 = vunpack.c.l.b16 %v151_v53  ;;  %v174_v62 = vrot.slane %v2607_v55, 7  ;;  %v172_v29 = vrot.slane %v2611_v57, 7  ;;  %v171_v32 = vsel %vm170_vm0, %v169_v58, %v2598_v49 }
  0x15   :  { %1941 = vmatpush3.bf16.msra.mxu1 %v2511_v19  ;;  %v180_v41 = vpack.c.b16 %v171_v32, %v171_v32  ;;  %v541_v44 = vsel %vm170_vm0, %v2611_v57, %v540_v33  ;;  %v179_v58 = vsel %vm170_vm0, %v178_v48, %v2641_v43 }
  0x16   :  { %1942 = vmatprep.subr.bf16.mxu1 %v2529_v22  ;;  %v176_v34 = vrot.slane %v2619_v61, 7  ;;  %v175_v39 = vsel %vm170_vm0, %v174_v62, %v2605_v54  ;;  %v173_v40 = vsel %vm170_vm0, %v172_v29, %v2609_v56  ;;  %v549_v53 = vpack.c.b16 %v541_v44, %v541_v44 }
  0x17   :  { %1921 = vmatpush3.bf16.msra.mxu0 %v2523_v21  ;;  %v181_v45 = vpack.c.b16 %v173_v40, %v173_v40  ;;  %v182_v47 = vpack.c.b16 %v175_v39, %v175_v39  ;;  %v545_v62 = vsel %vm170_vm0, %v2619_v61, %v544_v52  ;;  %v184_v29 = vpack.c.b16 %v179_v58, %v179_v58 }
  0x18   :  { %1922 = vmatprep.subr.bf16.mxu0 %v2541_v24  ;;  %v177_v46 = vsel %vm170_vm0, %v176_v34, %v2617_v60  ;;  %v551_v32 = vpack.c.b16 %v545_v62, %v545_v62 }
  0x19   :  { %1943 = vmatpush3.bf16.msra.mxu1 %v2535_v23  ;;  %v183_v51 = vpack.c.b16 %v177_v46, %v177_v46  ;;  %432 = vmatprep.mubr.bf16.mxu0 %v181_v45 }
  0x1a   :  { %1944 = vmatprep.subr.bf16.mxu1 %v2553_v26 }
  0x1b   :  { %1923 = vmatpush3.bf16.msra.mxu0 %v2547_v25  ;;  %472 = vmatprep.mubr.bf16.mxu1 %v183_v51 }
  0x1c   :  { %1924 = vmatprep.subr.bf16.mxu0 %v2565_v28 }
  0x1d   :  { %1945 = vmatpush3.bf16.msra.mxu1 %v2559_v27 }
  0x1e   :  { %1946 = vmatprep.subr.bf16.mxu1 %v2577_v31 }
  0x1f   :  { %1925 = vmatpush3.bf16.msra.mxu0 %v2571_v30 }
  0x20   :  { %2120 = vmatprep.subr.bf16.mxu0 %v3137_v38 }
  0x21   :  { %1947 = vmatpush3.bf16.msra.mxu1 %v2592_v37 }
  0x22   :  { %1957 = vmatprep.subr.bf16.mxu1 %v2398_v0  ;;  %433 = vmatmul.mubr.bf16.vlgmr.msra.gmra.mrb[0].mxu0 %v180_v41 }
  0x23   :  { %2121 = vmatpush3.bf16.msra.mxu0 %v2632_v35  ;;  %2124 = vmatprep.mubr.msk.bf16.mxu0 %vm2352_vm2, %v3137_v38 }
  0x24   :  { %473 = vmatmul.mubr.bf16.vlgmr.msra.gmra.mrb[0].mxu1 %v182_v47  ;;  %2122 = vmatprep.subr.bf16.mxu0 %v3137_v38 }
  0x25   :  { %1958 = vmatpush3.bf16.msra.mxu1 %v2403_v1  ;;  %592 = vmatprep.mubr.bf16.mxu1 %v549_v53 }
  0x26   :  { %1959 = vmatprep.subr.bf16.mxu1 %v2421_v4 }
  0x27   :  { %2123 = vmatpush3.bf16.msra.mxu0 %v2653_v59 }
  0x28   :  { %1979 = vmatprep.subr.bf16.mxu0 %v2409_v2 }
  0x29   :  { %1960 = vmatpush3.bf16.msra.mxu1 %v2427_v5 }
  0x2a   :  { %2125 = vmatmul.mubr.msk.bf16.vlgmr.msra.gmra.mrb[4].mxu0 %vm392_vm3, %v184_v29  ;;  %1961 = vmatprep.subr.bf16.mxu1 %v2445_v8 }
  0x2b   :  { %1980 = vmatpush3.bf16.msra.mxu0 %v2415_v3  ;;  %632 = vmatprep.mubr.bf16.mxu0 %v551_v32 }
  0x2c   :  { %1981 = vmatprep.subr.bf16.mxu0 %v2433_v6 }
  0x2d   :  { %1962 = vmatpush3.bf16.msra.mxu1 %v2451_v9 }
  0x2e   :  { %1963 = vmatprep.subr.bf16.mxu1 %v2469_v12 }
  0x2f   :  { %1982 = vmatpush3.bf16.msra.mxu0 %v2439_v7 }
  0x30   :  { %1983 = vmatprep.subr.bf16.mxu0 %v2457_v10 }
  0x31   :  { %1964 = vmatpush3.bf16.msra.mxu1 %v2475_v13 }
  0x32   :  { %1965 = vmatprep.subr.bf16.mxu1 %v2493_v16 }
  0x33   :  { %1984 = vmatpush3.bf16.msra.mxu0 %v2463_v11 }
  0x34   :  { %1985 = vmatprep.subr.bf16.mxu0 %v2481_v14 }
  0x35   :  { %1966 = vmatpush3.bf16.msra.mxu1 %v2499_v17 }
  0x36   :  { %1967 = vmatprep.subr.bf16.mxu1 %v2517_v20 }
  0x37   :  { %1986 = vmatpush3.bf16.msra.mxu0 %v2487_v15 }
  0x38   :  { %12 = vsyncpa [#allocation3], 0  ;;  %1987 = vmatprep.subr.bf16.mxu0 %v2505_v18  ;;  %v538_v33 = vrot.slane %v2598_v49, 1  ;;  %v2195_v39 = vld [vmem:[%s3132_s3 + $0x4] ss:$8 sps:$4 sm:$0xff]   ;;  %v542_v40 = vrot.slane %v2605_v54, 1 }
  0x39   :  { %1968 = vmatpush3.bf16.msra.mxu1 %v2523_v21  ;;  %v2193_v42 = vld [vmem:[%s3132_s3] ss:$8 sps:$4 sm:$0xff]   ;;  %v2198_v44 = vld [vmem:[%s3132_s3 + $0x14] ss:$8 sps:$4 sm:$0xff]   ;;  %v2196_v46 = vld [vmem:[%s3132_s3 + $0x10] ss:$8 sps:$4 sm:$0xff]  }
  0x3a   :  { %1969 = vmatprep.subr.bf16.mxu1 %v2541_v24  ;;  %v539_v34 = vsel %vm170_vm0, %v2600_v50, %v538_v33  ;;  %v543_v45 = vsel %vm170_vm0, %v2607_v55, %v542_v40  ;;  %v2201_v48 = vld [vmem:[%s3132_s3 + $0x24] ss:$8 sps:$4 sm:$0xff]   ;;  %v546_v51 = vrot.slane %v2641_v43, 1  ;;  %v2199_v52 = vld [vmem:[%s3132_s3 + $0x20] ss:$8 sps:$4 sm:$0xff]   ;;  %vm1712_vm4 = vcmask 1041408  }
  0x3b   :  { %1988 = vmatpush3.bf16.msra.mxu0 %v2511_v19  ;;  %v548_v41 = vpack.c.b16 %v539_v34, %v539_v34  ;;  %v550_v47 = vpack.c.b16 %v543_v45, %v543_v45  ;;  %v2204_v53 = vld [vmem:[%s3132_s3 + $0x34] ss:$8 sps:$4 sm:$0xff]   ;;  %v2202_v62 = vld [vmem:[%s3132_s3 + $0x30] ss:$8 sps:$4 sm:$0xff]   ;;  %v2207_v32 = vld [vmem:[%s3132_s3 + $0x44] ss:$8 sps:$4 sm:$0xff]  }
  0x3c   :  { %1989 = vmatprep.subr.bf16.mxu0 %v2529_v22  ;;  %v547_v58 = vsel %vm170_vm0, %v2622_v63, %v546_v51  ;;  %v2205_v33 = vld [vmem:[%s3132_s3 + $0x40] ss:$8 sps:$4 sm:$0xff]   ;;  %v2210_v34 = vld [vmem:[%s3132_s3 + $0x54] ss:$8 sps:$4 sm:$0xff]   ;;  %v2353_v45 = vmov 0   ;;  %s2354_s27 = smov [#allocation2]  }
  0x3d   :  { %1970 = vmatpush3.bf16.msra.mxu1 %v2547_v25  ;;  %v552_v29 = vpack.c.b16 %v547_v58, %v547_v58  ;;  %v2211_v40 = vld [vmem:[%s3132_s3 + $0x60] ss:$8 sps:$4 sm:$0xff]   ;;  %v2225_v51 = vld [vmem:[%s3132_s3 + $0xa4] ss:$8 sps:$4 sm:$0xff]   ;;  %v2226_v58 = vld [vmem:[%s3132_s3 + $0xb0] ss:$8 sps:$4 sm:$0xff]  }
  0x3e   :  { %1971 = vmatprep.subr.bf16.mxu1 %v2565_v28 }
  0x3f   :  { %1990 = vmatpush3.bf16.msra.mxu0 %v2535_v23 }
  0x40   :  { %1991 = vmatprep.subr.bf16.mxu0 %v2553_v26 }
  0x41   :  { %1972 = vmatpush3.bf16.msra.mxu1 %v2571_v30 }
  0x42   :  { %900 = vmatprep.subr.bf16.mxu1 %v2195_v39  ;;  %v2208_v39 = vld [vmem:[%s3132_s3 + $0x50] ss:$8 sps:$4 sm:$0xff]  }
  0x43   :  { %1992 = vmatpush3.bf16.msra.mxu0 %v2559_v27 }
  0x44   :  { %1993 = vmatprep.subr.bf16.mxu0 %v2577_v31  ;;  %593 = vmatmul.mubr.bf16.vlgmr.msra.gmra.mrb[4].mxu1 %v548_v41  ;;  %v2213_v41 = vld [vmem:[%s3132_s3 + $0x64] ss:$8 sps:$4 sm:$0xff]  }
  0x45   :  { %901 = vmatpush1.bf16.msra.mxu1 %v2193_v42  ;;  %v2216_v42 = vld [vmem:[%s3132_s3 + $0x74] ss:$8 sps:$4 sm:$0xff]   ;;  %932 = vmatprep.mubr.bf16.mxu1 %v2353_v45 }
  0x46   :  { %902 = vmatprep.subr.bf16.mxu1 %v2198_v44  ;;  %v2214_v44 = vld [vmem:[%s3132_s3 + $0x70] ss:$8 sps:$4 sm:$0xff]  }
  0x47   :  { %1994 = vmatpush3.bf16.msra.mxu0 %v2592_v37 }
  0x48   :  { %2128 = vmatprep.subr.bf16.mxu0 %v3137_v38 }
  0x49   :  { %903 = vmatpush1.bf16.msra.mxu1 %v2196_v46  ;;  %v2217_v46 = vld [vmem:[%s3132_s3 + $0x80] ss:$8 sps:$4 sm:$0xff]  }
  0x4a   :  { %633 = vmatmul.mubr.bf16.vlgmr.msra.gmra.mrb[8].mxu0 %v550_v47  ;;  %904 = vmatprep.subr.bf16.mxu1 %v2201_v48  ;;  %v2219_v47 = vld [vmem:[%s3132_s3 + $0x84] ss:$8 sps:$4 sm:$0xff]   ;;  %v2222_v48 = vld [vmem:[%s3132_s3 + $0x94] ss:$8 sps:$4 sm:$0xff]  }
  0x4b   :  { %2129 = vmatpush3.bf16.msra.mxu0 %v2632_v35  ;;  %2132 = vmatprep.mubr.msk.bf16.mxu0 %vm2352_vm2, %v3137_v38 }
  0x4c   :  { %2130 = vmatprep.subr.bf16.mxu0 %v3137_v38 }
  0x4d   :  { %905 = vmatpush1.bf16.msra.mxu1 %v2199_v52  ;;  %v2223_v52 = vld [vmem:[%s3132_s3 + $0xa0] ss:$8 sps:$4 sm:$0xff]  }
  0x4e   :  { %906 = vmatprep.subr.bf16.mxu1 %v2204_v53  ;;  %v2228_v53 = vld [vmem:[%s3132_s3 + $0xb4] ss:$8 sps:$4 sm:$0xff]  }
  0x4f   :  { %2131 = vmatpush3.bf16.msra.mxu0 %v2653_v59 }
  0x50   :  { %779 = vmatprep.subr.bf16.mxu0 %v2219_v47 }
  0x51   :  { %907 = vmatpush1.bf16.msra.mxu1 %v2202_v62  ;;  %v2229_v62 = vld [vmem:[%s3132_s3 + $0xc0] ss:$8 sps:$4 sm:$0xff]  }
  0x52   :  { %2133 = vmatmul.mubr.msk.bf16.vlgmr.msra.gmra.mrb[12].mxu0 %vm392_vm3, %v552_v29  ;;  %908 = vmatprep.subr.bf16.mxu1 %v2207_v32  ;;  %v2231_v29 = vld [vmem:[%s3132_s3 + $0xc4] ss:$8 sps:$4 sm:$0xff]   ;;  %v2234_v32 = vld [vmem:[%s3132_s3 + $0xd4] ss:$8 sps:$4 sm:$0xff]  }
  0x53   :  { %811 = vmatprep.mubr.bf16.mxu0 %v2353_v45  ;;  %780 = vmatpush1.bf16.msra.mxu0 %v2217_v46 }
  0x54   :  { %781 = vmatprep.subr.bf16.mxu0 %v2222_v48 }
  0x55   :  { %909 = vmatpush1.bf16.msra.mxu1 %v2205_v33  ;;  %v2232_v33 = vld [vmem:[%s3132_s3 + $0xd0] ss:$8 sps:$4 sm:$0xff]  }
  0x56   :  { %910 = vmatprep.subr.bf16.mxu1 %v2210_v34  ;;  %v2235_v34 = vld [vmem:[%s3132_s3 + $0xe0] ss:$8 sps:$4 sm:$0xff]  }
  0x59   :  { %911 = vmatpush1.bf16.msra.mxu1 %v2208_v39  ;;  %v2237_v39 = vld [vmem:[%s3132_s3 + $0xe4] ss:$8 sps:$4 sm:$0xff]  }
  0x5a   :  { %912 = vmatprep.subr.bf16.mxu1 %v2213_v41  ;;  %v2238_v41 = vld [vmem:[%s3132_s3 + $0xf0] ss:$8 sps:$4 sm:$0xff]  }
  0x5d   :  { %913 = vmatpush1.bf16.msra.mxu1 %v2211_v40  ;;  %v2240_v40 = vld [vmem:[%s3132_s3 + $0xf4] ss:$8 sps:$4 sm:$0xff]  }
  0x5e   :  { %914 = vmatprep.subr.bf16.mxu1 %v2216_v42 }
  0x61   :  { %915 = vmatpush1.bf16.msra.mxu1 %v2214_v44  ;;  %v2811_v44 = vld [vmem:[%s3131_s2] ss:$0 sm:$0xff] }
  0x62   :  { %2026 = vmatprep.subr.bf16.mxu1 %v2409_v2  ;;  %v2220_v2 = vld [vmem:[%s3132_s3 + $0x90] ss:$8 sps:$4 sm:$0xff]  }
  0x63   :  { %782 = vmatpush1.bf16.msra.mxu0 %v2220_v2 }
  0x64   :  { %783 = vmatprep.subr.bf16.mxu0 %v2225_v51 }
  0x67   :  { %784 = vmatpush1.bf16.msra.mxu0 %v2223_v52 }
  0x68   :  { %785 = vmatprep.subr.bf16.mxu0 %v2228_v53 }
  0x6b   :  { %786 = vmatpush1.bf16.msra.mxu0 %v2226_v58 }
  0x6c   :  { %787 = vmatprep.subr.bf16.mxu0 %v2231_v29 }
  0x6f   :  { %788 = vmatpush1.bf16.msra.mxu0 %v2229_v62 }
  0x70   :  { %789 = vmatprep.subr.bf16.mxu0 %v2234_v32  ;;  %v950_v32 = vrot.slane %v2617_v60, 2 }
  0x73   :  { %790 = vmatpush1.bf16.msra.mxu0 %v2232_v33 }
  0x74   :  { %791 = vmatprep.subr.bf16.mxu0 %v2237_v39 }
  0x77   :  { %792 = vmatpush1.bf16.msra.mxu0 %v2235_v34 }
  0x78   :  { %793 = vmatprep.subr.bf16.mxu0 %v2240_v40 }
  0x7b   :  { %794 = vmatpush1.bf16.msra.mxu0 %v2238_v41 }
  0x7c   :  { %2004 = vmatprep.subr.bf16.mxu0 %v2398_v0  ;;  %v951_v0 = vrot.slane %v2619_v61, 1 }
  0x7e   :  { %v952_v41 = vsel %vm170_vm0, %v951_v0, %v950_v32 }
  0xf5   :  { %v1926_v42 = vpop.f32.mrb[0].mxu0 }
  0xf6   :  { %v1927_v46 = vpop.f32.mrb[1].mxu0 }
  0xf7   :  { %v1948_v47 = vpop.f32.mrb[0].mxu1  ;;  %v1928_v48 = vadd.f32 %v1927_v46, %v1926_v42  ;;  %v1929_v2 = vpop.f32.mrb[2].mxu0 }
  0xf8   :  { %v1949_v51 = vpop.f32.mrb[1].mxu1  ;;  %v1930_v52 = vpop.f32.mrb[3].mxu0  ;;  %v959_v2 = vpack.c.b16 %v952_v41, %v952_v41 }
  0xf9   :  { %v1950_v53 = vadd.f32 %v1949_v51, %v1948_v47  ;;  %v1951_v58 = vpop.f32.mrb[2].mxu1  ;;  %v435_v62 = vadd.f32 %v1928_v48, %v2811_v44 }
  0xfa   :  { %v1952_v29 = vpop.f32.mrb[3].mxu1  ;;  %v944_v58 = vrot.slane %v2609_v56, 2 }
  0xfb   :  { %v475_v33 = vadd.f32 %v1950_v53, %v435_v62 }
  0xfd   :  { %v514_v34 = vpop.f32.mrb[4].mxu0 }
  0xfe   :  { %v515_v39 = vadd.f32 %v514_v34, %v475_v33  ;;  %v2126_v40 = vpop.f32.mrb[5].mxu0 }
  0xff   :  { %v517_v38 = vpop.f32.mrb[6].mxu0  ;;  %v942_v40 = vrot.slane %v2600_v50, 1 }
 0x100   :  { %v520_v42 = vmax.f32 %v515_v39, 0.0  ;;  %v2127_v46 = vpop.f32.mrb[7].mxu0 }
 0x101   :  { %v953_v46 = vrot.slane %v2641_v43, 2 }
 0x102   :  { %v521_v52 = vpack.c.bf16 %v520_v42, %v520_v42 }
 0x104   :  { %933 = vmatmul.mubr.bf16.vlgmr.msra.gmra.mrb[8].mxu1 %v521_v52  ;;  %v3139_v52 = vmov 0.0  }
 0x105   :  { %2027 = vmatpush3.bf16.msra.mxu1 %v2415_v3  ;;  %1040 = vmatprep.mubr.bf16.mxu1 %v959_v2  ;;  %v954_v2 = vrot.slane %v2622_v63, 1 }
 0x106   :  { %2028 = vmatprep.subr.bf16.mxu1 %v2433_v6 }
 0x109   :  { %2029 = vmatpush3.bf16.msra.mxu1 %v2439_v7  ;;  %v947_v7 = vrot.slane %v2605_v54, 2 }
 0x10a   :  { %2030 = vmatprep.subr.bf16.mxu1 %v2457_v10  ;;  %v948_v10 = vrot.slane %v2607_v55, 1 }
 0x10d   :  { %2031 = vmatpush3.bf16.msra.mxu1 %v2463_v11 }
 0x10e   :  { %2032 = vmatprep.subr.bf16.mxu1 %v2481_v14 }
 0x111   :  { %2033 = vmatpush3.bf16.msra.mxu1 %v2487_v15 }
 0x112   :  { %2034 = vmatprep.subr.bf16.mxu1 %v2505_v18  ;;  %v949_v18 = vsel %vm170_vm0, %v948_v10, %v947_v7  ;;  %v2264_v7 = vld [vmem:[%s3132_s3 + $0x174] ss:$8 sps:$4 sm:$0xff]   ;;  %v2262_v10 = vld [vmem:[%s3132_s3 + $0x170] ss:$8 sps:$4 sm:$0xff]  }
 0x113   :  { %v958_v51 = vpack.c.b16 %v949_v18, %v949_v18  ;;  %v1230_v18 = vrot.slane %v2598_v49, 3 }
 0x115   :  { %2035 = vmatpush3.bf16.msra.mxu1 %v2511_v19 }
 0x116   :  { %2036 = vmatprep.subr.bf16.mxu1 %v2529_v22 }
 0x117   :  { %v1973_v3 = vpop.f32.mrb[4].mxu1 }
 0x118   :  { %v1974_v38 = vpop.f32.mrb[5].mxu1 }
 0x119   :  { %v1975_v47 = vadd.f32 %v1974_v38, %v1973_v3  ;;  %v1976_v6 = vpop.f32.mrb[6].mxu1  ;;  %2037 = vmatpush3.bf16.msra.mxu1 %v2535_v23  ;;  %v955_v3 = vsel %vm170_vm0, %v954_v2, %v953_v46  ;;  %v1239_v46 = vrot.slane %v2617_v60, 3  ;;  %v1240_v2 = vrot.slane %v2619_v61, 2  ;;  %v2313_v60 = vld [vmem:[%s3130_s1 + $0xc8] sm:$0xff]  }
 0x11a   :  { %v1977_v11 = vpop.f32.mrb[7].mxu1  ;;  %2038 = vmatprep.subr.bf16.mxu1 %v2553_v26  ;;  %v945_v26 = vrot.slane %v2611_v57, 1  ;;  %v960_v38 = vpack.c.b16 %v955_v3, %v955_v3  ;;  %v2310_v6 = vld [vmem:[%s3130_s1] sm:$0xff]   ;;  %v2314_v61 = vld [vmem:[%s3130_s1 + $0x88] sm:$0xff]  }
 0x11b   :  { %v595_v14 = vadd.f32 %v1975_v47, %v2811_v44  ;;  %v2309_v47 = vld [vmem:[%s3130_s1 + $0x40] sm:$0xff]  }
 0x11c   :  { %v946_v32 = vsel %vm170_vm0, %v945_v26, %v944_v58  ;;  %v2311_v11 = vld [vmem:[%s3130_s1 + $0xc0] sm:$0xff]  }
 0x11d   :  { %v1995_v15 = vpop.f32.mrb[8].mxu0  ;;  %2039 = vmatpush3.bf16.msra.mxu1 %v2559_v27  ;;  %v957_v34 = vpack.c.b16 %v946_v32, %v946_v32 }
 0x11e   :  { %v1996_v19 = vpop.f32.mrb[9].mxu0  ;;  %2040 = vmatprep.subr.bf16.mxu1 %v2577_v31 }
 0x11f   :  { %v1997_v22 = vadd.f32 %v1996_v19, %v1995_v15  ;;  %v1998_v48 = vpop.f32.mrb[10].mxu0  ;;  %v1234_v15 = vrot.slane %v2611_v57, 2  ;;  %v1231_v19 = vrot.slane %v2600_v50, 2 }
 0x120   :  { %v1999_v23 = vpop.f32.mrb[11].mxu0 }
 0x121   :  { %v635_v53 = vadd.f32 %v1997_v22, %v595_v14  ;;  %2041 = vmatpush3.bf16.msra.mxu1 %v2592_v37  ;;  %v1233_v14 = vrot.slane %v2609_v56, 3  ;;  %v1232_v23 = vsel %vm170_vm0, %v1231_v19, %v1230_v18  ;;  %v1242_v56 = vrot.slane %v2641_v43, 3  ;;  %v2325_v18 = vld [vmem:[%s3130_s1 + $0xf8] sm:$0xff]   ;;  %v2267_v19 = vld [vmem:[%s3132_s3 + $0x184] ss:$8 sps:$4 sm:$0xff]  }
 0x123   :  { %v1235_v22 = vsel %vm170_vm0, %v1234_v15, %v1233_v14  ;;  %v2324_v14 = vld [vmem:[%s3130_s1 + $0xb0] sm:$0xff]  }
 0x124   :  { %1041 = vmatmul.mubr.bf16.vlgmr.msra.gmra.mrb[12].mxu1 %v958_v51  ;;  %v1246_v48 = vpack.c.b16 %v1235_v22, %v1235_v22  ;;  %v1245_v51 = vpack.c.b16 %v1232_v23, %v1232_v23  ;;  %v2270_v22 = vld [vmem:[%s3132_s3 + $0x194] ss:$8 sps:$4 sm:$0xff]   ;;  %v2271_v23 = vld [vmem:[%s3132_s3 + $0x1a0] ss:$8 sps:$4 sm:$0xff]  }
 0x125   :  { %v674_v62 = vpop.f32.mrb[12].mxu0  ;;  %1219 = vmatprep.mubr.bf16.mxu1 %v2353_v45 }
 0x126   :  { %v675_v27 = vadd.f32 %v674_v62, %v635_v53  ;;  %v2134_v29 = vpop.f32.mrb[13].mxu0 }
 0x127   :  { %v677_v31 = vpop.f32.mrb[14].mxu0 }
 0x128   :  { %v680_v0 = vmax.f32 %v675_v27, 0.0  ;;  %v2135_v33 = vpop.f32.mrb[15].mxu0 }
 0x12a   :  { %v681_v39 = vpack.c.bf16 %v680_v0, %v680_v0 }
 0x12c   :  { %812 = vmatmul.mubr.bf16.vlgmr.msra.gmra.mrb[16].mxu0 %v681_v39 }
 0x12d   :  { %2005 = vmatpush3.bf16.msra.mxu0 %v2403_v1  ;;  %1000 = vmatprep.mubr.bf16.mxu0 %v957_v34  ;;  %v941_v1 = vrot.slane %v2598_v49, 2  ;;  %v1243_v49 = vrot.slane %v2622_v63, 2 }
 0x12e   :  { %2006 = vmatprep.subr.bf16.mxu0 %v2421_v4 }
 0x12f   :  { %v943_v41 = vsel %vm170_vm0, %v942_v40, %v941_v1  ;;  %v1244_v50 = vsel %vm170_vm0, %v1243_v49, %v1242_v56  ;;  %v2274_v56 = vld [vmem:[%s3132_s3 + $0x1b0] ss:$8 sps:$4 sm:$0xff]   ;;  %v2279_v49 = vld [vmem:[%s3132_s3 + $0x1c4] ss:$8 sps:$4 sm:$0xff]  }
 0x130   :  { %v956_v42 = vpack.c.b16 %v943_v41, %v943_v41  ;;  %v1249_v57 = vpack.c.b16 %v1244_v50, %v1244_v50  ;;  %v2277_v50 = vld [vmem:[%s3132_s3 + $0x1c0] ss:$8 sps:$4 sm:$0xff]  }
 0x131   :  { %2007 = vmatpush3.bf16.msra.mxu0 %v2427_v5 }
 0x132   :  { %2008 = vmatprep.subr.bf16.mxu0 %v2445_v8 }
 0x135   :  { %2009 = vmatpush3.bf16.msra.mxu0 %v2451_v9 }
 0x136   :  { %2010 = vmatprep.subr.bf16.mxu0 %v2469_v12 }
 0x139   :  { %2011 = vmatpush3.bf16.msra.mxu0 %v2475_v13 }
 0x13a   :  { %2012 = vmatprep.subr.bf16.mxu0 %v2493_v16 }
 0x13d   :  { %2013 = vmatpush3.bf16.msra.mxu0 %v2499_v17 }
 0x13e   :  { %2014 = vmatprep.subr.bf16.mxu0 %v2517_v20 }
 0x141   :  { %2015 = vmatpush3.bf16.msra.mxu0 %v2523_v21 }
 0x142   :  { %2016 = vmatprep.subr.bf16.mxu0 %v2541_v24 }
 0x145   :  { %2017 = vmatpush3.bf16.msra.mxu0 %v2547_v25 }
 0x146   :  { %2018 = vmatprep.subr.bf16.mxu0 %v2565_v28 }
 0x149   :  { %2019 = vmatpush3.bf16.msra.mxu0 %v2571_v30 }
 0x14a   :  { %2136 = vmatprep.subr.bf16.mxu0 %v3139_v52 }
 0x14c   :  { %1001 = vmatmul.mubr.bf16.vlgmr.msra.gmra.mrb[20].mxu0 %v956_v42 }
 0x14d   :  { %2137 = vmatpush3.bf16.msra.mxu0 %v2632_v35  ;;  %2140 = vmatprep.mubr.msk.bf16.mxu0 %vm2352_vm2, %v3139_v52 }
 0x14e   :  { %2138 = vmatprep.subr.bf16.mxu0 %v3139_v52 }
 0x151   :  { %2139 = vmatpush3.bf16.msra.mxu0 %v2653_v59 }
 0x152   :  { %2051 = vmatprep.subr.bf16.mxu0 %v2309_v47 }
 0x154   :  { %2141 = vmatmul.mubr.msk.bf16.vlgmr.msra.gmra.mrb[24].mxu0 %vm392_vm3, %v960_v38 }
 0x155   :  { %2052 = vmatpush3.bf16.msra.mxu0 %v2310_v6  ;;  %1289 = vmatprep.mubr.bf16.mxu0 %v1246_v48  ;;  %v1241_v6 = vsel %vm170_vm0, %v1240_v2, %v1239_v46  ;;  %v2268_v48 = vld [vmem:[%s3132_s3 + $0x190] ss:$8 sps:$4 sm:$0xff]  }
 0x156   :  { %2053 = vmatprep.subr.bf16.mxu0 %v2421_v4  ;;  %v2241_v4 = vld [vmem:[%s3132_s3 + $0x100] ss:$8 sps:$4 sm:$0xff]   ;;  %v2294_v46 = vld [vmem:[%s3134_s5 + $0x10] sm:$0xff]   ;;  %v2295_v2 = vld [vmem:[%s3134_s5 + $0x58] sm:$0xff]  }
 0x159   :  { %2054 = vmatpush3.bf16.msra.mxu0 %v2427_v5  ;;  %v2243_v5 = vld [vmem:[%s3132_s3 + $0x104] ss:$8 sps:$4 sm:$0xff]  }
 0x15a   :  { %2055 = vmatprep.subr.bf16.mxu0 %v2445_v8  ;;  %v2246_v8 = vld [vmem:[%s3132_s3 + $0x114] ss:$8 sps:$4 sm:$0xff]   ;;  %1187 = vmatprep.subr.bf16.mxu1 %v2243_v5 }
 0x15b   :  { %1188 = vmatpush1.bf16.msra.mxu1 %v2241_v4 }
 0x15c   :  { %1189 = vmatprep.subr.bf16.mxu1 %v2246_v8 }
 0x15d   :  { %2056 = vmatpush3.bf16.msra.mxu0 %v2451_v9  ;;  %v2244_v9 = vld [vmem:[%s3132_s3 + $0x110] ss:$8 sps:$4 sm:$0xff]  }
 0x15e   :  { %2057 = vmatprep.subr.bf16.mxu0 %v2469_v12  ;;  %v2249_v12 = vld [vmem:[%s3132_s3 + $0x124] ss:$8 sps:$4 sm:$0xff]  }
 0x15f   :  { %1190 = vmatpush1.bf16.msra.mxu1 %v2244_v9  ;;  %v1248_v9 = vpack.c.b16 %v1241_v6, %v1241_v6 }
 0x160   :  { %1191 = vmatprep.subr.bf16.mxu1 %v2249_v12 }
 0x161   :  { %2058 = vmatpush3.bf16.msra.mxu0 %v2475_v13  ;;  %v2247_v13 = vld [vmem:[%s3132_s3 + $0x120] ss:$8 sps:$4 sm:$0xff]  }
 0x162   :  { %2059 = vmatprep.subr.bf16.mxu0 %v2493_v16  ;;  %v2252_v16 = vld [vmem:[%s3132_s3 + $0x134] ss:$8 sps:$4 sm:$0xff]  }
 0x163   :  { %1192 = vmatpush1.bf16.msra.mxu1 %v2247_v13  ;;  %v2312_v13 = vld [vmem:[%s3130_s1 + $0x80] sm:$0xff]  }
 0x164   :  { %1193 = vmatprep.subr.bf16.mxu1 %v2252_v16  ;;  %v2315_v16 = vld [vmem:[%s3130_s1 + $0xd0] sm:$0xff]  }
 0x165   :  { %2060 = vmatpush3.bf16.msra.mxu0 %v2499_v17  ;;  %v2250_v17 = vld [vmem:[%s3132_s3 + $0x130] ss:$8 sps:$4 sm:$0xff]  }
 0x166   :  { %2061 = vmatprep.subr.bf16.mxu0 %v2517_v20  ;;  %v2255_v20 = vld [vmem:[%s3132_s3 + $0x144] ss:$8 sps:$4 sm:$0xff]  }
 0x167   :  { %1194 = vmatpush1.bf16.msra.mxu1 %v2250_v17  ;;  %v2316_v17 = vld [vmem:[%s3130_s1 + $0x90] sm:$0xff]  }
 0x168   :  { %1195 = vmatprep.subr.bf16.mxu1 %v2255_v20  ;;  %v2317_v20 = vld [vmem:[%s3130_s1 + $0xd8] sm:$0xff]  }
 0x169   :  { %2062 = vmatpush3.bf16.msra.mxu0 %v2523_v21  ;;  %v2253_v21 = vld [vmem:[%s3132_s3 + $0x140] ss:$8 sps:$4 sm:$0xff]  }
 0x16a   :  { %2063 = vmatprep.subr.bf16.mxu0 %v2541_v24  ;;  %v2258_v24 = vld [vmem:[%s3132_s3 + $0x154] ss:$8 sps:$4 sm:$0xff]  }
 0x16b   :  { %1196 = vmatpush1.bf16.msra.mxu1 %v2253_v21  ;;  %v2318_v21 = vld [vmem:[%s3130_s1 + $0x98] sm:$0xff]  }
 0x16c   :  { %1197 = vmatprep.subr.bf16.mxu1 %v2258_v24  ;;  %v2319_v24 = vld [vmem:[%s3130_s1 + $0xe0] sm:$0xff]  }
 0x16d   :  { %2064 = vmatpush3.bf16.msra.mxu0 %v2547_v25  ;;  %v2256_v25 = vld [vmem:[%s3132_s3 + $0x150] ss:$8 sps:$4 sm:$0xff]  }
 0x16e   :  { %2065 = vmatprep.subr.bf16.mxu0 %v2565_v28  ;;  %v2259_v28 = vld [vmem:[%s3132_s3 + $0x160] ss:$8 sps:$4 sm:$0xff]  }
 0x16f   :  { %1198 = vmatpush1.bf16.msra.mxu1 %v2256_v25  ;;  %v2320_v25 = vld [vmem:[%s3130_s1 + $0xa0] sm:$0xff]  }
 0x171   :  { %2066 = vmatpush3.bf16.msra.mxu0 %v2571_v30  ;;  %v2261_v30 = vld [vmem:[%s3132_s3 + $0x164] ss:$8 sps:$4 sm:$0xff]  }
 0x172   :  { %2144 = vmatprep.subr.bf16.mxu0 %v3139_v52  ;;  %1199 = vmatprep.subr.bf16.mxu1 %v2261_v30  ;;  %v2322_v30 = vld [vmem:[%s3130_s1 + $0xa8] sm:$0xff]  }
 0x173   :  { %1200 = vmatpush1.bf16.msra.mxu1 %v2259_v28  ;;  %v2321_v28 = vld [vmem:[%s3130_s1 + $0xe8] sm:$0xff]  }
 0x174   :  { %1201 = vmatprep.subr.bf16.mxu1 %v2264_v7  ;;  %1290 = vmatmul.mubr.bf16.vlgmr.msra.gmra.mrb[28].mxu0 %v1245_v51  ;;  %v1236_v7 = vrot.slane %v2605_v54, 3  ;;  %v2276_v51 = vld [vmem:[%s3132_s3 + $0x1b4] ss:$8 sps:$4 sm:$0xff]  }
 0x175   :  { %2145 = vmatpush3.bf16.msra.mxu0 %v2632_v35  ;;  %2148 = vmatprep.mubr.msk.bf16.mxu0 %vm2352_vm2, %v3139_v52 }
 0x176   :  { %2146 = vmatprep.subr.bf16.mxu0 %v3139_v52 }
 0x177   :  { %1202 = vmatpush1.bf16.msra.mxu1 %v2262_v10  ;;  %v1237_v10 = vrot.slane %v2607_v55, 2  ;;  %v2265_v55 = vld [vmem:[%s3132_s3 + $0x180] ss:$8 sps:$4 sm:$0xff]  }
 0x178   :  { %2073 = vmatprep.subr.bf16.mxu1 %v2311_v11  ;;  %v2323_v11 = vld [vmem:[%s3130_s1 + $0xf0] sm:$0xff]  }
 0x179   :  { %2147 = vmatpush3.bf16.msra.mxu0 %v2653_v59  ;;  %v1238_v15 = vsel %vm170_vm0, %v1237_v10, %v1236_v7  ;;  %v2304_v7 = vld [vmem:[%s3134_s5 + $0x38] sm:$0xff]   ;;  %v1523_v10 = vsub.s32 0, %v2587_v36 }
 0x17a   :  { %v1247_v54 = vpack.c.b16 %v1238_v15, %v1238_v15  ;;  %1476 = vmatprep.subr.bf16.mxu0 %v2267_v19 }
 0x17c   :  { %2149 = vmatmul.mubr.msk.bf16.vlgmr.msra.gmra.mrb[32].mxu0 %vm392_vm3, %v1249_v57 }
 0x17d   :  { %1508 = vmatprep.mubr.bf16.mxu0 %v2353_v45  ;;  %1477 = vmatpush1.bf16.msra.mxu0 %v2265_v55 }
 0x17e   :  { %1478 = vmatprep.subr.bf16.mxu0 %v2270_v22 }
 0x181   :  { %1479 = vmatpush1.bf16.msra.mxu0 %v2268_v48 }
 0x1d7   :  { %v934_v53 = vpop.f32.mrb[8].mxu1 }
 0x1d8   :  { %v936_v35 = vpop.f32.mrb[9].mxu1 }
 0x1d9   :  { %v938_v58 = vpop.f32.mrb[10].mxu1 }
 0x1da   :  { %v939_v26 = vpop.f32.mrb[11].mxu1 }
 0x1f7   :  { %v2042_v62 = vpop.f32.mrb[12].mxu1 }
 0x1f8   :  { %v2043_v27 = vpop.f32.mrb[13].mxu1 }
 0x1f9   :  { %v2044_v29 = vadd.f32 %v2043_v27, %v2042_v62  ;;  %v2045_v32 = vpop.f32.mrb[14].mxu1  ;;  %v2282_v62 = vld [vmem:[%s3132_s3 + $0x1d4] ss:$8 sps:$4 sm:$0xff]   ;;  %v2280_v27 = vld [vmem:[%s3132_s3 + $0x1d0] ss:$8 sps:$4 sm:$0xff]  }
 0x1fa   :  { %v2046_v43 = vpop.f32.mrb[15].mxu1  ;;  %v2285_v32 = vld [vmem:[%s3132_s3 + $0x1e4] ss:$8 sps:$4 sm:$0xff]  }
 0x1ff   :  { %v813_v31 = vpop.f32.mrb[16].mxu0 }
 0x200   :  { %v2956_v63 = vadd.f32 %v934_v53, %v813_v31  ;;  %v815_v59 = vpop.f32.mrb[17].mxu0  ;;  %v2283_v31 = vld [vmem:[%s3132_s3 + $0x1e0] ss:$8 sps:$4 sm:$0xff]  }
 0x201   :  { %v2958_v0 = vadd.f32 %v936_v35, %v815_v59  ;;  %v817_v33 = vpop.f32.mrb[18].mxu0 }
 0x202   :  { %v818_v34 = vpop.f32.mrb[19].mxu0 }
 0x203   :  { %v2288_v34 = vld [vmem:[%s3132_s3 + $0x1f4] ss:$8 sps:$4 sm:$0xff]  }
 0x21f   :  { %v2020_v39 = vpop.f32.mrb[20].mxu0 }
 0x220   :  { %v2021_v1 = vpop.f32.mrb[21].mxu0 }
 0x221   :  { %v2022_v45 = vadd.f32 %v2021_v1, %v2020_v39  ;;  %v2023_v40 = vpop.f32.mrb[22].mxu0  ;;  %v2286_v39 = vld [vmem:[%s3132_s3 + $0x1f0] ss:$8 sps:$4 sm:$0xff]   ;;  %v2289_v1 = vld [vmem:[%s3134_s5 + $0x40] sm:$0xff]  }
 0x222   :  { %v2024_v41 = vpop.f32.mrb[23].mxu0  ;;  %v2291_v40 = vld [vmem:[%s3134_s5 + $0x48] sm:$0xff]  }
 0x223   :  { %v1003_v42 = vadd.f32 %v2022_v45, %v2811_v44  ;;  %v2290_v45 = vld [vmem:[%s3134_s5] sm:$0xff]   ;;  %v2292_v41 = vld [vmem:[%s3134_s5 + $0x8] sm:$0xff]  }
 0x225   :  { %v1043_v52 = vadd.f32 %v2044_v29, %v1003_v42  ;;  %v2293_v42 = vld [vmem:[%s3134_s5 + $0x50] sm:$0xff]  }
 0x227   :  { %v1082_v3 = vpop.f32.mrb[24].mxu0 }
 0x228   :  { %v1083_v38 = vadd.f32 %v1082_v3, %v1043_v52  ;;  %v2142_v47 = vpop.f32.mrb[25].mxu0  ;;  %v2296_v52 = vld [vmem:[%s3134_s5 + $0x18] sm:$0xff]   ;;  %v2297_v3 = vld [vmem:[%s3134_s5 + $0x60] sm:$0xff]  }
 0x229   :  { %v1085_v4 = vpop.f32.mrb[26].mxu0  ;;  %v2299_v47 = vld [vmem:[%s3134_s5 + $0x68] sm:$0xff]  }
 0x22a   :  { %v1088_v5 = vmax.f32 %v1083_v38, 0.0  ;;  %v2143_v8 = vpop.f32.mrb[27].mxu0  ;;  %v2298_v38 = vld [vmem:[%s3134_s5 + $0x20] sm:$0xff]  }
 0x22c   :  { %v1089_v12 = vpack.c.bf16 %v1088_v5, %v1088_v5 }
 0x22e   :  { %1220 = vmatmul.mubr.bf16.vlgmr.msra.gmra.mrb[16].mxu1 %v1089_v12 }
 0x22f   :  { %2074 = vmatpush3.bf16.msra.mxu1 %v2312_v13  ;;  %1329 = vmatprep.mubr.bf16.mxu1 %v1248_v9 }
 0x230   :  { %2075 = vmatprep.subr.bf16.mxu1 %v2313_v60 }
 0x233   :  { %2076 = vmatpush3.bf16.msra.mxu1 %v2314_v61 }
 0x234   :  { %2077 = vmatprep.subr.bf16.mxu1 %v2315_v16 }
 0x237   :  { %2078 = vmatpush3.bf16.msra.mxu1 %v2316_v17 }
 0x238   :  { %2079 = vmatprep.subr.bf16.mxu1 %v2317_v20 }
 0x23b   :  { %2080 = vmatpush3.bf16.msra.mxu1 %v2318_v21 }
 0x23c   :  { %2081 = vmatprep.subr.bf16.mxu1 %v2319_v24 }
 0x23f   :  { %2082 = vmatpush3.bf16.msra.mxu1 %v2320_v25 }
 0x240   :  { %2083 = vmatprep.subr.bf16.mxu1 %v2321_v28 }
 0x243   :  { %2084 = vmatpush3.bf16.msra.mxu1 %v2322_v30  ;;  %v2303_v30 = vld [vmem:[%s3134_s5 + $0x78] sm:$0xff]  }
 0x244   :  { %2085 = vmatprep.subr.bf16.mxu1 %v2323_v11  ;;  %v1519_v11 = vld [vmem:[%s3133_s4] sm:$0x3] }
 0x245   :  { %v1524_v15 = vrot.slane %v1519_v11, %v1523_v10 }
 0x247   :  { %2086 = vmatpush3.bf16.msra.mxu1 %v2324_v14  ;;  %v2067_v57 = vpop.f32.mrb[28].mxu0  ;;  %v1527_v14 = vsub.s32 1, %v2587_v36  ;;  %v1893_v36 = vld [vmem:[%s3135_s6] ss:$0 sm:$0xff] }
 0x248   :  { %2087 = vmatprep.subr.bf16.mxu1 %v2325_v18  ;;  %v2068_v53 = vpop.f32.mrb[29].mxu0 }
 0x249   :  { %v2069_v35 = vadd.f32 %v2068_v53, %v2067_v57  ;;  %v2070_v58 = vpop.f32.mrb[30].mxu0 }
 0x24a   :  { %v2071_v26 = vpop.f32.mrb[31].mxu0 }
 0x24b   :  { %2088 = vmatpush3.bf16.msra.mxu1 %v2592_v37  ;;  %v2273_v37 = vld [vmem:[%s3132_s3 + $0x1a4] ss:$8 sps:$4 sm:$0xff]   ;;  %v1292_v61 = vadd.f32 %v2069_v35, %v2811_v44  ;;  %v2302_v44 = vld [vmem:[%s3134_s5 + $0x30] sm:$0xff]   ;;  %s1732_s3 = sshll.u32 %s2354_s27, 4  ;;  %s1733_s3 = int_to_ptr.vmem [resolvable:$true] %s1732_s3 }
 0x24c   :  { %1480 = vmatprep.subr.bf16.mxu0 %v2273_v37  ;;  %2098 = vmatprep.subr.bf16.mxu1 %v2289_v1  ;;  %s2326_s6 = scalar_lea.vmem %s1733_s3, 32  ;;  %p2331_p1 = scmp.lt.s32.totalorder %s1733_s3, %s1733_s3 }
 0x24d   :  { %1481 = vmatpush1.bf16.msra.mxu0 %v2271_v23  ;;  %p2327_p0 = scmp.ne.s32.totalorder %s1733_s3, %s2326_s6  ;;  %p2332_p2 = scmp.lt.s32.totalorder %s2326_s6, %s2326_s6 }
 0x24e   :  { %1330 = vmatmul.mubr.bf16.vlgmr.msra.gmra.mrb[20].mxu1 %v1247_v54  ;;  %1482 = vmatprep.subr.bf16.mxu0 %v2276_v51  ;;  %v1528_v54 = vrot.slane %v1519_v11, %v1527_v14 }
 0x24f   :  { %v1371_v29 = vpop.f32.mrb[32].mxu0  ;;  %2099 = vmatpush3.bf16.msra.mxu1 %v2290_v45  ;;  %p2333_p3 = por %p2332_p2, %p2331_p1 }
 0x250   :  { %v2150_v43 = vpop.f32.mrb[33].mxu0  ;;  %2100 = vmatprep.subr.bf16.mxu1 %v2291_v40 }
 0x251   :  { %1483 = vmatpush1.bf16.msra.mxu0 %v2274_v56  ;;  %v1374_v59 = vpop.f32.mrb[34].mxu0  ;;  %p2334_p4 = pnand %p2333_p3, %p2327_p0 }
 0x252   :  { %1484 = vmatprep.subr.bf16.mxu0 %v2279_v49  ;;  %v2151_v33 = vpop.f32.mrb[35].mxu0 }
 0x253   :  { %2101 = vmatpush3.bf16.msra.mxu1 %v2292_v41 }
 0x254   :  { %2102 = vmatprep.subr.bf16.mxu1 %v2293_v42 }
 0x255   :  { %1485 = vmatpush1.bf16.msra.mxu0 %v2277_v50 }
 0x256   :  { %1486 = vmatprep.subr.bf16.mxu0 %v2282_v62 }
 0x257   :  { %2103 = vmatpush3.bf16.msra.mxu1 %v2294_v46 }
 0x258   :  { %2104 = vmatprep.subr.bf16.mxu1 %v2295_v2 }
 0x259   :  { %1487 = vmatpush1.bf16.msra.mxu0 %v2280_v27 }
 0x25a   :  { %1488 = vmatprep.subr.bf16.mxu0 %v2285_v32 }
 0x25b   :  { %2105 = vmatpush3.bf16.msra.mxu1 %v2296_v52 }
 0x25c   :  { %2106 = vmatprep.subr.bf16.mxu1 %v2297_v3 }
 0x25d   :  { %1489 = vmatpush1.bf16.msra.mxu0 %v2283_v31 }
 0x25e   :  { %1490 = vmatprep.subr.bf16.mxu0 %v2288_v34 }
 0x25f   :  { %2107 = vmatpush3.bf16.msra.mxu1 %v2298_v38 }
 0x260   :  { %2108 = vmatprep.subr.bf16.mxu1 %v2299_v47 }
 0x261   :  { %1491 = vmatpush1.bf16.msra.mxu0 %v2286_v39 }
 0x301   :  { %v1221_v6 = vpop.f32.mrb[16].mxu1 }
 0x302   :  { %v1228_v4 = vadd.f32 %v1221_v6, %v2956_v63  ;;  %v1223_v5 = vpop.f32.mrb[17].mxu1  ;;  %v2300_v63 = vld [vmem:[%s3134_s5 + $0x28] sm:$0xff]  }
 0x303   :  { %v1229_v8 = vadd.f32 %v1223_v5, %v2958_v0  ;;  %v1225_v9 = vpop.f32.mrb[18].mxu1  ;;  %2109 = vmatpush3.bf16.msra.mxu1 %v2300_v63  ;;  %v2301_v0 = vld [vmem:[%s3134_s5 + $0x70] sm:$0xff]  }
 0x304   :  { %v1226_v12 = vpop.f32.mrb[19].mxu1  ;;  %2110 = vmatprep.subr.bf16.mxu1 %v2301_v0 }
 0x307   :  { %2111 = vmatpush3.bf16.msra.mxu1 %v2302_v44 }
 0x308   :  { %2112 = vmatprep.subr.bf16.mxu1 %v2303_v30 }
 0x30b   :  { %2113 = vmatpush3.bf16.msra.mxu1 %v2304_v7 }
 0x321   :  { %v2089_v13 = vpop.f32.mrb[20].mxu1 }
 0x322   :  { %v2090_v60 = vpop.f32.mrb[21].mxu1 }
 0x323   :  { %v2091_v16 = vadd.f32 %v2090_v60, %v2089_v13  ;;  %v2092_v17 = vpop.f32.mrb[22].mxu1 }
 0x324   :  { %v2093_v20 = vpop.f32.mrb[23].mxu1 }
 0x325   :  { %v1332_v21 = vadd.f32 %v2091_v16, %v1292_v61 }
 0x327   :  { %v1372_v24 = vadd.f32 %v1371_v29, %v1332_v21 }
 0x329   :  { %v1377_v25 = vmax.f32 %v1372_v24, 0.0 }
 0x32b   :  { %v1378_v28 = vpack.c.bf16 %v1377_v25, %v1377_v25 }
 0x32d   :  { %1509 = vmatmul.mubr.bf16.vlgmr.msra.gmra.mrb[36].mxu0 %v1378_v28 }
 0x400   :  { %v1510_v18 = vpop.f32.mrb[36].mxu0 }
 0x401   :  { %v1517_v55 = vadd.f32 %v1510_v18, %v1228_v4  ;;  %v1512_v19 = vpop.f32.mrb[37].mxu0 }
 0x402   :  { %v1518_v22 = vadd.f32 %v1512_v19, %v1229_v8  ;;  %v1514_v48 = vpop.f32.mrb[38].mxu0 }
 0x403   :  { %v1531_v37 = vadd.f32 %v1524_v15, %v1517_v55  ;;  %v1515_v23 = vpop.f32.mrb[39].mxu0 }
 0x404   :  { %v1532_v51 = vadd.f32 %v1528_v54, %v1518_v22 }
 0x405   :  { %v1533_v56 = vmax.f32 %v1531_v37, 0.0 }
 0x406   :  { %v1534_v49 = vmax.f32 %v1532_v51, 0.0 }
 0x407   :  { %v1535_v57 = vpack.c.bf16 %v1533_v56, %v1533_v56 }
 0x408   :  { %v1536_v50 = vpack.c.bf16 %v1534_v49, %v1534_v49 }
 0x40a   :  { %1704 = vmatprep.mubr.bf16.mxu1 %v1536_v50 }
 0x40b   :  { %1705 = vmatmul.mubr.bf16.vlgmr.msra.gmra.mrb[24].mxu1 %v1535_v57 }
 0x4de   :  { %v2114_v53 = vpop.f32.mrb[24].mxu1 }
 0x4df   :  { %v2115_v35 = vpop.f32.mrb[25].mxu1 }
 0x4e0   :  { %v2116_v58 = vadd.f32 %v2115_v35, %v2114_v53  ;;  %v2117_v26 = vpop.f32.mrb[26].mxu1 }
 0x4e1   :  { %v2118_v62 = vpop.f32.mrb[27].mxu1 }
 0x4e2   :  { %v1707_v27 = vadd.f32 %v2116_v58, %v1893_v36 }
 0x4e4   :  { %v1713_v29 = vsel %vm1712_vm4, %v1707_v27, -inf }
 0x4e5   :  { %1714 = vmax.xlane.f32.xlu0 %v1713_v29 }
 0x572   :  { %v1715_v32 = vpop.xlane.xlu0 %1714 }
 0x573   :  { %v1716_v43 = vsub.f32 %v1707_v27, %v1715_v32 }
 0x575   :  { %v1717_v31 = vmul.f32 1.442695, %v1716_v43 }
 0x577   :  { %2305 = vpow2.f32 %v1717_v31 }
 0x581   :  { %v2306_v59 = vpop.eup %2305 }
 0x582   :  { %v1719_v33 = vsel %vm1712_vm4, %v2306_v59, 0.0 }
 0x583   :  { %1720 = vadd.xlane.f32.xlu0 %v1719_v33 }
 0x610   :  { %v1721_v34 = vpop.xlane.xlu0 %1720 }
 0x611   :  { %2307 = vlog2.f32 %v1721_v34 }
 0x61b   :  { %v2308_v39 = vpop.eup %2307 }
 0x61c   :  { %v1723_v1 = vmul.f32 0.6931472, %v2308_v39 }
 0x61e   :  { %v1724_v45 = vsub.f32 %v1716_v43, %v1723_v1 }
 0x620   :  { %1725 = vst [vmem:[#allocation2] sm:$0x3] %v1724_v45 }
 0x621   :  { %2337 = shalt.err (!%p2334_p4)
}
 0x622   :  { %s2338_s29 = scalar_lea.hbm %s3136_s7, 32 }
 0x623   :  { %p2339_p5 = scmp.ne.s32.totalorder %s3136_s7, %s2338_s29  ;;  %p2342_p6 = scmp.lt.u32.totalorder %s2338_s29, %s3136_s7 }
 0x625   :  { %p2344_p7 = pnand %p2342_p6, %p2339_p5 }
 0x627   :  { %2347 = shalt.err (!%p2344_p7)
}
 0x628   :  { %1735 = dma.vmem_to_hbm [thread:$0]  %s1733_s3, 32, %s3136_s7, [#allocation3]  }
 0x629   :  { %2348 = dma.done.wait [#allocation3], 32  }
 0x62a   :  { %2349 = vsyncadd [#allocation3], 4294967264 }
 0x62b   :  { %1739 = vsyncpa [#allocation3], 1 }

// kernel: convnet_forward.7
= control target key start
LH: loop header
LB: loop body
LE: loop exit
PB: predicated region body
PF: predicated region fallthrough
CT: control target
= control target key end

     0   :  { %vm166_vm0 = vcmask 1046528   ;;  %vm546_vm1 = vcmask 1045504   ;;  %vm797_vm2 = vcmask 1044480   ;;  %vm1048_vm3 = vcmask 1043456   ;;  %s9670_s1 = inlined_call_operand.vmem [shape: bf16[5,5,128,128], index: 1, kind: input, shape index: {}]   ;;  %s9671_s0 = inlined_call_operand.vmem [shape: bf16[2,12,12,128], index: 0, kind: input, shape index: {}]   ;;  %s9672_s2 = inlined_call_operand.vmem [shape: bf16[128,128], index: 2, kind: output, shape index: {0}]   ;;  %s9673_s3 = inlined_call_operand.vmem [shape: f32[1,2,128], index: 3, kind: output, shape index: {1}]  }
   0x1   :  { %v7507_v0 = vld [vmem:[%s9670_s1 + $0x40] sm:$0xff]   ;;  %v7509_v2 = vld [vmem:[%s9670_s1 + $0x48] sm:$0xff]   ;;  %v7511_v4 = vld [vmem:[%s9670_s1 + $0x50] sm:$0xff]   ;;  %vm5211_vm4 = vcmask 1040384  }
   0x2   :  { %v7508_v1 = vld [vmem:[%s9670_s1 + $0x300] sm:$0xff]   ;;  %6307 = vmatprep.subr.bf16.mxu1 %v7507_v0  ;;  %v7510_v3 = vld [vmem:[%s9670_s1 + $0x308] sm:$0xff]   ;;  %v7512_v5 = vld [vmem:[%s9670_s1 + $0x310] sm:$0xff]  }
   0x3   :  { %6691 = vmatprep.subr.bf16.mxu0 %v7508_v1  ;;  %6308 = vmatpush3.bf16.msra.mxu1 %v7507_v0  ;;  %v7513_v6 = vld [vmem:[%s9670_s1 + $0x58] sm:$0xff]   ;;  %v7515_v8 = vld [vmem:[%s9670_s1 + $0x60] sm:$0xff]   ;;  %v7517_v10 = vld [vmem:[%s9670_s1 + $0x68] sm:$0xff]  }
   0x4   :  { %6692 = vmatpush3.bf16.msra.mxu0 %v7508_v1  ;;  %6309 = vmatprep.subr.bf16.mxu1 %v7509_v2  ;;  %v7514_v7 = vld [vmem:[%s9670_s1 + $0x318] sm:$0xff]   ;;  %v7516_v9 = vld [vmem:[%s9670_s1 + $0x320] sm:$0xff]   ;;  %v7518_v11 = vld [vmem:[%s9670_s1 + $0x328] sm:$0xff]  }
   0x5   :  { %6693 = vmatprep.subr.bf16.mxu0 %v7510_v3  ;;  %v7801_v12 = vld [vmem:[%s9671_s0] sm:$0xf]  ;;  %v15_v13 = vld [vmem:[%s9671_s0 + $0x4] sm:$0x3]  ;;  %v7809_v14 = vld [vmem:[%s9671_s0 + $0x8] sm:$0xf] }
   0x6   :  { %v17_v15 = vld [vmem:[%s9671_s0 + $0xc] sm:$0x3]  ;;  %v7817_v16 = vld [vmem:[%s9671_s0 + $0x10] sm:$0xf]  ;;  %v19_v17 = vld [vmem:[%s9671_s0 + $0x14] sm:$0x3]  ;;  %v7823_v18 = vunpack.c.l.bf16 %v7801_v12  ;;  %v7825_v19 = vunpack.c.l.bf16 %v15_v13  ;;  %v7828_v20 = vunpack.c.l.bf16 %v7809_v14 }
   0x7   :  { %6310 = vmatpush3.bf16.msra.mxu1 %v7509_v2  ;;  %v7830_v21 = vunpack.c.l.bf16 %v17_v15  ;;  %v7833_v22 = vunpack.c.l.bf16 %v7817_v16  ;;  %v7835_v23 = vunpack.c.l.bf16 %v19_v17  ;;  %v7840_v24 = vld [vmem:[%s9671_s0 + $0x18] sm:$0xf]  ;;  %v21_v25 = vld [vmem:[%s9671_s0 + $0x1c] sm:$0x3]  ;;  %v7848_v26 = vld [vmem:[%s9671_s0 + $0x20] sm:$0xf] }
   0x8   :  { %6694 = vmatpush3.bf16.msra.mxu0 %v7510_v3  ;;  %6311 = vmatprep.subr.bf16.mxu1 %v7511_v4  ;;  %9790 = vst [vmem:[#allocation2_spill] sm:$0xff] %v7823_v18  ;;  %9791 = vst [vmem:[#allocation3_spill] sm:$0xff] %v7825_v19  ;;  %v167_v28 = vrot.slane %v7823_v18, 1  ;;  %v168_v29 = vrot.slane %v7825_v19, 1  ;;  %v170_v30 = vrot.slane %v7828_v20, 1  ;;  %v7859_v32 = vunpack.c.l.bf16 %v7840_v24  ;;  %v7519_v33 = vld [vmem:[%s9670_s1 + $0x70] sm:$0xff]  }
   0x9   :  { %6695 = vmatprep.subr.bf16.mxu0 %v7512_v5  ;;  %9792 = vst [vmem:[#allocation4_spill] sm:$0xff] %v7828_v20  ;;  %9793 = vst [vmem:[#allocation5_spill] sm:$0xff] %v7830_v21  ;;  %v23_v31 = vld [vmem:[%s9671_s0 + $0x24] sm:$0x3]  ;;  %v171_v34 = vrot.slane %v7830_v21, 1  ;;  %v173_v35 = vrot.slane %v7833_v22, 1  ;;  %v7867_v37 = vunpack.c.l.bf16 %v21_v25  ;;  %v7874_v40 = vunpack.c.l.bf16 %v7848_v26 }
   0xa   :  { %v174_v36 = vrot.slane %v7835_v23, 1  ;;  %v7520_v38 = vld [vmem:[%s9670_s1 + $0x330] sm:$0xff]   ;;  %v169_v39 = vsel %vm166_vm0, %v167_v28, %v168_v29  ;;  %v7876_v41 = vunpack.c.l.bf16 %v23_v31  ;;  %v550_v42 = vrot.slane %v7828_v20, 2  ;;  %v7882_v43 = vld [vmem:[%s9671_s0 + $0x28] sm:$0xf]  ;;  %v7521_v44 = vld [vmem:[%s9670_s1 + $0x78] sm:$0xff]  }
   0xb   :  { %6312 = vmatpush3.bf16.msra.mxu1 %v7511_v4  ;;  %v7888_v45 = vsel %vm166_vm0, %v170_v30, %v171_v34  ;;  %v551_v47 = vrot.slane %v7830_v21, 2  ;;  %v553_v48 = vrot.slane %v7833_v22, 2  ;;  %v25_v49 = vld [vmem:[%s9671_s0 + $0x2c] sm:$0x3]  ;;  %v554_v52 = vrot.slane %v7835_v23, 2  ;;  %v7522_v54 = vld [vmem:[%s9670_s1 + $0x338] sm:$0xff]  }
   0xc   :  { %6696 = vmatpush3.bf16.msra.mxu0 %v7512_v5  ;;  %6313 = vmatprep.subr.bf16.mxu1 %v7513_v6  ;;  %9794 = vst [vmem:[#allocation6_spill] sm:$0xff] %v7888_v45  ;;  %v7891_v46 = vsel %vm166_vm0, %v173_v35, %v174_v36  ;;  %v231_v50 = vpack.c.bf16 %v7888_v45, %v169_v39  ;;  %v556_v53 = vrot.slane %v7859_v32, 2  ;;  %v557_v56 = vrot.slane %v7867_v37, 2  ;;  %v7929_v3 = vld [vmem:[%s9671_s0 + $0x30] sm:$0xf]  ;;  %v7523_v13 = vld [vmem:[%s9670_s1] sm:$0xff]  }
   0xd   :  { %6697 = vmatprep.subr.bf16.mxu0 %v7514_v7  ;;  %9795 = vst [vmem:[#allocation7_spill] sm:$0xff] %v7891_v46  ;;  %v7907_v55 = vsel %vm546_vm1, %v550_v42, %v551_v47  ;;  %v559_v57 = vrot.slane %v7874_v40, 2  ;;  %v560_v58 = vrot.slane %v7876_v41, 2  ;;  %v7913_v59 = vsel %vm546_vm1, %v553_v48, %v554_v52  ;;  %v27_v4 = vld [vmem:[%s9671_s0 + $0x34] sm:$0x3]  ;;  %v7524_v28 = vld [vmem:[%s9670_s1 + $0x340] sm:$0xff]  }
   0xe   :  { %9796 = vst [vmem:[#allocation8_spill] sm:$0xff] %v7907_v55  ;;  %6323 = vmatprep.mubr.bf16.mxu1 %v231_v50  ;;  %9797 = vst [vmem:[#allocation9_spill] sm:$0xff] %v7913_v59  ;;  %v176_v60 = vrot.slane %v7859_v32, 1  ;;  %v177_v61 = vrot.slane %v7867_v37, 1  ;;  %v7918_v62 = vunpack.c.l.bf16 %v7882_v43  ;;  %v558_v63 = vsel %vm546_vm1, %v556_v53, %v557_v56  ;;  %v7937_v5 = vld [vmem:[%s9671_s0 + $0x38] sm:$0xf] }
   0xf   :  { %6314 = vmatpush3.bf16.msra.mxu1 %v7513_v6  ;;  %v561_v0 = vsel %vm546_vm1, %v559_v57, %v560_v58  ;;  %v7924_v2 = vunpack.c.l.bf16 %v25_v49  ;;  %v7940_v6 = vpack.c.bf16 %v558_v63, %v7913_v59  ;;  %v179_v17 = vrot.slane %v7874_v40, 1  ;;  %v30_v34 = vld [vmem:[%s9671_s0 + $0x40] sm:$0xf]  ;;  %v31_v42 = vld [vmem:[%s9671_s0 + $0x44] sm:$0x3]  ;;  %v7525_v56 = vld [vmem:[%s9670_s1 + $0x8] sm:$0xff]  }
  0x10   :  { %6698 = vmatpush3.bf16.msra.mxu0 %v7514_v7  ;;  %6315 = vmatprep.subr.bf16.mxu1 %v7515_v8  ;;  %v7942_v7 = vpack.c.bf16 %v561_v0, %v558_v63  ;;  %v180_v25 = vrot.slane %v7876_v41, 1  ;;  %v182_v29 = vrot.slane %v7918_v62, 1  ;;  %v7968_v31 = vunpack.c.l.bf16 %v7929_v3  ;;  %v32_v47 = vld [vmem:[%s9671_s0 + $0x48] sm:$0xf]  ;;  %v33_v53 = vld [vmem:[%s9671_s0 + $0x4c] sm:$0x3] }
  0x11   :  { %6699 = vmatprep.subr.bf16.mxu0 %v7516_v9  ;;  %9798 = vst [vmem:[#allocation10_spill] sm:$0xff] %v7940_v6  ;;  %v563_v15 = vrot.slane %v7924_v2, 2  ;;  %6707 = vmatprep.mubr.bf16.mxu0 %v7940_v6  ;;  %v183_v30 = vrot.slane %v7924_v2, 1  ;;  %v7529_v51 = vld [vmem:[%s9670_s1 + $0x18] sm:$0xff]   ;;  %v57_v55 = vld [vmem:[%s9671_s0 + $0xac] sm:$0x3] }
  0x12   :  { %9799 = vst [vmem:[#allocation11_spill] sm:$0xff] %v7942_v7  ;;  %v7977_v36 = vsel %vm166_vm0, %v179_v17, %v180_v25  ;;  %v565_v50 = vrot.slane %v7968_v31, 2  ;;  %v8022_v17 = vunpack.c.l.bf16 %v31_v42  ;;  %v8027_v25 = vld [vmem:[%s9671_s0 + $0x60] sm:$0xf]  ;;  %v8040_v42 = vunpack.c.l.bf16 %v32_v47  ;;  %v47_v7 = vld [vmem:[%s9671_s0 + $0x84] sm:$0x3] }
  0x13   :  { %6316 = vmatpush3.bf16.msra.mxu1 %v7515_v8  ;;  %v7945_v8 = vsel %vm166_vm0, %v176_v60, %v177_v61  ;;  %9802 = vst [vmem:[#allocation14_spill] sm:$0xff] %v7977_v36  ;;  %v184_v49 = vsel %vm166_vm0, %v182_v29, %v183_v30  ;;  %v185_v60 = vrot.slane %v7968_v31, 1  ;;  %v7526_v61 = vld [vmem:[%s9670_s1 + $0x348] sm:$0xff]   ;;  %v39_v29 = vld [vmem:[%s9671_s0 + $0x64] sm:$0x3] }
  0x14   :  { %6700 = vmatpush3.bf16.msra.mxu0 %v7516_v9  ;;  %6317 = vmatprep.subr.bf16.mxu1 %v7517_v10  ;;  %9800 = vst [vmem:[#allocation12_spill] sm:$0xff] %v7945_v8  ;;  %v562_v9 = vrot.slane %v7918_v62, 2  ;;  %9807 = vst [vmem:[#allocation19_spill] sm:$0xff] %v8022_v17 }
  0x15   :  { %6701 = vmatprep.subr.bf16.mxu0 %v7518_v11  ;;  %9810 = vst [vmem:[#allocation22_spill] sm:$0xff] %v8040_v42 }
  0x16   :  { %v564_v35 = vsel %vm546_vm1, %v562_v9, %v563_v15  ;;  %v8020_v15 = vunpack.c.l.bf16 %v30_v34 }
  0x17   :  { %6318 = vmatpush3.bf16.msra.mxu1 %v7517_v10  ;;  %v29_v10 = vld [vmem:[%s9671_s0 + $0x3c] sm:$0x3]  ;;  %v7990_v48 = vpack.c.bf16 %v564_v35, %v561_v0 }
  0x18   :  { %6702 = vmatpush3.bf16.msra.mxu0 %v7518_v11  ;;  %6319 = vmatprep.subr.bf16.mxu1 %v7519_v33  ;;  %v7953_v11 = vpack.c.bf16 %v7945_v8, %v7891_v46  ;;  %v7982_v39 = vunpack.c.l.bf16 %v29_v10  ;;  %v56_v8 = vld [vmem:[%s9671_s0 + $0xa8] sm:$0xf] }
  0x19   :  { %6703 = vmatprep.subr.bf16.mxu0 %v7520_v38  ;;  %9803 = vst [vmem:[#allocation15_spill] sm:$0xff] %v7990_v48 }
  0x1a   :  { %9801 = vst [vmem:[#allocation13_spill] sm:$0xff] %v7953_v11  ;;  %v569_v58 = vrot.slane %v7982_v39, 2 }
  0x1b   :  { %6320 = vmatpush3.bf16.msra.mxu1 %v7519_v33  ;;  %v7970_v33 = vunpack.c.l.bf16 %v27_v4  ;;  %v189_v4 = vrot.slane %v7982_v39, 1 }
  0x1c   :  { %6704 = vmatpush3.bf16.msra.mxu0 %v7520_v38  ;;  %6321 = vmatprep.subr.bf16.mxu1 %v7521_v44  ;;  %v7980_v38 = vunpack.c.l.bf16 %v7937_v5 }
  0x1d   :  { %6705 = vmatprep.subr.bf16.mxu0 %v7522_v54  ;;  %v566_v52 = vrot.slane %v7970_v33, 2  ;;  %v186_v63 = vrot.slane %v7970_v33, 1 }
  0x1e   :  { %v568_v57 = vrot.slane %v7980_v38, 2  ;;  %v188_v0 = vrot.slane %v7980_v38, 1 }
  0x1f   :  { %6322 = vmatpush3.bf16.msra.mxu1 %v7521_v44  ;;  %v8002_v44 = vpack.c.bf16 %v184_v49, %v7977_v36  ;;  %v187_v34 = vsel %vm166_vm0, %v185_v60, %v186_v63  ;;  %v8063_v60 = vunpack.c.l.bf16 %v33_v53  ;;  %v7528_v63 = vld [vmem:[%s9670_s1 + $0x350] sm:$0xff]   ;;  %v8076_v53 = vunpack.c.l.bf16 %v8027_v25 }
  0x20   :  { %6706 = vmatpush3.bf16.msra.mxu0 %v7522_v54  ;;  %6339 = vmatprep.subr.bf16.mxu1 %v7523_v13  ;;  %v567_v54 = vsel %vm546_vm1, %v565_v50, %v566_v52  ;;  %v8016_v9 = vsel %vm546_vm1, %v568_v57, %v569_v58  ;;  %v8045_v50 = vld [vmem:[%s9671_s0 + $0x68] sm:$0xf]  ;;  %v41_v52 = vld [vmem:[%s9671_s0 + $0x6c] sm:$0x3]  ;;  %v8058_v47 = vpack.c.bf16 %v187_v34, %v184_v49  ;;  %v7527_v58 = vld [vmem:[%s9670_s1 + $0x10] sm:$0xff]   ;;  %v1684_v49 = vrot.slane %v8022_v17, 2 }
  0x21   :  { %9804 = vst [vmem:[#allocation16_spill] sm:$0xff] %v8002_v44  ;;  %6723 = vmatprep.subr.bf16.mxu0 %v7524_v28  ;;  %9805 = vst [vmem:[#allocation17_spill] sm:$0xff] %v8016_v9  ;;  %v8018_v10 = vpack.c.bf16 %v567_v54, %v564_v35  ;;  %v8034_v30 = vpack.c.bf16 %v8016_v9, %v567_v54  ;;  %v8038_v35 = vsel %vm166_vm0, %v188_v0, %v189_v4 }
  0x22   :  { %6324 = vmatmul.mubr.bf16.vlgmr.msra.gmra.mrb[0].mxu1 %v7953_v11  ;;  %9809 = vst [vmem:[#allocation21_spill] sm:$0xff] %v8038_v35  ;;  %9811 = vst [vmem:[#allocation23_spill] sm:$0xff] %v8045_v50  ;;  %v8056_v57 = vpack.c.bf16 %v8038_v35, %v187_v34  ;;  %v1683_v54 = vrot.slane %v8020_v15, 2  ;;  %v2637_v0 = vrot.slane %v8040_v42, 2  ;;  %v8078_v4 = vunpack.c.l.bf16 %v39_v29  ;;  %v8083_v34 = vld [vmem:[%s9671_s0 + $0x78] sm:$0xf] }
  0x23   :  { %9806 = vst [vmem:[#allocation18_spill] sm:$0xff] %v8018_v10  ;;  %6708 = vmatmul.mubr.bf16.vlgmr.msra.gmra.mrb[0].mxu0 %v7990_v48  ;;  %6340 = vmatpush3.bf16.msra.mxu1 %v7523_v13  ;;  %9808 = vst [vmem:[#allocation20_spill] sm:$0xff] %v8034_v30  ;;  %v8053_v13 = vld [vmem:[%s9671_s0 + $0x70] sm:$0xf]  ;;  %v2638_v1 = vrot.slane %v8063_v60, 2  ;;  %v8091_v27 = vunpack.c.l.bf16 %v8045_v50  ;;  %v8093_v11 = vunpack.c.l.bf16 %v41_v52  ;;  %v191_v45 = vrot.slane %v8076_v53, 1 }
  0x24   :  { %9812 = vst [vmem:[#allocation24_spill] sm:$0xff] %v8053_v13  ;;  %6724 = vmatpush3.bf16.msra.mxu0 %v7524_v28  ;;  %6341 = vmatprep.subr.bf16.mxu1 %v7525_v56  ;;  %9813 = vst [vmem:[#allocation25_spill] sm:$0xff] %v8056_v57  ;;  %v43_v28 = vld [vmem:[%s9671_s0 + $0x74] sm:$0x3]  ;;  %v45_v29 = vld [vmem:[%s9671_s0 + $0x7c] sm:$0x3]  ;;  %v8102_v59 = vsel %vm546_vm1, %v1683_v54, %v1684_v49 }
  0x25   :  { %9814 = vst [vmem:[#allocation26_spill] sm:$0xff] %v8058_v47  ;;  %9815 = vst [vmem:[#allocation27_spill] sm:$0xff] %v8063_v60  ;;  %6725 = vmatprep.subr.bf16.mxu0 %v7526_v61  ;;  %6327 = vmatprep.mubr.bf16.mxu1 %v8002_v44  ;;  %v8099_v44 = vunpack.c.l.bf16 %v8053_v13  ;;  %v192_v46 = vrot.slane %v8078_v4, 1  ;;  %v8106_v10 = vunpack.c.l.bf16 %v43_v28  ;;  %v8111_v52 = vld [vmem:[%s9671_s0 + $0x80] sm:$0xf]  ;;  %v194_v54 = vrot.slane %v8091_v27, 1 }
  0x26   :  { %9816 = vst [vmem:[#allocation28_spill] sm:$0xff] %v8076_v53  ;;  %9817 = vst [vmem:[#allocation29_spill] sm:$0xff] %v8078_v4  ;;  %6711 = vmatprep.mubr.bf16.mxu0 %v8034_v30  ;;  %v195_v49 = vrot.slane %v8093_v11, 1  ;;  %v8122_v28 = vunpack.c.l.bf16 %v8083_v34  ;;  %v8127_v47 = vld [vmem:[%s9671_s0 + $0x88] sm:$0xf]  ;;  %v8140_v21 = vunpack.c.l.bf16 %v45_v29 }
  0x27   :  { %9818 = vst [vmem:[#allocation30_spill] sm:$0xff] %v8091_v27  ;;  %9819 = vst [vmem:[#allocation31_spill] sm:$0xff] %v8093_v11  ;;  %6342 = vmatpush3.bf16.msra.mxu1 %v7525_v56  ;;  %v8117_v56 = vsel %vm546_vm1, %v2637_v0, %v2638_v1  ;;  %v7530_v0 = vld [vmem:[%s9670_s1 + $0x358] sm:$0xff]   ;;  %v193_v35 = vsel %vm166_vm0, %v191_v45, %v192_v46  ;;  %v577_v20 = vrot.slane %v8099_v44, 2  ;;  %v578_v48 = vrot.slane %v8106_v10, 2 }
  0x28   :  { %9820 = vst [vmem:[#allocation32_spill] sm:$0xff] %v8102_v59  ;;  %6726 = vmatpush3.bf16.msra.mxu0 %v7526_v61  ;;  %6343 = vmatprep.subr.bf16.mxu1 %v7527_v58  ;;  %9821 = vst [vmem:[#allocation33_spill] sm:$0xff] %v8117_v56  ;;  %v49_v61 = vld [vmem:[%s9671_s0 + $0x8c] sm:$0x3]  ;;  %v8134_v1 = vpack.c.bf16 %v8117_v56, %v8102_v59  ;;  %v8145_v30 = vsel %vm166_vm0, %v194_v54, %v195_v49  ;;  %v580_v56 = vrot.slane %v8122_v28, 2 }
  0x29   :  { %6727 = vmatprep.subr.bf16.mxu0 %v7528_v63  ;;  %9823 = vst [vmem:[#allocation35_spill] sm:$0xff] %v8140_v21  ;;  %9824 = vst [vmem:[#allocation36_spill] sm:$0xff] %v8145_v30  ;;  %v197_v6 = vrot.slane %v8099_v44, 1  ;;  %v235_v45 = vpack.c.bf16 %v8145_v30, %v193_v35  ;;  %v581_v46 = vrot.slane %v8140_v21, 2  ;;  %v198_v29 = vrot.slane %v8106_v10, 1  ;;  %v7532_v30 = vld [vmem:[%s9670_s1 + $0x360] sm:$0xff]  }
  0x2a   :  { %9822 = vst [vmem:[#allocation34_spill] sm:$0xff] %v8134_v1  ;;  %6328 = vmatmul.mubr.bf16.gmra.mrb[4].mxu1 %v8056_v57  ;;  %v200_v57 = vrot.slane %v8122_v28, 1  ;;  %v8156_v54 = vsel %vm546_vm1, %v577_v20, %v578_v48  ;;  %v201_v49 = vrot.slane %v8140_v21, 1  ;;  %v8165_v35 = vunpack.c.l.bf16 %v47_v7  ;;  %v8184_v7 = vld [vmem:[%s9671_s0 + $0x90] sm:$0xf] }
  0x2b   :  { %6712 = vmatmul.mubr.bf16.gmra.mrb[4].mxu0 %v8134_v1  ;;  %6344 = vmatpush3.bf16.msra.mxu1 %v7527_v58  ;;  %9825 = vst [vmem:[#allocation37_spill] sm:$0xff] %v8156_v54  ;;  %v7531_v1 = vld [vmem:[%s9670_s1 + $0x20] sm:$0xff]   ;;  %v8163_v58 = vunpack.c.l.bf16 %v8111_v52  ;;  %v8171_v20 = vsel %vm546_vm1, %v580_v56, %v581_v46  ;;  %v8174_v48 = vsel %vm166_vm0, %v197_v6, %v198_v29  ;;  %v8179_v11 = vunpack.c.l.bf16 %v49_v61  ;;  %v8192_v56 = vld [vmem:[%s9671_s0 + $0x98] sm:$0xf] }
  0x2c   :  { %6728 = vmatpush3.bf16.msra.mxu0 %v7528_v63  ;;  %6345 = vmatprep.subr.bf16.mxu1 %v7529_v51  ;;  %9826 = vst [vmem:[#allocation38_spill] sm:$0xff] %v8171_v20  ;;  %9827 = vst [vmem:[#allocation39_spill] sm:$0xff] %v8174_v48  ;;  %v8177_v63 = vunpack.c.l.bf16 %v8127_v47  ;;  %v8196_v6 = vpack.c.bf16 %v8171_v20, %v8156_v54  ;;  %v8199_v61 = vsel %vm166_vm0, %v200_v57, %v201_v49  ;;  %v7533_v54 = vld [vmem:[%s9670_s1 + $0x28] sm:$0xff]   ;;  %v53_v49 = vld [vmem:[%s9671_s0 + $0x9c] sm:$0x3] }
  0x2d   :  { %6729 = vmatprep.subr.bf16.mxu0 %v7530_v0  ;;  %6331 = vmatprep.mubr.bf16.mxu1 %v235_v45  ;;  %9828 = vst [vmem:[#allocation40_spill] sm:$0xff] %v8184_v7  ;;  %v51_v45 = vld [vmem:[%s9671_s0 + $0x94] sm:$0x3]  ;;  %9829 = vst [vmem:[#allocation41_spill] sm:$0xff] %v8192_v56  ;;  %v583_v46 = vrot.slane %v8163_v58, 2  ;;  %v584_v29 = vrot.slane %v8165_v35, 2  ;;  %v8205_v27 = vpack.c.bf16 %v8199_v61, %v8174_v48  ;;  %v8241_v36 = vunpack.c.l.bf16 %v8192_v56 }
  0x2e   :  { %9830 = vst [vmem:[#allocation42_spill] sm:$0xff] %v8196_v6  ;;  %9831 = vst [vmem:[#allocation43_spill] sm:$0xff] %v8199_v61  ;;  %v586_v4 = vrot.slane %v8177_v63, 2  ;;  %v587_v53 = vrot.slane %v8179_v11, 2  ;;  %v203_v57 = vrot.slane %v8163_v58, 1  ;;  %6715 = vmatprep.mubr.bf16.mxu0 %v8196_v6  ;;  %v7534_v48 = vld [vmem:[%s9670_s1 + $0x368] sm:$0xff]   ;;  %v8238_v6 = vunpack.c.l.bf16 %v51_v45 }
  0x2f   :  { %6346 = vmatpush3.bf16.msra.mxu1 %v7529_v51  ;;  %9832 = vst [vmem:[#allocation44_spill] sm:$0xff] %v8205_v27  ;;  %v8218_v51 = vsel %vm546_vm1, %v583_v46, %v584_v29  ;;  %v204_v20 = vrot.slane %v8165_v35, 1  ;;  %v206_v59 = vrot.slane %v8177_v63, 1  ;;  %v207_v9 = vrot.slane %v8179_v11, 1  ;;  %v54_v61 = vld [vmem:[%s9671_s0 + $0xa0] sm:$0xf] }
  0x30   :  { %6730 = vmatpush3.bf16.msra.mxu0 %v7530_v0  ;;  %9833 = vst [vmem:[#allocation45_spill] sm:$0xff] %v8218_v51  ;;  %v55_v0 = vld [vmem:[%s9671_s0 + $0xa4] sm:$0x3]  ;;  %6347 = vmatprep.subr.bf16.mxu1 %v7531_v1  ;;  %v8233_v46 = vsel %vm546_vm1, %v586_v4, %v587_v53  ;;  %v8236_v29 = vunpack.c.l.bf16 %v8184_v7  ;;  %9836 = vst [vmem:[#allocation48_spill] sm:$0xff] %v8238_v6  ;;  %v8260_v7 = vunpack.c.l.bf16 %v53_v49 }
  0x31   :  { %9834 = vst [vmem:[#allocation46_spill] sm:$0xff] %v8233_v46  ;;  %6731 = vmatprep.subr.bf16.mxu0 %v7532_v30  ;;  %v8252_v53 = vpack.c.bf16 %v8233_v46, %v8218_v51  ;;  %v8255_v4 = vsel %vm166_vm0, %v203_v57, %v204_v20  ;;  %v8258_v45 = vsel %vm166_vm0, %v206_v59, %v207_v9  ;;  %v592_v46 = vrot.slane %v8241_v36, 2  ;;  %v7535_v20 = vld [vmem:[%s9670_s1 + $0x30] sm:$0xff]  }
  0x32   :  { %9835 = vst [vmem:[#allocation47_spill] sm:$0xff] %v8236_v29  ;;  %6332 = vmatmul.mubr.bf16.gmra.mrb[8].mxu1 %v8205_v27  ;;  %9838 = vst [vmem:[#allocation50_spill] sm:$0xff] %v8255_v4  ;;  %v8264_v56 = vpack.c.bf16 %v8258_v45, %v8255_v4  ;;  %v589_v19 = vrot.slane %v8236_v29, 2  ;;  %v590_v27 = vrot.slane %v8238_v6, 2  ;;  %v593_v59 = vrot.slane %v8260_v7, 2  ;;  %v7536_v4 = vld [vmem:[%s9670_s1 + $0x370] sm:$0xff]  }
  0x33   :  { %9837 = vst [vmem:[#allocation49_spill] sm:$0xff] %v8252_v53  ;;  %9839 = vst [vmem:[#allocation51_spill] sm:$0xff] %v8258_v45  ;;  %6348 = vmatpush3.bf16.msra.mxu1 %v7531_v1  ;;  %6716 = vmatmul.mubr.bf16.gmra.mrb[8].mxu0 %v8252_v53  ;;  %v209_v9 = vrot.slane %v8236_v29, 1  ;;  %v210_v1 = vrot.slane %v8238_v6, 1  ;;  %v212_v57 = vrot.slane %v8241_v36, 1  ;;  %v213_v51 = vrot.slane %v8260_v7, 1 }
  0x34   :  { %9840 = vst [vmem:[#allocation52_spill] sm:$0xff] %v8264_v56  ;;  %6349 = vmatprep.subr.bf16.mxu1 %v7533_v54  ;;  %6732 = vmatpush3.bf16.msra.mxu0 %v7532_v30  ;;  %v8279_v49 = vsel %vm546_vm1, %v589_v19, %v590_v27  ;;  %v8282_v45 = vunpack.c.l.bf16 %v54_v61  ;;  %v8284_v53 = vunpack.c.l.bf16 %v55_v0  ;;  %v8290_v18 = vsel %vm546_vm1, %v592_v46, %v593_v59 }
  0x35   :  { %6335 = vmatprep.mubr.bf16.mxu1 %v8264_v56  ;;  %9841 = vst [vmem:[#allocation53_spill] sm:$0xff] %v8279_v49  ;;  %6733 = vmatprep.subr.bf16.mxu0 %v7534_v48  ;;  %9842 = vst [vmem:[#allocation54_spill] sm:$0xff] %v8290_v18  ;;  %v8293_v30 = vsel %vm166_vm0, %v209_v9, %v210_v1  ;;  %v8295_v56 = vunpack.c.l.bf16 %v56_v8  ;;  %v8297_v19 = vunpack.c.l.bf16 %v57_v55  ;;  %v805_v1 = vrot.slane %v7835_v23, 3 }
  0x36   :  { %v8301_v27 = vpack.c.bf16 %v8290_v18, %v8279_v49  ;;  %v8304_v61 = vsel %vm166_vm0, %v212_v57, %v213_v51  ;;  %v1686_v0 = vrot.slane %v8282_v45, 2  ;;  %v1687_v46 = vrot.slane %v8284_v53, 2 }
  0x37   :  { %6350 = vmatpush3.bf16.msra.mxu1 %v7533_v54  ;;  %9844 = vst [vmem:[#allocation56_spill] sm:$0xff] %v8304_v61  ;;  %v8310_v59 = vpack.c.bf16 %v8304_v61, %v8293_v30  ;;  %v2640_v55 = vrot.slane %v8295_v56, 2  ;;  %v2641_v8 = vrot.slane %v8297_v19, 2  ;;  %v7537_v54 = vld [vmem:[%s9670_s1 + $0x38] sm:$0xff]   ;;  %v804_v51 = vrot.slane %v7833_v22, 3 }
  0x38   :  { %9843 = vst [vmem:[#allocation55_spill] sm:$0xff] %v8301_v27  ;;  %6351 = vmatprep.subr.bf16.mxu1 %v7535_v20  ;;  %6734 = vmatpush3.bf16.msra.mxu0 %v7534_v48  ;;  %v8320_v9 = vsel %vm546_vm1, %v1686_v0, %v1687_v46  ;;  %v807_v57 = vrot.slane %v7859_v32, 3  ;;  %v808_v61 = vrot.slane %v7867_v37, 3  ;;  %v810_v49 = vrot.slane %v7874_v40, 3  ;;  %v7538_v46 = vld [vmem:[%s9670_s1 + $0x378] sm:$0xff]  }
  0x39   :  { %9845 = vst [vmem:[#allocation57_spill] sm:$0xff] %v8310_v59  ;;  %6719 = vmatprep.mubr.bf16.mxu0 %v8301_v27  ;;  %v8327_v18 = vsel %vm546_vm1, %v2640_v55, %v2641_v8  ;;  %6735 = vmatprep.subr.bf16.mxu0 %v7536_v4  ;;  %v811_v48 = vrot.slane %v7876_v41, 3  ;;  %v8342_v55 = vsel %vm797_vm2, %v804_v51, %v805_v1  ;;  %v813_v27 = vrot.slane %v7918_v62, 3 }
  0x3a   :  { %6336 = vmatmul.mubr.bf16.gmra.mrb[12].mxu1 %v8310_v59  ;;  %9846 = vst [vmem:[#allocation58_spill] sm:$0xff] %v8327_v18  ;;  %v8333_v0 = vpack.c.bf16 %v8327_v18, %v8320_v9  ;;  %v9848_v59 = vcombine.low %v7801_v12, %v7809_v14  ;;  %9849 = vst [vmem:[#allocation60_spill] sm:$0xff] %v8342_v55  ;;  %v8345_v8 = vsel %vm797_vm2, %v807_v57, %v808_v61  ;;  %v7541_v18 = vld [vmem:[%s9670_s1 + $0x80] sm:$0xff]  }
  0x3b   :  { %6352 = vmatpush3.bf16.msra.mxu1 %v7535_v20  ;;  %9850 = vst [vmem:[#allocation61_spill] sm:$0xff] %v8345_v8  ;;  %v8350_v20 = vpack.c.bf16 %v8345_v8, %v8342_v55  ;;  %v814_v12 = vrot.slane %v7924_v2, 3  ;;  %v816_v14 = vrot.slane %v7968_v31, 3  ;;  %v817_v61 = vrot.slane %v7970_v33, 3  ;;  %v7542_v55 = vld [vmem:[%s9670_s1 + $0x380] sm:$0xff]  }
  0x3c   :  { %9847 = vst [vmem:[#allocation59_spill] sm:$0xff] %v8333_v0  ;;  %6355 = vmatprep.mubr.bf16.mxu1 %v9848_v59  ;;  %6353 = vmatprep.subr.bf16.mxu1 %v7537_v54  ;;  %v819_v59 = vrot.slane %v7980_v38, 3  ;;  %v820_v51 = vrot.slane %v7982_v39, 3  ;;  %v8364_v1 = vcombine.low %v7817_v16, %v7840_v24  ;;  %v8367_v57 = vsel %vm797_vm2, %v810_v49, %v811_v48  ;;  %v7543_v16 = vld [vmem:[%s9670_s1 + $0x88] sm:$0xff]  }
  0x3d   :  { %9851 = vst [vmem:[#allocation62_spill] sm:$0xff] %v8350_v20  ;;  %6720 = vmatmul.mubr.bf16.gmra.mrb[12].mxu0 %v8333_v0  ;;  %9853 = vst [vmem:[#allocation64_spill] sm:$0xff] %v8367_v57  ;;  %v815_v0 = vsel %vm797_vm2, %v813_v27, %v814_v12  ;;  %v818_v8 = vsel %vm797_vm2, %v816_v14, %v817_v61  ;;  %v8382_v49 = vcombine.low %v7848_v26, %v7882_v43 }
  0x3e   :  { %6736 = vmatpush3.bf16.msra.mxu0 %v7536_v4  ;;  %6739 = vmatprep.mubr.bf16.mxu0 %v8350_v20  ;;  %9852 = vst [vmem:[#allocation63_spill] sm:$0xff] %v8364_v1  ;;  %v8375_v4 = vsel %vm797_vm2, %v819_v59, %v820_v51  ;;  %v8384_v27 = vpack.c.bf16 %v818_v8, %v815_v0  ;;  %v1878_v12 = vrot.slane %v8022_v17, 3  ;;  %v2825_v14 = vrot.slane %v8040_v42, 3  ;;  %v7544_v59 = vld [vmem:[%s9670_s1 + $0x388] sm:$0xff]  }
  0x3f   :  { %6737 = vmatprep.subr.bf16.mxu0 %v7538_v46  ;;  %6354 = vmatpush3.bf16.msra.mxu1 %v7537_v54  ;;  %9854 = vst [vmem:[#allocation65_spill] sm:$0xff] %v8375_v4  ;;  %9855 = vst [vmem:[#allocation66_spill] sm:$0xff] %v8382_v49  ;;  %v1877_v54 = vrot.slane %v8020_v15, 3  ;;  %v8388_v48 = vpack.c.bf16 %v815_v0, %v8367_v57  ;;  %v2826_v61 = vrot.slane %v8063_v60, 3  ;;  %v828_v0 = vrot.slane %v8099_v44, 3 }
  0x40   :  { %6371 = vmatprep.subr.bf16.mxu1 %v7541_v18  ;;  %9856 = vst [vmem:[#allocation67_spill] sm:$0xff] %v8384_v27  ;;  %v8398_v51 = vpack.c.bf16 %v8375_v4, %v818_v8  ;;  %v829_v27 = vrot.slane %v8106_v10, 3  ;;  %v831_v20 = vrot.slane %v8122_v28, 3  ;;  %v832_v57 = vrot.slane %v8140_v21, 3 }
  0x41   :  { %9857 = vst [vmem:[#allocation68_spill] sm:$0xff] %v8388_v48  ;;  %v8410_v8 = vsel %vm797_vm2, %v1877_v54, %v1878_v12  ;;  %v8427_v54 = vcombine.low %v8053_v13, %v8083_v34  ;;  %v834_v12 = vrot.slane %v8163_v58, 3  ;;  %v1058_v21 = vrot.slane %v7859_v32, 4  ;;  %v7553_v32 = vld [vmem:[%s9670_s1 + $0xa0] sm:$0xff]  }
  0x42   :  { %6738 = vmatpush3.bf16.msra.mxu0 %v7538_v46  ;;  %6356 = vmatmul.mubr.bf16.vlgmr.msra.gmra.mrb[0].mxu1 %v8364_v1  ;;  %9858 = vst [vmem:[#allocation69_spill] sm:$0xff] %v8398_v51  ;;  %v7547_v46 = vld [vmem:[%s9670_s1 + $0x90] sm:$0xff]   ;;  %9859 = vst [vmem:[#allocation70_spill] sm:$0xff] %v8410_v8  ;;  %v8418_v1 = vcombine.low %v7929_v3, %v7937_v5  ;;  %v8433_v5 = vsel %vm797_vm2, %v831_v20, %v832_v57  ;;  %v840_v20 = vrot.slane %v8236_v29, 3  ;;  %v7550_v57 = vld [vmem:[%s9670_s1 + $0x398] sm:$0xff]  }
  0x43   :  { %6755 = vmatprep.subr.bf16.mxu0 %v7542_v55  ;;  %6372 = vmatpush3.bf16.msra.mxu1 %v7541_v18  ;;  %v8413_v18 = vsel %vm797_vm2, %v2825_v14, %v2826_v61  ;;  %9862 = vst [vmem:[#allocation73_spill] sm:$0xff] %v8427_v54  ;;  %v835_v14 = vrot.slane %v8165_v35, 3  ;;  %v7549_v61 = vld [vmem:[%s9670_s1 + $0x98] sm:$0xff]   ;;  %v8461_v29 = vcombine.low %v8111_v52, %v8127_v47 }
  0x44   :  { %6373 = vmatprep.subr.bf16.mxu1 %v7543_v16  ;;  %6359 = vmatprep.mubr.bf16.mxu1 %v8382_v49  ;;  %9860 = vst [vmem:[#allocation71_spill] sm:$0xff] %v8413_v18  ;;  %9861 = vst [vmem:[#allocation72_spill] sm:$0xff] %v8418_v1  ;;  %v7548_v49 = vld [vmem:[%s9670_s1 + $0x390] sm:$0xff]  }
  0x45   :  { %6740 = vmatmul.mubr.bf16.vlgmr.msra.gmra.mrb[0].mxu0 %v8388_v48  ;;  %v5226_v48 = vcombine.low %v8027_v25, %v8045_v50  ;;  %v8439_v25 = vpack.c.bf16 %v8413_v18, %v8410_v8  ;;  %v1055_v18 = vrot.slane %v7833_v22, 4  ;;  %v1056_v8 = vrot.slane %v7835_v23, 4  ;;  %9865 = vst [vmem:[#allocation76_spill] sm:$0xff] %v8461_v29  ;;  %v9899_v50 = vld [vmem:[#allocation31_spill] sm:$0xff] }
  0x46   :  { %6756 = vmatpush3.bf16.msra.mxu0 %v7542_v55  ;;  %6743 = vmatprep.mubr.bf16.mxu0 %v8398_v51  ;;  %v8430_v55 = vsel %vm797_vm2, %v828_v0, %v829_v27  ;;  %v838_v27 = vrot.slane %v8179_v11, 3  ;;  %v841_v0 = vrot.slane %v8238_v6, 3  ;;  %v843_v51 = vrot.slane %v8241_v36, 3 }
  0x47   :  { %6757 = vmatprep.subr.bf16.mxu0 %v7544_v59  ;;  %6374 = vmatpush3.bf16.msra.mxu1 %v7543_v16  ;;  %9863 = vst [vmem:[#allocation74_spill] sm:$0xff] %v8430_v55  ;;  %9864 = vst [vmem:[#allocation75_spill] sm:$0xff] %v8439_v25  ;;  %v837_v16 = vrot.slane %v8177_v63, 3  ;;  %v8457_v4 = vpack.c.bf16 %v8433_v5, %v8430_v55  ;;  %v1059_v6 = vrot.slane %v7867_v37, 4  ;;  %v844_v23 = vrot.slane %v8260_v7, 3 }
  0x48   :  { %6375 = vmatprep.subr.bf16.mxu1 %v7547_v46  ;;  %v8466_v22 = vsel %vm797_vm2, %v834_v12, %v835_v14  ;;  %v1061_v55 = vrot.slane %v7874_v40, 4  ;;  %v1064_v12 = vrot.slane %v7918_v62, 4  ;;  %v1065_v14 = vrot.slane %v7924_v2, 4 }
  0x49   :  { %v8477_v37 = vsel %vm1048_vm3, %v1058_v21, %v1059_v6  ;;  %v1067_v40 = vrot.slane %v7968_v31, 4  ;;  %v8491_v21 = vsel %vm797_vm2, %v840_v20, %v841_v0  ;;  %v1071_v2 = vrot.slane %v7982_v39, 4  ;;  %v7554_v31 = vld [vmem:[%s9670_s1 + $0x3a0] sm:$0xff]   ;;  %v9869_v0 = vld [vmem:[#allocation3_spill] sm:$0xff] }
  0x4a   :  { %6758 = vmatpush3.bf16.msra.mxu0 %v7544_v59  ;;  %6360 = vmatmul.mubr.bf16.gmra.mrb[4].mxu1 %v8418_v1  ;;  %v8470_v59 = vsel %vm1048_vm3, %v1055_v18, %v1056_v8  ;;  %v8484_v8 = vsel %vm797_vm2, %v837_v16, %v838_v27  ;;  %v1070_v18 = vrot.slane %v7980_v38, 4  ;;  %v1066_v62 = vsel %vm1048_vm3, %v1064_v12, %v1065_v14  ;;  %v9868_v27 = vld [vmem:[#allocation2_spill] sm:$0xff] }
  0x4b   :  { %6759 = vmatprep.subr.bf16.mxu0 %v7548_v49  ;;  %6376 = vmatpush3.bf16.msra.mxu1 %v7547_v46  ;;  %9866 = vst [vmem:[#allocation77_spill] sm:$0xff] %v8470_v59  ;;  %v1062_v46 = vrot.slane %v7876_v41, 4  ;;  %v1880_v38 = vrot.slane %v8282_v45, 3  ;;  %v8511_v39 = vpack.c.bf16 %v8484_v8, %v8466_v22  ;;  %v8523_v16 = vcombine.low %v7840_v24, %v7848_v26 }
  0x4c   :  { %6377 = vmatprep.subr.bf16.mxu1 %v7549_v61  ;;  %6363 = vmatprep.mubr.bf16.mxu1 %v5226_v48  ;;  %v1068_v48 = vrot.slane %v7970_v33, 4  ;;  %v8502_v33 = vsel %vm797_vm2, %v843_v51, %v844_v23  ;;  %v547_v20 = vrot.slane %v9868_v27, 2  ;;  %v548_v23 = vrot.slane %v9869_v0, 2 }
  0x4d   :  { %6744 = vmatmul.mubr.bf16.gmra.mrb[4].mxu0 %v8439_v25  ;;  %v8494_v41 = vsel %vm1048_vm3, %v1061_v55, %v1062_v46  ;;  %v7555_v55 = vld [vmem:[%s9670_s1 + $0xa8] sm:$0xff]   ;;  %v8532_v12 = vcombine.low %v7882_v43, %v7929_v3  ;;  %v8537_v14 = vpack.c.bf16 %v8502_v33, %v8491_v21  ;;  %v1881_v24 = vrot.slane %v8284_v53, 3  ;;  %v7559_v3 = vld [vmem:[%s9670_s1 + $0xb0] sm:$0xff]  }
  0x4e   :  { %6760 = vmatpush3.bf16.msra.mxu0 %v7548_v49  ;;  %6747 = vmatprep.mubr.bf16.mxu0 %v8457_v4  ;;  %v8506_v6 = vpack.c.bf16 %v1066_v62, %v8494_v41  ;;  %v1069_v49 = vsel %vm1048_vm3, %v1067_v40, %v1068_v48  ;;  %v2828_v26 = vrot.slane %v8295_v56, 3  ;;  %v2829_v40 = vrot.slane %v8297_v19, 3  ;;  %v7556_v43 = vld [vmem:[%s9670_s1 + $0x3a8] sm:$0xff]   ;;  %v9870_v48 = vld [vmem:[#allocation41_spill] sm:$0xff] }
  0x4f   :  { %6761 = vmatprep.subr.bf16.mxu0 %v7550_v57  ;;  %6378 = vmatpush3.bf16.msra.mxu1 %v7549_v61  ;;  %v8517_v61 = vsel %vm1048_vm3, %v1070_v18, %v1071_v2  ;;  %v8519_v51 = vpack.c.bf16 %v1069_v49, %v1066_v62  ;;  %v9871_v18 = vld [vmem:[#allocation40_spill] sm:$0xff]  ;;  %v1086_v2 = vrot.slane %v8165_v35, 4  ;;  %v8560_v25 = vsel %vm797_vm2, %v1880_v38, %v1881_v24 }
  0x50   :  { %6379 = vmatprep.subr.bf16.mxu1 %v7553_v32  ;;  %v8528_v46 = vpack.c.bf16 %v8517_v61, %v1069_v49  ;;  %v8553_v62 = vcombine.low %v9871_v18, %v9870_v48  ;;  %v1088_v49 = vrot.slane %v8177_v63, 4  ;;  %v8568_v48 = vcombine.low %v8083_v34, %v8111_v52  ;;  %v7560_v35 = vld [vmem:[%s9670_s1 + $0x3b0] sm:$0xff]  }
  0x51   :  { %9867 = vst [vmem:[#allocation78_spill] sm:$0xff] %v8519_v51  ;;  %v9874_v38 = vld [vmem:[#allocation8_spill] sm:$0xff]  ;;  %v2074_v34 = vrot.slane %v8282_v45, 4  ;;  %v3016_v24 = vrot.slane %v8295_v56, 4  ;;  %v9892_v51 = vld [vmem:[#allocation45_spill] sm:$0xff] }
  0x52   :  { %6762 = vmatpush3.bf16.msra.mxu0 %v7550_v57  ;;  %6364 = vmatmul.mubr.bf16.gmra.mrb[8].mxu1 %v8427_v54  ;;  %v1085_v57 = vrot.slane %v8163_v58, 4  ;;  %9872 = vst [vmem:[#allocation2_spill] sm:$0xff] %v8553_v62  ;;  %v8563_v58 = vsel %vm797_vm2, %v2828_v26, %v2829_v40  ;;  %v1089_v54 = vrot.slane %v8179_v11, 4  ;;  %v3017_v26 = vrot.slane %v8297_v19, 4 }
  0x53   :  { %6763 = vmatprep.subr.bf16.mxu0 %v7554_v31  ;;  %6380 = vmatpush3.bf16.msra.mxu1 %v7553_v32  ;;  %v549_v32 = vsel %vm546_vm1, %v547_v20, %v548_v23  ;;  %9873 = vst [vmem:[#allocation3_spill] sm:$0xff] %v8563_v58  ;;  %v8586_v52 = vpack.c.bf16 %v8563_v58, %v8560_v25  ;;  %v2075_v23 = vrot.slane %v8284_v53, 4  ;;  %v9895_v58 = vld [vmem:[#allocation53_spill] sm:$0xff] }
  0x54   :  { %6381 = vmatprep.subr.bf16.mxu1 %v7555_v55  ;;  %6367 = vmatprep.mubr.bf16.mxu1 %v8461_v29  ;;  %v8574_v63 = vsel %vm1048_vm3, %v1085_v57, %v1086_v2  ;;  %v611_v11 = vpack.c.bf16 %v9874_v38, %v549_v32  ;;  %v8581_v20 = vsel %vm1048_vm3, %v1088_v49, %v1089_v54  ;;  %v7562_v57 = vld [vmem:[%s9670_s1 + $0x3b8] sm:$0xff]   ;;  %v9877_v32 = vld [vmem:[#allocation12_spill] sm:$0xff]  ;;  %v9878_v2 = vld [vmem:[#allocation14_spill] sm:$0xff] }
  0x55   :  { %6748 = vmatmul.mubr.bf16.gmra.mrb[8].mxu0 %v8511_v39  ;;  %9875 = vst [vmem:[#allocation41_spill] sm:$0xff] %v8586_v52  ;;  %v8597_v54 = vpack.c.bf16 %v8477_v37, %v8470_v59  ;;  %v8602_v40 = vcombine.low %v8127_v47, %v9871_v18  ;;  %v8612_v49 = vpack.c.bf16 %v9878_v2, %v9877_v32  ;;  %v7563_v47 = vld [vmem:[%s9670_s1 + $0xc0] sm:$0xff]   ;;  %v9885_v2 = vld [vmem:[#allocation51_spill] sm:$0xff] }
  0x56   :  { %6764 = vmatpush3.bf16.msra.mxu0 %v7554_v31  ;;  %6751 = vmatprep.mubr.bf16.mxu0 %v8537_v14  ;;  %v7561_v31 = vld [vmem:[%s9670_s1 + $0xb8] sm:$0xff]   ;;  %v8618_v18 = vsel %vm1048_vm3, %v3016_v24, %v3017_v26  ;;  %v9883_v32 = vld [vmem:[#allocation50_spill] sm:$0xff]  ;;  %v8634_v59 = vpack.c.bf16 %v8293_v30, %v9885_v2  ;;  %v7565_v24 = vld [vmem:[%s9670_s1 + $0xc8] sm:$0xff]   ;;  %v2071_v26 = vrot.slane %v8020_v15, 4 }
  0x57   :  { %6765 = vmatprep.subr.bf16.mxu0 %v7556_v43  ;;  %6382 = vmatpush3.bf16.msra.mxu1 %v7555_v55  ;;  %v8590_v55 = vpack.c.bf16 %v8581_v20, %v8574_v63  ;;  %9876 = vst [vmem:[#allocation40_spill] sm:$0xff] %v8597_v54  ;;  %9879 = vst [vmem:[#allocation12_spill] sm:$0xff] %v8612_v49  ;;  %v9890_v2 = vld [vmem:[#allocation28_spill] sm:$0xff]  ;;  %v9898_v30 = vld [vmem:[#allocation30_spill] sm:$0xff] }
  0x58   :  { %6383 = vmatprep.subr.bf16.mxu1 %v7559_v3  ;;  %9880 = vst [vmem:[#allocation14_spill] sm:$0xff] %v8618_v18  ;;  %9886 = vst [vmem:[#allocation50_spill] sm:$0xff] %v8634_v59  ;;  %v571_v1 = vrot.slane %v9890_v2, 2  ;;  %v574_v13 = vrot.slane %v9898_v30, 2  ;;  %v9904_v49 = vld [vmem:[#allocation64_spill] sm:$0xff] }
  0x5a   :  { %6766 = vmatpush3.bf16.msra.mxu0 %v7556_v43  ;;  %6368 = vmatmul.mubr.bf16.gmra.mrb[12].mxu1 %v8553_v62  ;;  %v8608_v43 = vsel %vm1048_vm3, %v2074_v34, %v2075_v23  ;;  %v9882_v23 = vld [vmem:[#allocation43_spill] sm:$0xff]  ;;  %v9888_v62 = vld [vmem:[#allocation32_spill] sm:$0xff] }
  0x5b   :  { %6767 = vmatprep.subr.bf16.mxu0 %v7560_v35  ;;  %6384 = vmatpush3.bf16.msra.mxu1 %v7559_v3  ;;  %v7564_v3 = vld [vmem:[%s9670_s1 + $0x3c0] sm:$0xff]   ;;  %v8626_v34 = vpack.c.bf16 %v8618_v18, %v8608_v43 }
  0x5c   :  { %6385 = vmatprep.subr.bf16.mxu1 %v7561_v31  ;;  %6387 = vmatprep.mubr.bf16.mxu1 %v611_v11  ;;  %v8630_v11 = vpack.c.bf16 %v9883_v32, %v9882_v23  ;;  %v3013_v23 = vrot.slane %v8040_v42, 4  ;;  %v9887_v32 = vld [vmem:[#allocation17_spill] sm:$0xff]  ;;  %v9891_v18 = vld [vmem:[#allocation38_spill] sm:$0xff] }
  0x5d   :  { %6752 = vmatmul.mubr.bf16.gmra.mrb[12].mxu0 %v8586_v52  ;;  %9881 = vst [vmem:[#allocation79_spill] sm:$0xff] %v8626_v34  ;;  %v2072_v52 = vrot.slane %v8022_v17, 4  ;;  %v8645_v29 = vpack.c.bf16 %v9888_v62, %v9887_v32  ;;  %v8653_v38 = vpack.c.bf16 %v9892_v51, %v9891_v18  ;;  %v7566_v62 = vld [vmem:[%s9670_s1 + $0x3c8] sm:$0xff]   ;;  %v9897_v32 = vld [vmem:[#allocation29_spill] sm:$0xff]  ;;  %v9901_v51 = vld [vmem:[#allocation10_spill] sm:$0xff]  ;;  %v1080_v18 = vrot.slane %v8106_v10, 4 }
  0x5e   :  { %9884 = vst [vmem:[#allocation43_spill] sm:$0xff] %v8630_v11  ;;  %6768 = vmatpush3.bf16.msra.mxu0 %v7560_v35  ;;  %6771 = vmatprep.mubr.bf16.mxu0 %v8597_v54  ;;  %v3014_v35 = vrot.slane %v8063_v60, 4  ;;  %v575_v11 = vrot.slane %v9899_v50, 2  ;;  %v9900_v54 = vld [vmem:[#allocation54_spill] sm:$0xff]  ;;  %v9903_v42 = vld [vmem:[#allocation61_spill] sm:$0xff] }
  0x5f   :  { %6769 = vmatprep.subr.bf16.mxu0 %v7562_v57  ;;  %6386 = vmatpush3.bf16.msra.mxu1 %v7561_v31  ;;  %9889 = vst [vmem:[#allocation51_spill] sm:$0xff] %v8645_v29  ;;  %9893 = vst [vmem:[#allocation17_spill] sm:$0xff] %v8653_v38  ;;  %v9894_v31 = vld [vmem:[#allocation46_spill] sm:$0xff]  ;;  %v572_v29 = vrot.slane %v9897_v32, 2  ;;  %v8667_v60 = vpack.c.bf16 %v8320_v9, %v9900_v54  ;;  %v8676_v17 = vpack.c.bf16 %v9904_v49, %v9903_v42  ;;  %v9905_v9 = vld [vmem:[#allocation15_spill] sm:$0xff] }
  0x60   :  { %6403 = vmatprep.subr.bf16.mxu1 %v7563_v47  ;;  %v8657_v59 = vpack.c.bf16 %v9895_v58, %v9894_v31  ;;  %v1079_v58 = vrot.slane %v8099_v44, 4  ;;  %v1082_v31 = vrot.slane %v8122_v28, 4  ;;  %v7567_v54 = vld [vmem:[%s9670_s1 + $0xd0] sm:$0xff]   ;;  %v8685_v10 = vsel %vm546_vm1, %v574_v13, %v575_v11  ;;  %v7570_v49 = vld [vmem:[%s9670_s1 + $0x3d8] sm:$0xff]  }
  0x61   :  { %v573_v44 = vsel %vm546_vm1, %v571_v1, %v572_v29  ;;  %v8689_v42 = vsel %vm1048_vm3, %v2071_v26, %v2072_v52  ;;  %v8692_v28 = vsel %vm1048_vm3, %v3013_v23, %v3014_v35  ;;  %v7569_v1 = vld [vmem:[%s9670_s1 + $0xd8] sm:$0xff]   ;;  %v9912_v35 = vld [vmem:[#allocation70_spill] sm:$0xff] }
  0x62   :  { %9896 = vst [vmem:[#allocation32_spill] sm:$0xff] %v8657_v59  ;;  %6770 = vmatpush3.bf16.msra.mxu0 %v7562_v57  ;;  %6388 = vmatmul.mubr.bf16.vlgmr.msra.gmra.mrb[0].mxu1 %v9901_v51  ;;  %v9902_v59 = vld [vmem:[#allocation35_spill] sm:$0xff]  ;;  %v8698_v29 = vsel %vm1048_vm3, %v1079_v58, %v1080_v18  ;;  %v615_v52 = vpack.c.bf16 %v8685_v10, %v573_v44  ;;  %v9911_v23 = vld [vmem:[#allocation65_spill] sm:$0xff]  ;;  %v1094_v58 = vrot.slane %v8241_v36, 4  ;;  %v7571_v18 = vld [vmem:[%s9670_s1 + $0xe0] sm:$0xff]  }
  0x63   :  { %6787 = vmatprep.subr.bf16.mxu0 %v7564_v3  ;;  %6404 = vmatpush3.bf16.msra.mxu1 %v7563_v47  ;;  %v1083_v38 = vrot.slane %v9902_v59, 4  ;;  %v7568_v59 = vld [vmem:[%s9670_s1 + $0x3d0] sm:$0xff]   ;;  %9906 = vst [vmem:[#allocation28_spill] sm:$0xff] %v8698_v29  ;;  %v8709_v57 = vpack.c.bf16 %v8692_v28, %v8689_v42  ;;  %v8723_v51 = vpack.c.bf16 %v9912_v35, %v9911_v23  ;;  %v7573_v36 = vld [vmem:[%s9670_s1 + $0xe8] sm:$0xff]   ;;  %v1493_v23 = vrot.slane %v8284_v53, 1  ;;  %v9914_v35 = vld [vmem:[#allocation5_spill] sm:$0xff] }
  0x64   :  { %6405 = vmatprep.subr.bf16.mxu1 %v7565_v24  ;;  %6391 = vmatprep.mubr.bf16.mxu1 %v9905_v9  ;;  %v9908_v47 = vld [vmem:[#allocation20_spill] sm:$0xff]  ;;  %v2453_v53 = vrot.slane %v8297_v19, 1  ;;  %v7730_v9 = vld [vmem:[%s9671_s0 + $0x40] sm:$0xf] }
  0x65   :  { %6772 = vmatmul.mubr.bf16.vlgmr.msra.gmra.mrb[0].mxu0 %v8506_v6  ;;  %v8701_v13 = vsel %vm1048_vm3, %v1082_v31, %v1083_v38  ;;  %9907 = vst [vmem:[#allocation38_spill] sm:$0xff] %v8709_v57  ;;  %v7572_v31 = vld [vmem:[%s9670_s1 + $0x3e0] sm:$0xff]   ;;  %v35_v19 = vld [vmem:[%s9671_s0 + $0x54] sm:$0x3] }
  0x66   :  { %6788 = vmatpush3.bf16.msra.mxu0 %v7564_v3  ;;  %6775 = vmatprep.mubr.bf16.mxu0 %v8528_v46  ;;  %v8717_v38 = vpack.c.bf16 %v8701_v13, %v8698_v29  ;;  %v9909_v3 = vld [vmem:[#allocation47_spill] sm:$0xff] }
  0x67   :  { %6789 = vmatprep.subr.bf16.mxu0 %v7566_v62  ;;  %6406 = vmatpush3.bf16.msra.mxu1 %v7565_v24  ;;  %v1091_v11 = vrot.slane %v9909_v3, 4  ;;  %v9910_v24 = vld [vmem:[#allocation48_spill] sm:$0xff] }
  0x68   :  { %6407 = vmatprep.subr.bf16.mxu1 %v7567_v54  ;;  %v1092_v26 = vrot.slane %v9910_v24, 4  ;;  %v9913_v3 = vld [vmem:[#allocation4_spill] sm:$0xff] }
  0x69   :  { %v801_v24 = vrot.slane %v9913_v3, 3 }
  0x6a   :  { %6790 = vmatpush3.bf16.msra.mxu0 %v7566_v62  ;;  %6392 = vmatmul.mubr.bf16.gmra.mrb[4].mxu1 %v9908_v47  ;;  %v1095_v62 = vrot.slane %v8260_v7, 4  ;;  %v798_v7 = vrot.slane %v9868_v27, 3  ;;  %v2452_v47 = vrot.slane %v8295_v56, 1  ;;  %v7575_v56 = vld [vmem:[%s9670_s1 + $0xf0] sm:$0xff]  }
  0x6b   :  { %6791 = vmatprep.subr.bf16.mxu0 %v7568_v59  ;;  %6408 = vmatpush3.bf16.msra.mxu1 %v7567_v54  ;;  %v8740_v54 = vsel %vm1048_vm3, %v1091_v11, %v1092_v26  ;;  %v7574_v11 = vld [vmem:[%s9670_s1 + $0x3e8] sm:$0xff]  }
  0x6c   :  { %6409 = vmatprep.subr.bf16.mxu1 %v7569_v1  ;;  %6395 = vmatprep.mubr.bf16.mxu1 %v615_v52  ;;  %v8743_v44 = vsel %vm1048_vm3, %v1094_v58, %v1095_v62  ;;  %v799_v52 = vrot.slane %v9869_v0, 3  ;;  %v8765_v58 = vpack.c.bf16 %v8466_v22, %v8433_v5  ;;  %v9916_v62 = vld [vmem:[#allocation49_spill] sm:$0xff]  ;;  %v8779_v5 = vsel %vm166_vm0, %v2452_v47, %v2453_v53  ;;  %v7576_v47 = vld [vmem:[%s9670_s1 + $0x3f0] sm:$0xff]  }
  0x6d   :  { %6776 = vmatmul.mubr.bf16.gmra.mrb[4].mxu0 %v8709_v57  ;;  %v802_v57 = vrot.slane %v9914_v35, 3  ;;  %v8757_v26 = vpack.c.bf16 %v8743_v44, %v8740_v54 }
  0x6e   :  { %6792 = vmatpush3.bf16.msra.mxu0 %v7568_v59  ;;  %6779 = vmatprep.mubr.bf16.mxu0 %v8717_v38  ;;  %v1492_v59 = vrot.slane %v8282_v45, 1  ;;  %v800_v22 = vsel %vm797_vm2, %v798_v7, %v799_v52  ;;  %v8798_v7 = vunpack.c.l.bf16 %v35_v19 }
  0x6f   :  { %6793 = vmatprep.subr.bf16.mxu0 %v7570_v49  ;;  %6410 = vmatpush3.bf16.msra.mxu1 %v7569_v1  ;;  %v9915_v1 = vld [vmem:[#allocation42_spill] sm:$0xff] }
  0x70   :  { %6411 = vmatprep.subr.bf16.mxu1 %v7571_v18  ;;  %v8760_v45 = vsel %vm166_vm0, %v1492_v59, %v1493_v23  ;;  %v3762_v59 = vrot.slane %v8798_v7, 3  ;;  %v59_v23 = vld [vmem:[%s9671_s0 + $0xb4] sm:$0x3] }
  0x72   :  { %6794 = vmatpush3.bf16.msra.mxu0 %v7570_v49  ;;  %6396 = vmatmul.mubr.bf16.gmra.mrb[8].mxu1 %v9915_v1  ;;  %v8772_v49 = vpack.c.bf16 %v8491_v21, %v8484_v8  ;;  %v8789_v8 = vld [vmem:[%s9671_s0 + $0x50] sm:$0xf]  ;;  %v8817_v1 = vpack.c.bf16 %v8560_v25, %v8502_v33  ;;  %v8832_v25 = vunpack.c.l.bf16 %v59_v23  ;;  %v823_v23 = vrot.slane %v9897_v32, 3 }
  0x73   :  { %6795 = vmatprep.subr.bf16.mxu0 %v7572_v31  ;;  %6412 = vmatpush3.bf16.msra.mxu1 %v7571_v18  ;;  %v8784_v18 = vsel %vm797_vm2, %v801_v24, %v802_v57  ;;  %v8793_v21 = vunpack.c.l.bf16 %v8789_v8  ;;  %v7577_v57 = vld [vmem:[%s9670_s1 + $0xf8] sm:$0xff]   ;;  %v9918_v24 = vld [vmem:[#allocation55_spill] sm:$0xff] }
  0x74   :  { %6413 = vmatprep.subr.bf16.mxu1 %v7573_v36  ;;  %6399 = vmatprep.mubr.bf16.mxu1 %v9916_v62  ;;  %9917 = vst [vmem:[#allocation45_spill] sm:$0xff] %v8784_v18  ;;  %v7729_v62 = vld [vmem:[%s9671_s0 + $0x38] sm:$0xf] }
  0x75   :  { %6780 = vmatmul.mubr.bf16.gmra.mrb[8].mxu0 %v8590_v55  ;;  %v3761_v52 = vrot.slane %v8793_v21, 3  ;;  %v8857_v29 = vcombine.low %v7729_v62, %v7730_v9  ;;  %v7589_v62 = vld [vmem:[%s9670_s1 + $0x118] sm:$0xff]  }
  0x76   :  { %6796 = vmatpush3.bf16.msra.mxu0 %v7572_v31  ;;  %6783 = vmatprep.mubr.bf16.mxu0 %v8757_v26  ;;  %v862_v31 = vpack.c.bf16 %v8784_v18, %v800_v22  ;;  %v7580_v22 = vld [vmem:[%s9670_s1 + $0x100] sm:$0xff]   ;;  %v8861_v18 = vpack.c.bf16 %v8494_v41, %v8477_v37  ;;  %v7588_v41 = vld [vmem:[%s9670_s1 + $0x410] sm:$0xff]  }
  0x77   :  { %6797 = vmatprep.subr.bf16.mxu0 %v7574_v11  ;;  %6414 = vmatpush3.bf16.msra.mxu1 %v7573_v36  ;;  %v8810_v36 = vld [vmem:[%s9671_s0 + $0xb0] sm:$0xf]  ;;  %v8826_v19 = vsel %vm797_vm2, %v3761_v52, %v3762_v59  ;;  %v3765_v52 = vrot.slane %v8832_v25, 3  ;;  %v7583_v59 = vld [vmem:[%s9670_s1 + $0x108] sm:$0xff]  }
  0x78   :  { %6415 = vmatprep.subr.bf16.mxu1 %v7575_v56  ;;  %v8823_v53 = vunpack.c.l.bf16 %v8810_v36 }
  0x7a   :  { %6798 = vmatpush3.bf16.msra.mxu0 %v7574_v11  ;;  %6400 = vmatmul.mubr.bf16.gmra.mrb[12].mxu1 %v9918_v24  ;;  %v7578_v11 = vld [vmem:[%s9670_s1 + $0x3f8] sm:$0xff]   ;;  %v3764_v33 = vrot.slane %v8823_v53, 3 }
  0x7b   :  { %6799 = vmatprep.subr.bf16.mxu0 %v7576_v47  ;;  %6416 = vmatpush3.bf16.msra.mxu1 %v7575_v56  ;;  %v822_v56 = vrot.slane %v9890_v2, 3 }
  0x7c   :  { %6417 = vmatprep.subr.bf16.mxu1 %v7577_v57  ;;  %6419 = vmatprep.mubr.bf16.mxu1 %v862_v31  ;;  %v7582_v31 = vld [vmem:[%s9670_s1 + $0x400] sm:$0xff]   ;;  %v8848_v24 = vsel %vm797_vm2, %v3764_v33, %v3765_v52  ;;  %v9920_v33 = vld [vmem:[#allocation68_spill] sm:$0xff] }
  0x7d   :  { %6784 = vmatmul.mubr.bf16.gmra.mrb[12].mxu0 %v8626_v34  ;;  %v826_v34 = vrot.slane %v9899_v50, 3  ;;  %v7586_v52 = vld [vmem:[%s9670_s1 + $0x110] sm:$0xff]   ;;  %v824_v9 = vsel %vm797_vm2, %v822_v56, %v823_v23  ;;  %v3949_v56 = vrot.slane %v8793_v21, 4  ;;  %v9921_v23 = vld [vmem:[#allocation69_spill] sm:$0xff] }
  0x7e   :  { %6800 = vmatpush3.bf16.msra.mxu0 %v7576_v47  ;;  %6803 = vmatprep.mubr.bf16.mxu0 %v8523_v16  ;;  %v825_v47 = vrot.slane %v9898_v30, 3 }
  0x7f   :  { %6801 = vmatprep.subr.bf16.mxu0 %v7578_v11  ;;  %6418 = vmatpush3.bf16.msra.mxu1 %v7577_v57  ;;  %v9919_v57 = vld [vmem:[#allocation62_spill] sm:$0xff] }
  0x80   :  { %6435 = vmatprep.subr.bf16.mxu1 %v7580_v22  ;;  %v8873_v37 = vsel %vm797_vm2, %v825_v47, %v826_v34  ;;  %v7731_v34 = vld [vmem:[%s9671_s0 + $0x48] sm:$0xf]  ;;  %v8892_v47 = vpack.c.bf16 %v8689_v42, %v8517_v61  ;;  %v7594_v61 = vld [vmem:[%s9670_s1 + $0x420] sm:$0xff]   ;;  %v1049_v42 = vrot.slane %v9868_v27, 4 }
  0x81   :  { %v7733_v27 = vld [vmem:[%s9671_s0 + $0xa0] sm:$0xf] }
  0x82   :  { %6802 = vmatpush3.bf16.msra.mxu0 %v7578_v11  ;;  %6420 = vmatmul.mubr.bf16.vlgmr.msra.gmra.mrb[0].mxu1 %v9919_v57  ;;  %v7584_v11 = vld [vmem:[%s9670_s1 + $0x408] sm:$0xff]   ;;  %v7590_v57 = vld [vmem:[%s9670_s1 + $0x418] sm:$0xff]  }
  0x83   :  { %6819 = vmatprep.subr.bf16.mxu0 %v7582_v31  ;;  %6436 = vmatpush3.bf16.msra.mxu1 %v7580_v22  ;;  %v866_v22 = vpack.c.bf16 %v8873_v37, %v824_v9 }
  0x84   :  { %6437 = vmatprep.subr.bf16.mxu1 %v7583_v59  ;;  %6423 = vmatprep.mubr.bf16.mxu1 %v9920_v33 }
  0x85   :  { %6804 = vmatmul.mubr.bf16.vlgmr.msra.gmra.mrb[0].mxu0 %v8532_v12 }
  0x86   :  { %6820 = vmatpush3.bf16.msra.mxu0 %v7582_v31  ;;  %6807 = vmatprep.mubr.bf16.mxu0 %v8857_v29  ;;  %v5584_v31 = vcombine.low %v7731_v34, %v8789_v8  ;;  %v7592_v8 = vld [vmem:[%s9670_s1 + $0x120] sm:$0xff]  }
  0x87   :  { %6821 = vmatprep.subr.bf16.mxu0 %v7584_v11  ;;  %6438 = vmatpush3.bf16.msra.mxu1 %v7583_v59  ;;  %v3950_v59 = vrot.slane %v8798_v7, 4 }
  0x88   :  { %6439 = vmatprep.subr.bf16.mxu1 %v7586_v52 }
  0x89   :  { %v8898_v9 = vsel %vm1048_vm3, %v3949_v56, %v3950_v59  ;;  %v8955_v59 = vld [vmem:[%s9671_s0 + $0xa8] sm:$0xf] }
  0x8a   :  { %6822 = vmatpush3.bf16.msra.mxu0 %v7584_v11  ;;  %6424 = vmatmul.mubr.bf16.gmra.mrb[4].mxu1 %v9921_v23  ;;  %v7595_v11 = vld [vmem:[%s9670_s1 + $0x128] sm:$0xff]  }
  0x8b   :  { %6823 = vmatprep.subr.bf16.mxu0 %v7588_v41  ;;  %6440 = vmatpush3.bf16.msra.mxu1 %v7586_v52  ;;  %v1050_v52 = vrot.slane %v9869_v0, 4  ;;  %v8925_v0 = vpack.c.bf16 %v8574_v63, %v8701_v13  ;;  %v7600_v13 = vld [vmem:[%s9670_s1 + $0x430] sm:$0xff]  }
  0x8c   :  { %6441 = vmatprep.subr.bf16.mxu1 %v7589_v62  ;;  %6427 = vmatprep.mubr.bf16.mxu1 %v866_v22  ;;  %v1052_v22 = vrot.slane %v9913_v3, 4  ;;  %v8929_v3 = vpack.c.bf16 %v8740_v54, %v8581_v20  ;;  %v7601_v54 = vld [vmem:[%s9670_s1 + $0x138] sm:$0xff]  }
  0x8d   :  { %6808 = vmatmul.mubr.bf16.gmra.mrb[4].mxu0 %v5584_v31  ;;  %v1051_v63 = vsel %vm1048_vm3, %v1049_v42, %v1050_v52  ;;  %v3952_v31 = vrot.slane %v8823_v53, 4  ;;  %v8964_v42 = vpack.c.bf16 %v8608_v43, %v8743_v44  ;;  %v9922_v52 = vld [vmem:[#allocation19_spill] sm:$0xff]  ;;  %v9923_v43 = vld [vmem:[#allocation12_spill] sm:$0xff]  ;;  %v9924_v44 = vld [vmem:[#allocation22_spill] sm:$0xff] }
  0x8e   :  { %6824 = vmatpush3.bf16.msra.mxu0 %v7588_v41  ;;  %6811 = vmatprep.mubr.bf16.mxu0 %v8568_v48  ;;  %v1053_v41 = vrot.slane %v9914_v35, 4  ;;  %v7598_v35 = vld [vmem:[%s9670_s1 + $0x130] sm:$0xff]  }
  0x8f   :  { %6825 = vmatprep.subr.bf16.mxu0 %v7590_v57  ;;  %6442 = vmatpush3.bf16.msra.mxu1 %v7589_v62  ;;  %v7732_v62 = vld [vmem:[%s9671_s0 + $0x98] sm:$0xf] }
  0x90   :  { %6443 = vmatprep.subr.bf16.mxu1 %v7592_v8  ;;  %v8921_v56 = vcombine.low %v7732_v62, %v7733_v27  ;;  %v8941_v20 = vsel %vm1048_vm3, %v1052_v22, %v1053_v41  ;;  %v1490_v22 = vrot.slane %v9922_v52, 1  ;;  %v2449_v41 = vrot.slane %v9924_v44, 1  ;;  %v9925_v62 = vld [vmem:[#allocation27_spill] sm:$0xff] }
  0x91   :  { %v1113_v34 = vpack.c.bf16 %v8941_v20, %v1051_v63  ;;  %v2450_v27 = vrot.slane %v9925_v62, 1  ;;  %v1073_v63 = vrot.slane %v9890_v2, 4  ;;  %v3385_v2 = vrot.slane %v8793_v21, 1  ;;  %v7608_v62 = vld [vmem:[%s9670_s1 + $0x450] sm:$0xff]  }
  0x92   :  { %6826 = vmatpush3.bf16.msra.mxu0 %v7590_v57  ;;  %6428 = vmatmul.mubr.bf16.gmra.mrb[8].mxu1 %v8457_v4  ;;  %v7596_v4 = vld [vmem:[%s9670_s1 + $0x428] sm:$0xff]   ;;  %v5585_v57 = vcombine.low %v8955_v59, %v8810_v36  ;;  %v3386_v52 = vrot.slane %v8798_v7, 1 }
  0x93   :  { %6827 = vmatprep.subr.bf16.mxu0 %v7594_v61  ;;  %6444 = vmatpush3.bf16.msra.mxu1 %v7592_v8  ;;  %v3953_v8 = vrot.slane %v8832_v25, 4 }
  0x94   :  { %6445 = vmatprep.subr.bf16.mxu1 %v7595_v11  ;;  %6431 = vmatprep.mubr.bf16.mxu1 %v8511_v39  ;;  %v9016_v44 = vsel %vm166_vm0, %v3385_v2, %v3386_v52  ;;  %v3388_v2 = vrot.slane %v8823_v53, 1  ;;  %v3389_v52 = vrot.slane %v8832_v25, 1 }
  0x95   :  { %6812 = vmatmul.mubr.bf16.gmra.mrb[8].mxu0 %v8602_v40  ;;  %v8971_v36 = vsel %vm1048_vm3, %v3952_v31, %v3953_v8  ;;  %v1076_v31 = vrot.slane %v9898_v30, 4  ;;  %v9927_v8 = vld [vmem:[#allocation21_spill] sm:$0xff]  ;;  %v9928_v30 = vld [vmem:[#allocation26_spill] sm:$0xff] }
  0x96   :  { %6828 = vmatpush3.bf16.msra.mxu0 %v7594_v61  ;;  %6815 = vmatprep.mubr.bf16.mxu0 %v8921_v56  ;;  %v1489_v61 = vrot.slane %v8020_v15, 1  ;;  %v7603_v15 = vld [vmem:[%s9670_s1 + $0x140] sm:$0xff]  }
  0x97   :  { %6829 = vmatprep.subr.bf16.mxu0 %v7596_v4  ;;  %6446 = vmatpush3.bf16.msra.mxu1 %v7595_v11  ;;  %v7602_v11 = vld [vmem:[%s9670_s1 + $0x438] sm:$0xff]  }
  0x98   :  { %6447 = vmatprep.subr.bf16.mxu1 %v7598_v35 }
  0x9a   :  { %6830 = vmatpush3.bf16.msra.mxu0 %v7596_v4  ;;  %6432 = vmatmul.mubr.bf16.gmra.mrb[12].mxu1 %v8537_v14  ;;  %v7604_v4 = vld [vmem:[%s9670_s1 + $0x440] sm:$0xff]  }
  0x9b   :  { %6831 = vmatprep.subr.bf16.mxu0 %v7600_v13  ;;  %6448 = vmatpush3.bf16.msra.mxu1 %v7598_v35  ;;  %v8983_v35 = vsel %vm166_vm0, %v1489_v61, %v1490_v22 }
  0x9c   :  { %6449 = vmatprep.subr.bf16.mxu1 %v7601_v54  ;;  %6451 = vmatprep.mubr.bf16.mxu1 %v1113_v34  ;;  %v1074_v34 = vrot.slane %v9897_v32, 4  ;;  %v8995_v61 = vpack.c.bf16 %v8983_v35, %v9927_v8  ;;  %v7606_v32 = vld [vmem:[%s9670_s1 + $0x448] sm:$0xff]  }
  0x9d   :  { %6816 = vmatmul.mubr.bf16.gmra.mrb[12].mxu0 %v5585_v57  ;;  %v9926_v57 = vld [vmem:[#allocation40_spill] sm:$0xff] }
  0x9e   :  { %6832 = vmatpush3.bf16.msra.mxu0 %v7600_v13  ;;  %6835 = vmatprep.mubr.bf16.mxu0 %v9923_v43  ;;  %v7605_v13 = vld [vmem:[%s9670_s1 + $0x148] sm:$0xff]  }
  0x9f   :  { %6833 = vmatprep.subr.bf16.mxu0 %v7602_v11  ;;  %6450 = vmatpush3.bf16.msra.mxu1 %v7601_v54  ;;  %v1077_v54 = vrot.slane %v9899_v50, 4  ;;  %v7607_v50 = vld [vmem:[%s9670_s1 + $0x150] sm:$0xff]  }
  0xa0   :  { %6467 = vmatprep.subr.bf16.mxu1 %v7603_v15 }
  0xa1   :  { %v9009_v22 = vsel %vm1048_vm3, %v1076_v31, %v1077_v54  ;;  %v7612_v31 = vld [vmem:[%s9670_s1 + $0x460] sm:$0xff]   ;;  %v7613_v54 = vld [vmem:[%s9670_s1 + $0x168] sm:$0xff]  }
  0xa2   :  { %6834 = vmatpush3.bf16.msra.mxu0 %v7602_v11  ;;  %6452 = vmatmul.mubr.bf16.vlgmr.msra.gmra.mrb[0].mxu1 %v9926_v57  ;;  %v1075_v11 = vsel %vm1048_vm3, %v1073_v63, %v1074_v34  ;;  %v7609_v63 = vld [vmem:[%s9670_s1 + $0x158] sm:$0xff]   ;;  %v9929_v34 = vld [vmem:[#allocation43_spill] sm:$0xff]  ;;  %v9930_v57 = vld [vmem:[#allocation56_spill] sm:$0xff] }
  0xa3   :  { %6851 = vmatprep.subr.bf16.mxu0 %v7604_v4  ;;  %6468 = vmatpush3.bf16.msra.mxu1 %v7603_v15  ;;  %v9013_v15 = vsel %vm166_vm0, %v2449_v41, %v2450_v27  ;;  %v7610_v27 = vld [vmem:[%s9670_s1 + $0x458] sm:$0xff]   ;;  %v9044_v8 = vpack.c.bf16 %v8760_v45, %v9930_v57  ;;  %v9932_v57 = vld [vmem:[#allocation11_spill] sm:$0xff] }
  0xa4   :  { %6469 = vmatprep.subr.bf16.mxu1 %v7605_v13  ;;  %6455 = vmatprep.mubr.bf16.mxu1 %v8506_v6  ;;  %v3393_v41 = vpack.c.bf16 %v9016_v44, %v9013_v15 }
  0xa5   :  { %6836 = vmatmul.mubr.bf16.vlgmr.msra.gmra.mrb[0].mxu0 %v9928_v30 }
  0xa6   :  { %6852 = vmatpush3.bf16.msra.mxu0 %v7604_v4  ;;  %6839 = vmatprep.mubr.bf16.mxu0 %v8995_v61  ;;  %v1117_v4 = vpack.c.bf16 %v9009_v22, %v1075_v11  ;;  %v9058_v11 = vsel %vm166_vm0, %v3388_v2, %v3389_v52  ;;  %v7621_v2 = vld [vmem:[%s9670_s1 + $0x480] sm:$0xff]   ;;  %v7622_v52 = vld [vmem:[%s9670_s1 + $0x188] sm:$0xff]  }
  0xa7   :  { %6853 = vmatprep.subr.bf16.mxu0 %v7606_v32  ;;  %6470 = vmatpush3.bf16.msra.mxu1 %v7605_v13  ;;  %v7611_v13 = vld [vmem:[%s9670_s1 + $0x160] sm:$0xff]  }
  0xa8   :  { %6471 = vmatprep.subr.bf16.mxu1 %v7607_v50 }
  0xaa   :  { %6854 = vmatpush3.bf16.msra.mxu0 %v7606_v32  ;;  %6456 = vmatmul.mubr.bf16.gmra.mrb[4].mxu1 %v8528_v46  ;;  %v7614_v32 = vld [vmem:[%s9670_s1 + $0x468] sm:$0xff]  }
  0xab   :  { %6855 = vmatprep.subr.bf16.mxu0 %v7608_v62  ;;  %6472 = vmatpush3.bf16.msra.mxu1 %v7607_v50  ;;  %v9931_v50 = vld [vmem:[#allocation50_spill] sm:$0xff] }
  0xac   :  { %6473 = vmatprep.subr.bf16.mxu1 %v7609_v63  ;;  %6459 = vmatprep.mubr.bf16.mxu1 %v1117_v4  ;;  %v7735_v4 = vld [vmem:[%s9671_s0 + $0x8] sm:$0xf] }
  0xad   :  { %6840 = vmatmul.mubr.bf16.gmra.mrb[4].mxu0 %v3393_v41  ;;  %v7736_v41 = vld [vmem:[%s9671_s0 + $0x10] sm:$0xf] }
  0xae   :  { %6856 = vmatpush3.bf16.msra.mxu0 %v7608_v62  ;;  %6843 = vmatprep.mubr.bf16.mxu0 %v9929_v34  ;;  %v7616_v62 = vld [vmem:[%s9670_s1 + $0x470] sm:$0xff]  }
  0xaf   :  { %6857 = vmatprep.subr.bf16.mxu0 %v7610_v27  ;;  %6474 = vmatpush3.bf16.msra.mxu1 %v7609_v63  ;;  %v7617_v63 = vld [vmem:[%s9670_s1 + $0x178] sm:$0xff]  }
  0xb0   :  { %6475 = vmatprep.subr.bf16.mxu1 %v7611_v13 }
  0xb2   :  { %6858 = vmatpush3.bf16.msra.mxu0 %v7610_v27  ;;  %6460 = vmatmul.mubr.bf16.gmra.mrb[8].mxu1 %v8717_v38  ;;  %v7615_v38 = vld [vmem:[%s9670_s1 + $0x170] sm:$0xff]   ;;  %v5334_v27 = vcombine.low %v7735_v4, %v7736_v41  ;;  %v7626_v41 = vld [vmem:[%s9670_s1 + $0x198] sm:$0xff]  }
  0xb3   :  { %6859 = vmatprep.subr.bf16.mxu0 %v7612_v31  ;;  %6476 = vmatpush3.bf16.msra.mxu1 %v7611_v13  ;;  %v3394_v13 = vpack.c.bf16 %v9058_v11, %v8779_v5  ;;  %v7624_v4 = vld [vmem:[%s9670_s1 + $0x190] sm:$0xff]  }
  0xb4   :  { %6477 = vmatprep.subr.bf16.mxu1 %v7613_v54  ;;  %6463 = vmatprep.mubr.bf16.mxu1 %v8590_v55 }
  0xb5   :  { %6844 = vmatmul.mubr.bf16.gmra.mrb[8].mxu0 %v9931_v50 }
  0xb6   :  { %6860 = vmatpush3.bf16.msra.mxu0 %v7612_v31  ;;  %6847 = vmatprep.mubr.bf16.mxu0 %v9044_v8  ;;  %v7618_v31 = vld [vmem:[%s9670_s1 + $0x478] sm:$0xff]  }
  0xb7   :  { %6861 = vmatprep.subr.bf16.mxu0 %v7614_v32  ;;  %6478 = vmatpush3.bf16.msra.mxu1 %v7613_v54  ;;  %v7620_v54 = vld [vmem:[%s9670_s1 + $0x180] sm:$0xff]  }
  0xb8   :  { %6479 = vmatprep.subr.bf16.mxu1 %v7615_v38 }
  0xba   :  { %6862 = vmatpush3.bf16.msra.mxu0 %v7614_v32  ;;  %6464 = vmatmul.mubr.bf16.gmra.mrb[12].mxu1 %v8757_v26  ;;  %v3573_v32 = vrot.slane %v8793_v21, 2  ;;  %v9933_v21 = vld [vmem:[#allocation18_spill] sm:$0xff] }
  0xbb   :  { %6863 = vmatprep.subr.bf16.mxu0 %v7616_v62  ;;  %6480 = vmatpush3.bf16.msra.mxu1 %v7615_v38  ;;  %v7623_v38 = vld [vmem:[%s9670_s1 + $0x488] sm:$0xff]  }
  0xbc   :  { %6481 = vmatprep.subr.bf16.mxu1 %v7617_v63  ;;  %6483 = vmatprep.mubr.bf16.mxu1 %v5334_v27 }
  0xbd   :  { %6848 = vmatmul.mubr.bf16.gmra.mrb[12].mxu0 %v3394_v13  ;;  %v7627_v13 = vld [vmem:[%s9670_s1 + $0x498] sm:$0xff]  }
  0xbe   :  { %6864 = vmatpush3.bf16.msra.mxu0 %v7616_v62  ;;  %6867 = vmatprep.mubr.bf16.mxu0 %v9932_v57  ;;  %v3574_v62 = vrot.slane %v8798_v7, 2  ;;  %v7625_v7 = vld [vmem:[%s9670_s1 + $0x490] sm:$0xff]  }
  0xbf   :  { %6865 = vmatprep.subr.bf16.mxu0 %v7618_v31  ;;  %6482 = vmatpush3.bf16.msra.mxu1 %v7617_v63  ;;  %v9934_v63 = vld [vmem:[#allocation51_spill] sm:$0xff] }
  0xc0   :  { %6499 = vmatprep.subr.bf16.mxu1 %v7620_v54 }
  0xc2   :  { %6866 = vmatpush3.bf16.msra.mxu0 %v7618_v31  ;;  %6484 = vmatmul.mubr.bf16.vlgmr.msra.gmra.mrb[0].mxu1 %v8523_v16  ;;  %v9101_v16 = vsel %vm546_vm1, %v3573_v32, %v3574_v62  ;;  %v7629_v31 = vld [vmem:[%s9670_s1 + $0x1a0] sm:$0xff]   ;;  %v9939_v32 = vld [vmem:[#allocation17_spill] sm:$0xff]  ;;  %v3576_v62 = vrot.slane %v8823_v53, 2  ;;  %v9940_v53 = vld [vmem:[#allocation32_spill] sm:$0xff] }
  0xc3   :  { %6883 = vmatprep.subr.bf16.mxu0 %v7621_v2  ;;  %6500 = vmatpush3.bf16.msra.mxu1 %v7620_v54  ;;  %v9936_v54 = vld [vmem:[#allocation23_spill] sm:$0xff] }
  0xc4   :  { %6501 = vmatprep.subr.bf16.mxu1 %v7622_v52  ;;  %6487 = vmatprep.mubr.bf16.mxu1 %v8532_v12  ;;  %v9935_v12 = vld [vmem:[#allocation33_spill] sm:$0xff] }
  0xc5   :  { %6868 = vmatmul.mubr.bf16.vlgmr.msra.gmra.mrb[0].mxu0 %v9933_v21  ;;  %v3581_v27 = vpack.c.bf16 %v9101_v16, %v9935_v12  ;;  %v7633_v12 = vld [vmem:[%s9670_s1 + $0x1b0] sm:$0xff]  }
  0xc6   :  { %6884 = vmatpush3.bf16.msra.mxu0 %v7621_v2  ;;  %6871 = vmatprep.mubr.bf16.mxu0 %v9934_v63  ;;  %v9937_v2 = vld [vmem:[#allocation24_spill] sm:$0xff] }
  0xc7   :  { %6885 = vmatprep.subr.bf16.mxu0 %v7623_v38  ;;  %6502 = vmatpush3.bf16.msra.mxu1 %v7622_v52  ;;  %v9938_v52 = vcombine.low %v9936_v54, %v9937_v2  ;;  %v9942_v54 = vld [vmem:[#allocation7_spill] sm:$0xff]  ;;  %v9943_v2 = vld [vmem:[#allocation6_spill] sm:$0xff] }
  0xc8   :  { %6503 = vmatprep.subr.bf16.mxu1 %v7624_v4 }
  0xca   :  { %6886 = vmatpush3.bf16.msra.mxu0 %v7623_v38  ;;  %6488 = vmatmul.mubr.bf16.gmra.mrb[4].mxu1 %v8857_v29  ;;  %v7630_v29 = vld [vmem:[%s9670_s1 + $0x4a0] sm:$0xff]   ;;  %v7631_v38 = vld [vmem:[%s9670_s1 + $0x1a8] sm:$0xff]  }
  0xcb   :  { %6887 = vmatprep.subr.bf16.mxu0 %v7625_v7  ;;  %6504 = vmatpush3.bf16.msra.mxu1 %v7624_v4  ;;  %v7632_v4 = vld [vmem:[%s9670_s1 + $0x4a8] sm:$0xff]  }
  0xcc   :  { %6505 = vmatprep.subr.bf16.mxu1 %v7626_v41  ;;  %6491 = vmatprep.mubr.bf16.mxu1 %v9938_v52  ;;  %v9944_v52 = vpack.c.bf16 %v9942_v54, %v9943_v2  ;;  %v7648_v54 = vld [vmem:[%s9670_s1 + $0x4e8] sm:$0xff]   ;;  %v7649_v2 = vld [vmem:[%s9670_s1 + $0x1f0] sm:$0xff]  }
  0xcd   :  { %6872 = vmatmul.mubr.bf16.gmra.mrb[4].mxu0 %v3581_v27 }
  0xce   :  { %6888 = vmatpush3.bf16.msra.mxu0 %v7625_v7  ;;  %6875 = vmatprep.mubr.bf16.mxu0 %v9939_v32  ;;  %v3577_v7 = vrot.slane %v8832_v25, 2  ;;  %v7634_v25 = vld [vmem:[%s9670_s1 + $0x4b0] sm:$0xff]  }
  0xcf   :  { %6889 = vmatprep.subr.bf16.mxu0 %v7627_v13  ;;  %6506 = vmatpush3.bf16.msra.mxu1 %v7626_v41  ;;  %v7635_v41 = vld [vmem:[%s9670_s1 + $0x1b8] sm:$0xff]  }
  0xd0   :  { %6507 = vmatprep.subr.bf16.mxu1 %v7629_v31 }
  0xd2   :  { %6890 = vmatpush3.bf16.msra.mxu0 %v7627_v13  ;;  %6492 = vmatmul.mubr.bf16.gmra.mrb[8].mxu1 %v8568_v48  ;;  %v9141_v48 = vsel %vm546_vm1, %v3576_v62, %v3577_v7  ;;  %v7636_v13 = vld [vmem:[%s9670_s1 + $0x4b8] sm:$0xff]   ;;  %v7641_v62 = vld [vmem:[%s9670_s1 + $0x1d0] sm:$0xff]  }
  0xd3   :  { %6891 = vmatprep.subr.bf16.mxu0 %v7630_v29  ;;  %6508 = vmatpush3.bf16.msra.mxu1 %v7629_v31  ;;  %v7637_v31 = vld [vmem:[%s9670_s1 + $0x1c0] sm:$0xff]   ;;  %v9946_v7 = vld [vmem:[#allocation36_spill] sm:$0xff] }
  0xd4   :  { %6509 = vmatprep.subr.bf16.mxu1 %v7631_v38  ;;  %6495 = vmatprep.mubr.bf16.mxu1 %v8602_v40  ;;  %v9941_v40 = vld [vmem:[#allocation58_spill] sm:$0xff] }
  0xd5   :  { %6876 = vmatmul.mubr.bf16.gmra.mrb[8].mxu0 %v9940_v53  ;;  %v3582_v27 = vpack.c.bf16 %v9141_v48, %v9941_v40 }
  0xd6   :  { %6892 = vmatpush3.bf16.msra.mxu0 %v7630_v29  ;;  %6879 = vmatprep.mubr.bf16.mxu0 %v8667_v60  ;;  %v7639_v29 = vld [vmem:[%s9670_s1 + $0x1c8] sm:$0xff]  }
  0xd7   :  { %6893 = vmatprep.subr.bf16.mxu0 %v7632_v4  ;;  %6510 = vmatpush3.bf16.msra.mxu1 %v7631_v38  ;;  %v7640_v38 = vld [vmem:[%s9670_s1 + $0x4c8] sm:$0xff]  }
  0xd8   :  { %6511 = vmatprep.subr.bf16.mxu1 %v7633_v12 }
  0xda   :  { %6894 = vmatpush3.bf16.msra.mxu0 %v7632_v4  ;;  %6496 = vmatmul.mubr.bf16.gmra.mrb[12].mxu1 %v8921_v56  ;;  %v7638_v56 = vld [vmem:[%s9670_s1 + $0x4c0] sm:$0xff]   ;;  %v9945_v4 = vld [vmem:[#allocation67_spill] sm:$0xff] }
  0xdb   :  { %6895 = vmatprep.subr.bf16.mxu0 %v7634_v25  ;;  %6512 = vmatpush3.bf16.msra.mxu1 %v7633_v12  ;;  %v9947_v12 = vld [vmem:[#allocation39_spill] sm:$0xff] }
  0xdc   :  { %6513 = vmatprep.subr.bf16.mxu1 %v7635_v41  ;;  %6515 = vmatprep.mubr.bf16.mxu1 %v9944_v52  ;;  %v9949_v52 = vld [vmem:[#allocation3_spill] sm:$0xff] }
  0xdd   :  { %6880 = vmatmul.mubr.bf16.gmra.mrb[12].mxu0 %v3582_v27  ;;  %v7644_v27 = vld [vmem:[%s9670_s1 + $0x4d8] sm:$0xff]  }
  0xde   :  { %6896 = vmatpush3.bf16.msra.mxu0 %v7634_v25  ;;  %6899 = vmatprep.mubr.bf16.mxu0 %v8676_v17  ;;  %v1501_v25 = vpack.c.bf16 %v9947_v12, %v9946_v7  ;;  %v7655_v7 = vld [vmem:[%s9670_s1 + $0x208] sm:$0xff]  }
  0xdf   :  { %6897 = vmatprep.subr.bf16.mxu0 %v7636_v13  ;;  %6514 = vmatpush3.bf16.msra.mxu1 %v7635_v41  ;;  %v9948_v41 = vld [vmem:[#allocation71_spill] sm:$0xff] }
  0xe0   :  { %6531 = vmatprep.subr.bf16.mxu1 %v7637_v31  ;;  %v3769_v40 = vpack.c.bf16 %v8826_v19, %v9948_v41  ;;  %v7656_v12 = vld [vmem:[%s9670_s1 + $0x508] sm:$0xff]   ;;  %v9953_v41 = vld [vmem:[#allocation78_spill] sm:$0xff] }
  0xe2   :  { %6898 = vmatpush3.bf16.msra.mxu0 %v7636_v13  ;;  %6516 = vmatmul.mubr.bf16.vlgmr.msra.gmra.mrb[0].mxu1 %v9923_v43  ;;  %v7642_v43 = vld [vmem:[%s9670_s1 + $0x4d0] sm:$0xff]   ;;  %v7645_v13 = vld [vmem:[%s9670_s1 + $0x1e0] sm:$0xff]  }
  0xe3   :  { %6915 = vmatprep.subr.bf16.mxu0 %v7638_v56  ;;  %6532 = vmatpush3.bf16.msra.mxu1 %v7637_v31  ;;  %v7647_v31 = vld [vmem:[%s9670_s1 + $0x1e8] sm:$0xff]  }
  0xe4   :  { %6533 = vmatprep.subr.bf16.mxu1 %v7639_v29  ;;  %6519 = vmatprep.mubr.bf16.mxu1 %v9928_v30  ;;  %v7643_v30 = vld [vmem:[%s9670_s1 + $0x1d8] sm:$0xff]  }
  0xe5   :  { %6900 = vmatmul.mubr.bf16.vlgmr.msra.gmra.mrb[0].mxu0 %v9945_v4 }
  0xe6   :  { %6916 = vmatpush3.bf16.msra.mxu0 %v7638_v56  ;;  %6903 = vmatprep.mubr.bf16.mxu0 %v8723_v51  ;;  %v3770_v56 = vpack.c.bf16 %v8848_v24, %v9949_v52  ;;  %v9957_v52 = vld [vmem:[#allocation14_spill] sm:$0xff] }
  0xe7   :  { %6917 = vmatprep.subr.bf16.mxu0 %v7640_v38  ;;  %6534 = vmatpush3.bf16.msra.mxu1 %v7639_v29  ;;  %v7652_v29 = vld [vmem:[%s9670_s1 + $0x4f8] sm:$0xff]  }
  0xe8   :  { %6535 = vmatprep.subr.bf16.mxu1 %v7641_v62 }
  0xea   :  { %6918 = vmatpush3.bf16.msra.mxu0 %v7640_v38  ;;  %6520 = vmatmul.mubr.bf16.gmra.mrb[4].mxu1 %v8995_v61  ;;  %v7646_v61 = vld [vmem:[%s9670_s1 + $0x4e0] sm:$0xff]   ;;  %v9950_v38 = vld [vmem:[#allocation9_spill] sm:$0xff] }
  0xeb   :  { %6919 = vmatprep.subr.bf16.mxu0 %v7642_v43  ;;  %6536 = vmatpush3.bf16.msra.mxu1 %v7641_v62  ;;  %v9951_v62 = vld [vmem:[#allocation8_spill] sm:$0xff] }
  0xec   :  { %6537 = vmatprep.subr.bf16.mxu1 %v7643_v30  ;;  %6523 = vmatprep.mubr.bf16.mxu1 %v1501_v25  ;;  %v7657_v25 = vld [vmem:[%s9670_s1 + $0x210] sm:$0xff]  }
  0xed   :  { %6904 = vmatmul.mubr.bf16.gmra.mrb[4].mxu0 %v3769_v40  ;;  %v9954_v40 = vld [vmem:[#allocation37_spill] sm:$0xff] }
  0xee   :  { %6920 = vmatpush3.bf16.msra.mxu0 %v7642_v43  ;;  %6907 = vmatprep.mubr.bf16.mxu0 %v8765_v58  ;;  %v9952_v43 = vpack.c.bf16 %v9950_v38, %v9951_v62  ;;  %v7669_v38 = vld [vmem:[%s9670_s1 + $0x240] sm:$0xff]  }
  0xef   :  { %6921 = vmatprep.subr.bf16.mxu0 %v7644_v27  ;;  %6538 = vmatpush3.bf16.msra.mxu1 %v7643_v30  ;;  %v7653_v30 = vld [vmem:[%s9670_s1 + $0x200] sm:$0xff]  }
  0xf0   :  { %6539 = vmatprep.subr.bf16.mxu1 %v7645_v13  ;;  %v9958_v62 = vld [vmem:[#allocation66_spill] sm:$0xff] }
  0xf2   :  { %6922 = vmatpush3.bf16.msra.mxu0 %v7644_v27  ;;  %6524 = vmatmul.mubr.bf16.gmra.mrb[8].mxu1 %v9929_v34  ;;  %v7650_v34 = vld [vmem:[%s9670_s1 + $0x4f0] sm:$0xff]   ;;  %v1695_v27 = vpack.c.bf16 %v9954_v40, %v8685_v10  ;;  %v7662_v10 = vld [vmem:[%s9670_s1 + $0x520] sm:$0xff]  }
  0xf3   :  { %6923 = vmatprep.subr.bf16.mxu0 %v7646_v61  ;;  %6540 = vmatpush3.bf16.msra.mxu1 %v7645_v13  ;;  %v3957_v13 = vpack.c.bf16 %v8898_v9, %v8692_v28  ;;  %v7663_v28 = vld [vmem:[%s9670_s1 + $0x228] sm:$0xff]   ;;  %v9960_v40 = vld [vmem:[#allocation74_spill] sm:$0xff] }
  0xf4   :  { %6541 = vmatprep.subr.bf16.mxu1 %v7647_v31  ;;  %6527 = vmatprep.mubr.bf16.mxu1 %v9931_v50  ;;  %v7651_v50 = vld [vmem:[%s9670_s1 + $0x1f8] sm:$0xff]  }
  0xf5   :  { %6908 = vmatmul.mubr.bf16.gmra.mrb[8].mxu0 %v8772_v49 }
  0xf6   :  { %6924 = vmatpush3.bf16.msra.mxu0 %v7646_v61  ;;  %6911 = vmatprep.mubr.bf16.mxu0 %v8817_v1  ;;  %v7660_v61 = vld [vmem:[%s9670_s1 + $0x518] sm:$0xff]  }
  0xf7   :  { %6925 = vmatprep.subr.bf16.mxu0 %v7648_v54  ;;  %6542 = vmatpush3.bf16.msra.mxu1 %v7647_v31  ;;  %v7661_v31 = vld [vmem:[%s9670_s1 + $0x220] sm:$0xff]  }
  0xf8   :  { %6543 = vmatprep.subr.bf16.mxu1 %v7649_v2 }
  0xfa   :  { %6926 = vmatpush3.bf16.msra.mxu0 %v7648_v54  ;;  %6528 = vmatmul.mubr.bf16.gmra.mrb[12].mxu1 %v9044_v8  ;;  %v7654_v8 = vld [vmem:[%s9670_s1 + $0x500] sm:$0xff]   ;;  %v7665_v54 = vld [vmem:[%s9670_s1 + $0x230] sm:$0xff]  }
  0xfb   :  { %6927 = vmatprep.subr.bf16.mxu0 %v7650_v34  ;;  %6544 = vmatpush3.bf16.msra.mxu1 %v7649_v2  ;;  %v9955_v2 = vld [vmem:[#allocation45_spill] sm:$0xff] }
  0xfc   :  { %6545 = vmatprep.subr.bf16.mxu1 %v7651_v50  ;;  %6547 = vmatprep.mubr.bf16.mxu1 %v9952_v43  ;;  %v7671_v43 = vld [vmem:[%s9670_s1 + $0x248] sm:$0xff]  }
  0xfd   :  { %6912 = vmatmul.mubr.bf16.gmra.mrb[12].mxu0 %v3770_v56  ;;  %v3958_v56 = vpack.c.bf16 %v8971_v36, %v9957_v52  ;;  %v7741_v52 = vld [vmem:[%s9671_s0 + $0xb0] sm:$0xf] }
  0xfe   :  { %6928 = vmatpush3.bf16.msra.mxu0 %v7650_v34  ;;  %6931 = vmatprep.mubr.bf16.mxu0 %v8861_v18  ;;  %v9956_v34 = vld [vmem:[#allocation60_spill] sm:$0xff] }
  0xff   :  { %6929 = vmatprep.subr.bf16.mxu0 %v7652_v29  ;;  %6546 = vmatpush3.bf16.msra.mxu1 %v7651_v50  ;;  %v1885_v50 = vpack.c.bf16 %v9956_v34, %v9955_v2  ;;  %v7686_v2 = vld [vmem:[%s9670_s1 + $0x570] sm:$0xff]   ;;  %v9963_v34 = vld [vmem:[#allocation77_spill] sm:$0xff] }
 0x100   :  { %6563 = vmatprep.subr.bf16.mxu1 %v7653_v30 }
 0x102   :  { %6930 = vmatpush3.bf16.msra.mxu0 %v7652_v29  ;;  %6548 = vmatmul.mubr.bf16.vlgmr.msra.gmra.mrb[0].mxu1 %v9932_v57  ;;  %v7658_v57 = vld [vmem:[%s9670_s1 + $0x510] sm:$0xff]   ;;  %v7668_v29 = vld [vmem:[%s9670_s1 + $0x538] sm:$0xff]  }
 0x103   :  { %6947 = vmatprep.subr.bf16.mxu0 %v7654_v8  ;;  %6564 = vmatpush3.bf16.msra.mxu1 %v7653_v30  ;;  %v7737_v30 = vld [vmem:[%s9671_s0 + $0x40] sm:$0xf] }
 0x104   :  { %6565 = vmatprep.subr.bf16.mxu1 %v7655_v7  ;;  %6551 = vmatprep.mubr.bf16.mxu1 %v9933_v21  ;;  %v7659_v21 = vld [vmem:[%s9670_s1 + $0x218] sm:$0xff]  }
 0x105   :  { %6932 = vmatmul.mubr.bf16.vlgmr.msra.gmra.mrb[0].mxu0 %v9953_v41 }
 0x106   :  { %6948 = vmatpush3.bf16.msra.mxu0 %v7654_v8  ;;  %6935 = vmatprep.mubr.bf16.mxu0 %v8892_v47  ;;  %v7738_v8 = vld [vmem:[%s9671_s0 + $0x48] sm:$0xf] }
 0x107   :  { %6949 = vmatprep.subr.bf16.mxu0 %v7656_v12  ;;  %6566 = vmatpush3.bf16.msra.mxu1 %v7655_v7  ;;  %v9312_v7 = vcombine.low %v7737_v30, %v7738_v8  ;;  %v7690_v30 = vld [vmem:[%s9670_s1 + $0x580] sm:$0xff]   ;;  %v7691_v8 = vld [vmem:[%s9670_s1 + $0x288] sm:$0xff]  }
 0x108   :  { %6567 = vmatprep.subr.bf16.mxu1 %v7657_v25 }
 0x10a   :  { %6950 = vmatpush3.bf16.msra.mxu0 %v7656_v12  ;;  %6552 = vmatmul.mubr.bf16.gmra.mrb[4].mxu1 %v9934_v63  ;;  %v7664_v63 = vld [vmem:[%s9670_s1 + $0x528] sm:$0xff]  }
 0x10b   :  { %6951 = vmatprep.subr.bf16.mxu0 %v7658_v57  ;;  %6568 = vmatpush3.bf16.msra.mxu1 %v7657_v25  ;;  %v7672_v12 = vld [vmem:[%s9670_s1 + $0x548] sm:$0xff]   ;;  %v9959_v25 = vld [vmem:[#allocation72_spill] sm:$0xff] }
 0x10c   :  { %6569 = vmatprep.subr.bf16.mxu1 %v7659_v21  ;;  %6555 = vmatprep.mubr.bf16.mxu1 %v1695_v27  ;;  %v1889_v27 = vpack.c.bf16 %v9960_v40, %v8873_v37  ;;  %v7679_v37 = vld [vmem:[%s9670_s1 + $0x260] sm:$0xff]   ;;  %v9966_v40 = vld [vmem:[#allocation28_spill] sm:$0xff] }
 0x10d   :  { %6936 = vmatmul.mubr.bf16.gmra.mrb[4].mxu0 %v3957_v13  ;;  %v7739_v13 = vld [vmem:[%s9671_s0 + $0x50] sm:$0xf] }
 0x10e   :  { %6952 = vmatpush3.bf16.msra.mxu0 %v7658_v57  ;;  %6939 = vmatprep.mubr.bf16.mxu0 %v8925_v0  ;;  %v36_v57 = vld [vmem:[%s9671_s0 + $0x58] sm:$0xf] }
 0x10f   :  { %6953 = vmatprep.subr.bf16.mxu0 %v7660_v61  ;;  %6570 = vmatpush3.bf16.msra.mxu1 %v7659_v21  ;;  %v7676_v21 = vld [vmem:[%s9670_s1 + $0x550] sm:$0xff]  }
 0x110   :  { %6571 = vmatprep.subr.bf16.mxu1 %v7661_v31 }
 0x112   :  { %6954 = vmatpush3.bf16.msra.mxu0 %v7660_v61  ;;  %6556 = vmatmul.mubr.bf16.gmra.mrb[8].mxu1 %v9939_v32  ;;  %v7666_v32 = vld [vmem:[%s9670_s1 + $0x530] sm:$0xff]   ;;  %v5706_v61 = vcombine.low %v7739_v13, %v36_v57 }
 0x113   :  { %6955 = vmatprep.subr.bf16.mxu0 %v7662_v10  ;;  %6572 = vmatpush3.bf16.msra.mxu1 %v7661_v31  ;;  %v7678_v31 = vld [vmem:[%s9670_s1 + $0x558] sm:$0xff]  }
 0x114   :  { %6573 = vmatprep.subr.bf16.mxu1 %v7663_v28  ;;  %6559 = vmatprep.mubr.bf16.mxu1 %v9940_v53  ;;  %v7667_v53 = vld [vmem:[%s9670_s1 + $0x238] sm:$0xff]  }
 0x115   :  { %6940 = vmatmul.mubr.bf16.gmra.mrb[8].mxu0 %v8929_v3 }
 0x116   :  { %6956 = vmatpush3.bf16.msra.mxu0 %v7662_v10  ;;  %6943 = vmatprep.mubr.bf16.mxu0 %v8964_v42  ;;  %v9961_v10 = vld [vmem:[#allocation76_spill] sm:$0xff] }
 0x117   :  { %6957 = vmatprep.subr.bf16.mxu0 %v7664_v63  ;;  %6574 = vmatpush3.bf16.msra.mxu1 %v7663_v28  ;;  %v7681_v28 = vld [vmem:[%s9670_s1 + $0x268] sm:$0xff]  }
 0x118   :  { %6575 = vmatprep.subr.bf16.mxu1 %v7665_v54 }
 0x11a   :  { %6958 = vmatpush3.bf16.msra.mxu0 %v7664_v63  ;;  %6560 = vmatmul.mubr.bf16.gmra.mrb[12].mxu1 %v8667_v60  ;;  %v7670_v60 = vld [vmem:[%s9670_s1 + $0x540] sm:$0xff]  }
 0x11b   :  { %6959 = vmatprep.subr.bf16.mxu0 %v7666_v32  ;;  %6576 = vmatpush3.bf16.msra.mxu1 %v7665_v54  ;;  %v7740_v63 = vld [vmem:[%s9671_s0 + $0xa0] sm:$0xf] }
 0x11c   :  { %6577 = vmatprep.subr.bf16.mxu1 %v7667_v53  ;;  %6579 = vmatprep.mubr.bf16.mxu1 %v1885_v50  ;;  %v9356_v54 = vcombine.low %v7740_v63, %v8955_v59  ;;  %v60_v59 = vld [vmem:[%s9671_s0 + $0xb8] sm:$0xf]  ;;  %v2079_v50 = vpack.c.bf16 %v9963_v34, %v8941_v20  ;;  %v7689_v20 = vld [vmem:[%s9670_s1 + $0x280] sm:$0xff]   ;;  %v9452_v63 = vpack.c.bf16 %v8779_v5, %v8760_v45  ;;  %v7702_v5 = vld [vmem:[%s9670_s1 + $0x5b0] sm:$0xff]  }
 0x11d   :  { %6944 = vmatmul.mubr.bf16.gmra.mrb[12].mxu0 %v3958_v56  ;;  %v5707_v56 = vcombine.low %v7741_v52, %v60_v59  ;;  %v7704_v34 = vld [vmem:[%s9670_s1 + $0x5b8] sm:$0xff]   ;;  %v7705_v52 = vld [vmem:[%s9670_s1 + $0x2c0] sm:$0xff]  }
 0x11e   :  { %6960 = vmatpush3.bf16.msra.mxu0 %v7666_v32  ;;  %6963 = vmatprep.mubr.bf16.mxu0 %v9958_v62  ;;  %v7682_v32 = vld [vmem:[%s9670_s1 + $0x568] sm:$0xff]  }
 0x11f   :  { %6961 = vmatprep.subr.bf16.mxu0 %v7668_v29  ;;  %6578 = vmatpush3.bf16.msra.mxu1 %v7667_v53  ;;  %v9962_v53 = vld [vmem:[#allocation2_spill] sm:$0xff] }
 0x120   :  { %6595 = vmatprep.subr.bf16.mxu1 %v7669_v38 }
 0x122   :  { %6962 = vmatpush3.bf16.msra.mxu0 %v7668_v29  ;;  %6580 = vmatmul.mubr.bf16.vlgmr.msra.gmra.mrb[0].mxu1 %v8676_v17  ;;  %v7674_v17 = vld [vmem:[%s9670_s1 + $0x250] sm:$0xff]   ;;  %v7688_v29 = vld [vmem:[%s9670_s1 + $0x578] sm:$0xff]  }
 0x123   :  { %6979 = vmatprep.subr.bf16.mxu0 %v7670_v60  ;;  %6596 = vmatpush3.bf16.msra.mxu1 %v7669_v38  ;;  %v37_v38 = vld [vmem:[%s9671_s0 + $0x5c] sm:$0x3] }
 0x124   :  { %6597 = vmatprep.subr.bf16.mxu1 %v7671_v43  ;;  %6583 = vmatprep.mubr.bf16.mxu1 %v9945_v4  ;;  %v7677_v4 = vld [vmem:[%s9670_s1 + $0x258] sm:$0xff]  }
 0x125   :  { %6964 = vmatmul.mubr.bf16.vlgmr.msra.gmra.mrb[0].mxu0 %v9959_v25 }
 0x126   :  { %6980 = vmatpush3.bf16.msra.mxu0 %v7670_v60  ;;  %6967 = vmatprep.mubr.bf16.mxu0 %v9312_v7  ;;  %v9391_v60 = vunpack.c.l.bf16 %v36_v57 }
 0x127   :  { %6981 = vmatprep.subr.bf16.mxu0 %v7672_v12  ;;  %6598 = vmatpush3.bf16.msra.mxu1 %v7671_v43  ;;  %v9394_v43 = vunpack.c.l.bf16 %v37_v38 }
 0x128   :  { %6599 = vmatprep.subr.bf16.mxu1 %v7674_v17 }
 0x129   :  { %v4322_v57 = vrot.slane %v9394_v43, 1  ;;  %v4510_v38 = vrot.slane %v9394_v43, 2 }
 0x12a   :  { %6982 = vmatpush3.bf16.msra.mxu0 %v7672_v12  ;;  %6584 = vmatmul.mubr.bf16.gmra.mrb[4].mxu1 %v8723_v51  ;;  %v7680_v51 = vld [vmem:[%s9670_s1 + $0x560] sm:$0xff]   ;;  %v9405_v12 = vpack.c.bf16 %v9013_v15, %v8983_v35  ;;  %v7694_v15 = vld [vmem:[%s9670_s1 + $0x590] sm:$0xff]  }
 0x12b   :  { %6983 = vmatprep.subr.bf16.mxu0 %v7676_v21  ;;  %6600 = vmatpush3.bf16.msra.mxu1 %v7674_v17  ;;  %v4321_v17 = vrot.slane %v9391_v60, 1 }
 0x12c   :  { %6601 = vmatprep.subr.bf16.mxu1 %v7677_v4  ;;  %6587 = vmatprep.mubr.bf16.mxu1 %v1889_v27  ;;  %v2083_v27 = vpack.c.bf16 %v9966_v40, %v9009_v22  ;;  %v7697_v22 = vld [vmem:[%s9670_s1 + $0x2a0] sm:$0xff]  }
 0x12d   :  { %6968 = vmatmul.mubr.bf16.gmra.mrb[4].mxu0 %v5706_v61  ;;  %v4323_v35 = vsel %vm166_vm0, %v4321_v17, %v4322_v57  ;;  %v7696_v61 = vld [vmem:[%s9670_s1 + $0x598] sm:$0xff]   ;;  %v7710_v57 = vld [vmem:[%s9670_s1 + $0x5d0] sm:$0xff]  }
 0x12e   :  { %6984 = vmatpush3.bf16.msra.mxu0 %v7676_v21  ;;  %6971 = vmatprep.mubr.bf16.mxu0 %v9961_v10  ;;  %v7692_v21 = vld [vmem:[%s9670_s1 + $0x588] sm:$0xff]   ;;  %v4329_v13 = vpack.c.bf16 %v4323_v35, %v9016_v44  ;;  %v9438_v44 = vunpack.c.l.bf16 %v60_v59  ;;  %v9973_v35 = vld [vmem:[#allocation73_spill] sm:$0xff] }
 0x12f   :  { %6985 = vmatprep.subr.bf16.mxu0 %v7678_v31  ;;  %6602 = vmatpush3.bf16.msra.mxu1 %v7677_v4  ;;  %v9965_v4 = vld [vmem:[#allocation25_spill] sm:$0xff]  ;;  %v7700_v59 = vld [vmem:[%s9670_s1 + $0x5a8] sm:$0xff]  }
 0x130   :  { %6603 = vmatprep.subr.bf16.mxu1 %v7679_v37  ;;  %v4512_v40 = vrot.slane %v9438_v44, 2 }
 0x132   :  { %6986 = vmatpush3.bf16.msra.mxu0 %v7678_v31  ;;  %6588 = vmatmul.mubr.bf16.gmra.mrb[8].mxu1 %v8765_v58  ;;  %v7684_v58 = vld [vmem:[%s9670_s1 + $0x270] sm:$0xff]   ;;  %v61_v31 = vld [vmem:[%s9671_s0 + $0xbc] sm:$0x3] }
 0x133   :  { %6987 = vmatprep.subr.bf16.mxu0 %v7680_v51  ;;  %6604 = vmatpush3.bf16.msra.mxu1 %v7679_v37  ;;  %v9441_v37 = vunpack.c.l.bf16 %v61_v31  ;;  %v9975_v31 = vld [vmem:[#allocation55_spill] sm:$0xff] }
 0x134   :  { %6605 = vmatprep.subr.bf16.mxu1 %v7681_v28  ;;  %6591 = vmatprep.mubr.bf16.mxu1 %v8772_v49  ;;  %v7687_v49 = vld [vmem:[%s9670_s1 + $0x278] sm:$0xff]  }
 0x135   :  { %6972 = vmatmul.mubr.bf16.gmra.mrb[8].mxu0 %v9962_v53 }
 0x136   :  { %6988 = vmatpush3.bf16.msra.mxu0 %v7680_v51  ;;  %6975 = vmatprep.mubr.bf16.mxu0 %v9356_v54  ;;  %v7698_v51 = vld [vmem:[%s9670_s1 + $0x5a0] sm:$0xff]  }
 0x137   :  { %6989 = vmatprep.subr.bf16.mxu0 %v7682_v32  ;;  %6606 = vmatpush3.bf16.msra.mxu1 %v7681_v28  ;;  %v7699_v28 = vld [vmem:[%s9670_s1 + $0x2a8] sm:$0xff]  }
 0x138   :  { %6607 = vmatprep.subr.bf16.mxu1 %v7684_v58 }
 0x13a   :  { %6990 = vmatpush3.bf16.msra.mxu0 %v7682_v32  ;;  %6592 = vmatmul.mubr.bf16.gmra.mrb[12].mxu1 %v8817_v1  ;;  %v9964_v1 = vld [vmem:[#allocation16_spill] sm:$0xff]  ;;  %v4324_v32 = vrot.slane %v9438_v44, 1 }
 0x13b   :  { %6991 = vmatprep.subr.bf16.mxu0 %v7686_v2  ;;  %6608 = vmatpush3.bf16.msra.mxu1 %v7684_v58  ;;  %v4325_v58 = vrot.slane %v9441_v37, 1 }
 0x13c   :  { %6609 = vmatprep.subr.bf16.mxu1 %v7687_v49  ;;  %6611 = vmatprep.mubr.bf16.mxu1 %v2079_v50  ;;  %v9969_v50 = vld [vmem:[#allocation63_spill] sm:$0xff] }
 0x13d   :  { %6976 = vmatmul.mubr.bf16.gmra.mrb[12].mxu0 %v5707_v56  ;;  %v4326_v45 = vsel %vm166_vm0, %v4324_v32, %v4325_v58  ;;  %v9970_v56 = vld [vmem:[#allocation15_spill] sm:$0xff]  ;;  %v7720_v32 = vld [vmem:[%s9670_s1 + $0x5f8] sm:$0xff]  }
 0x13e   :  { %6992 = vmatpush3.bf16.msra.mxu0 %v7686_v2  ;;  %6995 = vmatprep.mubr.bf16.mxu0 %v9964_v1  ;;  %v9968_v2 = vld [vmem:[#allocation57_spill] sm:$0xff] }
 0x13f   :  { %6993 = vmatprep.subr.bf16.mxu0 %v7688_v29  ;;  %6610 = vmatpush3.bf16.msra.mxu1 %v7687_v49  ;;  %v4330_v49 = vpack.c.bf16 %v4326_v45, %v9058_v11  ;;  %v7707_v11 = vld [vmem:[%s9670_s1 + $0x2c8] sm:$0xff]   ;;  %v9977_v58 = vld [vmem:[#allocation13_spill] sm:$0xff] }
 0x140   :  { %6627 = vmatprep.subr.bf16.mxu1 %v7689_v20  ;;  %v9978_v45 = vld [vmem:[#allocation75_spill] sm:$0xff] }
 0x142   :  { %6994 = vmatpush3.bf16.msra.mxu0 %v7688_v29  ;;  %6612 = vmatmul.mubr.bf16.vlgmr.msra.gmra.mrb[0].mxu1 %v8861_v18  ;;  %v7693_v18 = vld [vmem:[%s9670_s1 + $0x290] sm:$0xff]   ;;  %v4509_v29 = vrot.slane %v9391_v60, 2 }
 0x143   :  { %7011 = vmatprep.subr.bf16.mxu0 %v7690_v30  ;;  %6628 = vmatpush3.bf16.msra.mxu1 %v7689_v20  ;;  %v7708_v20 = vld [vmem:[%s9670_s1 + $0x5c8] sm:$0xff]  }
 0x144   :  { %6629 = vmatprep.subr.bf16.mxu1 %v7691_v8  ;;  %6615 = vmatprep.mubr.bf16.mxu1 %v9953_v41  ;;  %v7695_v41 = vld [vmem:[%s9670_s1 + $0x298] sm:$0xff]   ;;  %v4511_v17 = vsel %vm546_vm1, %v4509_v29, %v4510_v38 }
 0x145   :  { %6996 = vmatmul.mubr.bf16.vlgmr.msra.gmra.mrb[0].mxu0 %v9965_v4 }
 0x146   :  { %7012 = vmatpush3.bf16.msra.mxu0 %v7690_v30  ;;  %6999 = vmatprep.mubr.bf16.mxu0 %v9405_v12  ;;  %v7709_v30 = vld [vmem:[%s9670_s1 + $0x2d0] sm:$0xff]  }
 0x147   :  { %7013 = vmatprep.subr.bf16.mxu0 %v7692_v21  ;;  %6630 = vmatpush3.bf16.msra.mxu1 %v7691_v8  ;;  %v9971_v8 = vld [vmem:[#allocation20_spill] sm:$0xff] }
 0x148   :  { %6631 = vmatprep.subr.bf16.mxu1 %v7693_v18 }
 0x14a   :  { %7014 = vmatpush3.bf16.msra.mxu0 %v7692_v21  ;;  %6616 = vmatmul.mubr.bf16.gmra.mrb[4].mxu1 %v8892_v47  ;;  %v9967_v47 = vld [vmem:[#allocation52_spill] sm:$0xff]  ;;  %v4517_v21 = vpack.c.bf16 %v4511_v17, %v9101_v16  ;;  %v7714_v16 = vld [vmem:[%s9670_s1 + $0x5e0] sm:$0xff]  }
 0x14b   :  { %7015 = vmatprep.subr.bf16.mxu0 %v7694_v15  ;;  %6632 = vmatpush3.bf16.msra.mxu1 %v7693_v18  ;;  %v7712_v18 = vld [vmem:[%s9670_s1 + $0x5d8] sm:$0xff]  }
 0x14c   :  { %6633 = vmatprep.subr.bf16.mxu1 %v7695_v41  ;;  %6619 = vmatprep.mubr.bf16.mxu1 %v2083_v27  ;;  %v4513_v27 = vrot.slane %v9441_v37, 2 }
 0x14d   :  { %7000 = vmatmul.mubr.bf16.gmra.mrb[4].mxu0 %v4329_v13  ;;  %v7716_v13 = vld [vmem:[%s9670_s1 + $0x5e8] sm:$0xff]  }
 0x14e   :  { %7016 = vmatpush3.bf16.msra.mxu0 %v7694_v15  ;;  %7003 = vmatprep.mubr.bf16.mxu0 %v9967_v47  ;;  %v7713_v15 = vld [vmem:[%s9670_s1 + $0x2e0] sm:$0xff]  }
 0x14f   :  { %7017 = vmatprep.subr.bf16.mxu0 %v7696_v61  ;;  %6634 = vmatpush3.bf16.msra.mxu1 %v7695_v41  ;;  %v9974_v41 = vld [vmem:[#allocation49_spill] sm:$0xff] }
 0x150   :  { %6635 = vmatprep.subr.bf16.mxu1 %v7697_v22 }
 0x152   :  { %7018 = vmatpush3.bf16.msra.mxu0 %v7696_v61  ;;  %6620 = vmatmul.mubr.bf16.gmra.mrb[8].mxu1 %v8925_v0  ;;  %v7701_v0 = vld [vmem:[%s9670_s1 + $0x2b0] sm:$0xff]  }
 0x153   :  { %7019 = vmatprep.subr.bf16.mxu0 %v7698_v51  ;;  %6636 = vmatpush3.bf16.msra.mxu1 %v7697_v22  ;;  %v7717_v61 = vld [vmem:[%s9670_s1 + $0x2f0] sm:$0xff]   ;;  %v4514_v22 = vsel %vm546_vm1, %v4512_v40, %v4513_v27 }
 0x154   :  { %6637 = vmatprep.subr.bf16.mxu1 %v7699_v28  ;;  %6623 = vmatprep.mubr.bf16.mxu1 %v8929_v3  ;;  %v7703_v3 = vld [vmem:[%s9670_s1 + $0x2b8] sm:$0xff]  }
 0x155   :  { %7004 = vmatmul.mubr.bf16.gmra.mrb[8].mxu0 %v9968_v2 }
 0x156   :  { %7020 = vmatpush3.bf16.msra.mxu0 %v7698_v51  ;;  %7007 = vmatprep.mubr.bf16.mxu0 %v9452_v63  ;;  %v7718_v51 = vld [vmem:[%s9670_s1 + $0x5f0] sm:$0xff]  }
 0x157   :  { %7021 = vmatprep.subr.bf16.mxu0 %v7700_v59  ;;  %6638 = vmatpush3.bf16.msra.mxu1 %v7699_v28  ;;  %v4518_v28 = vpack.c.bf16 %v4514_v22, %v9141_v48  ;;  %v7722_v48 = vld [vmem:[%s9670_s1 + $0x608] sm:$0xff]  }
 0x158   :  { %6639 = vmatprep.subr.bf16.mxu1 %v7701_v0 }
 0x15a   :  { %7022 = vmatpush3.bf16.msra.mxu0 %v7700_v59  ;;  %6624 = vmatmul.mubr.bf16.gmra.mrb[12].mxu1 %v8964_v42  ;;  %v7706_v42 = vld [vmem:[%s9670_s1 + $0x5c0] sm:$0xff]  }
 0x15b   :  { %7023 = vmatprep.subr.bf16.mxu0 %v7702_v5  ;;  %6640 = vmatpush3.bf16.msra.mxu1 %v7701_v0  ;;  %v7721_v59 = vld [vmem:[%s9670_s1 + $0x600] sm:$0xff]   ;;  %v4698_v0 = vrot.slane %v9394_v43, 3 }
 0x15c   :  { %6641 = vmatprep.subr.bf16.mxu1 %v7703_v3  ;;  %6643 = vmatprep.mubr.bf16.mxu1 %v9969_v50  ;;  %v7728_v50 = vld [vmem:[%s9670_s1 + $0x638] sm:$0xff]  }
 0x15d   :  { %7008 = vmatmul.mubr.bf16.gmra.mrb[12].mxu0 %v4330_v49  ;;  %v4701_v49 = vrot.slane %v9441_v37, 3 }
 0x15e   :  { %7024 = vmatpush3.bf16.msra.mxu0 %v7702_v5  ;;  %7027 = vmatprep.mubr.bf16.mxu0 %v9970_v56  ;;  %v7724_v5 = vld [vmem:[%s9670_s1 + $0x618] sm:$0xff]   ;;  %v9981_v56 = vld [vmem:[#allocation79_spill] sm:$0xff] }
 0x15f   :  { %7025 = vmatprep.subr.bf16.mxu0 %v7704_v34  ;;  %6642 = vmatpush3.bf16.msra.mxu1 %v7703_v3  ;;  %v7725_v3 = vld [vmem:[%s9670_s1 + $0x620] sm:$0xff]  }
 0x160   :  { %6659 = vmatprep.subr.bf16.mxu1 %v7705_v52 }
 0x162   :  { %7026 = vmatpush3.bf16.msra.mxu0 %v7704_v34  ;;  %6644 = vmatmul.mubr.bf16.vlgmr.msra.gmra.mrb[0].mxu1 %v9958_v62  ;;  %v9972_v62 = vld [vmem:[#allocation34_spill] sm:$0xff]  ;;  %v9980_v34 = vld [vmem:[#allocation41_spill] sm:$0xff] }
 0x163   :  { %7043 = vmatprep.subr.bf16.mxu0 %v7706_v42  ;;  %6660 = vmatpush3.bf16.msra.mxu1 %v7705_v52  ;;  %v4889_v52 = vrot.slane %v9441_v37, 4 }
 0x164   :  { %6661 = vmatprep.subr.bf16.mxu1 %v7707_v11  ;;  %6647 = vmatprep.mubr.bf16.mxu1 %v9959_v25  ;;  %v7711_v25 = vld [vmem:[%s9670_s1 + $0x2d8] sm:$0xff]  }
 0x165   :  { %7028 = vmatmul.mubr.bf16.vlgmr.msra.gmra.mrb[0].mxu0 %v9971_v8 }
 0x166   :  { %7044 = vmatpush3.bf16.msra.mxu0 %v7706_v42  ;;  %7031 = vmatprep.mubr.bf16.mxu0 %v9972_v62 }
 0x167   :  { %7045 = vmatprep.subr.bf16.mxu0 %v7708_v20  ;;  %6662 = vmatpush3.bf16.msra.mxu1 %v7707_v11 }
 0x168   :  { %6663 = vmatprep.subr.bf16.mxu1 %v7709_v30 }
 0x16a   :  { %7046 = vmatpush3.bf16.msra.mxu0 %v7708_v20  ;;  %6648 = vmatmul.mubr.bf16.gmra.mrb[4].mxu1 %v9312_v7  ;;  %v7715_v7 = vld [vmem:[%s9670_s1 + $0x2e8] sm:$0xff]  }
 0x16b   :  { %7047 = vmatprep.subr.bf16.mxu0 %v7710_v57  ;;  %6664 = vmatpush3.bf16.msra.mxu1 %v7709_v30 }
 0x16c   :  { %6665 = vmatprep.subr.bf16.mxu1 %v7711_v25  ;;  %6651 = vmatprep.mubr.bf16.mxu1 %v9973_v35 }
 0x16d   :  { %7032 = vmatmul.mubr.bf16.gmra.mrb[4].mxu0 %v4517_v21 }
 0x16e   :  { %7048 = vmatpush3.bf16.msra.mxu0 %v7710_v57  ;;  %7035 = vmatprep.mubr.bf16.mxu0 %v9974_v41 }
 0x16f   :  { %7049 = vmatprep.subr.bf16.mxu0 %v7712_v18  ;;  %6666 = vmatpush3.bf16.msra.mxu1 %v7711_v25 }
 0x170   :  { %6667 = vmatprep.subr.bf16.mxu1 %v7713_v15 }
 0x172   :  { %7050 = vmatpush3.bf16.msra.mxu0 %v7712_v18  ;;  %6652 = vmatmul.mubr.bf16.gmra.mrb[8].mxu1 %v9961_v10  ;;  %v9976_v10 = vld [vmem:[#allocation59_spill] sm:$0xff] }
 0x173   :  { %7051 = vmatprep.subr.bf16.mxu0 %v7714_v16  ;;  %6668 = vmatpush3.bf16.msra.mxu1 %v7713_v15 }
 0x174   :  { %6669 = vmatprep.subr.bf16.mxu1 %v7715_v7  ;;  %6655 = vmatprep.mubr.bf16.mxu1 %v9962_v53  ;;  %v7719_v53 = vld [vmem:[%s9670_s1 + $0x2f8] sm:$0xff]  }
 0x175   :  { %7036 = vmatmul.mubr.bf16.gmra.mrb[8].mxu0 %v9975_v31 }
 0x176   :  { %7052 = vmatpush3.bf16.msra.mxu0 %v7714_v16  ;;  %7039 = vmatprep.mubr.bf16.mxu0 %v9976_v10 }
 0x177   :  { %7053 = vmatprep.subr.bf16.mxu0 %v7716_v13  ;;  %6670 = vmatpush3.bf16.msra.mxu1 %v7715_v7 }
 0x178   :  { %6671 = vmatprep.subr.bf16.mxu1 %v7717_v61 }
 0x17a   :  { %7054 = vmatpush3.bf16.msra.mxu0 %v7716_v13  ;;  %6656 = vmatmul.mubr.bf16.gmra.mrb[12].mxu1 %v9356_v54  ;;  %v4697_v54 = vrot.slane %v9391_v60, 3 }
 0x17b   :  { %7055 = vmatprep.subr.bf16.mxu0 %v7718_v51  ;;  %6672 = vmatpush3.bf16.msra.mxu1 %v7717_v61 }
 0x17c   :  { %6673 = vmatprep.subr.bf16.mxu1 %v7719_v53  ;;  %6675 = vmatprep.mubr.bf16.mxu1 %v9977_v58 }
 0x17d   :  { %7040 = vmatmul.mubr.bf16.gmra.mrb[12].mxu0 %v4518_v28 }
 0x17e   :  { %7056 = vmatpush3.bf16.msra.mxu0 %v7718_v51  ;;  %7059 = vmatprep.mubr.bf16.mxu0 %v9920_v33  ;;  %v7723_v33 = vld [vmem:[%s9670_s1 + $0x610] sm:$0xff]  }
 0x17f   :  { %7057 = vmatprep.subr.bf16.mxu0 %v7720_v32  ;;  %6674 = vmatpush3.bf16.msra.mxu1 %v7719_v53 }
 0x180   :  { %7107 = vmatprep.subr.bf16.mxu1 %v7721_v59 }
 0x182   :  { %7058 = vmatpush3.bf16.msra.mxu0 %v7720_v32  ;;  %6676 = vmatmul.mubr.bf16.vlgmr.msra.gmra.mrb[0].mxu1 %v9964_v1  ;;  %v4699_v1 = vsel %vm797_vm2, %v4697_v54, %v4698_v0 }
 0x183   :  { %7075 = vmatprep.subr.bf16.mxu0 %v7721_v59  ;;  %7115 = vmatpush3.bf16.msra.mxu1 %v7721_v59 }
 0x184   :  { %7108 = vmatprep.subr.bf16.mxu1 %v7722_v48  ;;  %6679 = vmatprep.mubr.bf16.mxu1 %v9965_v4  ;;  %v4705_v4 = vpack.c.bf16 %v4699_v1, %v8826_v19  ;;  %v7726_v19 = vld [vmem:[%s9670_s1 + $0x628] sm:$0xff]  }
 0x185   :  { %7060 = vmatmul.mubr.bf16.vlgmr.msra.gmra.mrb[0].mxu0 %v9921_v23  ;;  %v9979_v23 = vld [vmem:[#allocation44_spill] sm:$0xff] }
 0x186   :  { %7076 = vmatpush3.bf16.msra.mxu0 %v7721_v59  ;;  %7063 = vmatprep.mubr.bf16.mxu0 %v9978_v45 }
 0x187   :  { %7077 = vmatprep.subr.bf16.mxu0 %v7722_v48  ;;  %7116 = vmatpush3.bf16.msra.mxu1 %v7722_v48 }
 0x188   :  { %7109 = vmatprep.subr.bf16.mxu1 %v7723_v33 }
 0x18a   :  { %7078 = vmatpush3.bf16.msra.mxu0 %v7722_v48  ;;  %6680 = vmatmul.mubr.bf16.gmra.mrb[4].mxu1 %v9405_v12  ;;  %v4700_v12 = vrot.slane %v9438_v44, 3 }
 0x18b   :  { %7079 = vmatprep.subr.bf16.mxu0 %v7723_v33  ;;  %7117 = vmatpush3.bf16.msra.mxu1 %v7723_v33 }
 0x18c   :  { %7110 = vmatprep.subr.bf16.mxu1 %v7724_v5  ;;  %6683 = vmatprep.mubr.bf16.mxu1 %v9979_v23 }
 0x18d   :  { %7064 = vmatmul.mubr.bf16.gmra.mrb[4].mxu0 %v4705_v4 }
 0x18e   :  { %7080 = vmatpush3.bf16.msra.mxu0 %v7723_v33  ;;  %7067 = vmatprep.mubr.bf16.mxu0 %v8511_v39  ;;  %v7727_v39 = vld [vmem:[%s9670_s1 + $0x630] sm:$0xff]  }
 0x18f   :  { %7081 = vmatprep.subr.bf16.mxu0 %v7724_v5  ;;  %7118 = vmatpush3.bf16.msra.mxu1 %v7724_v5 }
 0x190   :  { %7111 = vmatprep.subr.bf16.mxu1 %v7725_v3 }
 0x192   :  { %7082 = vmatpush3.bf16.msra.mxu0 %v7724_v5  ;;  %6684 = vmatmul.mubr.bf16.gmra.mrb[8].mxu1 %v9967_v47  ;;  %v4702_v47 = vsel %vm797_vm2, %v4700_v12, %v4701_v49 }
 0x193   :  { %7083 = vmatprep.subr.bf16.mxu0 %v7725_v3  ;;  %7119 = vmatpush3.bf16.msra.mxu1 %v7725_v3 }
 0x194   :  { %7112 = vmatprep.subr.bf16.mxu1 %v7726_v19  ;;  %6687 = vmatprep.mubr.bf16.mxu1 %v9968_v2  ;;  %v4706_v2 = vpack.c.bf16 %v4702_v47, %v8848_v24  ;;  %v4885_v24 = vrot.slane %v9391_v60, 4 }
 0x195   :  { %7068 = vmatmul.mubr.bf16.gmra.mrb[8].mxu0 %v8537_v14  ;;  %v4888_v14 = vrot.slane %v9438_v44, 4 }
 0x196   :  { %7084 = vmatpush3.bf16.msra.mxu0 %v7725_v3  ;;  %7071 = vmatprep.mubr.bf16.mxu0 %v9980_v34 }
 0x197   :  { %7085 = vmatprep.subr.bf16.mxu0 %v7726_v19  ;;  %7120 = vmatpush3.bf16.msra.mxu1 %v7726_v19 }
 0x198   :  { %7113 = vmatprep.subr.bf16.mxu1 %v7727_v39 }
 0x19a   :  { %7086 = vmatpush3.bf16.msra.mxu0 %v7726_v19  ;;  %6688 = vmatmul.mubr.bf16.gmra.mrb[12].mxu1 %v9452_v63  ;;  %v4886_v63 = vrot.slane %v9394_v43, 4 }
 0x19b   :  { %7087 = vmatprep.subr.bf16.mxu0 %v7727_v39  ;;  %7121 = vmatpush3.bf16.msra.mxu1 %v7727_v39 }
 0x19c   :  { %7114 = vmatprep.subr.bf16.mxu1 %v7728_v50  ;;  %7099 = vmatprep.mubr.bf16.mxu1 %v8590_v55  ;;  %v4890_v55 = vsel %vm1048_vm3, %v4888_v14, %v4889_v52  ;;  %v4887_v42 = vsel %vm1048_vm3, %v4885_v24, %v4886_v63 }
 0x19d   :  { %7072 = vmatmul.mubr.bf16.gmra.mrb[12].mxu0 %v4706_v2  ;;  %v4894_v44 = vpack.c.bf16 %v4890_v55, %v8971_v36  ;;  %v4893_v37 = vpack.c.bf16 %v4887_v42, %v8898_v9 }
 0x19e   :  { %7088 = vmatpush3.bf16.msra.mxu0 %v7727_v39  ;;  %7091 = vmatprep.mubr.bf16.mxu0 %v8506_v6  ;;  %v9982_v6 = vld [vmem:[#allocation38_spill] sm:$0xff] }
 0x19f   :  { %7089 = vmatprep.subr.bf16.mxu0 %v7728_v50  ;;  %7122 = vmatpush3.bf16.msra.mxu1 %v7728_v50 }
 0x1a2   :  { %7090 = vmatpush3.bf16.msra.mxu0 %v7728_v50  ;;  %7100 = vmatmul.mubr.bf16.vlgmr.msra.gmra.mrb[16].mxu1 %v8757_v26 }
 0x1a3   :  { %7103 = vmatprep.mubr.bf16.mxu1 %v9981_v56 }
 0x1a5   :  { %7092 = vmatmul.mubr.bf16.vlgmr.msra.gmra.mrb[0].mxu0 %v8528_v46 }
 0x1a6   :  { %7095 = vmatprep.mubr.bf16.mxu0 %v9982_v6 }
 0x1aa   :  { %7104 = vmatmul.mubr.bf16.gmra.mrb[20].mxu1 %v4894_v44 }
 0x1ad   :  { %7096 = vmatmul.mubr.bf16.gmra.mrb[4].mxu0 %v4893_v37 }
 0x255   :  { %v6677_v26 = vpop.f32.mrb[0].mxu1 }
 0x256   :  { %v2558_v60 = vpop.f32.mrb[1].mxu1 }
 0x257   :  { %v6678_v11 = vpop.f32.mrb[2].mxu1 }
 0x258   :  { %v2561_v43 = vpop.f32.mrb[3].mxu1 }
 0x25d   :  { %v9607_v29 = vpop.f32.mrb[4].mxu1 }
 0x25e   :  { %v9609_v38 = vpop.f32.mrb[5].mxu1 }
 0x25f   :  { %v9611_v20 = vpop.f32.mrb[6].mxu1 }
 0x260   :  { %v9613_v46 = vpop.f32.mrb[7].mxu1 }
 0x265   :  { %v6685_v30 = vpop.f32.mrb[8].mxu1 }
 0x266   :  { %v2590_v8 = vpop.f32.mrb[9].mxu1 }
 0x267   :  { %v6686_v62 = vpop.f32.mrb[10].mxu1 }
 0x268   :  { %v7069_v36 = vpop.f32.mrb[8].mxu0  ;;  %v2593_v17 = vpop.f32.mrb[11].mxu1 }
 0x269   :  { %v7131_v9 = vadd.f32 %v7069_v36, %v6685_v30  ;;  %v4838_v57 = vpop.f32.mrb[9].mxu0 }
 0x26a   :  { %v7133_v25 = vadd.f32 %v4838_v57, %v2590_v8  ;;  %v7070_v21 = vpop.f32.mrb[10].mxu0 }
 0x26b   :  { %v7135_v18 = vadd.f32 %v7070_v21, %v6686_v62  ;;  %v4841_v35 = vpop.f32.mrb[11].mxu0 }
 0x26c   :  { %v7137_v15 = vadd.f32 %v4841_v35, %v2593_v17 }
 0x26d   :  { %v6689_v41 = vpop.f32.mrb[12].mxu1 }
 0x26e   :  { %v2606_v16 = vpop.f32.mrb[13].mxu1 }
 0x26f   :  { %v6690_v7 = vpop.f32.mrb[14].mxu1 }
 0x270   :  { %v7073_v40 = vpop.f32.mrb[12].mxu0  ;;  %v2609_v27 = vpop.f32.mrb[15].mxu1 }
 0x271   :  { %v7139_v13 = vadd.f32 %v7073_v40, %v6689_v41  ;;  %v4854_v61 = vpop.f32.mrb[13].mxu0 }
 0x272   :  { %v7141_v31 = vadd.f32 %v4854_v61, %v2606_v16  ;;  %v7074_v10 = vpop.f32.mrb[14].mxu0 }
 0x273   :  { %v7143_v22 = vadd.f32 %v7074_v10, %v6690_v7  ;;  %v4857_v51 = vpop.f32.mrb[15].mxu0 }
 0x274   :  { %v7145_v53 = vadd.f32 %v4857_v51, %v2609_v27 }
 0x275   :  { %v7101_v28 = vpop.f32.mrb[16].mxu1 }
 0x276   :  { %v9615_v32 = vadd.f32 %v7131_v9, %v7101_v28  ;;  %v5026_v58 = vpop.f32.mrb[17].mxu1 }
 0x277   :  { %v9617_v59 = vadd.f32 %v7133_v25, %v5026_v58  ;;  %v7102_v48 = vpop.f32.mrb[18].mxu1 }
 0x278   :  { %v7093_v54 = vpop.f32.mrb[0].mxu0  ;;  %v9619_v0 = vadd.f32 %v7135_v18, %v7102_v48  ;;  %v5029_v33 = vpop.f32.mrb[19].mxu1 }
 0x279   :  { %v7123_v45 = vadd.f32 %v7093_v54, %v6677_v26  ;;  %v4994_v1 = vpop.f32.mrb[1].mxu0  ;;  %v9621_v5 = vadd.f32 %v7137_v15, %v5029_v33  ;;  %v5184_v54 = vmul.f32 %v9615_v32, %v9615_v32 }
 0x27a   :  { %v7124_v4 = vadd.f32 %v4994_v1, %v2558_v60  ;;  %v7094_v23 = vpop.f32.mrb[2].mxu0  ;;  %v5888_v3 = vpack.c.bf16 %v9619_v0, %v9615_v32  ;;  %v5185_v1 = vmul.f32 %v9619_v0, %v9619_v0 }
 0x27b   :  { %v7125_v19 = vadd.f32 %v7094_v23, %v6678_v11  ;;  %v4997_v12 = vpop.f32.mrb[3].mxu0  ;;  %v5883_v49 = vpack.c.bf16 %v9621_v5, %v9617_v59  ;;  %v5176_v6 = vmul.f32 %v7123_v45, %v7123_v45  ;;  %v5183_v28 = vmul.f32 %v9621_v5, %v9621_v5 }
 0x27c   :  { %5904 = vst [vmem:[%s9672_s2 + $0x28] sm:$0xff] %v5888_v3   ;;  %v7126_v39 = vadd.f32 %v4997_v12, %v2561_v43  ;;  %v5174_v34 = vmul.f32 %v7124_v4, %v7124_v4 }
 0x27d   :  { %v5868_v47 = vpack.c.bf16 %v7125_v19, %v7123_v45  ;;  %5903 = vst [vmem:[%s9672_s2 + $0x20] sm:$0xff] %v5883_v49   ;;  %v7105_v50 = vpop.f32.mrb[20].mxu1  ;;  %v5177_v11 = vmul.f32 %v7125_v19, %v7125_v19 }
 0x27e   :  { %v5863_v2 = vpack.c.bf16 %v7126_v39, %v7124_v4  ;;  %v5153_v14 = vadd.f32 %v7126_v39, %v7124_v4  ;;  %v5175_v52 = vmul.f32 %v7126_v39, %v7126_v39  ;;  %v7140_v24 = vadd.f32 %v7139_v13, %v7105_v50  ;;  %v5042_v63 = vpop.f32.mrb[21].mxu1 }
 0x27f   :  { %5900 = vst [vmem:[%s9672_s2 + $0x8] sm:$0xff] %v5868_v47   ;;  %v7142_v56 = vadd.f32 %v7141_v31, %v5042_v63  ;;  %v7106_v55 = vpop.f32.mrb[22].mxu1 }
 0x280   :  { %5864 = vst [vmem:[%s9672_s2] sm:$0xff] %v5863_v2   ;;  %v5154_v42 = vadd.f32 %v7123_v45, %v5153_v14  ;;  %v5190_v44 = vadd.f32 %v5175_v52, %v5174_v34  ;;  %v7097_v37 = vpop.f32.mrb[4].mxu0  ;;  %v7144_v26 = vadd.f32 %v7143_v22, %v7106_v55  ;;  %v5045_v60 = vpop.f32.mrb[23].mxu1  ;;  %v5182_v22 = vmul.f32 %v9617_v59, %v9617_v59 }
 0x281   :  { %v7127_v43 = vadd.f32 %v7097_v37, %v9607_v29  ;;  %v5010_v30 = vpop.f32.mrb[5].mxu0  ;;  %v7146_v8 = vadd.f32 %v7145_v53, %v5045_v60  ;;  %v5188_v34 = vmul.f32 %v7140_v24, %v7140_v24 }
 0x282   :  { %v5191_v62 = vadd.f32 %v5190_v44, %v5176_v6  ;;  %v7128_v36 = vadd.f32 %v5010_v30, %v9609_v38  ;;  %v5155_v17 = vadd.f32 %v7125_v19, %v5154_v42  ;;  %v7098_v9 = vpop.f32.mrb[6].mxu0  ;;  %v5898_v57 = vpack.c.bf16 %v7144_v26, %v7140_v24 }
 0x283   :  { %v7129_v25 = vadd.f32 %v7098_v9, %v9611_v20  ;;  %v5013_v21 = vpop.f32.mrb[7].mxu0  ;;  %v5893_v18 = vpack.c.bf16 %v7146_v8, %v7142_v56  ;;  %v5180_v27 = vmul.f32 %v7127_v43, %v7127_v43  ;;  %v5187_v49 = vmul.f32 %v7146_v8, %v7146_v8 }
 0x284   :  { %v5156_v35 = vadd.f32 %v7128_v36, %v5155_v17  ;;  %v5178_v15 = vmul.f32 %v7128_v36, %v7128_v36  ;;  %v5192_v41 = vadd.f32 %v5191_v62, %v5177_v11  ;;  %5906 = vst [vmem:[%s9672_s2 + $0x38] sm:$0xff] %v5898_v57   ;;  %v7130_v29 = vadd.f32 %v5013_v21, %v9613_v46 }
 0x285   :  { %v5878_v16 = vpack.c.bf16 %v7129_v25, %v7127_v43  ;;  %5905 = vst [vmem:[%s9672_s2 + $0x30] sm:$0xff] %v5893_v18   ;;  %v5181_v61 = vmul.f32 %v7129_v25, %v7129_v25  ;;  %v5189_v50 = vmul.f32 %v7144_v26, %v7144_v26 }
 0x286   :  { %v5193_v38 = vadd.f32 %v5192_v41, %v5178_v15  ;;  %v5873_v7 = vpack.c.bf16 %v7130_v29, %v7128_v36  ;;  %v5157_v40 = vadd.f32 %v7130_v29, %v5156_v35  ;;  %v5179_v20 = vmul.f32 %v7130_v29, %v7130_v29 }
 0x287   :  { %5902 = vst [vmem:[%s9672_s2 + $0x18] sm:$0xff] %v5878_v16  }
 0x288   :  { %5901 = vst [vmem:[%s9672_s2 + $0x10] sm:$0xff] %v5873_v7   ;;  %v5158_v13 = vadd.f32 %v7127_v43, %v5157_v40  ;;  %v5194_v46 = vadd.f32 %v5193_v38, %v5179_v20 }
 0x28a   :  { %v5159_v31 = vadd.f32 %v7129_v25, %v5158_v13  ;;  %v5195_v10 = vadd.f32 %v5194_v46, %v5180_v27 }
 0x28c   :  { %v5160_v51 = vadd.f32 %v9617_v59, %v5159_v31  ;;  %v5196_v53 = vadd.f32 %v5195_v10, %v5181_v61  ;;  %v5186_v59 = vmul.f32 %v7142_v56, %v7142_v56 }
 0x28e   :  { %v5197_v58 = vadd.f32 %v5196_v53, %v5182_v22  ;;  %v5161_v48 = vadd.f32 %v9621_v5, %v5160_v51 }
 0x290   :  { %v5162_v33 = vadd.f32 %v9615_v32, %v5161_v48  ;;  %v5198_v45 = vadd.f32 %v5197_v58, %v5183_v28 }
 0x292   :  { %v5163_v4 = vadd.f32 %v9619_v0, %v5162_v33  ;;  %v5199_v23 = vadd.f32 %v5198_v45, %v5184_v54 }
 0x294   :  { %v5164_v3 = vadd.f32 %v7142_v56, %v5163_v4  ;;  %v5200_v19 = vadd.f32 %v5199_v23, %v5185_v1 }
 0x296   :  { %v5165_v12 = vadd.f32 %v7146_v8, %v5164_v3  ;;  %v5201_v39 = vadd.f32 %v5200_v19, %v5186_v59 }
 0x298   :  { %v5166_v5 = vadd.f32 %v7140_v24, %v5165_v12  ;;  %v5202_v47 = vadd.f32 %v5201_v39, %v5187_v49 }
 0x29a   :  { %v5167_v2 = vadd.f32 %v7144_v26, %v5166_v5  ;;  %v5203_v14 = vadd.f32 %v5202_v47, %v5188_v34 }
 0x29c   :  { %v5168_v32 = vrot.slane %v5167_v2, 4  ;;  %v5204_v52 = vadd.f32 %v5203_v14, %v5189_v50 }
 0x29e   :  { %v5169_v63 = vadd.f32 %v5168_v32, %v5167_v2  ;;  %v5205_v55 = vrot.slane %v5204_v52, 4 }
 0x2a0   :  { %v5170_v6 = vrot.slane %v5169_v63, 2  ;;  %v5206_v42 = vadd.f32 %v5205_v55, %v5204_v52 }
 0x2a2   :  { %v5171_v0 = vadd.f32 %v5170_v6, %v5169_v63  ;;  %v5207_v44 = vrot.slane %v5206_v42, 2 }
 0x2a4   :  { %v5172_v37 = vrot.slane %v5171_v0, 1  ;;  %v5208_v56 = vadd.f32 %v5207_v44, %v5206_v42 }
 0x2a6   :  { %v5209_v60 = vrot.slane %v5208_v56, 1  ;;  %v5173_v11 = vadd.f32 %v5172_v37, %v5171_v0 }
 0x2a8   :  { %v5210_v43 = vadd.f32 %v5209_v60, %v5208_v56 }
 0x2aa   :  { %v5212_v30 = vsel %vm5211_vm4, %v5173_v11, %v5210_v43 }
 0x2ab   :  { %5213 = vst [vmem:[%s9673_s3] sm:$0x3] %v5212_v30 }

</bundles_post_ra>
